<compile_context>
chip_gen: v7x
topology: tpu7x:2x2x1
jax: 0.10.0
libtpu: 0.0.40
codegen_flags: <defaults>
</compile_context>

<pallas_src>
import jax
import jax.numpy as jnp
import numpy as np
from jax.experimental import pallas as pl
from jax.experimental.pallas import tpu as pltpu

_EPS = 1e-5                   # nn.BatchNorm2d default eps
_LANE = 128                   # TPU vreg lane width -> in-VMEM channel padding
_CONV_DTYPE = jnp.bfloat16    # MXU operand dtype (accumulation stays f32)


# ----------------------------- Pallas kernel ------------------------------- #

def basic_block_kernel(x_ref, w1_ref, w2_ref, g1_ref, b1_ref, g2_ref, b2_ref,
                       out_ref, pad_scr, acc_scr):
    """Fused BasicBlock forward on one VMEM-resident NHWC block.

    x_ref:   (N, H, W, C)       f32, channel-compact input (C real channels)
    w*_ref:  (9, Cp, Cp)        bf16, HWIO weights, tap-major, zero-padded C->Cp
    g*/b*:   (1, Cp)            f32, BN affine params (zero-padded)
    out_ref: (N, H, W, C)       f32, channel-compact output
    pad_scr: (N, H+2, W+2, Cp)  f32 scratch, halo-padded activation (reused)
    acc_scr: (N*H*W, Cp)        f32 scratch, conv accumulator (reused)
    """
    N, H, W, C = x_ref.shape
    Cp = acc_scr.shape[-1]
    NHW = N * H * W
    inv_nhw = 1.0 / NHW

    # Single zero pass over the halo scratch.  With the channel-compact HBM
    # input this one fill provides BOTH the 1-pixel conv halo (== Conv2d
    # padding=1) and the zero padded channels [C:Cp] needed for conv1; conv2
    # overwrites the interior with the full-Cp intermediate whose padded
    # channels are exactly zero, and the halo itself is never written.
    pad_scr[...] = jnp.zeros(pad_scr.shape, pad_scr.dtype)

    def conv3x3(w_ref):
        # Direct accumulation (no im2col buffer): 9 shifted-window matmuls,
        # each a lane-aligned (NHW, Cp) x (Cp, Cp) bf16 MXU op with f32
        # accumulation into the VMEM accumulator scratch.  Tap 0 assigns so the
        # accumulator never needs a zero-fill pass.
        for tap in range(9):
            dy, dx = divmod(tap, 3)
            patch = pad_scr[:, dy:dy + H, dx:dx + W, :].reshape(NHW, Cp)
            contrib = jnp.dot(patch.astype(_CONV_DTYPE), w_ref[tap],
                              preferred_element_type=jnp.float32)
            if tap == 0:
                acc_scr[...] = contrib
            else:
                acc_scr[...] += contrib

    def batchnorm(g_ref, b_ref):
        # Training-mode BN (biased stats over N,H,W) in ONE pass over the conv
        # output: sum and sum-of-squares together, var = E[x^2] - mean^2 (f32,
        # clamped at 0 against cancellation).  Padded channels stay exactly 0
        # because gamma/beta are zero-padded.
        z = acc_scr[...]
        s = jnp.sum(z, axis=0, keepdims=True)
        ss = jnp.sum(z * z, axis=0, keepdims=True)
        mean = s * inv_nhw
        var = jnp.maximum(ss * inv_nhw - mean * mean, 0.0)
        scale = jax.lax.rsqrt(var + _EPS) * g_ref[...]
        shift = b_ref[...] - mean * scale
        return acc_scr[...] * scale + shift                       # (NHW, Cp)

    # ---- conv1 -> bn1 -> relu ---------------------------------------------
    # x_ref is read exactly where it is needed (short live range, no big value
    # held across both convs).
    pad_scr[:, 1:H + 1, 1:W + 1, :C] = x_ref[...]
    conv3x3(w1_ref)
    y = jnp.maximum(batchnorm(g1_ref, b1_ref), 0.0)               # (NHW, Cp)

    # ---- conv2 -> bn2 -> +x -> relu   (intermediate never leaves VMEM) -----
    pad_scr[:, 1:H + 1, 1:W + 1, :] = y.reshape(N, H, W, Cp)
    conv3x3(w2_ref)
    z = batchnorm(g2_ref, b2_ref)                                 # (NHW, Cp)
    out = jnp.maximum(z[:, :C] + x_ref[...].reshape(NHW, C), 0.0)
    out_ref[...] = out.reshape(N, H, W, C)


# ------------------------------- Wrapper ----------------------------------- #

_VMEM = pl.BlockSpec(memory_space=pltpu.MemorySpace.VMEM)


def _vmem_limit_bytes():
    # Derive the scoped-VMEM limit from the actual chip (64 MiB on v7x,
    # 128 MiB on v5e/v6e) instead of hardcoding; keep headroom for the runtime.
    try:
        cap = pltpu.get_tpu_info().vmem_capacity_bytes
    except Exception:
        cap = 64 * 1024 * 1024
    return int(min(cap * 3 // 4, 96 * 1024 * 1024))


@jax.jit
def basic_block_forward(x_nchw, w1, g1, b1, w2, g2, b2):
    """BasicBlock forward. x_nchw: (N, C, H, W) float32 -> (N, C, H, W)."""
    x = jnp.transpose(x_nchw, (0, 2, 3, 1)).astype(jnp.float32)   # NCHW->NHWC
    N, H, W, C = x.shape
    Cp = ((C + _LANE - 1) // _LANE) * _LANE                       # in-VMEM lanes
    pc = Cp - C

    def prep_w(w):
        # (3,3,C,C) HWIO -> (9, Cp, Cp) bf16, tap-major.  Zero-padded in/out
        # channels keep padded activation channels exactly zero.
        wp = jnp.pad(w, ((0, 0), (0, 0), (0, pc), (0, pc)))
        return wp.reshape(9, Cp, Cp).astype(_CONV_DTYPE)

    def prep_v(v):   # gamma/beta -> (1, Cp) f32, zero-padded
        return jnp.pad(v.reshape(1, C).astype(jnp.float32), ((0, 0), (0, pc)))

    nhw = N * H * W
    cost = pl.CostEstimate(
        flops=2 * (2 * nhw * 9 * Cp * Cp) + 30 * nhw * Cp,
        transcendentals=2 * Cp,
        bytes_accessed=2 * nhw * C * 4 + 2 * 9 * Cp * Cp * 2 + 4 * Cp * 4)

    out = pl.pallas_call(
        basic_block_kernel,
        out_shape=jax.ShapeDtypeStruct((N, H, W, C), jnp.float32),
        in_specs=[_VMEM] * 7,
        out_specs=_VMEM,
        scratch_shapes=[
            pltpu.VMEM((N, H + 2, W + 2, Cp), jnp.float32),   # halo-padded act
            pltpu.VMEM((nhw, Cp), jnp.float32),               # conv accumulator
        ],
        compiler_params=pltpu.CompilerParams(
            vmem_limit_bytes=_vmem_limit_bytes()),
        cost_estimate=cost,
    )(x, prep_w(w1), prep_w(w2), prep_v(g1), prep_v(b1), prep_v(g2), prep_v(b2))

    # TODO(synk): if the consumer accepts NHWC, drop this transpose entirely.
    return jnp.transpose(out, (0, 3, 1, 2))                       # NHWC->NCHW


# ----------------------------- Pure-JAX reference --------------------------- #

def _reference(x_nchw, w1, g1, b1, w2, g2, b2, conv_dtype=jnp.float32):
    x = jnp.transpose(x_nchw, (0, 2, 3, 1)).astype(jnp.float32)

    def conv(z, w):
        return jax.lax.conv_general_dilated(
            z.astype(conv_dtype), w.astype(conv_dtype),
            window_strides=(1, 1), padding=((1, 1), (1, 1)),
            dimension_numbers=('NHWC', 'HWIO', 'NHWC'),
            preferred_element_type=jnp.float32,
            precision=jax.lax.Precision.HIGHEST)

    def bn(z, gamma, beta):
        mean = jnp.mean(z, axis=(0, 1, 2), keepdims=True)
        var = jnp.mean((z - mean) ** 2, axis=(0, 1, 2), keepdims=True)
        return (z - mean) * jax.lax.rsqrt(var + _EPS) * gamma.reshape(1, 1, 1, -1) \
            + beta.reshape(1, 1, 1, -1)

    t = jnp.maximum(bn(conv(x, w1), g1, b1), 0.0)
    out = jnp.maximum(bn(conv(t, w2), g2, b2) + x, 0.0)
    return jnp.transpose(out, (0, 3, 1, 2))


# --------------------------------- Main ------------------------------------ #

if __name__ == "__main__":
    N, C, H, W = 2, 4, 16, 16          # inplanes == planes == 4, stride == 1

    key = jax.random.PRNGKey(0)
    kx, kw1, kw2 = jax.random.split(key, 3)

    x = jax.random.normal(kx, (N, C, H, W), dtype=jnp.float32)

    # Deterministic parameter init (HWIO conv weights; BN gamma=1, beta=0).
    w1 = jax.random.normal(kw1, (3, 3, C, C), dtype=jnp.float32) * 0.1
    w2 = jax.random.normal(kw2, (3, 3, C, C), dtype=jnp.float32) * 0.1
    g1 = jnp.ones((1, C), jnp.float32)
    b1 = jnp.zeros((1, C), jnp.float32)
    g2 = jnp.ones((1, C), jnp.float32)
    b2 = jnp.zeros((1, C), jnp.float32)

    out = jax.block_until_ready(basic_block_forward(x, w1, g1, b1, w2, g2, b2))

    # Tight check vs. a reference that uses the same bf16 conv operands
    # (f32 accumulation, f32 BN/residual), then a looser check vs. pure f32
    # math (tolerance reflects bf16 conv operands only).
    ref_mixed = jax.block_until_ready(
        _reference(x, w1, g1, b1, w2, g2, b2, conv_dtype=_CONV_DTYPE))
    np.testing.assert_allclose(np.asarray(out), np.asarray(ref_mixed),
                               rtol=1e-2, atol=1e-2)

    ref_f32 = jax.block_until_ready(
        _reference(x, w1, g1, b1, w2, g2, b2, conv_dtype=jnp.float32))
    np.testing.assert_allclose(np.asarray(out), np.asarray(ref_f32),
                               rtol=5e-2, atol=5e-2)

    print("KERNEL_OK")
</pallas_src>

<mosaic_0001>
module attributes {stable_mosaic.version = 11 : i64} {
  func.func @basic_block_kernel(%arg0: memref<2x16x16x4xf32, #tpu.memory_space<vmem>>, %arg1: memref<9x128x128xbf16, #tpu.memory_space<vmem>>, %arg2: memref<9x128x128xbf16, #tpu.memory_space<vmem>>, %arg3: memref<1x128xf32, #tpu.memory_space<vmem>>, %arg4: memref<1x128xf32, #tpu.memory_space<vmem>>, %arg5: memref<1x128xf32, #tpu.memory_space<vmem>>, %arg6: memref<1x128xf32, #tpu.memory_space<vmem>>, %arg7: memref<2x16x16x4xf32, #tpu.memory_space<vmem>>, %arg8: memref<2x18x18x128xf32, #tpu.memory_space<vmem>>, %arg9: memref<512x128xf32, #tpu.memory_space<vmem>>) attributes {dimension_semantics = [], scalar_prefetch = 0 : i64, scratch_operands = 2 : i64, tpu.core_type = #tpu.core_type<tc>} {
    %cst = arith.constant 0.000000e+00 : f32
    %0 = vector.broadcast %cst : f32 to vector<2x18x18x128xf32>
    %c0 = arith.constant 0 : index
    %c0_0 = arith.constant 0 : index
    %c0_1 = arith.constant 0 : index
    %c0_2 = arith.constant 0 : index
    %1 = vector.load %arg8[%c0, %c0_0, %c0_1, %c0_2] : memref<2x18x18x128xf32, #tpu.memory_space<vmem>>, vector<2x18x18x128xf32>
    tpu.vector_store %arg8[%c0, %c0_0, %c0_1, %c0_2], %0 {strides = array<i32>} : memref<2x18x18x128xf32, #tpu.memory_space<vmem>>, vector<2x18x18x128xf32>,
    %c0_3 = arith.constant 0 : index
    %c0_4 = arith.constant 0 : index
    %c0_5 = arith.constant 0 : index
    %c0_6 = arith.constant 0 : index
    %2 = vector.load %arg0[%c0_3, %c0_4, %c0_5, %c0_6] : memref<2x16x16x4xf32, #tpu.memory_space<vmem>>, vector<2x16x16x4xf32>
    %c0_7 = arith.constant 0 : index
    %c1 = arith.constant 1 : index
    %c1_8 = arith.constant 1 : index
    %c0_9 = arith.constant 0 : index
    %3 = vector.load %arg8[%c0_7, %c1, %c1_8, %c0_9] : memref<2x18x18x128xf32, #tpu.memory_space<vmem>>, vector<2x16x16x4xf32>
    tpu.vector_store %arg8[%c0_7, %c1, %c1_8, %c0_9], %2 {strides = array<i32>} : memref<2x18x18x128xf32, #tpu.memory_space<vmem>>, vector<2x16x16x4xf32>,
    %c0_10 = arith.constant 0 : index
    %c0_11 = arith.constant 0 : index
    %c0_12 = arith.constant 0 : index
    %c0_13 = arith.constant 0 : index
    %4 = vector.load %arg8[%c0_10, %c0_11, %c0_12, %c0_13] : memref<2x18x18x128xf32, #tpu.memory_space<vmem>>, vector<2x16x16x128xf32>
    %5 = vector.shape_cast %4 : vector<2x16x16x128xf32> to vector<512x128xf32>
    %6 = arith.truncf %5 : vector<512x128xf32> to vector<512x128xbf16>
    %c0_14 = arith.constant 0 : index
    %c0_15 = arith.constant 0 : index
    %c0_16 = arith.constant 0 : index
    %7 = vector.load %arg1[%c0_14, %c0_15, %c0_16] : memref<9x128x128xbf16, #tpu.memory_space<vmem>>, vector<1x128x128xbf16>
    %8 = vector.shape_cast %7 : vector<1x128x128xbf16> to vector<128x128xbf16>
    %cst_17 = arith.constant dense<0.000000e+00> : vector<512x128xf32>
    %9 = tpu.matmul %6, %8, %cst_17 {dimension_numbers = #tpu.dot_dimension_numbers<[1], [0], [0], [1], [0, 0, 1, 1], [], []>} : vector<512x128xbf16>, vector<128x128xbf16>, vector<512x128xf32> -> vector<512x128xf32>
    %c0_18 = arith.constant 0 : index
    %c0_19 = arith.constant 0 : index
    %10 = vector.load %arg9[%c0_18, %c0_19] : memref<512x128xf32, #tpu.memory_space<vmem>>, vector<512x128xf32>
    tpu.vector_store %arg9[%c0_18, %c0_19], %9 {strides = array<i32>} : memref<512x128xf32, #tpu.memory_space<vmem>>, vector<512x128xf32>,
    %c0_20 = arith.constant 0 : index
    %c0_21 = arith.constant 0 : index
    %c1_22 = arith.constant 1 : index
    %c0_23 = arith.constant 0 : index
    %11 = vector.load %arg8[%c0_20, %c0_21, %c1_22, %c0_23] : memref<2x18x18x128xf32, #tpu.memory_space<vmem>>, vector<2x16x16x128xf32>
    %12 = vector.shape_cast %11 : vector<2x16x16x128xf32> to vector<512x128xf32>
    %13 = arith.truncf %12 : vector<512x128xf32> to vector<512x128xbf16>
    %c1_24 = arith.constant 1 : index
    %c0_25 = arith.constant 0 : index
    %c0_26 = arith.constant 0 : index
    %14 = vector.load %arg1[%c1_24, %c0_25, %c0_26] : memref<9x128x128xbf16, #tpu.memory_space<vmem>>, vector<1x128x128xbf16>
    %15 = vector.shape_cast %14 : vector<1x128x128xbf16> to vector<128x128xbf16>
    %cst_27 = arith.constant dense<0.000000e+00> : vector<512x128xf32>
    %16 = tpu.matmul %13, %15, %cst_27 {dimension_numbers = #tpu.dot_dimension_numbers<[1], [0], [0], [1], [0, 0, 1, 1], [], []>} : vector<512x128xbf16>, vector<128x128xbf16>, vector<512x128xf32> -> vector<512x128xf32>
    %c0_28 = arith.constant 0 : index
    %c0_29 = arith.constant 0 : index
    %17 = vector.load %arg9[%c0_28, %c0_29] : memref<512x128xf32, #tpu.memory_space<vmem>>, vector<512x128xf32>
    %18 = arith.addf %17, %16 : vector<512x128xf32>
    %c0_30 = arith.constant 0 : index
    %c0_31 = arith.constant 0 : index
    %19 = vector.load %arg9[%c0_30, %c0_31] : memref<512x128xf32, #tpu.memory_space<vmem>>, vector<512x128xf32>
    tpu.vector_store %arg9[%c0_30, %c0_31], %18 {strides = array<i32>} : memref<512x128xf32, #tpu.memory_space<vmem>>, vector<512x128xf32>,
    %c0_32 = arith.constant 0 : index
    %c0_33 = arith.constant 0 : index
    %c2 = arith.constant 2 : index
    %c0_34 = arith.constant 0 : index
    %20 = vector.load %arg8[%c0_32, %c0_33, %c2, %c0_34] : memref<2x18x18x128xf32, #tpu.memory_space<vmem>>, vector<2x16x16x128xf32>
    %21 = vector.shape_cast %20 : vector<2x16x16x128xf32> to vector<512x128xf32>
    %22 = arith.truncf %21 : vector<512x128xf32> to vector<512x128xbf16>
    %c2_35 = arith.constant 2 : index
    %c0_36 = arith.constant 0 : index
    %c0_37 = arith.constant 0 : index
    %23 = vector.load %arg1[%c2_35, %c0_36, %c0_37] : memref<9x128x128xbf16, #tpu.memory_space<vmem>>, vector<1x128x128xbf16>
    %24 = vector.shape_cast %23 : vector<1x128x128xbf16> to vector<128x128xbf16>
    %cst_38 = arith.constant dense<0.000000e+00> : vector<512x128xf32>
    %25 = tpu.matmul %22, %24, %cst_38 {dimension_numbers = #tpu.dot_dimension_numbers<[1], [0], [0], [1], [0, 0, 1, 1], [], []>} : vector<512x128xbf16>, vector<128x128xbf16>, vector<512x128xf32> -> vector<512x128xf32>
    %c0_39 = arith.constant 0 : index
    %c0_40 = arith.constant 0 : index
    %26 = vector.load %arg9[%c0_39, %c0_40] : memref<512x128xf32, #tpu.memory_space<vmem>>, vector<512x128xf32>
    %27 = arith.addf %26, %25 : vector<512x128xf32>
    %c0_41 = arith.constant 0 : index
    %c0_42 = arith.constant 0 : index
    %28 = vector.load %arg9[%c0_41, %c0_42] : memref<512x128xf32, #tpu.memory_space<vmem>>, vector<512x128xf32>
    tpu.vector_store %arg9[%c0_41, %c0_42], %27 {strides = array<i32>} : memref<512x128xf32, #tpu.memory_space<vmem>>, vector<512x128xf32>,
    %c0_43 = arith.constant 0 : index
    %c1_44 = arith.constant 1 : index
    %c0_45 = arith.constant 0 : index
    %c0_46 = arith.constant 0 : index
    %29 = vector.load %arg8[%c0_43, %c1_44, %c0_45, %c0_46] : memref<2x18x18x128xf32, #tpu.memory_space<vmem>>, vector<2x16x16x128xf32>
    %30 = vector.shape_cast %29 : vector<2x16x16x128xf32> to vector<512x128xf32>
    %31 = arith.truncf %30 : vector<512x128xf32> to vector<512x128xbf16>
    %c3 = arith.constant 3 : index
    %c0_47 = arith.constant 0 : index
    %c0_48 = arith.constant 0 : index
    %32 = vector.load %arg1[%c3, %c0_47, %c0_48] : memref<9x128x128xbf16, #tpu.memory_space<vmem>>, vector<1x128x128xbf16>
    %33 = vector.shape_cast %32 : vector<1x128x128xbf16> to vector<128x128xbf16>
    %cst_49 = arith.constant dense<0.000000e+00> : vector<512x128xf32>
    %34 = tpu.matmul %31, %33, %cst_49 {dimension_numbers = #tpu.dot_dimension_numbers<[1], [0], [0], [1], [0, 0, 1, 1], [], []>} : vector<512x128xbf16>, vector<128x128xbf16>, vector<512x128xf32> -> vector<512x128xf32>
    %c0_50 = arith.constant 0 : index
    %c0_51 = arith.constant 0 : index
    %35 = vector.load %arg9[%c0_50, %c0_51] : memref<512x128xf32, #tpu.memory_space<vmem>>, vector<512x128xf32>
    %36 = arith.addf %35, %34 : vector<512x128xf32>
    %c0_52 = arith.constant 0 : index
    %c0_53 = arith.constant 0 : index
    %37 = vector.load %arg9[%c0_52, %c0_53] : memref<512x128xf32, #tpu.memory_space<vmem>>, vector<512x128xf32>
    tpu.vector_store %arg9[%c0_52, %c0_53], %36 {strides = array<i32>} : memref<512x128xf32, #tpu.memory_space<vmem>>, vector<512x128xf32>,
    %c0_54 = arith.constant 0 : index
    %c1_55 = arith.constant 1 : index
    %c1_56 = arith.constant 1 : index
    %c0_57 = arith.constant 0 : index
    %38 = vector.load %arg8[%c0_54, %c1_55, %c1_56, %c0_57] : memref<2x18x18x128xf32, #tpu.memory_space<vmem>>, vector<2x16x16x128xf32>
    %39 = vector.shape_cast %38 : vector<2x16x16x128xf32> to vector<512x128xf32>
    %40 = arith.truncf %39 : vector<512x128xf32> to vector<512x128xbf16>
    %c4 = arith.constant 4 : index
    %c0_58 = arith.constant 0 : index
    %c0_59 = arith.constant 0 : index
    %41 = vector.load %arg1[%c4, %c0_58, %c0_59] : memref<9x128x128xbf16, #tpu.memory_space<vmem>>, vector<1x128x128xbf16>
    %42 = vector.shape_cast %41 : vector<1x128x128xbf16> to vector<128x128xbf16>
    %cst_60 = arith.constant dense<0.000000e+00> : vector<512x128xf32>
    %43 = tpu.matmul %40, %42, %cst_60 {dimension_numbers = #tpu.dot_dimension_numbers<[1], [0], [0], [1], [0, 0, 1, 1], [], []>} : vector<512x128xbf16>, vector<128x128xbf16>, vector<512x128xf32> -> vector<512x128xf32>
    %c0_61 = arith.constant 0 : index
    %c0_62 = arith.constant 0 : index
    %44 = vector.load %arg9[%c0_61, %c0_62] : memref<512x128xf32, #tpu.memory_space<vmem>>, vector<512x128xf32>
    %45 = arith.addf %44, %43 : vector<512x128xf32>
    %c0_63 = arith.constant 0 : index
    %c0_64 = arith.constant 0 : index
    %46 = vector.load %arg9[%c0_63, %c0_64] : memref<512x128xf32, #tpu.memory_space<vmem>>, vector<512x128xf32>
    tpu.vector_store %arg9[%c0_63, %c0_64], %45 {strides = array<i32>} : memref<512x128xf32, #tpu.memory_space<vmem>>, vector<512x128xf32>,
    %c0_65 = arith.constant 0 : index
    %c1_66 = arith.constant 1 : index
    %c2_67 = arith.constant 2 : index
    %c0_68 = arith.constant 0 : index
    %47 = vector.load %arg8[%c0_65, %c1_66, %c2_67, %c0_68] : memref<2x18x18x128xf32, #tpu.memory_space<vmem>>, vector<2x16x16x128xf32>
    %48 = vector.shape_cast %47 : vector<2x16x16x128xf32> to vector<512x128xf32>
    %49 = arith.truncf %48 : vector<512x128xf32> to vector<512x128xbf16>
    %c5 = arith.constant 5 : index
    %c0_69 = arith.constant 0 : index
    %c0_70 = arith.constant 0 : index
    %50 = vector.load %arg1[%c5, %c0_69, %c0_70] : memref<9x128x128xbf16, #tpu.memory_space<vmem>>, vector<1x128x128xbf16>
    %51 = vector.shape_cast %50 : vector<1x128x128xbf16> to vector<128x128xbf16>
    %cst_71 = arith.constant dense<0.000000e+00> : vector<512x128xf32>
    %52 = tpu.matmul %49, %51, %cst_71 {dimension_numbers = #tpu.dot_dimension_numbers<[1], [0], [0], [1], [0, 0, 1, 1], [], []>} : vector<512x128xbf16>, vector<128x128xbf16>, vector<512x128xf32> -> vector<512x128xf32>
    %c0_72 = arith.constant 0 : index
    %c0_73 = arith.constant 0 : index
    %53 = vector.load %arg9[%c0_72, %c0_73] : memref<512x128xf32, #tpu.memory_space<vmem>>, vector<512x128xf32>
    %54 = arith.addf %53, %52 : vector<512x128xf32>
    %c0_74 = arith.constant 0 : index
    %c0_75 = arith.constant 0 : index
    %55 = vector.load %arg9[%c0_74, %c0_75] : memref<512x128xf32, #tpu.memory_space<vmem>>, vector<512x128xf32>
    tpu.vector_store %arg9[%c0_74, %c0_75], %54 {strides = array<i32>} : memref<512x128xf32, #tpu.memory_space<vmem>>, vector<512x128xf32>,
    %c0_76 = arith.constant 0 : index
    %c2_77 = arith.constant 2 : index
    %c0_78 = arith.constant 0 : index
    %c0_79 = arith.constant 0 : index
    %56 = vector.load %arg8[%c0_76, %c2_77, %c0_78, %c0_79] : memref<2x18x18x128xf32, #tpu.memory_space<vmem>>, vector<2x16x16x128xf32>
    %57 = vector.shape_cast %56 : vector<2x16x16x128xf32> to vector<512x128xf32>
    %58 = arith.truncf %57 : vector<512x128xf32> to vector<512x128xbf16>
    %c6 = arith.constant 6 : index
    %c0_80 = arith.constant 0 : index
    %c0_81 = arith.constant 0 : index
    %59 = vector.load %arg1[%c6, %c0_80, %c0_81] : memref<9x128x128xbf16, #tpu.memory_space<vmem>>, vector<1x128x128xbf16>
    %60 = vector.shape_cast %59 : vector<1x128x128xbf16> to vector<128x128xbf16>
    %cst_82 = arith.constant dense<0.000000e+00> : vector<512x128xf32>
    %61 = tpu.matmul %58, %60, %cst_82 {dimension_numbers = #tpu.dot_dimension_numbers<[1], [0], [0], [1], [0, 0, 1, 1], [], []>} : vector<512x128xbf16>, vector<128x128xbf16>, vector<512x128xf32> -> vector<512x128xf32>
    %c0_83 = arith.constant 0 : index
    %c0_84 = arith.constant 0 : index
    %62 = vector.load %arg9[%c0_83, %c0_84] : memref<512x128xf32, #tpu.memory_space<vmem>>, vector<512x128xf32>
    %63 = arith.addf %62, %61 : vector<512x128xf32>
    %c0_85 = arith.constant 0 : index
    %c0_86 = arith.constant 0 : index
    %64 = vector.load %arg9[%c0_85, %c0_86] : memref<512x128xf32, #tpu.memory_space<vmem>>, vector<512x128xf32>
    tpu.vector_store %arg9[%c0_85, %c0_86], %63 {strides = array<i32>} : memref<512x128xf32, #tpu.memory_space<vmem>>, vector<512x128xf32>,
    %c0_87 = arith.constant 0 : index
    %c2_88 = arith.constant 2 : index
    %c1_89 = arith.constant 1 : index
    %c0_90 = arith.constant 0 : index
    %65 = vector.load %arg8[%c0_87, %c2_88, %c1_89, %c0_90] : memref<2x18x18x128xf32, #tpu.memory_space<vmem>>, vector<2x16x16x128xf32>
    %66 = vector.shape_cast %65 : vector<2x16x16x128xf32> to vector<512x128xf32>
    %67 = arith.truncf %66 : vector<512x128xf32> to vector<512x128xbf16>
    %c7 = arith.constant 7 : index
    %c0_91 = arith.constant 0 : index
    %c0_92 = arith.constant 0 : index
    %68 = vector.load %arg1[%c7, %c0_91, %c0_92] : memref<9x128x128xbf16, #tpu.memory_space<vmem>>, vector<1x128x128xbf16>
    %69 = vector.shape_cast %68 : vector<1x128x128xbf16> to vector<128x128xbf16>
    %cst_93 = arith.constant dense<0.000000e+00> : vector<512x128xf32>
    %70 = tpu.matmul %67, %69, %cst_93 {dimension_numbers = #tpu.dot_dimension_numbers<[1], [0], [0], [1], [0, 0, 1, 1], [], []>} : vector<512x128xbf16>, vector<128x128xbf16>, vector<512x128xf32> -> vector<512x128xf32>
    %c0_94 = arith.constant 0 : index
    %c0_95 = arith.constant 0 : index
    %71 = vector.load %arg9[%c0_94, %c0_95] : memref<512x128xf32, #tpu.memory_space<vmem>>, vector<512x128xf32>
    %72 = arith.addf %71, %70 : vector<512x128xf32>
    %c0_96 = arith.constant 0 : index
    %c0_97 = arith.constant 0 : index
    %73 = vector.load %arg9[%c0_96, %c0_97] : memref<512x128xf32, #tpu.memory_space<vmem>>, vector<512x128xf32>
    tpu.vector_store %arg9[%c0_96, %c0_97], %72 {strides = array<i32>} : memref<512x128xf32, #tpu.memory_space<vmem>>, vector<512x128xf32>,
    %c0_98 = arith.constant 0 : index
    %c2_99 = arith.constant 2 : index
    %c2_100 = arith.constant 2 : index
    %c0_101 = arith.constant 0 : index
    %74 = vector.load %arg8[%c0_98, %c2_99, %c2_100, %c0_101] : memref<2x18x18x128xf32, #tpu.memory_space<vmem>>, vector<2x16x16x128xf32>
    %75 = vector.shape_cast %74 : vector<2x16x16x128xf32> to vector<512x128xf32>
    %76 = arith.truncf %75 : vector<512x128xf32> to vector<512x128xbf16>
    %c8 = arith.constant 8 : index
    %c0_102 = arith.constant 0 : index
    %c0_103 = arith.constant 0 : index
    %77 = vector.load %arg1[%c8, %c0_102, %c0_103] : memref<9x128x128xbf16, #tpu.memory_space<vmem>>, vector<1x128x128xbf16>
    %78 = vector.shape_cast %77 : vector<1x128x128xbf16> to vector<128x128xbf16>
    %cst_104 = arith.constant dense<0.000000e+00> : vector<512x128xf32>
    %79 = tpu.matmul %76, %78, %cst_104 {dimension_numbers = #tpu.dot_dimension_numbers<[1], [0], [0], [1], [0, 0, 1, 1], [], []>} : vector<512x128xbf16>, vector<128x128xbf16>, vector<512x128xf32> -> vector<512x128xf32>
    %c0_105 = arith.constant 0 : index
    %c0_106 = arith.constant 0 : index
    %80 = vector.load %arg9[%c0_105, %c0_106] : memref<512x128xf32, #tpu.memory_space<vmem>>, vector<512x128xf32>
    %81 = arith.addf %80, %79 : vector<512x128xf32>
    %c0_107 = arith.constant 0 : index
    %c0_108 = arith.constant 0 : index
    %82 = vector.load %arg9[%c0_107, %c0_108] : memref<512x128xf32, #tpu.memory_space<vmem>>, vector<512x128xf32>
    tpu.vector_store %arg9[%c0_107, %c0_108], %81 {strides = array<i32>} : memref<512x128xf32, #tpu.memory_space<vmem>>, vector<512x128xf32>,
    %c0_109 = arith.constant 0 : index
    %c0_110 = arith.constant 0 : index
    %83 = vector.load %arg9[%c0_109, %c0_110] : memref<512x128xf32, #tpu.memory_space<vmem>>, vector<512x128xf32>
    %cst_111 = arith.constant dense<0.000000e+00> : vector<128xf32>
    %84 = vector.multi_reduction <add>, %83, %cst_111 [0] : vector<512x128xf32> to vector<128xf32>
    %85 = vector.shape_cast %84 : vector<128xf32> to vector<1x128xf32>
    %86 = arith.mulf %83, %83 : vector<512x128xf32>
    %cst_112 = arith.constant dense<0.000000e+00> : vector<128xf32>
    %87 = vector.multi_reduction <add>, %86, %cst_112 [0] : vector<512x128xf32> to vector<128xf32>
    %88 = vector.shape_cast %87 : vector<128xf32> to vector<1x128xf32>
    %cst_113 = arith.constant 0.001953125 : f32
    %89 = vector.broadcast %cst_113 : f32 to vector<1x128xf32>
    %90 = arith.mulf %85, %89 : vector<1x128xf32>
    %cst_114 = arith.constant 0.001953125 : f32
    %91 = vector.broadcast %cst_114 : f32 to vector<1x128xf32>
    %92 = arith.mulf %88, %91 : vector<1x128xf32>
    %93 = arith.mulf %90, %90 : vector<1x128xf32>
    %94 = arith.subf %92, %93 : vector<1x128xf32>
    %cst_115 = arith.constant 0.000000e+00 : f32
    %95 = vector.broadcast %cst_115 : f32 to vector<1x128xf32>
    %96 = arith.maximumf %94, %95 : vector<1x128xf32>
    %cst_116 = arith.constant 9.99999974E-6 : f32
    %97 = vector.broadcast %cst_116 : f32 to vector<1x128xf32>
    %98 = arith.addf %96, %97 : vector<1x128xf32>
    %99 = math.rsqrt %98 : vector<1x128xf32>
    %c0_117 = arith.constant 0 : index
    %c0_118 = arith.constant 0 : index
    %100 = vector.load %arg3[%c0_117, %c0_118] : memref<1x128xf32, #tpu.memory_space<vmem>>, vector<1x128xf32>
    %101 = arith.mulf %99, %100 : vector<1x128xf32>
    %c0_119 = arith.constant 0 : index
    %c0_120 = arith.constant 0 : index
    %102 = vector.load %arg4[%c0_119, %c0_120] : memref<1x128xf32, #tpu.memory_space<vmem>>, vector<1x128xf32>
    %103 = arith.mulf %90, %101 : vector<1x128xf32>
    %104 = arith.subf %102, %103 : vector<1x128xf32>
    %c0_121 = arith.constant 0 : index
    %c0_122 = arith.constant 0 : index
    %105 = vector.load %arg9[%c0_121, %c0_122] : memref<512x128xf32, #tpu.memory_space<vmem>>, vector<512x128xf32>
    %106 = vector.broadcast %101 : vector<1x128xf32> to vector<512x128xf32>
    %107 = arith.mulf %105, %106 : vector<512x128xf32>
    %108 = vector.broadcast %104 : vector<1x128xf32> to vector<512x128xf32>
    %109 = arith.addf %107, %108 : vector<512x128xf32>
    %cst_123 = arith.constant 0.000000e+00 : f32
    %110 = vector.broadcast %cst_123 : f32 to vector<512x128xf32>
    %111 = arith.maximumf %109, %110 : vector<512x128xf32>
    %112 = vector.shape_cast %111 : vector<512x128xf32> to vector<2x16x16x128xf32>
    %c0_124 = arith.constant 0 : index
    %c1_125 = arith.constant 1 : index
    %c1_126 = arith.constant 1 : index
    %c0_127 = arith.constant 0 : index
    %113 = vector.load %arg8[%c0_124, %c1_125, %c1_126, %c0_127] : memref<2x18x18x128xf32, #tpu.memory_space<vmem>>, vector<2x16x16x128xf32>
    tpu.vector_store %arg8[%c0_124, %c1_125, %c1_126, %c0_127], %112 {strides = array<i32>} : memref<2x18x18x128xf32, #tpu.memory_space<vmem>>, vector<2x16x16x128xf32>,
    %c0_128 = arith.constant 0 : index
    %c0_129 = arith.constant 0 : index
    %c0_130 = arith.constant 0 : index
    %c0_131 = arith.constant 0 : index
    %114 = vector.load %arg8[%c0_128, %c0_129, %c0_130, %c0_131] : memref<2x18x18x128xf32, #tpu.memory_space<vmem>>, vector<2x16x16x128xf32>
    %115 = vector.shape_cast %114 : vector<2x16x16x128xf32> to vector<512x128xf32>
    %116 = arith.truncf %115 : vector<512x128xf32> to vector<512x128xbf16>
    %c0_132 = arith.constant 0 : index
    %c0_133 = arith.constant 0 : index
    %c0_134 = arith.constant 0 : index
    %117 = vector.load %arg2[%c0_132, %c0_133, %c0_134] : memref<9x128x128xbf16, #tpu.memory_space<vmem>>, vector<1x128x128xbf16>
    %118 = vector.shape_cast %117 : vector<1x128x128xbf16> to vector<128x128xbf16>
    %cst_135 = arith.constant dense<0.000000e+00> : vector<512x128xf32>
    %119 = tpu.matmul %116, %118, %cst_135 {dimension_numbers = #tpu.dot_dimension_numbers<[1], [0], [0], [1], [0, 0, 1, 1], [], []>} : vector<512x128xbf16>, vector<128x128xbf16>, vector<512x128xf32> -> vector<512x128xf32>
    %c0_136 = arith.constant 0 : index
    %c0_137 = arith.constant 0 : index
    %120 = vector.load %arg9[%c0_136, %c0_137] : memref<512x128xf32, #tpu.memory_space<vmem>>, vector<512x128xf32>
    tpu.vector_store %arg9[%c0_136, %c0_137], %119 {strides = array<i32>} : memref<512x128xf32, #tpu.memory_space<vmem>>, vector<512x128xf32>,
    %c0_138 = arith.constant 0 : index
    %c0_139 = arith.constant 0 : index
    %c1_140 = arith.constant 1 : index
    %c0_141 = arith.constant 0 : index
    %121 = vector.load %arg8[%c0_138, %c0_139, %c1_140, %c0_141] : memref<2x18x18x128xf32, #tpu.memory_space<vmem>>, vector<2x16x16x128xf32>
    %122 = vector.shape_cast %121 : vector<2x16x16x128xf32> to vector<512x128xf32>
    %123 = arith.truncf %122 : vector<512x128xf32> to vector<512x128xbf16>
    %c1_142 = arith.constant 1 : index
    %c0_143 = arith.constant 0 : index
    %c0_144 = arith.constant 0 : index
    %124 = vector.load %arg2[%c1_142, %c0_143, %c0_144] : memref<9x128x128xbf16, #tpu.memory_space<vmem>>, vector<1x128x128xbf16>
    %125 = vector.shape_cast %124 : vector<1x128x128xbf16> to vector<128x128xbf16>
    %cst_145 = arith.constant dense<0.000000e+00> : vector<512x128xf32>
    %126 = tpu.matmul %123, %125, %cst_145 {dimension_numbers = #tpu.dot_dimension_numbers<[1], [0], [0], [1], [0, 0, 1, 1], [], []>} : vector<512x128xbf16>, vector<128x128xbf16>, vector<512x128xf32> -> vector<512x128xf32>
    %c0_146 = arith.constant 0 : index
    %c0_147 = arith.constant 0 : index
    %127 = vector.load %arg9[%c0_146, %c0_147] : memref<512x128xf32, #tpu.memory_space<vmem>>, vector<512x128xf32>
    %128 = arith.addf %127, %126 : vector<512x128xf32>
    %c0_148 = arith.constant 0 : index
    %c0_149 = arith.constant 0 : index
    %129 = vector.load %arg9[%c0_148, %c0_149] : memref<512x128xf32, #tpu.memory_space<vmem>>, vector<512x128xf32>
    tpu.vector_store %arg9[%c0_148, %c0_149], %128 {strides = array<i32>} : memref<512x128xf32, #tpu.memory_space<vmem>>, vector<512x128xf32>,
    %c0_150 = arith.constant 0 : index
    %c0_151 = arith.constant 0 : index
    %c2_152 = arith.constant 2 : index
    %c0_153 = arith.constant 0 : index
    %130 = vector.load %arg8[%c0_150, %c0_151, %c2_152, %c0_153] : memref<2x18x18x128xf32, #tpu.memory_space<vmem>>, vector<2x16x16x128xf32>
    %131 = vector.shape_cast %130 : vector<2x16x16x128xf32> to vector<512x128xf32>
    %132 = arith.truncf %131 : vector<512x128xf32> to vector<512x128xbf16>
    %c2_154 = arith.constant 2 : index
    %c0_155 = arith.constant 0 : index
    %c0_156 = arith.constant 0 : index
    %133 = vector.load %arg2[%c2_154, %c0_155, %c0_156] : memref<9x128x128xbf16, #tpu.memory_space<vmem>>, vector<1x128x128xbf16>
    %134 = vector.shape_cast %133 : vector<1x128x128xbf16> to vector<128x128xbf16>
    %cst_157 = arith.constant dense<0.000000e+00> : vector<512x128xf32>
    %135 = tpu.matmul %132, %134, %cst_157 {dimension_numbers = #tpu.dot_dimension_numbers<[1], [0], [0], [1], [0, 0, 1, 1], [], []>} : vector<512x128xbf16>, vector<128x128xbf16>, vector<512x128xf32> -> vector<512x128xf32>
    %c0_158 = arith.constant 0 : index
    %c0_159 = arith.constant 0 : index
    %136 = vector.load %arg9[%c0_158, %c0_159] : memref<512x128xf32, #tpu.memory_space<vmem>>, vector<512x128xf32>
    %137 = arith.addf %136, %135 : vector<512x128xf32>
    %c0_160 = arith.constant 0 : index
    %c0_161 = arith.constant 0 : index
    %138 = vector.load %arg9[%c0_160, %c0_161] : memref<512x128xf32, #tpu.memory_space<vmem>>, vector<512x128xf32>
    tpu.vector_store %arg9[%c0_160, %c0_161], %137 {strides = array<i32>} : memref<512x128xf32, #tpu.memory_space<vmem>>, vector<512x128xf32>,
    %c0_162 = arith.constant 0 : index
    %c1_163 = arith.constant 1 : index
    %c0_164 = arith.constant 0 : index
    %c0_165 = arith.constant 0 : index
    %139 = vector.load %arg8[%c0_162, %c1_163, %c0_164, %c0_165] : memref<2x18x18x128xf32, #tpu.memory_space<vmem>>, vector<2x16x16x128xf32>
    %140 = vector.shape_cast %139 : vector<2x16x16x128xf32> to vector<512x128xf32>
    %141 = arith.truncf %140 : vector<512x128xf32> to vector<512x128xbf16>
    %c3_166 = arith.constant 3 : index
    %c0_167 = arith.constant 0 : index
    %c0_168 = arith.constant 0 : index
    %142 = vector.load %arg2[%c3_166, %c0_167, %c0_168] : memref<9x128x128xbf16, #tpu.memory_space<vmem>>, vector<1x128x128xbf16>
    %143 = vector.shape_cast %142 : vector<1x128x128xbf16> to vector<128x128xbf16>
    %cst_169 = arith.constant dense<0.000000e+00> : vector<512x128xf32>
    %144 = tpu.matmul %141, %143, %cst_169 {dimension_numbers = #tpu.dot_dimension_numbers<[1], [0], [0], [1], [0, 0, 1, 1], [], []>} : vector<512x128xbf16>, vector<128x128xbf16>, vector<512x128xf32> -> vector<512x128xf32>
    %c0_170 = arith.constant 0 : index
    %c0_171 = arith.constant 0 : index
    %145 = vector.load %arg9[%c0_170, %c0_171] : memref<512x128xf32, #tpu.memory_space<vmem>>, vector<512x128xf32>
    %146 = arith.addf %145, %144 : vector<512x128xf32>
    %c0_172 = arith.constant 0 : index
    %c0_173 = arith.constant 0 : index
    %147 = vector.load %arg9[%c0_172, %c0_173] : memref<512x128xf32, #tpu.memory_space<vmem>>, vector<512x128xf32>
    tpu.vector_store %arg9[%c0_172, %c0_173], %146 {strides = array<i32>} : memref<512x128xf32, #tpu.memory_space<vmem>>, vector<512x128xf32>,
    %c0_174 = arith.constant 0 : index
    %c1_175 = arith.constant 1 : index
    %c1_176 = arith.constant 1 : index
    %c0_177 = arith.constant 0 : index
    %148 = vector.load %arg8[%c0_174, %c1_175, %c1_176, %c0_177] : memref<2x18x18x128xf32, #tpu.memory_space<vmem>>, vector<2x16x16x128xf32>
    %149 = vector.shape_cast %148 : vector<2x16x16x128xf32> to vector<512x128xf32>
    %150 = arith.truncf %149 : vector<512x128xf32> to vector<512x128xbf16>
    %c4_178 = arith.constant 4 : index
    %c0_179 = arith.constant 0 : index
    %c0_180 = arith.constant 0 : index
    %151 = vector.load %arg2[%c4_178, %c0_179, %c0_180] : memref<9x128x128xbf16, #tpu.memory_space<vmem>>, vector<1x128x128xbf16>
    %152 = vector.shape_cast %151 : vector<1x128x128xbf16> to vector<128x128xbf16>
    %cst_181 = arith.constant dense<0.000000e+00> : vector<512x128xf32>
    %153 = tpu.matmul %150, %152, %cst_181 {dimension_numbers = #tpu.dot_dimension_numbers<[1], [0], [0], [1], [0, 0, 1, 1], [], []>} : vector<512x128xbf16>, vector<128x128xbf16>, vector<512x128xf32> -> vector<512x128xf32>
    %c0_182 = arith.constant 0 : index
    %c0_183 = arith.constant 0 : index
    %154 = vector.load %arg9[%c0_182, %c0_183] : memref<512x128xf32, #tpu.memory_space<vmem>>, vector<512x128xf32>
    %155 = arith.addf %154, %153 : vector<512x128xf32>
    %c0_184 = arith.constant 0 : index
    %c0_185 = arith.constant 0 : index
    %156 = vector.load %arg9[%c0_184, %c0_185] : memref<512x128xf32, #tpu.memory_space<vmem>>, vector<512x128xf32>
    tpu.vector_store %arg9[%c0_184, %c0_185], %155 {strides = array<i32>} : memref<512x128xf32, #tpu.memory_space<vmem>>, vector<512x128xf32>,
    %c0_186 = arith.constant 0 : index
    %c1_187 = arith.constant 1 : index
    %c2_188 = arith.constant 2 : index
    %c0_189 = arith.constant 0 : index
    %157 = vector.load %arg8[%c0_186, %c1_187, %c2_188, %c0_189] : memref<2x18x18x128xf32, #tpu.memory_space<vmem>>, vector<2x16x16x128xf32>
    %158 = vector.shape_cast %157 : vector<2x16x16x128xf32> to vector<512x128xf32>
    %159 = arith.truncf %158 : vector<512x128xf32> to vector<512x128xbf16>
    %c5_190 = arith.constant 5 : index
    %c0_191 = arith.constant 0 : index
    %c0_192 = arith.constant 0 : index
    %160 = vector.load %arg2[%c5_190, %c0_191, %c0_192] : memref<9x128x128xbf16, #tpu.memory_space<vmem>>, vector<1x128x128xbf16>
    %161 = vector.shape_cast %160 : vector<1x128x128xbf16> to vector<128x128xbf16>
    %cst_193 = arith.constant dense<0.000000e+00> : vector<512x128xf32>
    %162 = tpu.matmul %159, %161, %cst_193 {dimension_numbers = #tpu.dot_dimension_numbers<[1], [0], [0], [1], [0, 0, 1, 1], [], []>} : vector<512x128xbf16>, vector<128x128xbf16>, vector<512x128xf32> -> vector<512x128xf32>
    %c0_194 = arith.constant 0 : index
    %c0_195 = arith.constant 0 : index
    %163 = vector.load %arg9[%c0_194, %c0_195] : memref<512x128xf32, #tpu.memory_space<vmem>>, vector<512x128xf32>
    %164 = arith.addf %163, %162 : vector<512x128xf32>
    %c0_196 = arith.constant 0 : index
    %c0_197 = arith.constant 0 : index
    %165 = vector.load %arg9[%c0_196, %c0_197] : memref<512x128xf32, #tpu.memory_space<vmem>>, vector<512x128xf32>
    tpu.vector_store %arg9[%c0_196, %c0_197], %164 {strides = array<i32>} : memref<512x128xf32, #tpu.memory_space<vmem>>, vector<512x128xf32>,
    %c0_198 = arith.constant 0 : index
    %c2_199 = arith.constant 2 : index
    %c0_200 = arith.constant 0 : index
    %c0_201 = arith.constant 0 : index
    %166 = vector.load %arg8[%c0_198, %c2_199, %c0_200, %c0_201] : memref<2x18x18x128xf32, #tpu.memory_space<vmem>>, vector<2x16x16x128xf32>
    %167 = vector.shape_cast %166 : vector<2x16x16x128xf32> to vector<512x128xf32>
    %168 = arith.truncf %167 : vector<512x128xf32> to vector<512x128xbf16>
    %c6_202 = arith.constant 6 : index
    %c0_203 = arith.constant 0 : index
    %c0_204 = arith.constant 0 : index
    %169 = vector.load %arg2[%c6_202, %c0_203, %c0_204] : memref<9x128x128xbf16, #tpu.memory_space<vmem>>, vector<1x128x128xbf16>
    %170 = vector.shape_cast %169 : vector<1x128x128xbf16> to vector<128x128xbf16>
    %cst_205 = arith.constant dense<0.000000e+00> : vector<512x128xf32>
    %171 = tpu.matmul %168, %170, %cst_205 {dimension_numbers = #tpu.dot_dimension_numbers<[1], [0], [0], [1], [0, 0, 1, 1], [], []>} : vector<512x128xbf16>, vector<128x128xbf16>, vector<512x128xf32> -> vector<512x128xf32>
    %c0_206 = arith.constant 0 : index
    %c0_207 = arith.constant 0 : index
    %172 = vector.load %arg9[%c0_206, %c0_207] : memref<512x128xf32, #tpu.memory_space<vmem>>, vector<512x128xf32>
    %173 = arith.addf %172, %171 : vector<512x128xf32>
    %c0_208 = arith.constant 0 : index
    %c0_209 = arith.constant 0 : index
    %174 = vector.load %arg9[%c0_208, %c0_209] : memref<512x128xf32, #tpu.memory_space<vmem>>, vector<512x128xf32>
    tpu.vector_store %arg9[%c0_208, %c0_209], %173 {strides = array<i32>} : memref<512x128xf32, #tpu.memory_space<vmem>>, vector<512x128xf32>,
    %c0_210 = arith.constant 0 : index
    %c2_211 = arith.constant 2 : index
    %c1_212 = arith.constant 1 : index
    %c0_213 = arith.constant 0 : index
    %175 = vector.load %arg8[%c0_210, %c2_211, %c1_212, %c0_213] : memref<2x18x18x128xf32, #tpu.memory_space<vmem>>, vector<2x16x16x128xf32>
    %176 = vector.shape_cast %175 : vector<2x16x16x128xf32> to vector<512x128xf32>
    %177 = arith.truncf %176 : vector<512x128xf32> to vector<512x128xbf16>
    %c7_214 = arith.constant 7 : index
    %c0_215 = arith.constant 0 : index
    %c0_216 = arith.constant 0 : index
    %178 = vector.load %arg2[%c7_214, %c0_215, %c0_216] : memref<9x128x128xbf16, #tpu.memory_space<vmem>>, vector<1x128x128xbf16>
    %179 = vector.shape_cast %178 : vector<1x128x128xbf16> to vector<128x128xbf16>
    %cst_217 = arith.constant dense<0.000000e+00> : vector<512x128xf32>
    %180 = tpu.matmul %177, %179, %cst_217 {dimension_numbers = #tpu.dot_dimension_numbers<[1], [0], [0], [1], [0, 0, 1, 1], [], []>} : vector<512x128xbf16>, vector<128x128xbf16>, vector<512x128xf32> -> vector<512x128xf32>
    %c0_218 = arith.constant 0 : index
    %c0_219 = arith.constant 0 : index
    %181 = vector.load %arg9[%c0_218, %c0_219] : memref<512x128xf32, #tpu.memory_space<vmem>>, vector<512x128xf32>
    %182 = arith.addf %181, %180 : vector<512x128xf32>
    %c0_220 = arith.constant 0 : index
    %c0_221 = arith.constant 0 : index
    %183 = vector.load %arg9[%c0_220, %c0_221] : memref<512x128xf32, #tpu.memory_space<vmem>>, vector<512x128xf32>
    tpu.vector_store %arg9[%c0_220, %c0_221], %182 {strides = array<i32>} : memref<512x128xf32, #tpu.memory_space<vmem>>, vector<512x128xf32>,
    %c0_222 = arith.constant 0 : index
    %c2_223 = arith.constant 2 : index
    %c2_224 = arith.constant 2 : index
    %c0_225 = arith.constant 0 : index
    %184 = vector.load %arg8[%c0_222, %c2_223, %c2_224, %c0_225] : memref<2x18x18x128xf32, #tpu.memory_space<vmem>>, vector<2x16x16x128xf32>
    %185 = vector.shape_cast %184 : vector<2x16x16x128xf32> to vector<512x128xf32>
    %186 = arith.truncf %185 : vector<512x128xf32> to vector<512x128xbf16>
    %c8_226 = arith.constant 8 : index
    %c0_227 = arith.constant 0 : index
    %c0_228 = arith.constant 0 : index
    %187 = vector.load %arg2[%c8_226, %c0_227, %c0_228] : memref<9x128x128xbf16, #tpu.memory_space<vmem>>, vector<1x128x128xbf16>
    %188 = vector.shape_cast %187 : vector<1x128x128xbf16> to vector<128x128xbf16>
    %cst_229 = arith.constant dense<0.000000e+00> : vector<512x128xf32>
    %189 = tpu.matmul %186, %188, %cst_229 {dimension_numbers = #tpu.dot_dimension_numbers<[1], [0], [0], [1], [0, 0, 1, 1], [], []>} : vector<512x128xbf16>, vector<128x128xbf16>, vector<512x128xf32> -> vector<512x128xf32>
    %c0_230 = arith.constant 0 : index
    %c0_231 = arith.constant 0 : index
    %190 = vector.load %arg9[%c0_230, %c0_231] : memref<512x128xf32, #tpu.memory_space<vmem>>, vector<512x128xf32>
    %191 = arith.addf %190, %189 : vector<512x128xf32>
    %c0_232 = arith.constant 0 : index
    %c0_233 = arith.constant 0 : index
    %192 = vector.load %arg9[%c0_232, %c0_233] : memref<512x128xf32, #tpu.memory_space<vmem>>, vector<512x128xf32>
    tpu.vector_store %arg9[%c0_232, %c0_233], %191 {strides = array<i32>} : memref<512x128xf32, #tpu.memory_space<vmem>>, vector<512x128xf32>,
    %c0_234 = arith.constant 0 : index
    %c0_235 = arith.constant 0 : index
    %193 = vector.load %arg9[%c0_234, %c0_235] : memref<512x128xf32, #tpu.memory_space<vmem>>, vector<512x128xf32>
    %cst_236 = arith.constant dense<0.000000e+00> : vector<128xf32>
    %194 = vector.multi_reduction <add>, %193, %cst_236 [0] : vector<512x128xf32> to vector<128xf32>
    %195 = vector.shape_cast %194 : vector<128xf32> to vector<1x128xf32>
    %196 = arith.mulf %193, %193 : vector<512x128xf32>
    %cst_237 = arith.constant dense<0.000000e+00> : vector<128xf32>
    %197 = vector.multi_reduction <add>, %196, %cst_237 [0] : vector<512x128xf32> to vector<128xf32>
    %198 = vector.shape_cast %197 : vector<128xf32> to vector<1x128xf32>
    %cst_238 = arith.constant 0.001953125 : f32
    %199 = vector.broadcast %cst_238 : f32 to vector<1x128xf32>
    %200 = arith.mulf %195, %199 : vector<1x128xf32>
    %cst_239 = arith.constant 0.001953125 : f32
    %201 = vector.broadcast %cst_239 : f32 to vector<1x128xf32>
    %202 = arith.mulf %198, %201 : vector<1x128xf32>
    %203 = arith.mulf %200, %200 : vector<1x128xf32>
    %204 = arith.subf %202, %203 : vector<1x128xf32>
    %cst_240 = arith.constant 0.000000e+00 : f32
    %205 = vector.broadcast %cst_240 : f32 to vector<1x128xf32>
    %206 = arith.maximumf %204, %205 : vector<1x128xf32>
    %cst_241 = arith.constant 9.99999974E-6 : f32
    %207 = vector.broadcast %cst_241 : f32 to vector<1x128xf32>
    %208 = arith.addf %206, %207 : vector<1x128xf32>
    %209 = math.rsqrt %208 : vector<1x128xf32>
    %c0_242 = arith.constant 0 : index
    %c0_243 = arith.constant 0 : index
    %210 = vector.load %arg5[%c0_242, %c0_243] : memref<1x128xf32, #tpu.memory_space<vmem>>, vector<1x128xf32>
    %211 = arith.mulf %209, %210 : vector<1x128xf32>
    %c0_244 = arith.constant 0 : index
    %c0_245 = arith.constant 0 : index
    %212 = vector.load %arg6[%c0_244, %c0_245] : memref<1x128xf32, #tpu.memory_space<vmem>>, vector<1x128xf32>
    %213 = arith.mulf %200, %211 : vector<1x128xf32>
    %214 = arith.subf %212, %213 : vector<1x128xf32>
    %c0_246 = arith.constant 0 : index
    %c0_247 = arith.constant 0 : index
    %215 = vector.load %arg9[%c0_246, %c0_247] : memref<512x128xf32, #tpu.memory_space<vmem>>, vector<512x128xf32>
    %216 = vector.broadcast %211 : vector<1x128xf32> to vector<512x128xf32>
    %217 = arith.mulf %215, %216 : vector<512x128xf32>
    %218 = vector.broadcast %214 : vector<1x128xf32> to vector<512x128xf32>
    %219 = arith.addf %217, %218 : vector<512x128xf32>
    %220 = vector.extract_strided_slice %219 {offsets = [0, 0], sizes = [512, 4], strides = [1, 1]} : vector<512x128xf32> to vector<512x4xf32>
    %c0_248 = arith.constant 0 : index
    %c0_249 = arith.constant 0 : index
    %c0_250 = arith.constant 0 : index
    %c0_251 = arith.constant 0 : index
    %221 = vector.load %arg0[%c0_248, %c0_249, %c0_250, %c0_251] : memref<2x16x16x4xf32, #tpu.memory_space<vmem>>, vector<2x16x16x4xf32>
    %222 = vector.shape_cast %221 : vector<2x16x16x4xf32> to vector<512x4xf32>
    %223 = arith.addf %220, %222 : vector<512x4xf32>
    %cst_252 = arith.constant 0.000000e+00 : f32
    %224 = vector.broadcast %cst_252 : f32 to vector<512x4xf32>
    %225 = arith.maximumf %223, %224 : vector<512x4xf32>
    %226 = vector.shape_cast %225 : vector<512x4xf32> to vector<2x16x16x4xf32>
    %c0_253 = arith.constant 0 : index
    %c0_254 = arith.constant 0 : index
    %c0_255 = arith.constant 0 : index
    %c0_256 = arith.constant 0 : index
    %227 = vector.load %arg7[%c0_253, %c0_254, %c0_255, %c0_256] : memref<2x16x16x4xf32, #tpu.memory_space<vmem>>, vector<2x16x16x4xf32>
    tpu.vector_store %arg7[%c0_253, %c0_254, %c0_255, %c0_256], %226 {strides = array<i32>} : memref<2x16x16x4xf32, #tpu.memory_space<vmem>>, vector<2x16x16x4xf32>,
    return
  }
}

</mosaic_0001>

<bundles_post_ra>
// kernel: basic_block_forward.1
= control target key start
LH: loop header
LB: loop body
LE: loop exit
PB: predicated region body
PF: predicated region fallthrough
CT: control target
= control target key end

     0   :  { %v16520_v1 = vmov 0.0   ;;  %v16521_v3 = vmov 0.0|0.0   ;;  %vm200_vm0 = vcmask 31744   ;;  %s20938_s1 = inlined_call_operand.vmem [shape: bf16[9,128,128], index: 1, kind: input, shape index: {}]   ;;  %s20939_s0 = inlined_call_operand.vmem [shape: f32[2,16,16,4], index: 0, kind: input, shape index: {}]   ;;  %s20940_s2 = inlined_call_operand.vmem [shape: bf16[9,128,128], index: 2, kind: input, shape index: {}]   ;;  %s20941_s3 = inlined_call_operand.vmem [shape: f32[1,128], index: 3, kind: input, shape index: {}]   ;;  %s20942_s4 = inlined_call_operand.vmem [shape: f32[1,128], index: 4, kind: input, shape index: {}]   ;;  %s20943_s5 = inlined_call_operand.vmem [shape: f32[1,128], index: 5, kind: input, shape index: {}]   ;;  %s20944_s6 = inlined_call_operand.vmem [shape: f32[1,128], index: 6, kind: input, shape index: {}]   ;;  %s20945_s7 = inlined_call_operand.vmem [shape: f32[2,16,16,4], index: 7, kind: output, shape index: {}]  }
   0x1   :  { %v16565_v0 = vld [vmem:[%s20938_s1] sm:$0xff]   ;;  %27 = vst [vmem:[#allocation2] sm:$0xff] %v16520_v1  ;;  %28 = vst [vmem:[#allocation2 + $0x8] sm:$0xff] %v16520_v1  ;;  %v16370_v2 = vld [vmem:[%s20938_s1 + $0x8] sm:$0xff]   ;;  %13920 = vmatprep.mubr.bf16.mxu0 %v16521_v3 }
   0x2   :  { %29 = vst [vmem:[#allocation2 + $0x10] sm:$0x3] %v16520_v1  ;;  %30 = vst [vmem:[#allocation2 + $0x18] sm:$0xff] %v16520_v1  ;;  %13904 = vmatprep.subr.bf16.mxu0 %v16565_v0  ;;  %v16371_v4 = vld [vmem:[%s20938_s1 + $0x10] sm:$0xff]   ;;  %v16372_v5 = vld [vmem:[%s20938_s1 + $0x18] sm:$0xff]  }
   0x3   :  { %31 = vst [vmem:[#allocation2 + $0x20] sm:$0xff] %v16520_v1  ;;  %32 = vst [vmem:[#allocation2 + $0x28] sm:$0x3] %v16520_v1  ;;  %13905 = vmatpush3.bf16.msra.mxu0 %v16565_v0  ;;  %v135_v6 = vld [vmem:[%s20939_s0] sm:$0xff]  ;;  %v136_v7 = vld [vmem:[%s20939_s0 + $0x8] sm:$0xff] }
   0x4   :  { %33 = vst [vmem:[#allocation2 + $0x30] sm:$0xff] %v16520_v1  ;;  %34 = vst [vmem:[#allocation2 + $0x38] sm:$0xff] %v16520_v1  ;;  %13906 = vmatprep.subr.bf16.mxu0 %v16370_v2  ;;  %v137_v8 = vld [vmem:[%s20939_s0 + $0x10] sm:$0xff]  ;;  %v16373_v9 = vld [vmem:[%s20938_s1 + $0x20] sm:$0xff]  }
   0x5   :  { %35 = vst [vmem:[#allocation2 + $0x40] sm:$0x3] %v16520_v1  ;;  %36 = vst [vmem:[#allocation2 + $0x48] sm:$0xff] %v16520_v1  ;;  %v138_v10 = vld [vmem:[%s20939_s0 + $0x18] sm:$0xff]  ;;  %v139_v11 = vld [vmem:[%s20939_s0 + $0x20] sm:$0xff] }
   0x6   :  { %37 = vst [vmem:[#allocation2 + $0x50] sm:$0xff] %v16520_v1  ;;  %38 = vst [vmem:[#allocation2 + $0x58] sm:$0x3] %v16520_v1  ;;  %v140_v12 = vld [vmem:[%s20939_s0 + $0x28] sm:$0xff]  ;;  %v141_v13 = vld [vmem:[%s20939_s0 + $0x30] sm:$0xff] }
   0x7   :  { %39 = vst [vmem:[#allocation2 + $0x60] sm:$0xff] %v16520_v1  ;;  %40 = vst [vmem:[#allocation2 + $0x68] sm:$0xff] %v16520_v1  ;;  %13907 = vmatpush3.bf16.msra.mxu0 %v16370_v2  ;;  %v142_v14 = vld [vmem:[%s20939_s0 + $0x38] sm:$0xff]  ;;  %v143_v15 = vld [vmem:[%s20939_s0 + $0x40] sm:$0xff] }
   0x8   :  { %41 = vst [vmem:[#allocation2 + $0x70] sm:$0x3] %v16520_v1  ;;  %42 = vst [vmem:[#allocation2 + $0x78] sm:$0xff] %v16520_v1  ;;  %13908 = vmatprep.subr.bf16.mxu0 %v16371_v4  ;;  %v144_v16 = vld [vmem:[%s20939_s0 + $0x48] sm:$0xff]  ;;  %v145_v17 = vld [vmem:[%s20939_s0 + $0x50] sm:$0xff] }
   0x9   :  { %43 = vst [vmem:[#allocation2 + $0x80] sm:$0xff] %v16520_v1  ;;  %44 = vst [vmem:[#allocation2 + $0x88] sm:$0x3] %v16520_v1  ;;  %v146_v18 = vld [vmem:[%s20939_s0 + $0x58] sm:$0xff]  ;;  %v147_v19 = vld [vmem:[%s20939_s0 + $0x60] sm:$0xff] }
   0xa   :  { %45 = vst [vmem:[#allocation2 + $0x90] sm:$0xff] %v16520_v1  ;;  %46 = vst [vmem:[#allocation2 + $0x98] sm:$0xff] %v16520_v1  ;;  %v148_v20 = vld [vmem:[%s20939_s0 + $0x68] sm:$0xff]  ;;  %v149_v21 = vld [vmem:[%s20939_s0 + $0x70] sm:$0xff] }
   0xb   :  { %47 = vst [vmem:[#allocation2 + $0xa0] sm:$0x3] %v16520_v1  ;;  %48 = vst [vmem:[#allocation2 + $0xa8] sm:$0xff] %v16520_v1  ;;  %13909 = vmatpush3.bf16.msra.mxu0 %v16371_v4  ;;  %v150_v22 = vld [vmem:[%s20939_s0 + $0x78] sm:$0xff]  ;;  %v151_v23 = vld [vmem:[%s20939_s0 + $0x80] sm:$0xff] }
   0xc   :  { %49 = vst [vmem:[#allocation2 + $0xb0] sm:$0xff] %v16520_v1  ;;  %50 = vst [vmem:[#allocation2 + $0xb8] sm:$0x3] %v16520_v1  ;;  %13910 = vmatprep.subr.bf16.mxu0 %v16372_v5  ;;  %v152_v24 = vld [vmem:[%s20939_s0 + $0x88] sm:$0xff]  ;;  %v16375_v26 = vld [vmem:[%s20938_s1 + $0x30] sm:$0xff]  }
   0xd   :  { %51 = vst [vmem:[#allocation2 + $0xc0] sm:$0xff] %v16520_v1  ;;  %52 = vst [vmem:[#allocation2 + $0xc8] sm:$0xff] %v16520_v1  ;;  %v16374_v25 = vld [vmem:[%s20938_s1 + $0x28] sm:$0xff]   ;;  %v153_v27 = vld [vmem:[%s20939_s0 + $0x90] sm:$0xff] }
   0xe   :  { %53 = vst [vmem:[#allocation2 + $0xd0] sm:$0x3] %v16520_v1  ;;  %54 = vst [vmem:[#allocation2 + $0xd8] sm:$0xff] %v16520_v1  ;;  %v154_v28 = vld [vmem:[%s20939_s0 + $0x98] sm:$0xff]  ;;  %v155_v29 = vld [vmem:[%s20939_s0 + $0xa0] sm:$0xff] }
   0xf   :  { %55 = vst [vmem:[#allocation2 + $0xe0] sm:$0xff] %v16520_v1  ;;  %56 = vst [vmem:[#allocation2 + $0xe8] sm:$0x3] %v16520_v1  ;;  %13911 = vmatpush3.bf16.msra.mxu0 %v16372_v5  ;;  %v16376_v30 = vld [vmem:[%s20938_s1 + $0x38] sm:$0xff]   ;;  %v156_v31 = vld [vmem:[%s20939_s0 + $0xa8] sm:$0xff] }
  0x10   :  { %57 = vst [vmem:[#allocation2 + $0xf0] sm:$0xff] %v16520_v1  ;;  %58 = vst [vmem:[#allocation2 + $0xf8] sm:$0xff] %v16520_v1  ;;  %13912 = vmatprep.subr.bf16.mxu0 %v16373_v9  ;;  %v157_v32 = vld [vmem:[%s20939_s0 + $0xb0] sm:$0xff]  ;;  %v158_v33 = vld [vmem:[%s20939_s0 + $0xb8] sm:$0xff] }
  0x11   :  { %59 = vst [vmem:[#allocation2 + $0x100] sm:$0x3] %v16520_v1  ;;  %60 = vst [vmem:[#allocation2 + $0x108] sm:$0xff] %v16520_v1  ;;  %v159_v35 = vld [vmem:[%s20939_s0 + $0xc0] sm:$0xff]  ;;  %v160_v36 = vld [vmem:[%s20939_s0 + $0xc8] sm:$0xff] }
  0x12   :  { %61 = vst [vmem:[#allocation2 + $0x110] sm:$0xff] %v16520_v1  ;;  %62 = vst [vmem:[#allocation2 + $0x118] sm:$0x3] %v16520_v1  ;;  %v16377_v38 = vld [vmem:[%s20938_s1 + $0x40] sm:$0xff]   ;;  %v161_v39 = vld [vmem:[%s20939_s0 + $0xd0] sm:$0xff] }
  0x13   :  { %63 = vst [vmem:[#allocation2 + $0x120] sm:$0xff] %v16520_v1  ;;  %64 = vst [vmem:[#allocation2 + $0x128] sm:$0xff] %v16520_v1  ;;  %13913 = vmatpush3.bf16.msra.mxu0 %v16373_v9  ;;  %v162_v40 = vld [vmem:[%s20939_s0 + $0xd8] sm:$0xff]  ;;  %v163_v41 = vld [vmem:[%s20939_s0 + $0xe0] sm:$0xff] }
  0x14   :  { %65 = vst [vmem:[#allocation2 + $0x130] sm:$0x3] %v16520_v1  ;;  %66 = vst [vmem:[#allocation2 + $0x138] sm:$0xff] %v16520_v1  ;;  %13914 = vmatprep.subr.bf16.mxu0 %v16374_v25  ;;  %v164_v42 = vld [vmem:[%s20939_s0 + $0xe8] sm:$0xff]  ;;  %v167_v45 = vld [vmem:[%s20939_s0 + $0x100] sm:$0xff] }
  0x15   :  { %67 = vst [vmem:[#allocation2 + $0x140] sm:$0xff] %v16520_v1  ;;  %68 = vst [vmem:[#allocation2 + $0x148] sm:$0x3] %v16520_v1  ;;  %v168_v46 = vld [vmem:[%s20939_s0 + $0x108] sm:$0xff]  ;;  %v169_v48 = vld [vmem:[%s20939_s0 + $0x110] sm:$0xff] }
  0x16   :  { %69 = vst [vmem:[#allocation2 + $0x150] sm:$0xff] %v16520_v1  ;;  %70 = vst [vmem:[#allocation2 + $0x158] sm:$0xff] %v16520_v1  ;;  %v170_v50 = vld [vmem:[%s20939_s0 + $0x118] sm:$0xff]  ;;  %v171_v51 = vld [vmem:[%s20939_s0 + $0x120] sm:$0xff] }
  0x17   :  { %71 = vst [vmem:[#allocation2 + $0x160] sm:$0x3] %v16520_v1  ;;  %72 = vst [vmem:[#allocation2 + $0x168] sm:$0xff] %v16520_v1  ;;  %13915 = vmatpush3.bf16.msra.mxu0 %v16374_v25  ;;  %v172_v52 = vld [vmem:[%s20939_s0 + $0x128] sm:$0xff]  ;;  %v173_v54 = vld [vmem:[%s20939_s0 + $0x130] sm:$0xff] }
  0x18   :  { %73 = vst [vmem:[#allocation2 + $0x170] sm:$0xff] %v16520_v1  ;;  %74 = vst [vmem:[#allocation2 + $0x178] sm:$0x3] %v16520_v1  ;;  %13916 = vmatprep.subr.bf16.mxu0 %v16375_v26  ;;  %v16378_v53 = vld [vmem:[%s20938_s1 + $0x48] sm:$0xff]   ;;  %v16379_v55 = vld [vmem:[%s20938_s1 + $0x50] sm:$0xff]  }
  0x19   :  { %75 = vst [vmem:[#allocation2 + $0x180] sm:$0xff] %v16520_v1  ;;  %76 = vst [vmem:[#allocation2 + $0x188] sm:$0xff] %v16520_v1  ;;  %v174_v56 = vld [vmem:[%s20939_s0 + $0x138] sm:$0xff]  ;;  %v175_v57 = vld [vmem:[%s20939_s0 + $0x140] sm:$0xff] }
  0x1a   :  { %77 = vst [vmem:[#allocation2 + $0x190] sm:$0x3] %v16520_v1  ;;  %78 = vst [vmem:[#allocation2 + $0x198] sm:$0xff] %v16520_v1  ;;  %v176_v62 = vld [vmem:[%s20939_s0 + $0x148] sm:$0xff]  ;;  %v177_v0 = vld [vmem:[%s20939_s0 + $0x150] sm:$0xff] }
  0x1b   :  { %79 = vst [vmem:[#allocation2 + $0x1a0] sm:$0xff] %v16520_v1  ;;  %80 = vst [vmem:[#allocation2 + $0x1a8] sm:$0x3] %v16520_v1  ;;  %13917 = vmatpush3.bf16.msra.mxu0 %v16375_v26  ;;  %v16380_v4 = vld [vmem:[%s20938_s1 + $0x58] sm:$0xff]   ;;  %v179_v5 = vld [vmem:[%s20939_s0 + $0x160] sm:$0xff] }
  0x1c   :  { %81 = vst [vmem:[#allocation2 + $0x1b0] sm:$0xff] %v16520_v1  ;;  %82 = vst [vmem:[#allocation2 + $0x1b8] sm:$0xff] %v16520_v1  ;;  %13918 = vmatprep.subr.bf16.mxu0 %v16376_v30  ;;  %v182_v9 = vld [vmem:[%s20939_s0 + $0x178] sm:$0xff]  ;;  %v192_v25 = vld [vmem:[%s20939_s0 + $0x1c8] sm:$0xff] }
  0x1d   :  { %83 = vst [vmem:[#allocation2 + $0x1c0] sm:$0x3] %v16520_v1  ;;  %84 = vst [vmem:[#allocation2 + $0x1c8] sm:$0xff] %v16520_v1  ;;  %v16382_v26 = vld [vmem:[%s20938_s1 + $0x68] sm:$0xff]  }
  0x1e   :  { %85 = vst [vmem:[#allocation2 + $0x1d0] sm:$0xff] %v16520_v1  ;;  %86 = vst [vmem:[#allocation2 + $0x1d8] sm:$0x3] %v16520_v1 }
  0x1f   :  { %87 = vst [vmem:[#allocation2 + $0x1e0] sm:$0xff] %v16520_v1  ;;  %88 = vst [vmem:[#allocation2 + $0x1e8] sm:$0xff] %v16520_v1  ;;  %13919 = vmatpush3.bf16.msra.mxu0 %v16376_v30  ;;  %v194_v30 = vld [vmem:[%s20939_s0 + $0x1d8] sm:$0xff] }
  0x20   :  { %89 = vst [vmem:[#allocation2 + $0x1f0] sm:$0x3] %v16520_v1  ;;  %90 = vst [vmem:[#allocation2 + $0x1f8] sm:$0xff] %v16520_v1  ;;  %13984 = vmatprep.subr.bf16.mxu0 %v16377_v38 }
  0x21   :  { %91 = vst [vmem:[#allocation2 + $0x200] sm:$0xff] %v16520_v1  ;;  %92 = vst [vmem:[#allocation2 + $0x208] sm:$0x3] %v16520_v1 }
  0x22   :  { %93 = vst [vmem:[#allocation2 + $0x210] sm:$0xff] %v16520_v1  ;;  %94 = vst [vmem:[#allocation2 + $0x218] sm:$0xff] %v16520_v1 }
  0x23   :  { %95 = vst [vmem:[#allocation2 + $0x220] sm:$0x3] %v16520_v1  ;;  %96 = vst [vmem:[#allocation2 + $0x228] sm:$0xff] %v16520_v1 }
  0x24   :  { %97 = vst [vmem:[#allocation2 + $0x230] sm:$0xff] %v16520_v1  ;;  %98 = vst [vmem:[#allocation2 + $0x238] sm:$0x3] %v16520_v1 }
  0x25   :  { %99 = vst [vmem:[#allocation2 + $0x240] sm:$0xff] %v16520_v1  ;;  %100 = vst [vmem:[#allocation2 + $0x248] sm:$0xff] %v16520_v1 }
  0x26   :  { %101 = vst [vmem:[#allocation2 + $0x250] sm:$0x3] %v16520_v1  ;;  %102 = vst [vmem:[#allocation2 + $0x258] sm:$0xff] %v16520_v1 }
  0x27   :  { %103 = vst [vmem:[#allocation2 + $0x260] sm:$0xff] %v16520_v1  ;;  %104 = vst [vmem:[#allocation2 + $0x268] sm:$0x3] %v16520_v1 }
  0x28   :  { %105 = vst [vmem:[#allocation2 + $0x270] sm:$0xff] %v16520_v1  ;;  %106 = vst [vmem:[#allocation2 + $0x278] sm:$0xff] %v16520_v1 }
  0x29   :  { %107 = vst [vmem:[#allocation2 + $0x280] sm:$0x3] %v16520_v1  ;;  %108 = vst [vmem:[#allocation2 + $0x288] sm:$0xff] %v16520_v1 }
  0x2a   :  { %109 = vst [vmem:[#allocation2 + $0x290] sm:$0xff] %v16520_v1  ;;  %110 = vst [vmem:[#allocation2 + $0x298] sm:$0x3] %v16520_v1 }
  0x2b   :  { %111 = vst [vmem:[#allocation2 + $0x2a0] sm:$0xff] %v16520_v1  ;;  %112 = vst [vmem:[#allocation2 + $0x2a8] sm:$0xff] %v16520_v1 }
  0x2c   :  { %113 = vst [vmem:[#allocation2 + $0x2b0] sm:$0x3] %v16520_v1  ;;  %114 = vst [vmem:[#allocation2 + $0x2b8] sm:$0xff] %v16520_v1 }
  0x2d   :  { %115 = vst [vmem:[#allocation2 + $0x2c0] sm:$0xff] %v16520_v1  ;;  %116 = vst [vmem:[#allocation2 + $0x2c8] sm:$0x3] %v16520_v1 }
  0x2e   :  { %117 = vst [vmem:[#allocation2 + $0x2d0] sm:$0xff] %v16520_v1  ;;  %118 = vst [vmem:[#allocation2 + $0x2d8] sm:$0xff] %v16520_v1 }
  0x2f   :  { %119 = vst [vmem:[#allocation2 + $0x2e0] sm:$0x3] %v16520_v1  ;;  %120 = vst [vmem:[#allocation2 + $0x2e8] sm:$0xff] %v16520_v1 }
  0x30   :  { %121 = vst [vmem:[#allocation2 + $0x2f0] sm:$0xff] %v16520_v1  ;;  %122 = vst [vmem:[#allocation2 + $0x2f8] sm:$0x3] %v16520_v1 }
  0x31   :  { %123 = vst [vmem:[#allocation2 + $0x300] sm:$0xff] %v16520_v1  ;;  %124 = vst [vmem:[#allocation2 + $0x308] sm:$0xff] %v16520_v1 }
  0x32   :  { %125 = vst [vmem:[#allocation2 + $0x310] sm:$0x3] %v16520_v1  ;;  %126 = vst [vmem:[#allocation2 + $0x318] sm:$0xff] %v16520_v1 }
  0x33   :  { %127 = vst [vmem:[#allocation2 + $0x320] sm:$0xff] %v16520_v1  ;;  %128 = vst [vmem:[#allocation2 + $0x328] sm:$0x3] %v16520_v1 }
  0x34   :  { %129 = vst [vmem:[#allocation2 + $0x330] sm:$0xff] %v16520_v1  ;;  %130 = vst [vmem:[#allocation2 + $0x338] sm:$0xff] %v16520_v1 }
  0x35   :  { %131 = vst [vmem:[#allocation2 + $0x340] sm:$0x3] %v16520_v1  ;;  %132 = vst [vmem:[#allocation2 + $0x348] sm:$0xff] %v16520_v1 }
  0x36   :  { %133 = vst [vmem:[#allocation2 + $0x350] sm:$0xff] %v16520_v1  ;;  %134 = vst [vmem:[#allocation2 + $0x358] sm:$0x3] %v16520_v1  ;;  %v178_v1 = vld [vmem:[%s20939_s0 + $0x158] sm:$0xff] }
  0x37   :  { %201 = vst.msk [vmem:[#allocation2 + $0x19] sm:$0xff] %vm200_vm0, %v135_v6  ;;  %202 = vst.msk [vmem:[#allocation2 + $0x21] sm:$0xff] %vm200_vm0, %v136_v7  ;;  %v180_v6 = vld [vmem:[%s20939_s0 + $0x168] sm:$0xff]  ;;  %v181_v7 = vld [vmem:[%s20939_s0 + $0x170] sm:$0xff] }
  0x38   :  { %203 = vst.msk [vmem:[#allocation2 + $0x31] sm:$0xff] %vm200_vm0, %v137_v8  ;;  %204 = vst.msk [vmem:[#allocation2 + $0x39] sm:$0xff] %vm200_vm0, %v138_v10  ;;  %v183_v10 = vld [vmem:[%s20939_s0 + $0x180] sm:$0xff] }
  0x39   :  { %205 = vst.msk [vmem:[#allocation2 + $0x49] sm:$0xff] %vm200_vm0, %v139_v11  ;;  %206 = vst.msk [vmem:[#allocation2 + $0x51] sm:$0xff] %vm200_vm0, %v140_v12 }
  0x3a   :  { %207 = vst.msk [vmem:[#allocation2 + $0x61] sm:$0xff] %vm200_vm0, %v141_v13  ;;  %208 = vst.msk [vmem:[#allocation2 + $0x69] sm:$0xff] %vm200_vm0, %v142_v14  ;;  %v184_v13 = vld [vmem:[%s20939_s0 + $0x188] sm:$0xff] }
  0x3b   :  { %209 = vst.msk [vmem:[#allocation2 + $0x79] sm:$0xff] %vm200_vm0, %v143_v15  ;;  %210 = vst.msk [vmem:[#allocation2 + $0x81] sm:$0xff] %vm200_vm0, %v144_v16  ;;  %v16381_v15 = vld [vmem:[%s20938_s1 + $0x60] sm:$0xff]   ;;  %v185_v16 = vld [vmem:[%s20939_s0 + $0x190] sm:$0xff] }
  0x3c   :  { %211 = vst.msk [vmem:[#allocation2 + $0x91] sm:$0xff] %vm200_vm0, %v145_v17  ;;  %212 = vst.msk [vmem:[#allocation2 + $0x99] sm:$0xff] %vm200_vm0, %v146_v18  ;;  %v186_v17 = vld [vmem:[%s20939_s0 + $0x198] sm:$0xff]  ;;  %v187_v18 = vld [vmem:[%s20939_s0 + $0x1a0] sm:$0xff] }
  0x3d   :  { %213 = vst.msk [vmem:[#allocation2 + $0xa9] sm:$0xff] %vm200_vm0, %v147_v19  ;;  %214 = vst.msk [vmem:[#allocation2 + $0xb1] sm:$0xff] %vm200_vm0, %v148_v20  ;;  %v188_v19 = vld [vmem:[%s20939_s0 + $0x1a8] sm:$0xff]  ;;  %v189_v20 = vld [vmem:[%s20939_s0 + $0x1b0] sm:$0xff] }
  0x3e   :  { %215 = vst.msk [vmem:[#allocation2 + $0xc1] sm:$0xff] %vm200_vm0, %v149_v21  ;;  %216 = vst.msk [vmem:[#allocation2 + $0xc9] sm:$0xff] %vm200_vm0, %v150_v22  ;;  %v267_v34 = vld [vmem:[#allocation2 + $0x18] sm:$0xff]  ;;  %v268_v37 = vld [vmem:[#allocation2 + $0x20] sm:$0xff] }
  0x3f   :  { %217 = vst.msk [vmem:[#allocation2 + $0xd9] sm:$0xff] %vm200_vm0, %v151_v23  ;;  %218 = vst.msk [vmem:[#allocation2 + $0xe1] sm:$0xff] %vm200_vm0, %v152_v24  ;;  %v269_v43 = vld [vmem:[#allocation2 + $0x30] sm:$0xff]  ;;  %v270_v44 = vld [vmem:[#allocation2 + $0x38] sm:$0xff]  ;;  %v330_v47 = vpack.c.bf16 %v268_v37, %v267_v34 }
  0x40   :  { %219 = vst.msk [vmem:[#allocation2 + $0xf1] sm:$0xff] %vm200_vm0, %v153_v27  ;;  %220 = vst.msk [vmem:[#allocation2 + $0xf9] sm:$0xff] %vm200_vm0, %v154_v28  ;;  %v331_v49 = vpack.c.bf16 %v270_v44, %v269_v43  ;;  %v271_v58 = vld [vmem:[#allocation2 + $0x48] sm:$0xff]  ;;  %v272_v59 = vld [vmem:[#allocation2 + $0x50] sm:$0xff] }
  0x41   :  { %221 = vst.msk [vmem:[#allocation2 + $0x109] sm:$0xff] %vm200_vm0, %v155_v29  ;;  %222 = vst.msk [vmem:[#allocation2 + $0x111] sm:$0xff] %vm200_vm0, %v156_v31  ;;  %13921 = vmatmul.mubr.bf16.vlgmr.msra.gmra.mrb[0].mxu0 %v330_v47  ;;  %v273_v60 = vld [vmem:[#allocation2 + $0x60] sm:$0xff]  ;;  %v274_v61 = vld [vmem:[#allocation2 + $0x68] sm:$0xff]  ;;  %v332_v63 = vpack.c.bf16 %v272_v59, %v271_v58 }
  0x42   :  { %223 = vst.msk [vmem:[#allocation2 + $0x121] sm:$0xff] %vm200_vm0, %v157_v32  ;;  %224 = vst.msk [vmem:[#allocation2 + $0x129] sm:$0xff] %vm200_vm0, %v158_v33  ;;  %13985 = vmatpush3.bf16.msra.mxu0 %v16377_v38  ;;  %13924 = vmatprep.mubr.bf16.mxu0 %v331_v49  ;;  %v333_v2 = vpack.c.bf16 %v274_v61, %v273_v60  ;;  %v275_v8 = vld [vmem:[#allocation2 + $0x78] sm:$0xff]  ;;  %v276_v11 = vld [vmem:[#allocation2 + $0x80] sm:$0xff] }
  0x43   :  { %225 = vst.msk [vmem:[#allocation2 + $0x139] sm:$0xff] %vm200_vm0, %v159_v35  ;;  %226 = vst.msk [vmem:[#allocation2 + $0x141] sm:$0xff] %vm200_vm0, %v160_v36  ;;  %13986 = vmatprep.subr.bf16.mxu0 %v16378_v53  ;;  %v277_v12 = vld [vmem:[#allocation2 + $0x90] sm:$0xff]  ;;  %v278_v14 = vld [vmem:[#allocation2 + $0x98] sm:$0xff]  ;;  %v334_v21 = vpack.c.bf16 %v276_v11, %v275_v8 }
  0x44   :  { %227 = vst.msk [vmem:[#allocation2 + $0x151] sm:$0xff] %vm200_vm0, %v161_v39  ;;  %228 = vst.msk [vmem:[#allocation2 + $0x159] sm:$0xff] %vm200_vm0, %v162_v40  ;;  %v190_v22 = vld [vmem:[%s20939_s0 + $0x1b8] sm:$0xff]  ;;  %v335_v23 = vpack.c.bf16 %v278_v14, %v277_v12  ;;  %v191_v24 = vld [vmem:[%s20939_s0 + $0x1c0] sm:$0xff] }
  0x45   :  { %229 = vst.msk [vmem:[#allocation2 + $0x169] sm:$0xff] %vm200_vm0, %v163_v41  ;;  %230 = vst.msk [vmem:[#allocation2 + $0x171] sm:$0xff] %vm200_vm0, %v164_v42  ;;  %v279_v27 = vld [vmem:[#allocation2 + $0xa8] sm:$0xff]  ;;  %v280_v28 = vld [vmem:[#allocation2 + $0xb0] sm:$0xff] }
  0x46   :  { %233 = vst.msk [vmem:[#allocation2 + $0x1c9] sm:$0xff] %vm200_vm0, %v167_v45  ;;  %234 = vst.msk [vmem:[#allocation2 + $0x1d1] sm:$0xff] %vm200_vm0, %v168_v46  ;;  %13987 = vmatpush3.bf16.msra.mxu0 %v16378_v53  ;;  %v193_v29 = vld [vmem:[%s20939_s0 + $0x1d0] sm:$0xff]  ;;  %v195_v31 = vld [vmem:[%s20939_s0 + $0x1e0] sm:$0xff]  ;;  %v336_v36 = vpack.c.bf16 %v280_v28, %v279_v27 }
  0x47   :  { %235 = vst.msk [vmem:[#allocation2 + $0x1e1] sm:$0xff] %vm200_vm0, %v169_v48  ;;  %236 = vst.msk [vmem:[#allocation2 + $0x1e9] sm:$0xff] %vm200_vm0, %v170_v50  ;;  %13988 = vmatprep.subr.bf16.mxu0 %v16379_v55  ;;  %v196_v32 = vld [vmem:[%s20939_s0 + $0x1e8] sm:$0xff]  ;;  %v281_v33 = vld [vmem:[#allocation2 + $0xc0] sm:$0xff] }
  0x48   :  { %237 = vst.msk [vmem:[#allocation2 + $0x1f9] sm:$0xff] %vm200_vm0, %v171_v51  ;;  %238 = vst.msk [vmem:[#allocation2 + $0x201] sm:$0xff] %vm200_vm0, %v172_v52  ;;  %v282_v34 = vld [vmem:[#allocation2 + $0xc8] sm:$0xff]  ;;  %v16383_v35 = vld [vmem:[%s20938_s1 + $0x70] sm:$0xff]  }
  0x49   :  { %239 = vst.msk [vmem:[#allocation2 + $0x211] sm:$0xff] %vm200_vm0, %v173_v54  ;;  %240 = vst.msk [vmem:[#allocation2 + $0x219] sm:$0xff] %vm200_vm0, %v174_v56  ;;  %13925 = vmatmul.mubr.bf16.gmra.mrb[4].mxu0 %v332_v63  ;;  %v337_v37 = vpack.c.bf16 %v282_v34, %v281_v33  ;;  %v16384_v38 = vld [vmem:[%s20938_s1 + $0x78] sm:$0xff]   ;;  %v284_v40 = vld [vmem:[#allocation2 + $0xe0] sm:$0xff] }
  0x4a   :  { %241 = vst.msk [vmem:[#allocation2 + $0x229] sm:$0xff] %vm200_vm0, %v175_v57  ;;  %242 = vst.msk [vmem:[#allocation2 + $0x231] sm:$0xff] %vm200_vm0, %v176_v62  ;;  %13928 = vmatprep.mubr.bf16.mxu0 %v333_v2  ;;  %13989 = vmatpush3.bf16.msra.mxu0 %v16379_v55  ;;  %v283_v39 = vld [vmem:[#allocation2 + $0xd8] sm:$0xff]  ;;  %v285_v41 = vld [vmem:[#allocation2 + $0xf0] sm:$0xff] }
  0x4b   :  { %243 = vst.msk [vmem:[#allocation2 + $0x241] sm:$0xff] %vm200_vm0, %v177_v0  ;;  %244 = vst.msk [vmem:[#allocation2 + $0x249] sm:$0xff] %vm200_vm0, %v178_v1  ;;  %13990 = vmatprep.subr.bf16.mxu0 %v16380_v4  ;;  %v286_v42 = vld [vmem:[#allocation2 + $0xf8] sm:$0xff]  ;;  %v16966_v43 = vld [vmem:[%s20938_s1 + $0x80] sm:$0xff]   ;;  %v338_v44 = vpack.c.bf16 %v284_v40, %v283_v39 }
  0x4c   :  { %245 = vst.msk [vmem:[#allocation2 + $0x259] sm:$0xff] %vm200_vm0, %v179_v5  ;;  %246 = vst.msk [vmem:[#allocation2 + $0x261] sm:$0xff] %vm200_vm0, %v180_v6  ;;  %v339_v45 = vpack.c.bf16 %v286_v42, %v285_v41  ;;  %v287_v46 = vld [vmem:[#allocation2 + $0x108] sm:$0xff]  ;;  %v288_v47 = vld [vmem:[#allocation2 + $0x110] sm:$0xff] }
  0x4d   :  { %247 = vst.msk [vmem:[#allocation2 + $0x271] sm:$0xff] %vm200_vm0, %v181_v7  ;;  %248 = vst.msk [vmem:[#allocation2 + $0x279] sm:$0xff] %vm200_vm0, %v182_v9  ;;  %v289_v48 = vld [vmem:[#allocation2 + $0x120] sm:$0xff]  ;;  %v290_v49 = vld [vmem:[#allocation2 + $0x128] sm:$0xff]  ;;  %v340_v50 = vpack.c.bf16 %v288_v47, %v287_v46 }
  0x4e   :  { %249 = vst.msk [vmem:[#allocation2 + $0x289] sm:$0xff] %vm200_vm0, %v183_v10  ;;  %250 = vst.msk [vmem:[#allocation2 + $0x291] sm:$0xff] %vm200_vm0, %v184_v13  ;;  %13991 = vmatpush3.bf16.msra.mxu0 %v16380_v4  ;;  %v341_v51 = vpack.c.bf16 %v290_v49, %v289_v48  ;;  %v291_v52 = vld [vmem:[#allocation2 + $0x138] sm:$0xff]  ;;  %v292_v53 = vld [vmem:[#allocation2 + $0x140] sm:$0xff] }
  0x4f   :  { %251 = vst.msk [vmem:[#allocation2 + $0x2a1] sm:$0xff] %vm200_vm0, %v185_v16  ;;  %252 = vst.msk [vmem:[#allocation2 + $0x2a9] sm:$0xff] %vm200_vm0, %v186_v17  ;;  %13992 = vmatprep.subr.bf16.mxu0 %v16381_v15  ;;  %v293_v54 = vld [vmem:[#allocation2 + $0x150] sm:$0xff]  ;;  %v294_v55 = vld [vmem:[#allocation2 + $0x158] sm:$0xff]  ;;  %v342_v56 = vpack.c.bf16 %v292_v53, %v291_v52 }
  0x50   :  { %253 = vst.msk [vmem:[#allocation2 + $0x2b9] sm:$0xff] %vm200_vm0, %v187_v18  ;;  %254 = vst.msk [vmem:[#allocation2 + $0x2c1] sm:$0xff] %vm200_vm0, %v188_v19  ;;  %v343_v57 = vpack.c.bf16 %v294_v55, %v293_v54  ;;  %v295_v58 = vld [vmem:[#allocation2 + $0x168] sm:$0xff]  ;;  %v296_v59 = vld [vmem:[#allocation2 + $0x170] sm:$0xff] }
  0x51   :  { %255 = vst.msk [vmem:[#allocation2 + $0x2d1] sm:$0xff] %vm200_vm0, %v189_v20  ;;  %256 = vst.msk [vmem:[#allocation2 + $0x2d9] sm:$0xff] %vm200_vm0, %v190_v22  ;;  %13929 = vmatmul.mubr.bf16.gmra.mrb[8].mxu0 %v334_v21  ;;  %v344_v60 = vpack.c.bf16 %v296_v59, %v295_v58  ;;  %v299_v61 = vld [vmem:[#allocation2 + $0x1c8] sm:$0xff]  ;;  %v300_v62 = vld [vmem:[#allocation2 + $0x1d0] sm:$0xff] }
  0x52   :  { %257 = vst.msk [vmem:[#allocation2 + $0x2e9] sm:$0xff] %vm200_vm0, %v191_v24  ;;  %258 = vst.msk [vmem:[#allocation2 + $0x2f1] sm:$0xff] %vm200_vm0, %v192_v25  ;;  %13932 = vmatprep.mubr.bf16.mxu0 %v335_v23  ;;  %13993 = vmatpush3.bf16.msra.mxu0 %v16381_v15  ;;  %v301_v63 = vld [vmem:[#allocation2 + $0x1e0] sm:$0xff]  ;;  %v302_v0 = vld [vmem:[#allocation2 + $0x1e8] sm:$0xff]  ;;  %v346_v1 = vpack.c.bf16 %v300_v62, %v299_v61 }
  0x53   :  { %259 = vst.msk [vmem:[#allocation2 + $0x301] sm:$0xff] %vm200_vm0, %v193_v29  ;;  %13994 = vmatprep.subr.bf16.mxu0 %v16382_v26  ;;  %260 = vst.msk [vmem:[#allocation2 + $0x309] sm:$0xff] %vm200_vm0, %v194_v30  ;;  %v347_v2 = vpack.c.bf16 %v302_v0, %v301_v63  ;;  %v303_v4 = vld [vmem:[#allocation2 + $0x1f8] sm:$0xff]  ;;  %v304_v5 = vld [vmem:[#allocation2 + $0x200] sm:$0xff] }
  0x54   :  { %261 = vst.msk [vmem:[#allocation2 + $0x319] sm:$0xff] %vm200_vm0, %v195_v31  ;;  %262 = vst.msk [vmem:[#allocation2 + $0x321] sm:$0xff] %vm200_vm0, %v196_v32  ;;  %v305_v6 = vld [vmem:[#allocation2 + $0x210] sm:$0xff]  ;;  %v306_v7 = vld [vmem:[#allocation2 + $0x218] sm:$0xff]  ;;  %v348_v8 = vpack.c.bf16 %v304_v5, %v303_v4 }
  0x55   :  { %v349_v9 = vpack.c.bf16 %v306_v7, %v305_v6  ;;  %v307_v10 = vld [vmem:[#allocation2 + $0x228] sm:$0xff]  ;;  %v308_v11 = vld [vmem:[#allocation2 + $0x230] sm:$0xff]  ;;  %v309_v12 = vld [vmem:[#allocation2 + $0x240] sm:$0xff] }
  0x56   :  { %13995 = vmatpush3.bf16.msra.mxu0 %v16382_v26  ;;  %v310_v13 = vld [vmem:[#allocation2 + $0x248] sm:$0xff]  ;;  %v350_v14 = vpack.c.bf16 %v308_v11, %v307_v10  ;;  %v311_v15 = vld [vmem:[#allocation2 + $0x258] sm:$0xff]  ;;  %v312_v16 = vld [vmem:[#allocation2 + $0x260] sm:$0xff] }
  0x57   :  { %13996 = vmatprep.subr.bf16.mxu0 %v16383_v35  ;;  %v313_v17 = vld [vmem:[#allocation2 + $0x270] sm:$0xff]  ;;  %v314_v18 = vld [vmem:[#allocation2 + $0x278] sm:$0xff]  ;;  %v352_v19 = vpack.c.bf16 %v312_v16, %v311_v15  ;;  %v315_v21 = vld [vmem:[#allocation2 + $0x288] sm:$0xff] }
  0x58   :  { %v353_v20 = vpack.c.bf16 %v314_v18, %v313_v17  ;;  %v316_v22 = vld [vmem:[#allocation2 + $0x290] sm:$0xff]  ;;  %v317_v23 = vld [vmem:[#allocation2 + $0x2a0] sm:$0xff]  ;;  %v318_v24 = vld [vmem:[#allocation2 + $0x2a8] sm:$0xff] }
  0x59   :  { %13933 = vmatmul.mubr.bf16.gmra.mrb[12].mxu0 %v336_v36  ;;  %v354_v25 = vpack.c.bf16 %v316_v22, %v315_v21  ;;  %v355_v26 = vpack.c.bf16 %v318_v24, %v317_v23  ;;  %v319_v27 = vld [vmem:[#allocation2 + $0x2b8] sm:$0xff]  ;;  %v320_v28 = vld [vmem:[#allocation2 + $0x2c0] sm:$0xff]  ;;  %v321_v29 = vld [vmem:[#allocation2 + $0x2d0] sm:$0xff] }
  0x5a   :  { %13936 = vmatprep.mubr.bf16.mxu0 %v337_v37  ;;  %13997 = vmatpush3.bf16.msra.mxu0 %v16383_v35  ;;  %v322_v30 = vld [vmem:[#allocation2 + $0x2d8] sm:$0xff]  ;;  %v356_v31 = vpack.c.bf16 %v320_v28, %v319_v27  ;;  %v323_v33 = vld [vmem:[#allocation2 + $0x2e8] sm:$0xff]  ;;  %v324_v34 = vld [vmem:[#allocation2 + $0x2f0] sm:$0xff] }
  0x5b   :  { %13998 = vmatprep.subr.bf16.mxu0 %v16384_v38  ;;  %v357_v32 = vpack.c.bf16 %v322_v30, %v321_v29  ;;  %v325_v35 = vld [vmem:[#allocation2 + $0x300] sm:$0xff]  ;;  %v326_v36 = vld [vmem:[#allocation2 + $0x308] sm:$0xff]  ;;  %v16970_v37 = vpack.c.bf16 %v324_v34, %v323_v33  ;;  %v327_v39 = vld [vmem:[#allocation2 + $0x318] sm:$0xff] }
  0x5c   :  { %v328_v40 = vld [vmem:[#allocation2 + $0x320] sm:$0xff]  ;;  %v779_v42 = vld [vmem:[#allocation2 + $0x9] sm:$0xff]  ;;  %v782_v48 = vld [vmem:[#allocation2 + $0x31] sm:$0xff] }
  0x5d   :  { %v778_v41 = vld [vmem:[#allocation2 + $0x1] sm:$0xff]  ;;  %v780_v46 = vld [vmem:[#allocation2 + $0x19] sm:$0xff]  ;;  %v784_v53 = vld [vmem:[#allocation2 + $0x49] sm:$0xff] }
  0x5e   :  { %13999 = vmatpush3.bf16.msra.mxu0 %v16384_v38  ;;  %v16972_v38 = vpack.c.bf16 %v326_v36, %v325_v35  ;;  %v781_v47 = vld [vmem:[#allocation2 + $0x21] sm:$0xff]  ;;  %v783_v49 = vld [vmem:[#allocation2 + $0x39] sm:$0xff]  ;;  %v785_v54 = vld [vmem:[#allocation2 + $0x51] sm:$0xff] }
  0x5f   :  { %14064 = vmatprep.subr.bf16.mxu0 %v16966_v43  ;;  %v16386_v52 = vld [vmem:[%s20938_s1 + $0x88] sm:$0xff]   ;;  %v16992_v58 = vpack.c.bf16 %v785_v54, %v784_v53  ;;  %v790_v62 = vld [vmem:[#allocation2 + $0x91] sm:$0xff]  ;;  %v791_v63 = vld [vmem:[#allocation2 + $0x99] sm:$0xff] }
  0x60   :  { %v786_v55 = vld [vmem:[#allocation2 + $0x61] sm:$0xff]  ;;  %v792_v5 = vld [vmem:[#allocation2 + $0xa9] sm:$0xff]  ;;  %v793_v6 = vld [vmem:[#allocation2 + $0xb1] sm:$0xff] }
  0x61   :  { %13937 = vmatmul.mubr.bf16.gmra.mrb[16].mxu0 %v338_v44  ;;  %v16976_v44 = vpack.c.bf16 %v328_v40, %v327_v39  ;;  %v789_v61 = vld [vmem:[#allocation2 + $0x81] sm:$0xff]  ;;  %v17016_v10 = vpack.c.bf16 %v793_v6, %v792_v5  ;;  %v799_v15 = vld [vmem:[#allocation2 + $0xf9] sm:$0xff]  ;;  %v803_v22 = vld [vmem:[#allocation2 + $0x129] sm:$0xff] }
  0x62   :  { %13940 = vmatprep.mubr.bf16.mxu0 %v339_v45  ;;  %v842_v45 = vpack.c.bf16 %v779_v42, %v778_v41  ;;  %v16389_v0 = vld [vmem:[%s20938_s1 + $0xa0] sm:$0xff]   ;;  %v16390_v4 = vld [vmem:[%s20938_s1 + $0xa8] sm:$0xff]   ;;  %v806_v27 = vld [vmem:[#allocation2 + $0x151] sm:$0xff] }
  0x63   :  { %v794_v7 = vld [vmem:[#allocation2 + $0xc1] sm:$0xff]  ;;  %v807_v28 = vld [vmem:[#allocation2 + $0x159] sm:$0xff]  ;;  %v810_v33 = vld [vmem:[#allocation2 + $0x1b1] sm:$0xff] }
  0x64   :  { %v17028_v16 = vld [vmem:[%s20938_s1 + $0xc0] sm:$0xff]   ;;  %v17045_v30 = vpack.c.bf16 %v807_v28, %v806_v27  ;;  %v812_v39 = vld [vmem:[#allocation2 + $0x1c9] sm:$0xff]  ;;  %v813_v40 = vld [vmem:[#allocation2 + $0x1d1] sm:$0xff] }
  0x65   :  { %v802_v21 = vld [vmem:[#allocation2 + $0x121] sm:$0xff]  ;;  %v811_v34 = vld [vmem:[#allocation2 + $0x1b9] sm:$0xff]  ;;  %v815_v42 = vld [vmem:[#allocation2 + $0x1e9] sm:$0xff] }
  0x66   :  { %v17039_v24 = vpack.c.bf16 %v803_v22, %v802_v21  ;;  %v858_v36 = vpack.c.bf16 %v811_v34, %v810_v33  ;;  %v814_v41 = vld [vmem:[#allocation2 + $0x1e1] sm:$0xff]  ;;  %v839_v28 = vld [vmem:[#allocation2 + $0x309] sm:$0xff]  ;;  %v840_v33 = vld [vmem:[#allocation2 + $0x319] sm:$0xff] }
  0x67   :  { %v838_v27 = vld [vmem:[#allocation2 + $0x301] sm:$0xff] }
  0x68   :  { %v841_v34 = vld [vmem:[#allocation2 + $0x321] sm:$0xff] }
  0x69   :  { %13941 = vmatmul.mubr.bf16.gmra.mrb[20].mxu0 %v340_v50  ;;  %v16979_v50 = vpack.c.bf16 %v781_v47, %v780_v46  ;;  %v17054_v46 = vpack.c.bf16 %v815_v42, %v814_v41  ;;  %v816_v47 = vld [vmem:[#allocation2 + $0x1f9] sm:$0xff] }
  0x6a   :  { %13944 = vmatprep.mubr.bf16.mxu0 %v341_v51  ;;  %v16981_v51 = vpack.c.bf16 %v783_v49, %v782_v48  ;;  %v817_v48 = vld [vmem:[#allocation2 + $0x201] sm:$0xff]  ;;  %v818_v49 = vld [vmem:[#allocation2 + $0x211] sm:$0xff] }
  0x6b   :  { %v17058_v53 = vpack.c.bf16 %v817_v48, %v816_v47  ;;  %v1422_v42 = vld [vmem:[#allocation2 + $0x1a] sm:$0xff]  ;;  %v1423_v47 = vld [vmem:[#allocation2 + $0x22] sm:$0xff]  ;;  %v1424_v48 = vld [vmem:[#allocation2 + $0x32] sm:$0xff] }
  0x71   :  { %13945 = vmatmul.mubr.bf16.gmra.mrb[24].mxu0 %v342_v56  ;;  %v787_v56 = vld [vmem:[#allocation2 + $0x69] sm:$0xff] }
  0x72   :  { %13948 = vmatprep.mubr.bf16.mxu0 %v343_v57  ;;  %v16387_v57 = vld [vmem:[%s20938_s1 + $0x90] sm:$0xff]   ;;  %v16994_v59 = vpack.c.bf16 %v787_v56, %v786_v55 }
  0x73   :  { %v820_v55 = vld [vmem:[#allocation2 + $0x229] sm:$0xff]  ;;  %v821_v56 = vld [vmem:[#allocation2 + $0x231] sm:$0xff] }
  0x79   :  { %13949 = vmatmul.mubr.bf16.gmra.mrb[28].mxu0 %v344_v60  ;;  %v788_v60 = vld [vmem:[#allocation2 + $0x79] sm:$0xff] }
  0x7a   :  { %13952 = vmatprep.mubr.bf16.mxu0 %v16521_v3  ;;  %v351_v3 = vpack.c.bf16 %v310_v13, %v309_v12  ;;  %v16392_v12 = vld [vmem:[%s20938_s1 + $0xb8] sm:$0xff]  }
  0x7b   :  { %v796_v13 = vld [vmem:[#allocation2 + $0xd9] sm:$0xff] }
  0x81   :  { %13953 = vmatmul.mubr.bf16.gmra.mrb[32].mxu0 %v346_v1  ;;  %v17004_v1 = vpack.c.bf16 %v789_v61, %v788_v60  ;;  %v17064_v60 = vpack.c.bf16 %v821_v56, %v820_v55  ;;  %v16394_v56 = vld [vmem:[%s20938_s1 + $0xc8] sm:$0xff]  }
  0x82   :  { %13956 = vmatprep.mubr.bf16.mxu0 %v347_v2  ;;  %v17006_v2 = vpack.c.bf16 %v791_v63, %v790_v62  ;;  %v824_v62 = vld [vmem:[#allocation2 + $0x259] sm:$0xff]  ;;  %v825_v63 = vld [vmem:[#allocation2 + $0x261] sm:$0xff] }
  0x83   :  { %v17070_v5 = vpack.c.bf16 %v825_v63, %v824_v62  ;;  %v1428_v62 = vld [vmem:[#allocation2 + $0x62] sm:$0xff]  ;;  %v1429_v63 = vld [vmem:[#allocation2 + $0x6a] sm:$0xff] }
  0x89   :  { %13957 = vmatmul.mubr.bf16.gmra.mrb[36].mxu0 %v348_v8  ;;  %v795_v8 = vld [vmem:[#allocation2 + $0xc9] sm:$0xff] }
  0x8a   :  { %13960 = vmatprep.mubr.bf16.mxu0 %v349_v9  ;;  %v16391_v9 = vld [vmem:[%s20938_s1 + $0xb0] sm:$0xff]   ;;  %v17018_v11 = vpack.c.bf16 %v795_v8, %v794_v7 }
  0x8b   :  { %v828_v7 = vld [vmem:[#allocation2 + $0x289] sm:$0xff]  ;;  %v829_v8 = vld [vmem:[#allocation2 + $0x291] sm:$0xff] }
  0x91   :  { %13961 = vmatmul.mubr.bf16.gmra.mrb[40].mxu0 %v350_v14  ;;  %v797_v14 = vld [vmem:[#allocation2 + $0xe1] sm:$0xff] }
  0x92   :  { %13964 = vmatprep.mubr.bf16.mxu0 %v351_v3  ;;  %v798_v3 = vld [vmem:[#allocation2 + $0xf1] sm:$0xff]  ;;  %v17030_v17 = vpack.c.bf16 %v797_v14, %v796_v13  ;;  %v17076_v13 = vpack.c.bf16 %v829_v8, %v828_v7  ;;  %v17112_v7 = vpack.c.bf16 %v1429_v63, %v1428_v62  ;;  %v1430_v8 = vld [vmem:[#allocation2 + $0x7a] sm:$0xff] }
  0x93   :  { %v17032_v18 = vpack.c.bf16 %v799_v15, %v798_v3  ;;  %v832_v3 = vld [vmem:[#allocation2 + $0x2b9] sm:$0xff]  ;;  %v833_v15 = vld [vmem:[#allocation2 + $0x2c1] sm:$0xff]  ;;  %v1442_v62 = vld [vmem:[#allocation2 + $0x10a] sm:$0xff] }
  0x94   :  { %v17082_v21 = vpack.c.bf16 %v833_v15, %v832_v3  ;;  %v1433_v3 = vld [vmem:[#allocation2 + $0x9a] sm:$0xff]  ;;  %v1443_v63 = vld [vmem:[#allocation2 + $0x112] sm:$0xff] }
  0x95   :  { %v16397_v15 = vld [vmem:[%s20938_s1 + $0xe0] sm:$0xff]  }
  0x99   :  { %13965 = vmatmul.mubr.bf16.gmra.mrb[44].mxu0 %v352_v19  ;;  %v800_v19 = vld [vmem:[#allocation2 + $0x109] sm:$0xff] }
  0x9a   :  { %13968 = vmatprep.mubr.bf16.mxu0 %v353_v20  ;;  %v801_v20 = vld [vmem:[#allocation2 + $0x111] sm:$0xff] }
  0x9b   :  { %v17037_v23 = vpack.c.bf16 %v801_v20, %v800_v19  ;;  %v834_v19 = vld [vmem:[#allocation2 + $0x2d1] sm:$0xff]  ;;  %v835_v20 = vld [vmem:[#allocation2 + $0x2d9] sm:$0xff] }
  0x9c   :  { %v17084_v22 = vpack.c.bf16 %v835_v20, %v834_v19 }
  0xa1   :  { %13969 = vmatmul.mubr.bf16.gmra.mrb[48].mxu0 %v354_v25  ;;  %v804_v25 = vld [vmem:[#allocation2 + $0x139] sm:$0xff] }
  0xa2   :  { %13972 = vmatprep.mubr.bf16.mxu0 %v355_v26  ;;  %v805_v26 = vld [vmem:[#allocation2 + $0x141] sm:$0xff] }
  0xa3   :  { %v17043_v29 = vpack.c.bf16 %v805_v26, %v804_v25  ;;  %v836_v25 = vld [vmem:[#allocation2 + $0x2e9] sm:$0xff]  ;;  %v837_v26 = vld [vmem:[#allocation2 + $0x2f1] sm:$0xff] }
  0xa9   :  { %13973 = vmatmul.mubr.bf16.gmra.mrb[52].mxu0 %v356_v31  ;;  %v808_v31 = vld [vmem:[#allocation2 + $0x169] sm:$0xff] }
  0xaa   :  { %13976 = vmatprep.mubr.bf16.mxu0 %v357_v32  ;;  %v809_v32 = vld [vmem:[#allocation2 + $0x171] sm:$0xff] }
  0xab   :  { %v17049_v35 = vpack.c.bf16 %v809_v32, %v808_v31  ;;  %v17088_v31 = vpack.c.bf16 %v837_v26, %v836_v25  ;;  %v17090_v32 = vpack.c.bf16 %v839_v28, %v838_v27  ;;  %v16398_v25 = vld [vmem:[%s20938_s1 + $0xe8] sm:$0xff]   ;;  %v1435_v27 = vld [vmem:[#allocation2 + $0xb2] sm:$0xff] }
  0xac   :  { %v1434_v26 = vld [vmem:[#allocation2 + $0xaa] sm:$0xff]  ;;  %v1436_v28 = vld [vmem:[#allocation2 + $0xc2] sm:$0xff] }
  0xb1   :  { %13977 = vmatmul.mubr.bf16.gmra.mrb[56].mxu0 %v16970_v37 }
  0xb2   :  { %13980 = vmatprep.mubr.bf16.mxu0 %v16972_v38 }
  0xb9   :  { %13981 = vmatmul.mubr.bf16.gmra.mrb[60].mxu0 %v16976_v44 }
  0xba   :  { %14000 = vmatprep.mubr.bf16.mxu0 %v842_v45  ;;  %v17052_v45 = vpack.c.bf16 %v813_v40, %v812_v39  ;;  %v1421_v39 = vld [vmem:[#allocation2 + $0xa] sm:$0xff]  ;;  %v17094_v40 = vpack.c.bf16 %v841_v34, %v840_v33 }
  0xbb   :  { %v1437_v33 = vld [vmem:[#allocation2 + $0xca] sm:$0xff] }
  0xbc   :  { %v16399_v34 = vld [vmem:[%s20938_s1 + $0xf0] sm:$0xff]  }
  0xc1   :  { %14001 = vmatmul.mubr.bf16.vlgmr.msra.gmra.mrb[0].mxu0 %v16979_v50 }
  0xc2   :  { %14065 = vmatpush3.bf16.msra.mxu0 %v16966_v43  ;;  %14004 = vmatprep.mubr.bf16.mxu0 %v16981_v51  ;;  %v16388_v43 = vld [vmem:[%s20938_s1 + $0x98] sm:$0xff]  }
  0xc3   :  { %14066 = vmatprep.subr.bf16.mxu0 %v16386_v52 }
  0xc6   :  { %14067 = vmatpush3.bf16.msra.mxu0 %v16386_v52  ;;  %v819_v52 = vld [vmem:[#allocation2 + $0x219] sm:$0xff] }
  0xc7   :  { %14068 = vmatprep.subr.bf16.mxu0 %v16387_v57  ;;  %v17060_v54 = vpack.c.bf16 %v819_v52, %v818_v49  ;;  %v1425_v49 = vld [vmem:[#allocation2 + $0x3a] sm:$0xff]  ;;  %v17097_v52 = vpack.c.bf16 %v1423_v47, %v1422_v42  ;;  %v1439_v47 = vld [vmem:[#allocation2 + $0xe2] sm:$0xff] }
  0xc8   :  { %v17099_v55 = vpack.c.bf16 %v1425_v49, %v1424_v48  ;;  %v1438_v42 = vld [vmem:[#allocation2 + $0xda] sm:$0xff]  ;;  %v1440_v48 = vld [vmem:[#allocation2 + $0xf2] sm:$0xff] }
  0xc9   :  { %14005 = vmatmul.mubr.bf16.gmra.mrb[4].mxu0 %v16992_v58  ;;  %v1441_v49 = vld [vmem:[#allocation2 + $0xfa] sm:$0xff] }
  0xca   :  { %14008 = vmatprep.mubr.bf16.mxu0 %v16994_v59  ;;  %14069 = vmatpush3.bf16.msra.mxu0 %v16387_v57  ;;  %v822_v57 = vld [vmem:[#allocation2 + $0x241] sm:$0xff] }
  0xcb   :  { %14070 = vmatprep.subr.bf16.mxu0 %v16388_v43 }
  0xce   :  { %14071 = vmatpush3.bf16.msra.mxu0 %v16388_v43  ;;  %v823_v43 = vld [vmem:[#allocation2 + $0x249] sm:$0xff] }
  0xcf   :  { %14072 = vmatprep.subr.bf16.mxu0 %v16389_v0  ;;  %v17066_v61 = vpack.c.bf16 %v823_v43, %v822_v57  ;;  %v1426_v57 = vld [vmem:[#allocation2 + $0x4a] sm:$0xff]  ;;  %v1427_v43 = vld [vmem:[#allocation2 + $0x52] sm:$0xff] }
  0xd1   :  { %14009 = vmatmul.mubr.bf16.gmra.mrb[8].mxu0 %v17004_v1 }
  0xd2   :  { %14012 = vmatprep.mubr.bf16.mxu0 %v17006_v2  ;;  %14073 = vmatpush3.bf16.msra.mxu0 %v16389_v0  ;;  %v826_v0 = vld [vmem:[#allocation2 + $0x271] sm:$0xff] }
  0xd3   :  { %14074 = vmatprep.subr.bf16.mxu0 %v16390_v4 }
  0xd6   :  { %14075 = vmatpush3.bf16.msra.mxu0 %v16390_v4  ;;  %v827_v4 = vld [vmem:[#allocation2 + $0x279] sm:$0xff] }
  0xd7   :  { %14076 = vmatprep.subr.bf16.mxu0 %v16391_v9  ;;  %v17072_v6 = vpack.c.bf16 %v827_v4, %v826_v0  ;;  %v16395_v0 = vld [vmem:[%s20938_s1 + $0xd0] sm:$0xff]   ;;  %v17110_v4 = vpack.c.bf16 %v1427_v43, %v1426_v57  ;;  %v17148_v57 = vpack.c.bf16 %v1439_v47, %v1438_v42  ;;  %v17150_v43 = vpack.c.bf16 %v1441_v49, %v1440_v48  ;;  %v1453_v47 = vld [vmem:[#allocation2 + $0x1ba] sm:$0xff] }
  0xd8   :  { %v1452_v42 = vld [vmem:[#allocation2 + $0x1b2] sm:$0xff] }
  0xd9   :  { %14013 = vmatmul.mubr.bf16.gmra.mrb[12].mxu0 %v17016_v10  ;;  %v1500_v49 = vpack.c.bf16 %v1453_v47, %v1452_v42  ;;  %v1462_v42 = vld [vmem:[#allocation2 + $0x22a] sm:$0xff]  ;;  %v1463_v47 = vld [vmem:[#allocation2 + $0x232] sm:$0xff] }
  0xda   :  { %14016 = vmatprep.mubr.bf16.mxu0 %v17018_v11  ;;  %14077 = vmatpush3.bf16.msra.mxu0 %v16391_v9  ;;  %v830_v9 = vld [vmem:[#allocation2 + $0x2a1] sm:$0xff] }
  0xdb   :  { %14078 = vmatprep.subr.bf16.mxu0 %v16392_v12 }
  0xde   :  { %14079 = vmatpush3.bf16.msra.mxu0 %v16392_v12  ;;  %v831_v12 = vld [vmem:[#allocation2 + $0x2a9] sm:$0xff] }
  0xdf   :  { %14144 = vmatprep.subr.bf16.mxu0 %v17028_v16  ;;  %v17078_v14 = vpack.c.bf16 %v831_v12, %v830_v9  ;;  %v1431_v9 = vld [vmem:[#allocation2 + $0x82] sm:$0xff]  ;;  %v1432_v12 = vld [vmem:[#allocation2 + $0x92] sm:$0xff] }
  0xe0   :  { %v17122_v19 = vpack.c.bf16 %v1431_v9, %v1430_v8  ;;  %v17124_v20 = vpack.c.bf16 %v1433_v3, %v1432_v12  ;;  %v17155_v8 = vpack.c.bf16 %v1443_v63, %v1442_v62  ;;  %v1446_v12 = vld [vmem:[#allocation2 + $0x13a] sm:$0xff]  ;;  %v1447_v3 = vld [vmem:[#allocation2 + $0x142] sm:$0xff]  ;;  %v1454_v62 = vld [vmem:[#allocation2 + $0x1ca] sm:$0xff] }
  0xe1   :  { %14017 = vmatmul.mubr.bf16.gmra.mrb[16].mxu0 %v17030_v17  ;;  %v1455_v63 = vld [vmem:[#allocation2 + $0x1d2] sm:$0xff] }
  0xe2   :  { %14020 = vmatprep.mubr.bf16.mxu0 %v17032_v18 }
  0xe9   :  { %14021 = vmatmul.mubr.bf16.gmra.mrb[20].mxu0 %v17037_v23 }
  0xea   :  { %14024 = vmatprep.mubr.bf16.mxu0 %v17039_v24 }
  0xf1   :  { %14025 = vmatmul.mubr.bf16.gmra.mrb[24].mxu0 %v17043_v29 }
  0xf2   :  { %14028 = vmatprep.mubr.bf16.mxu0 %v17045_v30 }
  0xf9   :  { %14029 = vmatmul.mubr.bf16.gmra.mrb[28].mxu0 %v17049_v35 }
  0xfa   :  { %14032 = vmatprep.mubr.bf16.mxu0 %v858_v36  ;;  %v1420_v36 = vld [vmem:[#allocation2 + $0x2] sm:$0xff] }
  0xfb   :  { %v1484_v41 = vpack.c.bf16 %v1421_v39, %v1420_v36  ;;  %v17134_v36 = vpack.c.bf16 %v1435_v27, %v1434_v26  ;;  %v17136_v39 = vpack.c.bf16 %v1437_v33, %v1436_v28  ;;  %v17161_v26 = vpack.c.bf16 %v1447_v3, %v1446_v12  ;;  %v165_v28 = vld [vmem:[%s20939_s0 + $0xf0] sm:$0xff]  ;;  %v166_v33 = vld [vmem:[%s20939_s0 + $0xf8] sm:$0xff] }
  0xfc   :  { %231 = vst.msk [vmem:[#allocation2 + $0x181] sm:$0xff] %vm200_vm0, %v165_v28  ;;  %232 = vst.msk [vmem:[#allocation2 + $0x189] sm:$0xff] %vm200_vm0, %v166_v33  ;;  %v17178_v12 = vpack.c.bf16 %v1455_v63, %v1454_v62  ;;  %v1460_v28 = vld [vmem:[#allocation2 + $0x212] sm:$0xff]  ;;  %v1461_v33 = vld [vmem:[#allocation2 + $0x21a] sm:$0xff]  ;;  %v17190_v63 = vpack.c.bf16 %v1463_v47, %v1462_v42 }
  0xfd   :  { %v1465_v62 = vld [vmem:[#allocation2 + $0x24a] sm:$0xff]  ;;  %v1471_v47 = vld [vmem:[#allocation2 + $0x292] sm:$0xff] }
  0xfe   :  { %21081 = vst [vmem:[#allocation7_spill] sm:$0xff] %v17190_v63  ;;  %v1470_v42 = vld [vmem:[#allocation2 + $0x28a] sm:$0xff] }
 0x101   :  { %14033 = vmatmul.mubr.bf16.gmra.mrb[32].mxu0 %v17052_v45 }
 0x102   :  { %14036 = vmatprep.mubr.bf16.mxu0 %v17054_v46 }
 0x109   :  { %14037 = vmatmul.mubr.bf16.gmra.mrb[36].mxu0 %v17058_v53 }
 0x10a   :  { %14040 = vmatprep.mubr.bf16.mxu0 %v17060_v54 }
 0x111   :  { %14041 = vmatmul.mubr.bf16.gmra.mrb[40].mxu0 %v17064_v60 }
 0x112   :  { %14044 = vmatprep.mubr.bf16.mxu0 %v17066_v61 }
 0x119   :  { %14045 = vmatmul.mubr.bf16.gmra.mrb[44].mxu0 %v17070_v5 }
 0x11a   :  { %14048 = vmatprep.mubr.bf16.mxu0 %v17072_v6 }
 0x121   :  { %14049 = vmatmul.mubr.bf16.gmra.mrb[48].mxu0 %v17076_v13 }
 0x122   :  { %14052 = vmatprep.mubr.bf16.mxu0 %v17078_v14 }
 0x129   :  { %14053 = vmatmul.mubr.bf16.gmra.mrb[52].mxu0 %v17082_v21 }
 0x12a   :  { %14056 = vmatprep.mubr.bf16.mxu0 %v17084_v22 }
 0x131   :  { %14057 = vmatmul.mubr.bf16.gmra.mrb[56].mxu0 %v17088_v31 }
 0x132   :  { %14060 = vmatprep.mubr.bf16.mxu0 %v17090_v32 }
 0x139   :  { %14061 = vmatmul.mubr.bf16.gmra.mrb[60].mxu0 %v17094_v40 }
 0x13a   :  { %14080 = vmatprep.mubr.bf16.mxu0 %v1484_v41  ;;  %v16400_v41 = vld [vmem:[%s20938_s1 + $0xf8] sm:$0xff]  }
 0x141   :  { %14081 = vmatmul.mubr.bf16.vlgmr.msra.gmra.mrb[0].mxu0 %v17097_v52 }
 0x142   :  { %14145 = vmatpush3.bf16.msra.mxu0 %v17028_v16  ;;  %14084 = vmatprep.mubr.bf16.mxu0 %v17099_v55  ;;  %v16396_v16 = vld [vmem:[%s20938_s1 + $0xd8] sm:$0xff]  }
 0x143   :  { %14146 = vmatprep.subr.bf16.mxu0 %v16394_v56 }
 0x146   :  { %14147 = vmatpush3.bf16.msra.mxu0 %v16394_v56  ;;  %v17146_v56 = vld [vmem:[%s20938_s1 + $0x100] sm:$0xff]  }
 0x147   :  { %14148 = vmatprep.subr.bf16.mxu0 %v16395_v0 }
 0x149   :  { %14085 = vmatmul.mubr.bf16.gmra.mrb[4].mxu0 %v17110_v4 }
 0x14a   :  { %14088 = vmatprep.mubr.bf16.mxu0 %v17112_v7  ;;  %14149 = vmatpush3.bf16.msra.mxu0 %v16395_v0  ;;  %v1444_v0 = vld [vmem:[#allocation2 + $0x122] sm:$0xff] }
 0x14b   :  { %14150 = vmatprep.subr.bf16.mxu0 %v16396_v16 }
 0x14e   :  { %14151 = vmatpush3.bf16.msra.mxu0 %v16396_v16  ;;  %v1445_v16 = vld [vmem:[#allocation2 + $0x12a] sm:$0xff] }
 0x14f   :  { %14152 = vmatprep.subr.bf16.mxu0 %v16397_v15  ;;  %v17157_v9 = vpack.c.bf16 %v1445_v16, %v1444_v0  ;;  %v1456_v0 = vld [vmem:[#allocation2 + $0x1e2] sm:$0xff]  ;;  %v1457_v16 = vld [vmem:[#allocation2 + $0x1ea] sm:$0xff] }
 0x150   :  { %v17180_v3 = vpack.c.bf16 %v1457_v16, %v1456_v0  ;;  %v1466_v16 = vld [vmem:[#allocation2 + $0x25a] sm:$0xff] }
 0x151   :  { %14089 = vmatmul.mubr.bf16.gmra.mrb[8].mxu0 %v17122_v19 }
 0x152   :  { %14092 = vmatprep.mubr.bf16.mxu0 %v17124_v20  ;;  %14153 = vmatpush3.bf16.msra.mxu0 %v16397_v15  ;;  %v1448_v15 = vld [vmem:[#allocation2 + $0x152] sm:$0xff]  ;;  %21078 = vst [vmem:[#allocation4_spill] sm:$0xff] %v17180_v3 }
 0x153   :  { %14154 = vmatprep.subr.bf16.mxu0 %v16398_v25 }
 0x156   :  { %14155 = vmatpush3.bf16.msra.mxu0 %v16398_v25  ;;  %v1449_v25 = vld [vmem:[#allocation2 + $0x15a] sm:$0xff] }
 0x157   :  { %14156 = vmatprep.subr.bf16.mxu0 %v16399_v34  ;;  %v17163_v27 = vpack.c.bf16 %v1449_v25, %v1448_v15  ;;  %v1458_v15 = vld [vmem:[#allocation2 + $0x1fa] sm:$0xff]  ;;  %v1459_v25 = vld [vmem:[#allocation2 + $0x202] sm:$0xff] }
 0x159   :  { %14093 = vmatmul.mubr.bf16.gmra.mrb[12].mxu0 %v17134_v36 }
 0x15a   :  { %14096 = vmatprep.mubr.bf16.mxu0 %v17136_v39  ;;  %14157 = vmatpush3.bf16.msra.mxu0 %v16399_v34  ;;  %v1450_v34 = vld [vmem:[#allocation2 + $0x16a] sm:$0xff] }
 0x15b   :  { %14158 = vmatprep.subr.bf16.mxu0 %v16400_v41 }
 0x15e   :  { %14159 = vmatpush3.bf16.msra.mxu0 %v16400_v41  ;;  %v1451_v41 = vld [vmem:[#allocation2 + $0x172] sm:$0xff] }
 0x15f   :  { %14224 = vmatprep.subr.bf16.mxu0 %v17146_v56  ;;  %v17175_v48 = vpack.c.bf16 %v1451_v41, %v1450_v34  ;;  %v17184_v34 = vpack.c.bf16 %v1459_v25, %v1458_v15  ;;  %v17186_v41 = vpack.c.bf16 %v1461_v33, %v1460_v28  ;;  %v1467_v15 = vld [vmem:[#allocation2 + $0x262] sm:$0xff]  ;;  %v1468_v25 = vld [vmem:[#allocation2 + $0x272] sm:$0xff]  ;;  %v1469_v28 = vld [vmem:[#allocation2 + $0x27a] sm:$0xff] }
 0x160   :  { %v17196_v33 = vpack.c.bf16 %v1467_v15, %v1466_v16  ;;  %v1474_v16 = vld [vmem:[#allocation2 + $0x2ba] sm:$0xff]  ;;  %v1475_v15 = vld [vmem:[#allocation2 + $0x2c2] sm:$0xff] }
 0x161   :  { %14097 = vmatmul.mubr.bf16.gmra.mrb[16].mxu0 %v17148_v57  ;;  %21079 = vst [vmem:[#allocation5_spill] sm:$0xff] %v17184_v34  ;;  %21080 = vst [vmem:[#allocation6_spill] sm:$0xff] %v17186_v41 }
 0x162   :  { %14100 = vmatprep.mubr.bf16.mxu0 %v17150_v43  ;;  %21083 = vst [vmem:[#allocation9_spill] sm:$0xff] %v17196_v33 }
 0x169   :  { %14101 = vmatmul.mubr.bf16.gmra.mrb[20].mxu0 %v17155_v8 }
 0x16a   :  { %14104 = vmatprep.mubr.bf16.mxu0 %v17157_v9 }
 0x171   :  { %14105 = vmatmul.mubr.bf16.gmra.mrb[24].mxu0 %v17161_v26 }
 0x172   :  { %14108 = vmatprep.mubr.bf16.mxu0 %v17163_v27 }
 0x179   :  { %14109 = vmatmul.mubr.bf16.gmra.mrb[28].mxu0 %v17175_v48 }
 0x17a   :  { %14112 = vmatprep.mubr.bf16.mxu0 %v1500_v49  ;;  %v1464_v49 = vld [vmem:[#allocation2 + $0x242] sm:$0xff] }
 0x17b   :  { %v17192_v0 = vpack.c.bf16 %v1465_v62, %v1464_v49  ;;  %v1472_v49 = vld [vmem:[#allocation2 + $0x2a2] sm:$0xff]  ;;  %v1473_v62 = vld [vmem:[#allocation2 + $0x2aa] sm:$0xff] }
 0x17d   :  { %21082 = vst [vmem:[#allocation8_spill] sm:$0xff] %v17192_v0 }
 0x181   :  { %14113 = vmatmul.mubr.bf16.gmra.mrb[32].mxu0 %v17178_v12 }
 0x182   :  { %14116 = vmatprep.mubr.bf16.mxu0 %v17180_v3 }
 0x189   :  { %14117 = vmatmul.mubr.bf16.gmra.mrb[36].mxu0 %v17184_v34  ;;  %v17198_v34 = vpack.c.bf16 %v1469_v28, %v1468_v25  ;;  %v1476_v25 = vld [vmem:[#allocation2 + $0x2d2] sm:$0xff]  ;;  %v1477_v28 = vld [vmem:[#allocation2 + $0x2da] sm:$0xff] }
 0x18a   :  { %14120 = vmatprep.mubr.bf16.mxu0 %v17186_v41  ;;  %v17202_v41 = vpack.c.bf16 %v1471_v47, %v1470_v42  ;;  %v1478_v42 = vld [vmem:[#allocation2 + $0x2ea] sm:$0xff]  ;;  %v1479_v47 = vld [vmem:[#allocation2 + $0x2f2] sm:$0xff] }
 0x18b   :  { %21084 = vst [vmem:[#allocation10_spill] sm:$0xff] %v17198_v34 }
 0x18c   :  { %21085 = vst [vmem:[#allocation11_spill] sm:$0xff] %v17202_v41 }
 0x191   :  { %14121 = vmatmul.mubr.bf16.gmra.mrb[40].mxu0 %v17190_v63  ;;  %v17204_v63 = vpack.c.bf16 %v1473_v62, %v1472_v49  ;;  %v1480_v49 = vld [vmem:[#allocation2 + $0x302] sm:$0xff]  ;;  %v1481_v62 = vld [vmem:[#allocation2 + $0x30a] sm:$0xff] }
 0x192   :  { %14124 = vmatprep.mubr.bf16.mxu0 %v17192_v0  ;;  %v17208_v0 = vpack.c.bf16 %v1475_v15, %v1474_v16  ;;  %v198_v16 = vld [vmem:[%s20939_s0 + $0x1f8] sm:$0xff] }
 0x193   :  { %21086 = vst [vmem:[#allocation12_spill] sm:$0xff] %v17204_v63  ;;  %264 = vst.msk [vmem:[#allocation2 + $0x339] sm:$0xff] %vm200_vm0, %v198_v16  ;;  %v1482_v15 = vld [vmem:[#allocation2 + $0x31a] sm:$0xff] }
 0x194   :  { %21087 = vst [vmem:[#allocation13_spill] sm:$0xff] %v17208_v0 }
 0x199   :  { %14125 = vmatmul.mubr.bf16.gmra.mrb[44].mxu0 %v17196_v33  ;;  %v17210_v33 = vpack.c.bf16 %v1477_v28, %v1476_v25  ;;  %v1483_v25 = vld [vmem:[#allocation2 + $0x322] sm:$0xff]  ;;  %v2062_v28 = vld [vmem:[#allocation2 + $0x18] sm:$0xff] }
 0x19a   :  { %14128 = vmatprep.mubr.bf16.mxu0 %v17198_v34  ;;  %v17214_v34 = vpack.c.bf16 %v1479_v47, %v1478_v42  ;;  %v2063_v42 = vld [vmem:[#allocation2 + $0x20] sm:$0xff]  ;;  %v17228_v47 = vpack.c.bf16 %v1483_v25, %v1482_v15  ;;  %v2069_v25 = vld [vmem:[#allocation2 + $0x68] sm:$0xff] }
 0x19b   :  { %21088 = vst [vmem:[#allocation14_spill] sm:$0xff] %v17210_v33  ;;  %v2068_v15 = vld [vmem:[#allocation2 + $0x60] sm:$0xff] }
 0x19c   :  { %21089 = vst [vmem:[#allocation15_spill] sm:$0xff] %v17214_v34  ;;  %21091 = vst [vmem:[#allocation17_spill] sm:$0xff] %v17228_v47 }
 0x1a1   :  { %14129 = vmatmul.mubr.bf16.gmra.mrb[48].mxu0 %v17202_v41  ;;  %v17216_v41 = vpack.c.bf16 %v1481_v62, %v1480_v49  ;;  %v2126_v49 = vpack.c.bf16 %v2063_v42, %v2062_v28  ;;  %v2064_v62 = vld [vmem:[#allocation2 + $0x30] sm:$0xff]  ;;  %v2070_v28 = vld [vmem:[#allocation2 + $0x78] sm:$0xff]  ;;  %v2071_v42 = vld [vmem:[#allocation2 + $0x80] sm:$0xff] }
 0x1a2   :  { %14132 = vmatprep.mubr.bf16.mxu0 %v17204_v63  ;;  %v197_v63 = vld [vmem:[%s20939_s0 + $0x1f0] sm:$0xff] }
 0x1a3   :  { %21090 = vst [vmem:[#allocation16_spill] sm:$0xff] %v17216_v41  ;;  %263 = vst.msk [vmem:[#allocation2 + $0x331] sm:$0xff] %vm200_vm0, %v197_v63  ;;  %v2067_v63 = vld [vmem:[#allocation2 + $0x50] sm:$0xff] }
 0x1a9   :  { %14133 = vmatmul.mubr.bf16.gmra.mrb[52].mxu0 %v17208_v0  ;;  %v2066_v0 = vld [vmem:[#allocation2 + $0x48] sm:$0xff] }
 0x1aa   :  { %14136 = vmatprep.mubr.bf16.mxu0 %v17210_v33  ;;  %v2065_v33 = vld [vmem:[#allocation2 + $0x38] sm:$0xff]  ;;  %v17233_v16 = vpack.c.bf16 %v2067_v63, %v2066_v0  ;;  %v16403_v0 = vld [vmem:[%s20938_s1 + $0x110] sm:$0xff]  }
 0x1ab   :  { %v17231_v3 = vpack.c.bf16 %v2065_v33, %v2064_v62  ;;  %v17244_v33 = vpack.c.bf16 %v2069_v25, %v2068_v15  ;;  %v2072_v62 = vld [vmem:[#allocation2 + $0x90] sm:$0xff]  ;;  %v2073_v63 = vld [vmem:[#allocation2 + $0x98] sm:$0xff]  ;;  %v16405_v15 = vld [vmem:[%s20938_s1 + $0x120] sm:$0xff]  }
 0x1ac   :  { %21093 = vst [vmem:[#allocation19_spill] sm:$0xff] %v17233_v16 }
 0x1ad   :  { %21092 = vst [vmem:[#allocation18_spill] sm:$0xff] %v17231_v3  ;;  %21094 = vst [vmem:[#allocation20_spill] sm:$0xff] %v17244_v33 }
 0x1b1   :  { %14137 = vmatmul.mubr.bf16.gmra.mrb[56].mxu0 %v17214_v34  ;;  %v2097_v34 = vld [vmem:[#allocation2 + $0x1e8] sm:$0xff] }
 0x1b2   :  { %14140 = vmatprep.mubr.bf16.mxu0 %v17216_v41  ;;  %v16402_v41 = vld [vmem:[%s20938_s1 + $0x108] sm:$0xff]  }
 0x1b9   :  { %14141 = vmatmul.mubr.bf16.gmra.mrb[60].mxu0 %v17228_v47 }
 0x1ba   :  { %14160 = vmatprep.mubr.bf16.mxu0 %v2126_v49  ;;  %v17246_v49 = vpack.c.bf16 %v2071_v42, %v2070_v28  ;;  %v16406_v28 = vld [vmem:[%s20938_s1 + $0x128] sm:$0xff]   ;;  %v2076_v42 = vld [vmem:[#allocation2 + $0xc0] sm:$0xff] }
 0x1bc   :  { %21095 = vst [vmem:[#allocation21_spill] sm:$0xff] %v17246_v49 }
 0x1c1   :  { %14161 = vmatmul.mubr.bf16.vlgmr.msra.gmra.mrb[0].mxu0 %v17231_v3  ;;  %v2075_v3 = vld [vmem:[#allocation2 + $0xb0] sm:$0xff] }
 0x1c2   :  { %14225 = vmatpush3.bf16.msra.mxu0 %v17146_v56  ;;  %14164 = vmatprep.mubr.bf16.mxu0 %v17233_v16  ;;  %v16404_v56 = vld [vmem:[%s20938_s1 + $0x118] sm:$0xff]   ;;  %v2074_v16 = vld [vmem:[#allocation2 + $0xa8] sm:$0xff] }
 0x1c3   :  { %14226 = vmatprep.subr.bf16.mxu0 %v16402_v41  ;;  %v17258_v25 = vpack.c.bf16 %v2075_v3, %v2074_v16  ;;  %v16407_v3 = vld [vmem:[%s20938_s1 + $0x130] sm:$0xff]  }
 0x1c5   :  { %21097 = vst [vmem:[#allocation23_spill] sm:$0xff] %v17258_v25 }
 0x1c6   :  { %14227 = vmatpush3.bf16.msra.mxu0 %v16402_v41  ;;  %v17256_v41 = vpack.c.bf16 %v2073_v63, %v2072_v62  ;;  %v16408_v62 = vld [vmem:[%s20938_s1 + $0x138] sm:$0xff]   ;;  %v2080_v63 = vld [vmem:[#allocation2 + $0xf0] sm:$0xff] }
 0x1c7   :  { %14228 = vmatprep.subr.bf16.mxu0 %v16403_v0 }
 0x1c8   :  { %21096 = vst [vmem:[#allocation22_spill] sm:$0xff] %v17256_v41 }
 0x1c9   :  { %14165 = vmatmul.mubr.bf16.gmra.mrb[4].mxu0 %v17244_v33  ;;  %v2079_v33 = vld [vmem:[#allocation2 + $0xe0] sm:$0xff] }
 0x1ca   :  { %14168 = vmatprep.mubr.bf16.mxu0 %v17246_v49  ;;  %14229 = vmatpush3.bf16.msra.mxu0 %v16403_v0  ;;  %v2077_v0 = vld [vmem:[#allocation2 + $0xc8] sm:$0xff]  ;;  %v2078_v49 = vld [vmem:[#allocation2 + $0xd8] sm:$0xff] }
 0x1cb   :  { %14230 = vmatprep.subr.bf16.mxu0 %v16404_v56  ;;  %v17268_v16 = vpack.c.bf16 %v2077_v0, %v2076_v42  ;;  %v2084_v42 = vld [vmem:[#allocation2 + $0x120] sm:$0xff]  ;;  %v2085_v0 = vld [vmem:[#allocation2 + $0x128] sm:$0xff] }
 0x1cd   :  { %21098 = vst [vmem:[#allocation24_spill] sm:$0xff] %v17268_v16 }
 0x1ce   :  { %14231 = vmatpush3.bf16.msra.mxu0 %v16404_v56  ;;  %v17270_v56 = vpack.c.bf16 %v2079_v33, %v2078_v49  ;;  %v17280_v33 = vld [vmem:[%s20938_s1 + $0x140] sm:$0xff]  }
 0x1cf   :  { %14232 = vmatprep.subr.bf16.mxu0 %v16405_v15 }
 0x1d0   :  { %21099 = vst [vmem:[#allocation25_spill] sm:$0xff] %v17270_v56 }
 0x1d1   :  { %14169 = vmatmul.mubr.bf16.gmra.mrb[8].mxu0 %v17256_v41  ;;  %v2083_v41 = vld [vmem:[#allocation2 + $0x110] sm:$0xff] }
 0x1d2   :  { %14172 = vmatprep.mubr.bf16.mxu0 %v17258_v25  ;;  %14233 = vmatpush3.bf16.msra.mxu0 %v16405_v15  ;;  %v2081_v15 = vld [vmem:[#allocation2 + $0xf8] sm:$0xff]  ;;  %v2082_v25 = vld [vmem:[#allocation2 + $0x108] sm:$0xff] }
 0x1d3   :  { %14234 = vmatprep.subr.bf16.mxu0 %v16406_v28  ;;  %v17282_v49 = vpack.c.bf16 %v2081_v15, %v2080_v63  ;;  %v2091_v63 = vld [vmem:[#allocation2 + $0x170] sm:$0xff] }
 0x1d5   :  { %21100 = vst [vmem:[#allocation26_spill] sm:$0xff] %v17282_v49 }
 0x1d6   :  { %14235 = vmatpush3.bf16.msra.mxu0 %v16406_v28  ;;  %v17284_v28 = vpack.c.bf16 %v2083_v41, %v2082_v25  ;;  %v2088_v41 = vld [vmem:[#allocation2 + $0x150] sm:$0xff]  ;;  %v2089_v25 = vld [vmem:[#allocation2 + $0x158] sm:$0xff] }
 0x1d7   :  { %14236 = vmatprep.subr.bf16.mxu0 %v16407_v3  ;;  %v17295_v15 = vpack.c.bf16 %v2089_v25, %v2088_v41  ;;  %v2098_v41 = vld [vmem:[#allocation2 + $0x1f8] sm:$0xff]  ;;  %v2099_v25 = vld [vmem:[#allocation2 + $0x200] sm:$0xff] }
 0x1d8   :  { %21101 = vst [vmem:[#allocation27_spill] sm:$0xff] %v17284_v28 }
 0x1d9   :  { %14173 = vmatmul.mubr.bf16.gmra.mrb[12].mxu0 %v17268_v16  ;;  %v17289_v16 = vpack.c.bf16 %v2085_v0, %v2084_v42  ;;  %21104 = vst [vmem:[#allocation30_spill] sm:$0xff] %v17295_v15  ;;  %v2092_v42 = vld [vmem:[#allocation2 + $0x180] sm:$0xff]  ;;  %v2093_v0 = vld [vmem:[#allocation2 + $0x188] sm:$0xff] }
 0x1da   :  { %14176 = vmatprep.mubr.bf16.mxu0 %v17270_v56  ;;  %14237 = vmatpush3.bf16.msra.mxu0 %v16407_v3  ;;  %v2086_v3 = vld [vmem:[#allocation2 + $0x138] sm:$0xff]  ;;  %v2087_v56 = vld [vmem:[#allocation2 + $0x140] sm:$0xff] }
 0x1db   :  { %14238 = vmatprep.subr.bf16.mxu0 %v16408_v62  ;;  %21102 = vst [vmem:[#allocation28_spill] sm:$0xff] %v17289_v16  ;;  %v17291_v47 = vpack.c.bf16 %v2087_v56, %v2086_v3  ;;  %v2094_v56 = vld [vmem:[#allocation2 + $0x1c8] sm:$0xff]  ;;  %v2095_v3 = vld [vmem:[#allocation2 + $0x1d0] sm:$0xff] }
 0x1dd   :  { %21103 = vst [vmem:[#allocation29_spill] sm:$0xff] %v17291_v47 }
 0x1de   :  { %14239 = vmatpush3.bf16.msra.mxu0 %v16408_v62  ;;  %v2090_v62 = vld [vmem:[#allocation2 + $0x168] sm:$0xff] }
 0x1df   :  { %14304 = vmatprep.subr.bf16.mxu0 %v17280_v33 }
 0x1e1   :  { %14177 = vmatmul.mubr.bf16.gmra.mrb[16].mxu0 %v17282_v49  ;;  %v17297_v49 = vpack.c.bf16 %v2091_v63, %v2090_v62  ;;  %v17306_v63 = vpack.c.bf16 %v2099_v25, %v2098_v41  ;;  %v2107_v41 = vld [vmem:[#allocation2 + $0x260] sm:$0xff] }
 0x1e2   :  { %14180 = vmatprep.mubr.bf16.mxu0 %v17284_v28  ;;  %v17301_v28 = vpack.c.bf16 %v2093_v0, %v2092_v42  ;;  %v2102_v42 = vld [vmem:[#allocation2 + $0x228] sm:$0xff]  ;;  %v2103_v0 = vld [vmem:[#allocation2 + $0x230] sm:$0xff] }
 0x1e3   :  { %21105 = vst [vmem:[#allocation31_spill] sm:$0xff] %v17297_v49  ;;  %21107 = vst [vmem:[#allocation33_spill] sm:$0xff] %v17306_v63 }
 0x1e9   :  { %14181 = vmatmul.mubr.bf16.gmra.mrb[20].mxu0 %v17289_v16  ;;  %v2142_v16 = vpack.c.bf16 %v2095_v3, %v2094_v56  ;;  %v17312_v3 = vpack.c.bf16 %v2103_v0, %v2102_v42  ;;  %v2110_v42 = vld [vmem:[#allocation2 + $0x288] sm:$0xff]  ;;  %v2111_v0 = vld [vmem:[#allocation2 + $0x290] sm:$0xff] }
 0x1ea   :  { %14184 = vmatprep.mubr.bf16.mxu0 %v17291_v47  ;;  %v2096_v47 = vld [vmem:[#allocation2 + $0x1e0] sm:$0xff] }
 0x1eb   :  { %v17304_v62 = vpack.c.bf16 %v2097_v34, %v2096_v47  ;;  %21109 = vst [vmem:[#allocation35_spill] sm:$0xff] %v17312_v3  ;;  %v2104_v34 = vld [vmem:[#allocation2 + $0x240] sm:$0xff]  ;;  %v2105_v47 = vld [vmem:[#allocation2 + $0x248] sm:$0xff] }
 0x1ec   :  { %v17316_v25 = vpack.c.bf16 %v2105_v47, %v2104_v34  ;;  %v2112_v34 = vld [vmem:[#allocation2 + $0x2a0] sm:$0xff]  ;;  %v2113_v47 = vld [vmem:[#allocation2 + $0x2a8] sm:$0xff] }
 0x1ed   :  { %21106 = vst [vmem:[#allocation32_spill] sm:$0xff] %v17304_v62 }
 0x1ee   :  { %21110 = vst [vmem:[#allocation36_spill] sm:$0xff] %v17316_v25 }
 0x1f1   :  { %14185 = vmatmul.mubr.bf16.gmra.mrb[24].mxu0 %v17295_v15  ;;  %v2101_v15 = vld [vmem:[#allocation2 + $0x218] sm:$0xff] }
 0x1f2   :  { %14188 = vmatprep.mubr.bf16.mxu0 %v17297_v49  ;;  %v2100_v49 = vld [vmem:[#allocation2 + $0x210] sm:$0xff] }
 0x1f3   :  { %v17310_v56 = vpack.c.bf16 %v2101_v15, %v2100_v49  ;;  %v2108_v49 = vld [vmem:[#allocation2 + $0x270] sm:$0xff]  ;;  %v2109_v15 = vld [vmem:[#allocation2 + $0x278] sm:$0xff] }
 0x1f5   :  { %21108 = vst [vmem:[#allocation34_spill] sm:$0xff] %v17310_v56 }
 0x1f9   :  { %14189 = vmatmul.mubr.bf16.gmra.mrb[28].mxu0 %v17301_v28 }
 0x1fa   :  { %14192 = vmatprep.mubr.bf16.mxu0 %v2142_v16  ;;  %v2106_v16 = vld [vmem:[#allocation2 + $0x258] sm:$0xff] }
 0x201   :  { %14193 = vmatmul.mubr.bf16.gmra.mrb[32].mxu0 %v17304_v62  ;;  %v17318_v62 = vpack.c.bf16 %v2107_v41, %v2106_v16  ;;  %v2114_v16 = vld [vmem:[#allocation2 + $0x2b8] sm:$0xff]  ;;  %v2115_v41 = vld [vmem:[#allocation2 + $0x2c0] sm:$0xff] }
 0x202   :  { %14196 = vmatprep.mubr.bf16.mxu0 %v17306_v63  ;;  %v17322_v63 = vpack.c.bf16 %v2109_v15, %v2108_v49  ;;  %v2116_v49 = vld [vmem:[#allocation2 + $0x2d0] sm:$0xff]  ;;  %v2117_v15 = vld [vmem:[#allocation2 + $0x2d8] sm:$0xff] }
 0x209   :  { %14197 = vmatmul.mubr.bf16.gmra.mrb[36].mxu0 %v17310_v56  ;;  %v17324_v56 = vpack.c.bf16 %v2111_v0, %v2110_v42  ;;  %v17334_v42 = vpack.c.bf16 %v2117_v15, %v2116_v49  ;;  %v2124_v0 = vld [vmem:[#allocation2 + $0x330] sm:$0xff]  ;;  %v21130_v49 = vld [vmem:[#allocation23_spill] sm:$0xff]  ;;  %v21131_v15 = vld [vmem:[#allocation24_spill] sm:$0xff] }
 0x20a   :  { %14200 = vmatprep.mubr.bf16.mxu0 %v17312_v3  ;;  %v17328_v3 = vpack.c.bf16 %v2113_v47, %v2112_v34  ;;  %v2125_v34 = vld [vmem:[#allocation2 + $0x338] sm:$0xff] }
 0x20b   :  { %v17340_v47 = vpack.c.bf16 %v2125_v34, %v2124_v0  ;;  %v16431_v0 = vld [vmem:[%s20938_s1 + $0x1f0] sm:$0xff]   ;;  %v16432_v34 = vld [vmem:[%s20938_s1 + $0x1f8] sm:$0xff]  }
 0x211   :  { %14201 = vmatmul.mubr.bf16.gmra.mrb[40].mxu0 %v17316_v25  ;;  %v17330_v25 = vpack.c.bf16 %v2115_v41, %v2114_v16  ;;  %v16410_v16 = vld [vmem:[%s20938_s1 + $0x148] sm:$0xff]  }
 0x212   :  { %14204 = vmatprep.mubr.bf16.mxu0 %v17318_v62  ;;  %v16430_v41 = vld [vmem:[%s20938_s1 + $0x1e8] sm:$0xff]  }
 0x219   :  { %14205 = vmatmul.mubr.bf16.gmra.mrb[44].mxu0 %v17322_v63 }
 0x21a   :  { %14208 = vmatprep.mubr.bf16.mxu0 %v17324_v56 }
 0x221   :  { %14209 = vmatmul.mubr.bf16.gmra.mrb[48].mxu0 %v17328_v3 }
 0x222   :  { %14212 = vmatprep.mubr.bf16.mxu0 %v17330_v25 }
 0x229   :  { %14213 = vmatmul.mubr.bf16.gmra.mrb[52].mxu0 %v17334_v42 }
 0x22a   :  { %14216 = vmatprep.mubr.bf16.mxu0 %v16970_v37  ;;  %v16411_v37 = vld [vmem:[%s20938_s1 + $0x150] sm:$0xff]  }
 0x231   :  { %14217 = vmatmul.mubr.bf16.gmra.mrb[56].mxu0 %v16972_v38  ;;  %v16412_v38 = vld [vmem:[%s20938_s1 + $0x158] sm:$0xff]  }
 0x232   :  { %14220 = vmatprep.mubr.bf16.mxu0 %v16976_v44  ;;  %v16413_v44 = vld [vmem:[%s20938_s1 + $0x160] sm:$0xff]  }
 0x239   :  { %14221 = vmatmul.mubr.bf16.gmra.mrb[60].mxu0 %v17340_v47 }
 0x23a   :  { %14240 = vmatprep.mubr.bf16.mxu0 %v16979_v50  ;;  %v16414_v50 = vld [vmem:[%s20938_s1 + $0x168] sm:$0xff]  }
 0x241   :  { %14241 = vmatmul.mubr.bf16.vlgmr.msra.gmra.mrb[0].mxu0 %v16981_v51  ;;  %v16415_v51 = vld [vmem:[%s20938_s1 + $0x170] sm:$0xff]  }
 0x242   :  { %14305 = vmatpush3.bf16.msra.mxu0 %v17280_v33  ;;  %14244 = vmatprep.mubr.bf16.mxu0 %v16992_v58  ;;  %v16416_v58 = vld [vmem:[%s20938_s1 + $0x178] sm:$0xff]   ;;  %v16429_v33 = vld [vmem:[%s20938_s1 + $0x1e0] sm:$0xff]  }
 0x243   :  { %14306 = vmatprep.subr.bf16.mxu0 %v16410_v16 }
 0x246   :  { %14307 = vmatpush3.bf16.msra.mxu0 %v16410_v16  ;;  %v21132_v16 = vld [vmem:[#allocation25_spill] sm:$0xff] }
 0x247   :  { %14308 = vmatprep.subr.bf16.mxu0 %v16411_v37 }
 0x249   :  { %14245 = vmatmul.mubr.bf16.gmra.mrb[4].mxu0 %v16994_v59  ;;  %v16417_v59 = vld [vmem:[%s20938_s1 + $0x180] sm:$0xff]  }
 0x24a   :  { %14248 = vmatprep.mubr.bf16.mxu0 %v17004_v1  ;;  %14309 = vmatpush3.bf16.msra.mxu0 %v16411_v37  ;;  %v2734_v1 = vld [vmem:[#allocation2 + $0x181] sm:$0xff]  ;;  %v21133_v37 = vld [vmem:[#allocation26_spill] sm:$0xff] }
 0x24b   :  { %14310 = vmatprep.subr.bf16.mxu0 %v16412_v38 }
 0x24e   :  { %14311 = vmatpush3.bf16.msra.mxu0 %v16412_v38  ;;  %v16433_v38 = vld [vmem:[%s20938_s1 + $0x200] sm:$0xff]  }
 0x24f   :  { %14312 = vmatprep.subr.bf16.mxu0 %v16413_v44 }
 0x251   :  { %14249 = vmatmul.mubr.bf16.gmra.mrb[8].mxu0 %v17006_v2  ;;  %v2735_v2 = vld [vmem:[#allocation2 + $0x189] sm:$0xff] }
 0x252   :  { %14252 = vmatprep.mubr.bf16.mxu0 %v17016_v10  ;;  %14313 = vmatpush3.bf16.msra.mxu0 %v16413_v44  ;;  %v17383_v10 = vpack.c.bf16 %v2735_v2, %v2734_v1  ;;  %v21134_v44 = vld [vmem:[#allocation27_spill] sm:$0xff]  ;;  %v16517_v1 = vld [vmem:[#allocation2] sm:$0xff] }
 0x253   :  { %14314 = vmatprep.subr.bf16.mxu0 %v16414_v50  ;;  %v4068_v2 = vpack.c.bf16 %v16517_v1, %v16517_v1 }
 0x256   :  { %14315 = vmatpush3.bf16.msra.mxu0 %v16414_v50  ;;  %v21135_v50 = vld [vmem:[#allocation28_spill] sm:$0xff] }
 0x257   :  { %14316 = vmatprep.subr.bf16.mxu0 %v16415_v51 }
 0x259   :  { %14253 = vmatmul.mubr.bf16.gmra.mrb[12].mxu0 %v17018_v11  ;;  %v2766_v11 = vld [vmem:[#allocation2 + $0x331] sm:$0xff] }
 0x25a   :  { %14256 = vmatprep.mubr.bf16.mxu0 %v17030_v17  ;;  %14317 = vmatpush3.bf16.msra.mxu0 %v16415_v51  ;;  %v2767_v17 = vld [vmem:[#allocation2 + $0x339] sm:$0xff]  ;;  %v21136_v51 = vld [vmem:[#allocation29_spill] sm:$0xff] }
 0x25b   :  { %14318 = vmatprep.subr.bf16.mxu0 %v16416_v58 }
 0x25e   :  { %14319 = vmatpush3.bf16.msra.mxu0 %v16416_v58  ;;  %v21137_v58 = vld [vmem:[#allocation30_spill] sm:$0xff] }
 0x25f   :  { %14384 = vmatprep.subr.bf16.mxu0 %v16417_v59 }
 0x261   :  { %14257 = vmatmul.mubr.bf16.gmra.mrb[16].mxu0 %v17032_v18  ;;  %v17401_v18 = vpack.c.bf16 %v2767_v17, %v2766_v11  ;;  %v21139_v11 = vld [vmem:[#allocation32_spill] sm:$0xff]  ;;  %v21140_v17 = vld [vmem:[#allocation33_spill] sm:$0xff] }
 0x262   :  { %14260 = vmatprep.mubr.bf16.mxu0 %v17037_v23  ;;  %v16418_v23 = vld [vmem:[%s20938_s1 + $0x188] sm:$0xff]  }
 0x269   :  { %14261 = vmatmul.mubr.bf16.gmra.mrb[20].mxu0 %v17039_v24  ;;  %v16419_v24 = vld [vmem:[%s20938_s1 + $0x190] sm:$0xff]  }
 0x26a   :  { %14264 = vmatprep.mubr.bf16.mxu0 %v17043_v29  ;;  %v16420_v29 = vld [vmem:[%s20938_s1 + $0x198] sm:$0xff]  }
 0x271   :  { %14265 = vmatmul.mubr.bf16.gmra.mrb[24].mxu0 %v17045_v30  ;;  %v16421_v30 = vld [vmem:[%s20938_s1 + $0x1a0] sm:$0xff]  }
 0x272   :  { %14268 = vmatprep.mubr.bf16.mxu0 %v17049_v35  ;;  %v16422_v35 = vld [vmem:[%s20938_s1 + $0x1a8] sm:$0xff]  }
 0x279   :  { %14269 = vmatmul.mubr.bf16.gmra.mrb[28].mxu0 %v17383_v10 }
 0x27a   :  { %14272 = vmatprep.mubr.bf16.mxu0 %v17052_v45  ;;  %v16423_v45 = vld [vmem:[%s20938_s1 + $0x1b0] sm:$0xff]  }
 0x281   :  { %14273 = vmatmul.mubr.bf16.gmra.mrb[32].mxu0 %v17054_v46  ;;  %v16424_v46 = vld [vmem:[%s20938_s1 + $0x1b8] sm:$0xff]  }
 0x282   :  { %14276 = vmatprep.mubr.bf16.mxu0 %v17058_v53  ;;  %v16425_v53 = vld [vmem:[%s20938_s1 + $0x1c0] sm:$0xff]  }
 0x289   :  { %14277 = vmatmul.mubr.bf16.gmra.mrb[36].mxu0 %v17060_v54  ;;  %v3376_v54 = vld [vmem:[#allocation2 + $0x182] sm:$0xff] }
 0x28a   :  { %14280 = vmatprep.mubr.bf16.mxu0 %v17064_v60  ;;  %v3377_v60 = vld [vmem:[#allocation2 + $0x18a] sm:$0xff] }
 0x291   :  { %14281 = vmatmul.mubr.bf16.gmra.mrb[40].mxu0 %v17066_v61  ;;  %v17443_v61 = vpack.c.bf16 %v3377_v60, %v3376_v54  ;;  %v4047_v54 = vld [vmem:[#allocation2 + $0x318] sm:$0xff] }
 0x292   :  { %14284 = vmatprep.mubr.bf16.mxu0 %v17070_v5  ;;  %v21111_v5 = vld [vmem:[#allocation4_spill] sm:$0xff] }
 0x299   :  { %14285 = vmatmul.mubr.bf16.gmra.mrb[44].mxu0 %v17072_v6  ;;  %v21112_v6 = vld [vmem:[#allocation5_spill] sm:$0xff] }
 0x29a   :  { %14288 = vmatprep.mubr.bf16.mxu0 %v17076_v13  ;;  %v21113_v13 = vld [vmem:[#allocation6_spill] sm:$0xff] }
 0x2a1   :  { %14289 = vmatmul.mubr.bf16.gmra.mrb[48].mxu0 %v17078_v14  ;;  %v21114_v14 = vld [vmem:[#allocation7_spill] sm:$0xff] }
 0x2a2   :  { %14292 = vmatprep.mubr.bf16.mxu0 %v17082_v21  ;;  %v21115_v21 = vld [vmem:[#allocation8_spill] sm:$0xff] }
 0x2a9   :  { %14293 = vmatmul.mubr.bf16.gmra.mrb[52].mxu0 %v17084_v22  ;;  %v21116_v22 = vld [vmem:[#allocation9_spill] sm:$0xff] }
 0x2aa   :  { %14296 = vmatprep.mubr.bf16.mxu0 %v17088_v31  ;;  %v21117_v31 = vld [vmem:[#allocation10_spill] sm:$0xff] }
 0x2b1   :  { %14297 = vmatmul.mubr.bf16.gmra.mrb[56].mxu0 %v17090_v32  ;;  %v21118_v32 = vld [vmem:[#allocation11_spill] sm:$0xff] }
 0x2b2   :  { %14300 = vmatprep.mubr.bf16.mxu0 %v17094_v40  ;;  %v21119_v40 = vld [vmem:[#allocation12_spill] sm:$0xff] }
 0x2b9   :  { %14301 = vmatmul.mubr.bf16.gmra.mrb[60].mxu0 %v17401_v18 }
 0x2ba   :  { %14320 = vmatprep.mubr.bf16.mxu0 %v17097_v52  ;;  %v21120_v52 = vld [vmem:[#allocation13_spill] sm:$0xff] }
 0x2c1   :  { %14321 = vmatmul.mubr.bf16.vlgmr.msra.gmra.mrb[0].mxu0 %v17099_v55  ;;  %v21121_v55 = vld [vmem:[#allocation14_spill] sm:$0xff] }
 0x2c2   :  { %14385 = vmatpush3.bf16.msra.mxu0 %v16417_v59  ;;  %14324 = vmatprep.mubr.bf16.mxu0 %v17110_v4  ;;  %v21122_v4 = vld [vmem:[#allocation15_spill] sm:$0xff] }
 0x2c3   :  { %14386 = vmatprep.subr.bf16.mxu0 %v16418_v23  ;;  %v21138_v59 = vld [vmem:[#allocation31_spill] sm:$0xff] }
 0x2c6   :  { %14387 = vmatpush3.bf16.msra.mxu0 %v16418_v23  ;;  %v21141_v23 = vld [vmem:[#allocation34_spill] sm:$0xff] }
 0x2c7   :  { %14388 = vmatprep.subr.bf16.mxu0 %v16419_v24 }
 0x2c9   :  { %14325 = vmatmul.mubr.bf16.gmra.mrb[4].mxu0 %v17112_v7  ;;  %v21123_v7 = vld [vmem:[#allocation16_spill] sm:$0xff] }
 0x2ca   :  { %14328 = vmatprep.mubr.bf16.mxu0 %v17122_v19  ;;  %14389 = vmatpush3.bf16.msra.mxu0 %v16419_v24  ;;  %v21124_v19 = vld [vmem:[#allocation17_spill] sm:$0xff]  ;;  %v21142_v24 = vld [vmem:[#allocation35_spill] sm:$0xff] }
 0x2cb   :  { %14390 = vmatprep.subr.bf16.mxu0 %v16420_v29 }
 0x2ce   :  { %14391 = vmatpush3.bf16.msra.mxu0 %v16420_v29  ;;  %v21143_v29 = vld [vmem:[#allocation36_spill] sm:$0xff] }
 0x2cf   :  { %14392 = vmatprep.subr.bf16.mxu0 %v16421_v30 }
 0x2d1   :  { %14329 = vmatmul.mubr.bf16.gmra.mrb[8].mxu0 %v17124_v20  ;;  %v3408_v20 = vld [vmem:[#allocation2 + $0x332] sm:$0xff] }
 0x2d2   :  { %14332 = vmatprep.mubr.bf16.mxu0 %v17134_v36  ;;  %14393 = vmatpush3.bf16.msra.mxu0 %v16421_v30  ;;  %v3409_v36 = vld [vmem:[#allocation2 + $0x33a] sm:$0xff]  ;;  %v4044_v30 = vld [vmem:[#allocation2 + $0x2f0] sm:$0xff] }
 0x2d3   :  { %14394 = vmatprep.subr.bf16.mxu0 %v16422_v35 }
 0x2d6   :  { %14395 = vmatpush3.bf16.msra.mxu0 %v16422_v35  ;;  %v4045_v35 = vld [vmem:[#allocation2 + $0x300] sm:$0xff] }
 0x2d7   :  { %14396 = vmatprep.subr.bf16.mxu0 %v16423_v45 }
 0x2d9   :  { %14333 = vmatmul.mubr.bf16.gmra.mrb[12].mxu0 %v17136_v39  ;;  %v17461_v39 = vpack.c.bf16 %v3409_v36, %v3408_v20  ;;  %v4643_v20 = vld [vmem:[#allocation2 + $0xc1] sm:$0xff]  ;;  %v4644_v36 = vld [vmem:[#allocation2 + $0xc9] sm:$0xff] }
 0x2da   :  { %14336 = vmatprep.mubr.bf16.mxu0 %v17148_v57  ;;  %14397 = vmatpush3.bf16.msra.mxu0 %v16423_v45  ;;  %v21125_v57 = vld [vmem:[#allocation18_spill] sm:$0xff]  ;;  %v4046_v45 = vld [vmem:[#allocation2 + $0x308] sm:$0xff] }
 0x2db   :  { %14398 = vmatprep.subr.bf16.mxu0 %v16424_v46 }
 0x2de   :  { %14399 = vmatpush3.bf16.msra.mxu0 %v16424_v46 }
 0x2df   :  { %14464 = vmatprep.subr.bf16.mxu0 %v16425_v53 }
 0x2e1   :  { %14337 = vmatmul.mubr.bf16.gmra.mrb[16].mxu0 %v17150_v43  ;;  %v16426_v43 = vld [vmem:[%s20938_s1 + $0x1c8] sm:$0xff]  }
 0x2e2   :  { %14340 = vmatprep.mubr.bf16.mxu0 %v17155_v8  ;;  %v21126_v8 = vld [vmem:[#allocation19_spill] sm:$0xff] }
 0x2e9   :  { %14341 = vmatmul.mubr.bf16.gmra.mrb[20].mxu0 %v17157_v9  ;;  %v21127_v9 = vld [vmem:[#allocation20_spill] sm:$0xff] }
 0x2ea   :  { %14344 = vmatprep.mubr.bf16.mxu0 %v17161_v26  ;;  %v16427_v26 = vld [vmem:[%s20938_s1 + $0x1d0] sm:$0xff]  }
 0x2f1   :  { %14345 = vmatmul.mubr.bf16.gmra.mrb[24].mxu0 %v17163_v27  ;;  %v16428_v27 = vld [vmem:[%s20938_s1 + $0x1d8] sm:$0xff]  }
 0x2f2   :  { %14348 = vmatprep.mubr.bf16.mxu0 %v17175_v48  ;;  %v21128_v48 = vld [vmem:[#allocation21_spill] sm:$0xff] }
 0x2f9   :  { %14349 = vmatmul.mubr.bf16.gmra.mrb[28].mxu0 %v17443_v61 }
 0x2fa   :  { %14352 = vmatprep.mubr.bf16.mxu0 %v17178_v12  ;;  %v21129_v12 = vld [vmem:[#allocation22_spill] sm:$0xff] }
 0x301   :  { %14353 = vmatmul.mubr.bf16.gmra.mrb[32].mxu0 %v21111_v5  ;;  %v4635_v5 = vld [vmem:[#allocation2 + $0x61] sm:$0xff] }
 0x302   :  { %14356 = vmatprep.mubr.bf16.mxu0 %v21112_v6  ;;  %v4636_v6 = vld [vmem:[#allocation2 + $0x69] sm:$0xff] }
 0x309   :  { %14357 = vmatmul.mubr.bf16.gmra.mrb[36].mxu0 %v21113_v13 }
 0x30a   :  { %14360 = vmatprep.mubr.bf16.mxu0 %v21114_v14  ;;  %v4697_v14 = vpack.c.bf16 %v4636_v6, %v4635_v5  ;;  %v4673_v6 = vld [vmem:[#allocation2 + $0x259] sm:$0xff] }
 0x311   :  { %14361 = vmatmul.mubr.bf16.gmra.mrb[40].mxu0 %v21115_v21  ;;  %v16434_v21 = vld [vmem:[%s20938_s1 + $0x208] sm:$0xff]  }
 0x312   :  { %14364 = vmatprep.mubr.bf16.mxu0 %v21116_v22  ;;  %v4637_v22 = vld [vmem:[#allocation2 + $0x79] sm:$0xff] }
 0x319   :  { %14365 = vmatmul.mubr.bf16.gmra.mrb[44].mxu0 %v21117_v31  ;;  %v4639_v31 = vld [vmem:[#allocation2 + $0x91] sm:$0xff] }
 0x31a   :  { %14368 = vmatprep.mubr.bf16.mxu0 %v21118_v32  ;;  %v4640_v32 = vld [vmem:[#allocation2 + $0x99] sm:$0xff] }
 0x321   :  { %14369 = vmatmul.mubr.bf16.gmra.mrb[48].mxu0 %v21119_v40  ;;  %v16435_v40 = vld [vmem:[%s20938_s1 + $0x210] sm:$0xff]  }
 0x322   :  { %14372 = vmatprep.mubr.bf16.mxu0 %v21120_v52 }
 0x329   :  { %14373 = vmatmul.mubr.bf16.gmra.mrb[52].mxu0 %v21121_v55  ;;  %v4699_v55 = vpack.c.bf16 %v4640_v32, %v4639_v31  ;;  %v4677_v31 = vld [vmem:[#allocation2 + $0x289] sm:$0xff]  ;;  %v4678_v32 = vld [vmem:[#allocation2 + $0x291] sm:$0xff] }
 0x32a   :  { %14376 = vmatprep.mubr.bf16.mxu0 %v21122_v4  ;;  %v16436_v4 = vld [vmem:[%s20938_s1 + $0x218] sm:$0xff]  }
 0x331   :  { %14377 = vmatmul.mubr.bf16.gmra.mrb[56].mxu0 %v21123_v7  ;;  %v4641_v7 = vld [vmem:[#allocation2 + $0xa9] sm:$0xff] }
 0x332   :  { %14380 = vmatprep.mubr.bf16.mxu0 %v21124_v19  ;;  %v4642_v19 = vld [vmem:[#allocation2 + $0xb1] sm:$0xff] }
 0x339   :  { %14381 = vmatmul.mubr.bf16.gmra.mrb[60].mxu0 %v17461_v39 }
 0x33a   :  { %14400 = vmatprep.mubr.bf16.mxu0 %v21125_v57  ;;  %v16437_v57 = vld [vmem:[%s20938_s1 + $0x220] sm:$0xff]  }
 0x341   :  { %14401 = vmatmul.mubr.bf16.vlgmr.msra.gmra.mrb[0].mxu0 %v21126_v8  ;;  %v4701_v8 = vpack.c.bf16 %v4644_v36, %v4643_v20  ;;  %v4683_v20 = vld [vmem:[#allocation2 + $0x2d1] sm:$0xff]  ;;  %v4684_v36 = vld [vmem:[#allocation2 + $0x2d9] sm:$0xff] }
 0x342   :  { %14465 = vmatpush3.bf16.msra.mxu0 %v16425_v53  ;;  %14404 = vmatprep.mubr.bf16.mxu0 %v21127_v9  ;;  %v4081_v53 = vpack.c.bf16 %v4046_v45, %v4045_v35  ;;  %v16438_v9 = vld [vmem:[%s20938_s1 + $0x228] sm:$0xff]  }
 0x343   :  { %14466 = vmatprep.subr.bf16.mxu0 %v16426_v43 }
 0x346   :  { %14467 = vmatpush3.bf16.msra.mxu0 %v16426_v43  ;;  %v4700_v43 = vpack.c.bf16 %v4642_v19, %v4641_v7  ;;  %v4681_v7 = vld [vmem:[#allocation2 + $0x2b9] sm:$0xff]  ;;  %v4682_v19 = vld [vmem:[#allocation2 + $0x2c1] sm:$0xff] }
 0x347   :  { %14468 = vmatprep.subr.bf16.mxu0 %v16427_v26 }
 0x349   :  { %14405 = vmatmul.mubr.bf16.gmra.mrb[4].mxu0 %v21128_v48  ;;  %v4647_v48 = vld [vmem:[#allocation2 + $0xf1] sm:$0xff] }
 0x34a   :  { %14408 = vmatprep.mubr.bf16.mxu0 %v21129_v12  ;;  %14469 = vmatpush3.bf16.msra.mxu0 %v16427_v26  ;;  %v4645_v26 = vld [vmem:[#allocation2 + $0xd9] sm:$0xff] }
 0x34b   :  { %14470 = vmatprep.subr.bf16.mxu0 %v16428_v27  ;;  %v4648_v12 = vld [vmem:[#allocation2 + $0xf9] sm:$0xff] }
 0x34e   :  { %14471 = vmatpush3.bf16.msra.mxu0 %v16428_v27  ;;  %v4646_v27 = vld [vmem:[#allocation2 + $0xe1] sm:$0xff] }
 0x34f   :  { %14472 = vmatprep.subr.bf16.mxu0 %v16429_v33 }
 0x351   :  { %14409 = vmatmul.mubr.bf16.gmra.mrb[8].mxu0 %v21130_v49  ;;  %v4703_v49 = vpack.c.bf16 %v4648_v12, %v4647_v48 }
 0x352   :  { %14412 = vmatprep.mubr.bf16.mxu0 %v21131_v15  ;;  %14473 = vmatpush3.bf16.msra.mxu0 %v16429_v33  ;;  %v16439_v33 = vld [vmem:[%s20938_s1 + $0x230] sm:$0xff]   ;;  %v16440_v15 = vld [vmem:[%s20938_s1 + $0x238] sm:$0xff]  }
 0x353   :  { %14474 = vmatprep.subr.bf16.mxu0 %v16430_v41 }
 0x356   :  { %14475 = vmatpush3.bf16.msra.mxu0 %v16430_v41  ;;  %v4702_v41 = vpack.c.bf16 %v4646_v27, %v4645_v26  ;;  %v4687_v26 = vld [vmem:[#allocation2 + $0x301] sm:$0xff]  ;;  %v4688_v27 = vld [vmem:[#allocation2 + $0x309] sm:$0xff] }
 0x357   :  { %14476 = vmatprep.subr.bf16.mxu0 %v16431_v0  ;;  %v4723_v12 = vpack.c.bf16 %v4688_v27, %v4687_v26 }
 0x359   :  { %14413 = vmatmul.mubr.bf16.gmra.mrb[12].mxu0 %v21132_v16  ;;  %v4651_v16 = vld [vmem:[#allocation2 + $0x121] sm:$0xff] }
 0x35a   :  { %14416 = vmatprep.mubr.bf16.mxu0 %v21133_v37  ;;  %14477 = vmatpush3.bf16.msra.mxu0 %v16431_v0  ;;  %v4649_v0 = vld [vmem:[#allocation2 + $0x109] sm:$0xff] }
 0x35b   :  { %14478 = vmatprep.subr.bf16.mxu0 %v16432_v34  ;;  %v4652_v37 = vld [vmem:[#allocation2 + $0x129] sm:$0xff] }
 0x35e   :  { %14479 = vmatpush3.bf16.msra.mxu0 %v16432_v34  ;;  %v4650_v34 = vld [vmem:[#allocation2 + $0x111] sm:$0xff] }
 0x35f   :  { %14544 = vmatprep.subr.bf16.mxu0 %v16433_v38 }
 0x361   :  { %14417 = vmatmul.mubr.bf16.gmra.mrb[16].mxu0 %v21134_v44  ;;  %v4705_v44 = vpack.c.bf16 %v4652_v37, %v4651_v16  ;;  %v5274_v16 = vld [vmem:[#allocation2 + $0x3a] sm:$0xff] }
 0x362   :  { %14420 = vmatprep.mubr.bf16.mxu0 %v21135_v50  ;;  %v4653_v50 = vld [vmem:[#allocation2 + $0x139] sm:$0xff] }
 0x369   :  { %14421 = vmatmul.mubr.bf16.gmra.mrb[20].mxu0 %v21136_v51  ;;  %v4654_v51 = vld [vmem:[#allocation2 + $0x141] sm:$0xff] }
 0x36a   :  { %14424 = vmatprep.mubr.bf16.mxu0 %v21137_v58  ;;  %v4655_v58 = vld [vmem:[#allocation2 + $0x151] sm:$0xff]  ;;  %v4706_v1 = vpack.c.bf16 %v4654_v51, %v4653_v50  ;;  %v5277_v51 = vld [vmem:[#allocation2 + $0x62] sm:$0xff] }
 0x36b   :  { %v5276_v50 = vld [vmem:[#allocation2 + $0x52] sm:$0xff] }
 0x371   :  { %14425 = vmatmul.mubr.bf16.gmra.mrb[24].mxu0 %v21138_v59  ;;  %v4656_v59 = vld [vmem:[#allocation2 + $0x159] sm:$0xff] }
 0x372   :  { %14428 = vmatprep.mubr.bf16.mxu0 %v17301_v28  ;;  %v4043_v28 = vld [vmem:[#allocation2 + $0x2e8] sm:$0xff] }
 0x373   :  { %v4080_v46 = vpack.c.bf16 %v4044_v30, %v4043_v28  ;;  %v4663_v28 = vld [vmem:[#allocation2 + $0x1e1] sm:$0xff]  ;;  %v4664_v30 = vld [vmem:[#allocation2 + $0x1e9] sm:$0xff] }
 0x374   :  { %v4711_v45 = vpack.c.bf16 %v4664_v30, %v4663_v28  ;;  %v5284_v28 = vld [vmem:[#allocation2 + $0xb2] sm:$0xff]  ;;  %v5285_v30 = vld [vmem:[#allocation2 + $0xc2] sm:$0xff] }
 0x379   :  { %14429 = vmatmul.mubr.bf16.gmra.mrb[28].mxu0 %v4068_v2 }
 0x37a   :  { %14432 = vmatprep.mubr.bf16.mxu0 %v21139_v11  ;;  %v4657_v11 = vld [vmem:[#allocation2 + $0x169] sm:$0xff] }
 0x381   :  { %14433 = vmatmul.mubr.bf16.gmra.mrb[32].mxu0 %v21140_v17  ;;  %v4658_v17 = vld [vmem:[#allocation2 + $0x171] sm:$0xff] }
 0x382   :  { %14436 = vmatprep.mubr.bf16.mxu0 %v21141_v23  ;;  %v4708_v23 = vpack.c.bf16 %v4658_v17, %v4657_v11  ;;  %v5280_v11 = vld [vmem:[#allocation2 + $0x82] sm:$0xff]  ;;  %v5281_v17 = vld [vmem:[#allocation2 + $0x92] sm:$0xff] }
 0x389   :  { %14437 = vmatmul.mubr.bf16.gmra.mrb[36].mxu0 %v21142_v24  ;;  %v4661_v24 = vld [vmem:[#allocation2 + $0x199] sm:$0xff] }
 0x38a   :  { %14440 = vmatprep.mubr.bf16.mxu0 %v21143_v29  ;;  %v4662_v29 = vld [vmem:[#allocation2 + $0x1a1] sm:$0xff] }
 0x38b   :  { %v4710_v35 = vpack.c.bf16 %v4662_v29, %v4661_v24  ;;  %v5283_v29 = vld [vmem:[#allocation2 + $0xaa] sm:$0xff] }
 0x391   :  { %14441 = vmatmul.mubr.bf16.gmra.mrb[40].mxu0 %v17318_v62  ;;  %v4048_v62 = vld [vmem:[#allocation2 + $0x320] sm:$0xff] }
 0x392   :  { %14444 = vmatprep.mubr.bf16.mxu0 %v17322_v63  ;;  %v4082_v60 = vpack.c.bf16 %v4048_v62, %v4047_v54  ;;  %v4631_v63 = vld [vmem:[#allocation2 + $0x31] sm:$0xff]  ;;  %v4668_v62 = vld [vmem:[#allocation2 + $0x219] sm:$0xff] }
 0x393   :  { %v4667_v54 = vld [vmem:[#allocation2 + $0x211] sm:$0xff] }
 0x399   :  { %14445 = vmatmul.mubr.bf16.gmra.mrb[44].mxu0 %v17324_v56  ;;  %v4632_v56 = vld [vmem:[#allocation2 + $0x39] sm:$0xff] }
 0x39a   :  { %14448 = vmatprep.mubr.bf16.mxu0 %v17328_v3  ;;  %v4695_v3 = vpack.c.bf16 %v4632_v56, %v4631_v63  ;;  %v4713_v63 = vpack.c.bf16 %v4668_v62, %v4667_v54  ;;  %v4669_v56 = vld [vmem:[#allocation2 + $0x229] sm:$0xff]  ;;  %v5289_v62 = vld [vmem:[#allocation2 + $0xf2] sm:$0xff] }
 0x39b   :  { %v5288_v54 = vld [vmem:[#allocation2 + $0xe2] sm:$0xff] }
 0x3a1   :  { %14449 = vmatmul.mubr.bf16.gmra.mrb[48].mxu0 %v17330_v25  ;;  %v4633_v25 = vld [vmem:[#allocation2 + $0x49] sm:$0xff] }
 0x3a2   :  { %14452 = vmatprep.mubr.bf16.mxu0 %v17334_v42  ;;  %v4634_v42 = vld [vmem:[#allocation2 + $0x51] sm:$0xff] }
 0x3a3   :  { %v4696_v13 = vpack.c.bf16 %v4634_v42, %v4633_v25  ;;  %v4671_v25 = vld [vmem:[#allocation2 + $0x241] sm:$0xff] }
 0x3a9   :  { %14453 = vmatmul.mubr.bf16.gmra.mrb[52].mxu0 %v4080_v46  ;;  %v4665_v46 = vld [vmem:[#allocation2 + $0x1f9] sm:$0xff] }
 0x3aa   :  { %14456 = vmatprep.mubr.bf16.mxu0 %v4081_v53  ;;  %v4666_v53 = vld [vmem:[#allocation2 + $0x201] sm:$0xff] }
 0x3b1   :  { %14457 = vmatmul.mubr.bf16.gmra.mrb[56].mxu0 %v4082_v60  ;;  %v4712_v60 = vpack.c.bf16 %v4666_v53, %v4665_v46  ;;  %v5287_v53 = vld [vmem:[#allocation2 + $0xda] sm:$0xff] }
 0x3b2   :  { %14460 = vmatprep.mubr.bf16.mxu0 %v17340_v47  ;;  %v4638_v47 = vld [vmem:[#allocation2 + $0x81] sm:$0xff] }
 0x3b3   :  { %v4698_v52 = vpack.c.bf16 %v4638_v47, %v4637_v22 }
 0x3b9   :  { %14461 = vmatmul.mubr.bf16.gmra.mrb[60].mxu0 %v4068_v2  ;;  %v4707_v2 = vpack.c.bf16 %v4656_v59, %v4655_v58  ;;  %v5278_v58 = vld [vmem:[#allocation2 + $0x6a] sm:$0xff] }
 0x3ba   :  { %14480 = vmatprep.mubr.bf16.mxu0 %v4695_v3  ;;  %v4670_v3 = vld [vmem:[#allocation2 + $0x231] sm:$0xff] }
 0x3bb   :  { %v4714_v42 = vpack.c.bf16 %v4670_v3, %v4669_v56  ;;  %v5291_v3 = vld [vmem:[#allocation2 + $0x10a] sm:$0xff] }
 0x3c1   :  { %14481 = vmatmul.mubr.bf16.vlgmr.msra.gmra.mrb[0].mxu0 %v4696_v13  ;;  %v4674_v13 = vld [vmem:[#allocation2 + $0x261] sm:$0xff] }
 0x3c2   :  { %14545 = vmatpush3.bf16.msra.mxu0 %v16433_v38  ;;  %14484 = vmatprep.mubr.bf16.mxu0 %v4697_v14  ;;  %v4704_v38 = vpack.c.bf16 %v4650_v34, %v4649_v0  ;;  %v4675_v14 = vld [vmem:[#allocation2 + $0x271] sm:$0xff]  ;;  %v4716_v22 = vpack.c.bf16 %v4674_v13, %v4673_v6  ;;  %v5295_v13 = vld [vmem:[#allocation2 + $0x13a] sm:$0xff] }
 0x3c3   :  { %14546 = vmatprep.subr.bf16.mxu0 %v16434_v21  ;;  %v4694_v0 = vld [vmem:[#allocation2 + $0x351] sm:$0xff] }
 0x3c4   :  { %v5273_v34 = vld [vmem:[#allocation2 + $0x32] sm:$0xff] }
 0x3c6   :  { %14547 = vmatpush3.bf16.msra.mxu0 %v16434_v21  ;;  %v4676_v21 = vld [vmem:[#allocation2 + $0x279] sm:$0xff] }
 0x3c7   :  { %14548 = vmatprep.subr.bf16.mxu0 %v16435_v40  ;;  %v4717_v47 = vpack.c.bf16 %v4676_v21, %v4675_v14  ;;  %v5296_v14 = vld [vmem:[#allocation2 + $0x142] sm:$0xff]  ;;  %v5297_v21 = vld [vmem:[#allocation2 + $0x152] sm:$0xff] }
 0x3c9   :  { %14485 = vmatmul.mubr.bf16.gmra.mrb[4].mxu0 %v4698_v52  ;;  %v4680_v52 = vld [vmem:[#allocation2 + $0x2a9] sm:$0xff] }
 0x3ca   :  { %14488 = vmatprep.mubr.bf16.mxu0 %v4699_v55  ;;  %14549 = vmatpush3.bf16.msra.mxu0 %v16435_v40  ;;  %v4679_v40 = vld [vmem:[#allocation2 + $0x2a1] sm:$0xff]  ;;  %v4718_v55 = vpack.c.bf16 %v4678_v32, %v4677_v31  ;;  %v5299_v32 = vld [vmem:[#allocation2 + $0x16a] sm:$0xff] }
 0x3cb   :  { %14550 = vmatprep.subr.bf16.mxu0 %v16436_v4 }
 0x3ce   :  { %14551 = vmatpush3.bf16.msra.mxu0 %v16436_v4  ;;  %v4719_v4 = vpack.c.bf16 %v4680_v52, %v4679_v40  ;;  %v5300_v40 = vld [vmem:[#allocation2 + $0x172] sm:$0xff] }
 0x3cf   :  { %14552 = vmatprep.subr.bf16.mxu0 %v16437_v57  ;;  %v5350_v52 = vpack.c.bf16 %v5300_v40, %v5299_v32 }
 0x3d1   :  { %14489 = vmatmul.mubr.bf16.gmra.mrb[8].mxu0 %v4700_v43  ;;  %v4721_v43 = vpack.c.bf16 %v4684_v36, %v4683_v20 }
 0x3d2   :  { %14492 = vmatprep.mubr.bf16.mxu0 %v4701_v8  ;;  %14553 = vmatpush3.bf16.msra.mxu0 %v16437_v57  ;;  %v4720_v57 = vpack.c.bf16 %v4682_v19, %v4681_v7  ;;  %v4685_v8 = vld [vmem:[#allocation2 + $0x2e9] sm:$0xff] }
 0x3d3   :  { %14554 = vmatprep.subr.bf16.mxu0 %v16438_v9  ;;  %v5305_v7 = vld [vmem:[#allocation2 + $0x1e2] sm:$0xff]  ;;  %v5306_v19 = vld [vmem:[#allocation2 + $0x1ea] sm:$0xff] }
 0x3d4   :  { %v5353_v36 = vpack.c.bf16 %v5306_v19, %v5305_v7 }
 0x3d6   :  { %14555 = vmatpush3.bf16.msra.mxu0 %v16438_v9  ;;  %v4686_v9 = vld [vmem:[#allocation2 + $0x2f1] sm:$0xff] }
 0x3d7   :  { %14556 = vmatprep.subr.bf16.mxu0 %v16439_v33  ;;  %v4722_v48 = vpack.c.bf16 %v4686_v9, %v4685_v8  ;;  %v5309_v8 = vld [vmem:[#allocation2 + $0x212] sm:$0xff]  ;;  %v5310_v9 = vld [vmem:[#allocation2 + $0x21a] sm:$0xff] }
 0x3d8   :  { %v5355_v27 = vpack.c.bf16 %v5310_v9, %v5309_v8 }
 0x3d9   :  { %14493 = vmatmul.mubr.bf16.gmra.mrb[12].mxu0 %v4702_v41  ;;  %v4690_v41 = vld [vmem:[#allocation2 + $0x321] sm:$0xff] }
 0x3da   :  { %14496 = vmatprep.mubr.bf16.mxu0 %v4703_v49  ;;  %14557 = vmatpush3.bf16.msra.mxu0 %v16439_v33  ;;  %v4689_v33 = vld [vmem:[#allocation2 + $0x319] sm:$0xff] }
 0x3db   :  { %14558 = vmatprep.subr.bf16.mxu0 %v16440_v15  ;;  %v4724_v49 = vpack.c.bf16 %v4690_v41, %v4689_v33  ;;  %v5313_v33 = vld [vmem:[#allocation2 + $0x242] sm:$0xff] }
 0x3de   :  { %14559 = vmatpush3.bf16.msra.mxu0 %v16440_v15  ;;  %v4693_v15 = vld [vmem:[#allocation2 + $0x349] sm:$0xff] }
 0x3df   :  { %v4726_v37 = vpack.c.bf16 %v4694_v0, %v4693_v15  ;;  %v5315_v15 = vld [vmem:[#allocation2 + $0x25a] sm:$0xff]  ;;  %v5316_v0 = vld [vmem:[#allocation2 + $0x262] sm:$0xff] }
 0x3e1   :  { %14497 = vmatmul.mubr.bf16.gmra.mrb[16].mxu0 %v4704_v38  ;;  %v5337_v38 = vpack.c.bf16 %v5274_v16, %v5273_v34  ;;  %v5317_v34 = vld [vmem:[#allocation2 + $0x272] sm:$0xff]  ;;  %v5318_v16 = vld [vmem:[#allocation2 + $0x27a] sm:$0xff] }
 0x3e2   :  { %14500 = vmatprep.mubr.bf16.mxu0 %v4705_v44  ;;  %v5275_v44 = vld [vmem:[#allocation2 + $0x4a] sm:$0xff] }
 0x3e3   :  { %v5338_v59 = vpack.c.bf16 %v5276_v50, %v5275_v44  ;;  %v5319_v44 = vld [vmem:[#allocation2 + $0x28a] sm:$0xff]  ;;  %v5320_v50 = vld [vmem:[#allocation2 + $0x292] sm:$0xff] }
 0x3e9   :  { %14501 = vmatmul.mubr.bf16.gmra.mrb[20].mxu0 %v4706_v1  ;;  %v5339_v1 = vpack.c.bf16 %v5278_v58, %v5277_v51  ;;  %v5321_v51 = vld [vmem:[#allocation2 + $0x2a2] sm:$0xff]  ;;  %v5322_v58 = vld [vmem:[#allocation2 + $0x2aa] sm:$0xff] }
 0x3ea   :  { %14504 = vmatprep.mubr.bf16.mxu0 %v4707_v2  ;;  %v5279_v2 = vld [vmem:[#allocation2 + $0x7a] sm:$0xff] }
 0x3f1   :  { %14505 = vmatmul.mubr.bf16.gmra.mrb[24].mxu0 %v4708_v23  ;;  %v5340_v23 = vpack.c.bf16 %v5280_v11, %v5279_v2  ;;  %v5323_v2 = vld [vmem:[#allocation2 + $0x2ba] sm:$0xff]  ;;  %v5324_v11 = vld [vmem:[#allocation2 + $0x2c2] sm:$0xff] }
 0x3f2   :  { %14508 = vmatprep.mubr.bf16.mxu0 %v17383_v10  ;;  %v4672_v10 = vld [vmem:[#allocation2 + $0x249] sm:$0xff] }
 0x3f3   :  { %v4715_v5 = vpack.c.bf16 %v4672_v10, %v4671_v25  ;;  %v5292_v25 = vld [vmem:[#allocation2 + $0x112] sm:$0xff]  ;;  %v5293_v10 = vld [vmem:[#allocation2 + $0x122] sm:$0xff] }
 0x3f9   :  { %14509 = vmatmul.mubr.bf16.gmra.mrb[28].mxu0 %v4710_v35  ;;  %v5286_v35 = vld [vmem:[#allocation2 + $0xca] sm:$0xff] }
 0x3fa   :  { %14512 = vmatprep.mubr.bf16.mxu0 %v4711_v45  ;;  %v5342_v45 = vpack.c.bf16 %v5284_v28, %v5283_v29  ;;  %v5343_v46 = vpack.c.bf16 %v5286_v35, %v5285_v30  ;;  %v5327_v29 = vld [vmem:[#allocation2 + $0x2ea] sm:$0xff]  ;;  %v5328_v28 = vld [vmem:[#allocation2 + $0x2f2] sm:$0xff]  ;;  %v5329_v30 = vld [vmem:[#allocation2 + $0x302] sm:$0xff] }
 0x3fb   :  { %v5330_v35 = vld [vmem:[#allocation2 + $0x30a] sm:$0xff] }
 0x401   :  { %14513 = vmatmul.mubr.bf16.gmra.mrb[32].mxu0 %v4712_v60  ;;  %v5290_v60 = vld [vmem:[#allocation2 + $0xfa] sm:$0xff] }
 0x402   :  { %14516 = vmatprep.mubr.bf16.mxu0 %v4713_v63  ;;  %v5344_v63 = vpack.c.bf16 %v5288_v54, %v5287_v53  ;;  %v5345_v56 = vpack.c.bf16 %v5290_v60, %v5289_v62  ;;  %v5331_v53 = vld [vmem:[#allocation2 + $0x31a] sm:$0xff]  ;;  %v5332_v54 = vld [vmem:[#allocation2 + $0x322] sm:$0xff]  ;;  %v5335_v60 = vld [vmem:[#allocation2 + $0x34a] sm:$0xff] }
 0x403   :  { %v5366_v62 = vpack.c.bf16 %v5332_v54, %v5331_v53 }
 0x409   :  { %14517 = vmatmul.mubr.bf16.gmra.mrb[36].mxu0 %v4714_v42  ;;  %v5294_v42 = vld [vmem:[#allocation2 + $0x12a] sm:$0xff] }
 0x40a   :  { %14520 = vmatprep.mubr.bf16.mxu0 %v4715_v5  ;;  %v5346_v5 = vpack.c.bf16 %v5292_v25, %v5291_v3  ;;  %v5347_v6 = vpack.c.bf16 %v5294_v42, %v5293_v10 }
 0x411   :  { %14521 = vmatmul.mubr.bf16.gmra.mrb[40].mxu0 %v4716_v22  ;;  %v5298_v22 = vld [vmem:[#allocation2 + $0x15a] sm:$0xff] }
 0x412   :  { %14524 = vmatprep.mubr.bf16.mxu0 %v4717_v47  ;;  %v5348_v47 = vpack.c.bf16 %v5296_v14, %v5295_v13  ;;  %v5349_v31 = vpack.c.bf16 %v5298_v22, %v5297_v21 }
 0x419   :  { %14525 = vmatmul.mubr.bf16.gmra.mrb[44].mxu0 %v4718_v55  ;;  %v5303_v55 = vld [vmem:[#allocation2 + $0x19a] sm:$0xff] }
 0x41a   :  { %14528 = vmatprep.mubr.bf16.mxu0 %v4719_v4  ;;  %v5304_v4 = vld [vmem:[#allocation2 + $0x1a2] sm:$0xff] }
 0x41b   :  { %v5352_v20 = vpack.c.bf16 %v5304_v4, %v5303_v55 }
 0x421   :  { %14529 = vmatmul.mubr.bf16.gmra.mrb[48].mxu0 %v4720_v57  ;;  %v5307_v57 = vld [vmem:[#allocation2 + $0x1fa] sm:$0xff] }
 0x422   :  { %14532 = vmatprep.mubr.bf16.mxu0 %v4721_v43  ;;  %v5308_v43 = vld [vmem:[#allocation2 + $0x202] sm:$0xff] }
 0x423   :  { %v5354_v26 = vpack.c.bf16 %v5308_v43, %v5307_v57 }
 0x429   :  { %14533 = vmatmul.mubr.bf16.gmra.mrb[52].mxu0 %v4722_v48  ;;  %v5311_v48 = vld [vmem:[#allocation2 + $0x22a] sm:$0xff] }
 0x42a   :  { %14536 = vmatprep.mubr.bf16.mxu0 %v4723_v12  ;;  %v5312_v12 = vld [vmem:[#allocation2 + $0x232] sm:$0xff] }
 0x42b   :  { %v5356_v41 = vpack.c.bf16 %v5312_v12, %v5311_v48 }
 0x431   :  { %14537 = vmatmul.mubr.bf16.gmra.mrb[56].mxu0 %v4724_v49 }
 0x432   :  { %14540 = vmatprep.mubr.bf16.mxu0 %v17401_v18  ;;  %v5282_v18 = vld [vmem:[#allocation2 + $0x9a] sm:$0xff] }
 0x433   :  { %v5341_v24 = vpack.c.bf16 %v5282_v18, %v5281_v17  ;;  %v5325_v17 = vld [vmem:[#allocation2 + $0x2d2] sm:$0xff]  ;;  %v5326_v18 = vld [vmem:[#allocation2 + $0x2da] sm:$0xff] }
 0x439   :  { %14541 = vmatmul.mubr.bf16.gmra.mrb[60].mxu0 %v4726_v37  ;;  %v5358_v37 = vpack.c.bf16 %v5316_v0, %v5315_v15 }
 0x43a   :  { %14560 = vmatprep.mubr.bf16.mxu0 %v5337_v38  ;;  %v5359_v38 = vpack.c.bf16 %v5318_v16, %v5317_v34 }
 0x441   :  { %14561 = vmatmul.mubr.bf16.vlgmr.msra.gmra.mrb[0].mxu0 %v5338_v59  ;;  %v5360_v59 = vpack.c.bf16 %v5320_v50, %v5319_v44 }
 0x442   :  { %14564 = vmatprep.mubr.bf16.mxu0 %v5339_v1  ;;  %v5361_v1 = vpack.c.bf16 %v5322_v58, %v5321_v51 }
 0x449   :  { %14565 = vmatmul.mubr.bf16.gmra.mrb[4].mxu0 %v5340_v23  ;;  %v5362_v23 = vpack.c.bf16 %v5324_v11, %v5323_v2 }
 0x44a   :  { %14568 = vmatprep.mubr.bf16.mxu0 %v5341_v24  ;;  %v5363_v24 = vpack.c.bf16 %v5326_v18, %v5325_v17 }
 0x451   :  { %14569 = vmatmul.mubr.bf16.gmra.mrb[8].mxu0 %v5342_v45  ;;  %v5364_v45 = vpack.c.bf16 %v5328_v28, %v5327_v29 }
 0x452   :  { %14572 = vmatprep.mubr.bf16.mxu0 %v5343_v46  ;;  %v5365_v46 = vpack.c.bf16 %v5330_v35, %v5329_v30 }
 0x459   :  { %14573 = vmatmul.mubr.bf16.gmra.mrb[12].mxu0 %v5344_v63  ;;  %v5336_v63 = vld [vmem:[#allocation2 + $0x352] sm:$0xff] }
 0x45a   :  { %14576 = vmatprep.mubr.bf16.mxu0 %v5345_v56  ;;  %v5368_v56 = vpack.c.bf16 %v5336_v63, %v5335_v60 }
 0x461   :  { %14577 = vmatmul.mubr.bf16.gmra.mrb[16].mxu0 %v5346_v5 }
 0x462   :  { %14580 = vmatprep.mubr.bf16.mxu0 %v5347_v6 }
 0x469   :  { %14581 = vmatmul.mubr.bf16.gmra.mrb[20].mxu0 %v5348_v47 }
 0x46a   :  { %14584 = vmatprep.mubr.bf16.mxu0 %v5349_v31 }
 0x471   :  { %14585 = vmatmul.mubr.bf16.gmra.mrb[24].mxu0 %v5350_v52 }
 0x472   :  { %14588 = vmatprep.mubr.bf16.mxu0 %v17443_v61  ;;  %v5314_v61 = vld [vmem:[#allocation2 + $0x24a] sm:$0xff] }
 0x473   :  { %v5357_v49 = vpack.c.bf16 %v5314_v61, %v5313_v33 }
 0x479   :  { %14589 = vmatmul.mubr.bf16.gmra.mrb[28].mxu0 %v5352_v20 }
 0x47a   :  { %14592 = vmatprep.mubr.bf16.mxu0 %v5353_v36 }
 0x481   :  { %14593 = vmatmul.mubr.bf16.gmra.mrb[32].mxu0 %v5354_v26 }
 0x482   :  { %14596 = vmatprep.mubr.bf16.mxu0 %v5355_v27 }
 0x489   :  { %14597 = vmatmul.mubr.bf16.gmra.mrb[36].mxu0 %v5356_v41 }
 0x48a   :  { %14600 = vmatprep.mubr.bf16.mxu0 %v5357_v49 }
 0x491   :  { %14601 = vmatmul.mubr.bf16.gmra.mrb[40].mxu0 %v5358_v37 }
 0x492   :  { %14604 = vmatprep.mubr.bf16.mxu0 %v5359_v38 }
 0x499   :  { %14605 = vmatmul.mubr.bf16.gmra.mrb[44].mxu0 %v5360_v59 }
 0x49a   :  { %14608 = vmatprep.mubr.bf16.mxu0 %v5361_v1 }
 0x4a1   :  { %14609 = vmatmul.mubr.bf16.gmra.mrb[48].mxu0 %v5362_v23 }
 0x4a2   :  { %14612 = vmatprep.mubr.bf16.mxu0 %v5363_v24 }
 0x4a9   :  { %14613 = vmatmul.mubr.bf16.gmra.mrb[52].mxu0 %v5364_v45 }
 0x4aa   :  { %14616 = vmatprep.mubr.bf16.mxu0 %v5365_v46 }
 0x4b1   :  { %14617 = vmatmul.mubr.bf16.gmra.mrb[56].mxu0 %v5366_v62 }
 0x4b2   :  { %14620 = vmatprep.mubr.bf16.mxu0 %v17461_v39 }
 0x4b9   :  { %14621 = vmatmul.mubr.bf16.gmra.mrb[60].mxu0 %v5368_v56 }
 0x514   :  { %v17540_v3 = vpop.f32.mrb[0].mxu0 }
 0x515   :  { %v17542_v25 = vpop.f32.mrb[1].mxu0  ;;  %v6050_v13 = vmul.f32 %v17540_v3, %v17540_v3 }
 0x516   :  { %v17544_v10 = vpop.f32.mrb[2].mxu0  ;;  %v6048_v5 = vmul.f32 %v17542_v25, %v17542_v25 }
 0x517   :  { %v17546_v42 = vpop.f32.mrb[3].mxu0  ;;  %v6051_v22 = vmul.f32 %v17544_v10, %v17544_v10 }
 0x518   :  { %v5979_v6 = vadd.f32 %v17546_v42, %v17542_v25  ;;  %v6049_v39 = vmul.f32 %v17546_v42, %v17546_v42 }
 0x51a   :  { %v5980_v14 = vadd.f32 %v17540_v3, %v5979_v6  ;;  %v6112_v21 = vadd.f32 %v6049_v39, %v6048_v5 }
 0x51c   :  { %v6113_v47 = vadd.f32 %v6112_v21, %v6050_v13  ;;  %v17559_v31 = vpop.f32.mrb[4].mxu0  ;;  %v5981_v32 = vadd.f32 %v17544_v10, %v5980_v14 }
 0x51d   :  { %v17562_v40 = vpop.f32.mrb[5].mxu0  ;;  %v6054_v43 = vmul.f32 %v17559_v31, %v17559_v31 }
 0x51e   :  { %v5982_v52 = vadd.f32 %v5981_v32, %v17562_v40  ;;  %v6052_v55 = vmul.f32 %v17562_v40, %v17562_v40  ;;  %v6114_v4 = vadd.f32 %v6113_v47, %v6051_v22  ;;  %v17567_v7 = vpop.f32.mrb[6].mxu0 }
 0x51f   :  { %v17569_v19 = vpop.f32.mrb[7].mxu0  ;;  %v6055_v26 = vmul.f32 %v17567_v7, %v17567_v7 }
 0x520   :  { %v6115_v20 = vadd.f32 %v6114_v4, %v6052_v55  ;;  %v5983_v36 = vadd.f32 %v5982_v52, %v17569_v19  ;;  %v6053_v57 = vmul.f32 %v17569_v19, %v17569_v19 }
 0x522   :  { %v5984_v8 = vadd.f32 %v17559_v31, %v5983_v36  ;;  %v6116_v9 = vadd.f32 %v6115_v20, %v6053_v57 }
 0x524   :  { %v6117_v27 = vadd.f32 %v6116_v9, %v6054_v43  ;;  %v17579_v48 = vpop.f32.mrb[8].mxu0  ;;  %v5985_v12 = vadd.f32 %v17567_v7, %v5984_v8 }
 0x525   :  { %v17582_v33 = vpop.f32.mrb[9].mxu0  ;;  %v6058_v38 = vmul.f32 %v17579_v48, %v17579_v48 }
 0x526   :  { %v5986_v61 = vadd.f32 %v5985_v12, %v17582_v33  ;;  %v6056_v41 = vmul.f32 %v17582_v33, %v17582_v33  ;;  %v6118_v49 = vadd.f32 %v6117_v27, %v6055_v26  ;;  %v17587_v15 = vpop.f32.mrb[10].mxu0 }
 0x527   :  { %v17589_v0 = vpop.f32.mrb[11].mxu0  ;;  %v6059_v51 = vmul.f32 %v17587_v15, %v17587_v15 }
 0x528   :  { %v6119_v34 = vadd.f32 %v6118_v49, %v6056_v41  ;;  %v5987_v16 = vadd.f32 %v5986_v61, %v17589_v0  ;;  %v6057_v37 = vmul.f32 %v17589_v0, %v17589_v0 }
 0x52a   :  { %v5988_v44 = vadd.f32 %v17579_v48, %v5987_v16  ;;  %v6120_v50 = vadd.f32 %v6119_v34, %v6057_v37 }
 0x52c   :  { %v6121_v58 = vadd.f32 %v6120_v50, %v6058_v38  ;;  %v17599_v59 = vpop.f32.mrb[12].mxu0  ;;  %v5989_v1 = vadd.f32 %v17587_v15, %v5988_v44 }
 0x52d   :  { %v17602_v2 = vpop.f32.mrb[13].mxu0  ;;  %v6062_v35 = vmul.f32 %v17599_v59, %v17599_v59 }
 0x52e   :  { %v5990_v11 = vadd.f32 %v5989_v1, %v17602_v2  ;;  %v6060_v17 = vmul.f32 %v17602_v2, %v17602_v2  ;;  %v6122_v18 = vadd.f32 %v6121_v58, %v6059_v51  ;;  %v17607_v23 = vpop.f32.mrb[14].mxu0 }
 0x52f   :  { %v17609_v24 = vpop.f32.mrb[15].mxu0  ;;  %v6063_v53 = vmul.f32 %v17607_v23, %v17607_v23 }
 0x530   :  { %v6123_v29 = vadd.f32 %v6122_v18, %v6060_v17  ;;  %v5991_v28 = vadd.f32 %v5990_v11, %v17609_v24  ;;  %v6061_v30 = vmul.f32 %v17609_v24, %v17609_v24 }
 0x532   :  { %v5992_v45 = vadd.f32 %v17599_v59, %v5991_v28  ;;  %v6124_v46 = vadd.f32 %v6123_v29, %v6061_v30 }
 0x534   :  { %v6125_v54 = vadd.f32 %v6124_v46, %v6062_v35  ;;  %v17619_v62 = vpop.f32.mrb[16].mxu0  ;;  %v5993_v60 = vadd.f32 %v17607_v23, %v5992_v45 }
 0x535   :  { %v17622_v63 = vpop.f32.mrb[17].mxu0  ;;  %v6066_v47 = vmul.f32 %v17619_v62, %v17619_v62 }
 0x536   :  { %v5994_v56 = vadd.f32 %v5993_v60, %v17622_v63  ;;  %v6064_v5 = vmul.f32 %v17622_v63, %v17622_v63  ;;  %v6126_v6 = vadd.f32 %v6125_v54, %v6063_v53  ;;  %v17627_v39 = vpop.f32.mrb[18].mxu0 }
 0x537   :  { %v17629_v13 = vpop.f32.mrb[19].mxu0  ;;  %v6067_v55 = vmul.f32 %v17627_v39, %v17627_v39 }
 0x538   :  { %v6127_v14 = vadd.f32 %v6126_v6, %v6064_v5  ;;  %v5995_v21 = vadd.f32 %v5994_v56, %v17629_v13  ;;  %v6065_v22 = vmul.f32 %v17629_v13, %v17629_v13 }
 0x53a   :  { %v5996_v32 = vadd.f32 %v17619_v62, %v5995_v21  ;;  %v6128_v52 = vadd.f32 %v6127_v14, %v6065_v22 }
 0x53c   :  { %v6129_v4 = vadd.f32 %v6128_v52, %v6066_v47  ;;  %v17639_v20 = vpop.f32.mrb[20].mxu0  ;;  %v5997_v36 = vadd.f32 %v17627_v39, %v5996_v32 }
 0x53d   :  { %v17642_v57 = vpop.f32.mrb[21].mxu0  ;;  %v6070_v49 = vmul.f32 %v17639_v20, %v17639_v20 }
 0x53e   :  { %v5998_v43 = vadd.f32 %v5997_v36, %v17642_v57  ;;  %v6068_v8 = vmul.f32 %v17642_v57, %v17642_v57  ;;  %v6130_v9 = vadd.f32 %v6129_v4, %v6067_v55  ;;  %v17647_v26 = vpop.f32.mrb[22].mxu0 }
 0x53f   :  { %v17649_v27 = vpop.f32.mrb[23].mxu0  ;;  %v6071_v37 = vmul.f32 %v17647_v26, %v17647_v26 }
 0x540   :  { %v6131_v12 = vadd.f32 %v6130_v9, %v6068_v8  ;;  %v5999_v61 = vadd.f32 %v5998_v43, %v17649_v27  ;;  %v6069_v41 = vmul.f32 %v17649_v27, %v17649_v27 }
 0x542   :  { %v6000_v34 = vadd.f32 %v17639_v20, %v5999_v61  ;;  %v6132_v16 = vadd.f32 %v6131_v12, %v6069_v41 }
 0x544   :  { %v6133_v38 = vadd.f32 %v6132_v16, %v6070_v49  ;;  %v17659_v44 = vpop.f32.mrb[24].mxu0  ;;  %v6001_v50 = vadd.f32 %v17647_v26, %v6000_v34  ;;  %v16441_v49 = vld [vmem:[%s20940_s2] sm:$0xff]  }
 0x545   :  { %v17662_v51 = vpop.f32.mrb[25].mxu0  ;;  %v6074_v35 = vmul.f32 %v17659_v44, %v17659_v44  ;;  %14624 = vmatprep.subr.bf16.mxu1 %v16441_v49 }
 0x546   :  { %v6002_v58 = vadd.f32 %v6001_v50, %v17662_v51  ;;  %v6072_v1 = vmul.f32 %v17662_v51, %v17662_v51  ;;  %v6134_v11 = vadd.f32 %v6133_v38, %v6071_v37  ;;  %v17667_v17 = vpop.f32.mrb[26].mxu0  ;;  %14625 = vmatpush3.bf16.msra.mxu1 %v16441_v49 }
 0x547   :  { %v17669_v18 = vpop.f32.mrb[27].mxu0  ;;  %v6075_v53 = vmul.f32 %v17667_v17, %v17667_v17 }
 0x548   :  { %v6135_v29 = vadd.f32 %v6134_v11, %v6072_v1  ;;  %v6003_v28 = vadd.f32 %v6002_v58, %v17669_v18  ;;  %v6073_v30 = vmul.f32 %v17669_v18, %v17669_v18 }
 0x54a   :  { %v6004_v45 = vadd.f32 %v17659_v44, %v6003_v28  ;;  %v6136_v46 = vadd.f32 %v6135_v29, %v6073_v30  ;;  %v16442_v29 = vld [vmem:[%s20940_s2 + $0x8] sm:$0xff]  }
 0x54b   :  { %14626 = vmatprep.subr.bf16.mxu1 %v16442_v29 }
 0x54c   :  { %v6137_v54 = vadd.f32 %v6136_v46, %v6074_v35  ;;  %v17679_v60 = vpop.f32.mrb[28].mxu0  ;;  %v6005_v56 = vadd.f32 %v17667_v17, %v6004_v45  ;;  %14627 = vmatpush3.bf16.msra.mxu1 %v16442_v29 }
 0x54d   :  { %v17682_v5 = vpop.f32.mrb[29].mxu0  ;;  %v6078_v4 = vmul.f32 %v17679_v60, %v17679_v60 }
 0x54e   :  { %v6006_v6 = vadd.f32 %v6005_v56, %v17682_v5  ;;  %v6076_v14 = vmul.f32 %v17682_v5, %v17682_v5  ;;  %v6138_v21 = vadd.f32 %v6137_v54, %v6075_v53  ;;  %v17687_v22 = vpop.f32.mrb[30].mxu0 }
 0x54f   :  { %v17689_v47 = vpop.f32.mrb[31].mxu0  ;;  %v6079_v8 = vmul.f32 %v17687_v22, %v17687_v22 }
 0x550   :  { %v6139_v32 = vadd.f32 %v6138_v21, %v6076_v14  ;;  %v6007_v52 = vadd.f32 %v6006_v6, %v17689_v47  ;;  %v6077_v55 = vmul.f32 %v17689_v47, %v17689_v47  ;;  %v16443_v6 = vld [vmem:[%s20940_s2 + $0x10] sm:$0xff]  }
 0x551   :  { %14628 = vmatprep.subr.bf16.mxu1 %v16443_v6 }
 0x552   :  { %v6008_v36 = vadd.f32 %v17679_v60, %v6007_v52  ;;  %v6140_v43 = vadd.f32 %v6139_v32, %v6077_v55  ;;  %14629 = vmatpush3.bf16.msra.mxu1 %v16443_v6 }
 0x554   :  { %v6141_v9 = vadd.f32 %v6140_v43, %v6078_v4  ;;  %v17699_v12 = vpop.f32.mrb[32].mxu0  ;;  %v6009_v61 = vadd.f32 %v17687_v22, %v6008_v36 }
 0x555   :  { %v17702_v41 = vpop.f32.mrb[33].mxu0  ;;  %v6082_v28 = vmul.f32 %v17699_v12, %v17699_v12 }
 0x556   :  { %v6010_v34 = vadd.f32 %v6009_v61, %v17702_v41  ;;  %v6080_v16 = vmul.f32 %v17702_v41, %v17702_v41  ;;  %v6142_v37 = vadd.f32 %v6141_v9, %v6079_v8  ;;  %v17710_v38 = vpop.f32.mrb[34].mxu0  ;;  %v16444_v8 = vld [vmem:[%s20940_s2 + $0x18] sm:$0xff]  }
 0x557   :  { %v17712_v50 = vpop.f32.mrb[35].mxu0  ;;  %v6083_v45 = vmul.f32 %v17710_v38, %v17710_v38  ;;  %14630 = vmatprep.subr.bf16.mxu1 %v16444_v8 }
 0x558   :  { %v6143_v58 = vadd.f32 %v6142_v37, %v6080_v16  ;;  %v6011_v1 = vadd.f32 %v6010_v34, %v17712_v50  ;;  %v6081_v11 = vmul.f32 %v17712_v50, %v17712_v50  ;;  %14631 = vmatpush3.bf16.msra.mxu1 %v16444_v8 }
 0x55a   :  { %v6012_v30 = vadd.f32 %v17699_v12, %v6011_v1  ;;  %v6144_v35 = vadd.f32 %v6143_v58, %v6081_v11  ;;  %v16445_v11 = vld [vmem:[%s20940_s2 + $0x20] sm:$0xff]  }
 0x55b   :  { %14632 = vmatprep.subr.bf16.mxu1 %v16445_v11 }
 0x55c   :  { %v6145_v46 = vadd.f32 %v6144_v35, %v6082_v28  ;;  %v17725_v53 = vpop.f32.mrb[36].mxu0  ;;  %v6013_v54 = vadd.f32 %v17710_v38, %v6012_v30  ;;  %14633 = vmatpush3.bf16.msra.mxu1 %v16445_v11 }
 0x55d   :  { %21144 = vst [vmem:[#allocation4_spill] sm:$0xff] %v17725_v53  ;;  %v17728_v56 = vpop.f32.mrb[37].mxu0  ;;  %v6086_v9 = vmul.f32 %v17725_v53, %v17725_v53 }
 0x55e   :  { %v6014_v14 = vadd.f32 %v6013_v54, %v17728_v56  ;;  %v6084_v21 = vmul.f32 %v17728_v56, %v17728_v56  ;;  %v6146_v32 = vadd.f32 %v6145_v46, %v6083_v45  ;;  %v17736_v52 = vpop.f32.mrb[38].mxu0 }
 0x55f   :  { %21145 = vst [vmem:[#allocation5_spill] sm:$0xff] %v17736_v52  ;;  %v17738_v55 = vpop.f32.mrb[39].mxu0  ;;  %v6087_v34 = vmul.f32 %v17736_v52, %v17736_v52 }
 0x560   :  { %v6147_v4 = vadd.f32 %v6146_v32, %v6084_v21  ;;  %v6015_v36 = vadd.f32 %v6014_v14, %v17738_v55  ;;  %v6085_v43 = vmul.f32 %v17738_v55, %v17738_v55  ;;  %v16446_v14 = vld [vmem:[%s20940_s2 + $0x28] sm:$0xff]  }
 0x561   :  { %14634 = vmatprep.subr.bf16.mxu1 %v16446_v14 }
 0x562   :  { %v6016_v61 = vadd.f32 %v17725_v53, %v6015_v36  ;;  %v6148_v49 = vadd.f32 %v6147_v4, %v6085_v43  ;;  %14635 = vmatpush3.bf16.msra.mxu1 %v16446_v14 }
 0x564   :  { %v6149_v16 = vadd.f32 %v6148_v49, %v6086_v9  ;;  %v17751_v37 = vpop.f32.mrb[40].mxu0  ;;  %v6017_v58 = vadd.f32 %v17736_v52, %v6016_v61  ;;  %v16447_v49 = vld [vmem:[%s20940_s2 + $0x30] sm:$0xff]  }
 0x565   :  { %21146 = vst [vmem:[#allocation6_spill] sm:$0xff] %v17751_v37  ;;  %v17754_v1 = vpop.f32.mrb[41].mxu0  ;;  %v6090_v21 = vmul.f32 %v17751_v37, %v17751_v37  ;;  %14636 = vmatprep.subr.bf16.mxu1 %v16447_v49 }
 0x566   :  { %21147 = vst [vmem:[#allocation7_spill] sm:$0xff] %v17754_v1  ;;  %v6018_v29 = vadd.f32 %v6017_v58, %v17754_v1  ;;  %v6088_v28 = vmul.f32 %v17754_v1, %v17754_v1  ;;  %v6150_v30 = vadd.f32 %v6149_v16, %v6087_v34  ;;  %v17762_v35 = vpop.f32.mrb[42].mxu0  ;;  %v16448_v34 = vld [vmem:[%s20940_s2 + $0x38] sm:$0xff]   ;;  %v16518_v16 = vld [vmem:[#allocation2] sm:$0xff]  ;;  %14637 = vmatpush3.bf16.msra.mxu1 %v16447_v49 }
 0x567   :  { %21148 = vst [vmem:[#allocation8_spill] sm:$0xff] %v17762_v35  ;;  %v17764_v45 = vpop.f32.mrb[43].mxu0  ;;  %v6091_v36 = vmul.f32 %v17762_v35, %v17762_v35  ;;  %v17788_v58 = vpack.c.bf16 %v16518_v16, %v16518_v16  ;;  %14638 = vmatprep.subr.bf16.mxu1 %v16448_v34 }
 0x568   :  { %21149 = vst [vmem:[#allocation9_spill] sm:$0xff] %v17764_v45  ;;  %v6151_v46 = vadd.f32 %v6150_v30, %v6088_v28  ;;  %v6019_v54 = vadd.f32 %v6018_v29, %v17764_v45  ;;  %v6089_v6 = vmul.f32 %v17764_v45, %v17764_v45 }
 0x569   :  { %21152 = vst [vmem:[#allocation12_spill] sm:$0xff] %v17788_v58  ;;  %14640 = vmatprep.mubr.bf16.mxu1 %v17788_v58 }
 0x56a   :  { %v6020_v32 = vadd.f32 %v17751_v37, %v6019_v54  ;;  %v6152_v4 = vadd.f32 %v6151_v46, %v6089_v6  ;;  %v17801_v54 = vld [vmem:[%s20940_s2 + $0x40] sm:$0xff]   ;;  %14639 = vmatpush3.bf16.msra.mxu1 %v16448_v34 }
 0x56b   :  { %21155 = vst [vmem:[#allocation15_spill] sm:$0xff] %v17801_v54  ;;  %14704 = vmatprep.subr.bf16.mxu1 %v17801_v54 }
 0x56c   :  { %v6153_v43 = vadd.f32 %v6152_v4, %v6090_v21  ;;  %v17777_v8 = vpop.f32.mrb[44].mxu0  ;;  %v6021_v9 = vadd.f32 %v17762_v35, %v6020_v32 }
 0x56d   :  { %21150 = vst [vmem:[#allocation10_spill] sm:$0xff] %v17777_v8  ;;  %v17780_v61 = vpop.f32.mrb[45].mxu0  ;;  %v6094_v32 = vmul.f32 %v17777_v8, %v17777_v8 }
 0x56e   :  { %21151 = vst [vmem:[#allocation11_spill] sm:$0xff] %v17780_v61  ;;  %v6022_v11 = vadd.f32 %v6021_v9, %v17780_v61  ;;  %v6092_v29 = vmul.f32 %v17780_v61, %v17780_v61  ;;  %v6154_v28 = vadd.f32 %v6153_v43, %v6091_v36  ;;  %v17793_v30 = vpop.f32.mrb[46].mxu0 }
 0x56f   :  { %21153 = vst [vmem:[#allocation13_spill] sm:$0xff] %v17793_v30  ;;  %v17795_v46 = vpop.f32.mrb[47].mxu0  ;;  %v6095_v43 = vmul.f32 %v17793_v30, %v17793_v30 }
 0x570   :  { %21154 = vst [vmem:[#allocation14_spill] sm:$0xff] %v17795_v46  ;;  %v6155_v6 = vadd.f32 %v6154_v28, %v6092_v29  ;;  %v6023_v14 = vadd.f32 %v6022_v11, %v17795_v46  ;;  %v6093_v21 = vmul.f32 %v17795_v46, %v17795_v46 }
 0x572   :  { %v6024_v4 = vadd.f32 %v17777_v8, %v6023_v14  ;;  %v6156_v36 = vadd.f32 %v6155_v6, %v6093_v21 }
 0x574   :  { %v6157_v9 = vadd.f32 %v6156_v36, %v6094_v32  ;;  %v17811_v16 = vpop.f32.mrb[48].mxu0  ;;  %v6025_v29 = vadd.f32 %v17793_v30, %v6024_v4 }
 0x575   :  { %21156 = vst [vmem:[#allocation16_spill] sm:$0xff] %v17811_v16  ;;  %v17814_v11 = vpop.f32.mrb[49].mxu0  ;;  %v6098_v4 = vmul.f32 %v17811_v16, %v17811_v16 }
 0x576   :  { %21157 = vst [vmem:[#allocation17_spill] sm:$0xff] %v17814_v11  ;;  %v6026_v49 = vadd.f32 %v6025_v29, %v17814_v11  ;;  %v6096_v28 = vmul.f32 %v17814_v11, %v17814_v11  ;;  %v6158_v14 = vadd.f32 %v6157_v9, %v6095_v43  ;;  %v17820_v6 = vpop.f32.mrb[50].mxu0 }
 0x577   :  { %21158 = vst [vmem:[#allocation18_spill] sm:$0xff] %v17820_v6  ;;  %v17822_v21 = vpop.f32.mrb[51].mxu0  ;;  %v6099_v54 = vmul.f32 %v17820_v6, %v17820_v6 }
 0x578   :  { %21159 = vst [vmem:[#allocation19_spill] sm:$0xff] %v17822_v21  ;;  %v6159_v32 = vadd.f32 %v6158_v14, %v6096_v28  ;;  %v6027_v36 = vadd.f32 %v6026_v49, %v17822_v21  ;;  %v6097_v34 = vmul.f32 %v17822_v21, %v17822_v21 }
 0x57a   :  { %v6028_v58 = vadd.f32 %v17811_v16, %v6027_v36  ;;  %v6160_v29 = vadd.f32 %v6159_v32, %v6097_v34 }
 0x57c   :  { %v6161_v43 = vadd.f32 %v6160_v29, %v6098_v4  ;;  %v17832_v9 = vpop.f32.mrb[52].mxu0  ;;  %v6029_v11 = vadd.f32 %v17820_v6, %v6028_v58 }
 0x57d   :  { %21160 = vst [vmem:[#allocation20_spill] sm:$0xff] %v17832_v9  ;;  %v17835_v28 = vpop.f32.mrb[53].mxu0  ;;  %v6102_v58 = vmul.f32 %v17832_v9, %v17832_v9 }
 0x57e   :  { %21161 = vst [vmem:[#allocation21_spill] sm:$0xff] %v17835_v28  ;;  %v6030_v49 = vadd.f32 %v6029_v11, %v17835_v28  ;;  %v6100_v14 = vmul.f32 %v17835_v28, %v17835_v28  ;;  %v6162_v21 = vadd.f32 %v6161_v43, %v6099_v54  ;;  %v17840_v30 = vpop.f32.mrb[54].mxu0 }
 0x57f   :  { %21162 = vst [vmem:[#allocation22_spill] sm:$0xff] %v17840_v30  ;;  %v17842_v36 = vpop.f32.mrb[55].mxu0  ;;  %v6103_v28 = vmul.f32 %v17840_v30, %v17840_v30 }
 0x580   :  { %21163 = vst [vmem:[#allocation23_spill] sm:$0xff] %v17842_v36  ;;  %v6163_v32 = vadd.f32 %v6162_v21, %v6100_v14  ;;  %v6031_v34 = vadd.f32 %v6030_v49, %v17842_v36  ;;  %v6101_v4 = vmul.f32 %v17842_v36, %v17842_v36 }
 0x582   :  { %v6032_v29 = vadd.f32 %v17832_v9, %v6031_v34  ;;  %v6164_v11 = vadd.f32 %v6163_v32, %v6101_v4 }
 0x584   :  { %v6165_v54 = vadd.f32 %v6164_v11, %v6102_v58  ;;  %v17852_v43 = vpop.f32.mrb[56].mxu0  ;;  %v6033_v6 = vadd.f32 %v17840_v30, %v6032_v29 }
 0x585   :  { %21164 = vst [vmem:[#allocation24_spill] sm:$0xff] %v17852_v43  ;;  %v17855_v21 = vpop.f32.mrb[57].mxu0  ;;  %v6106_v29 = vmul.f32 %v17852_v43, %v17852_v43 }
 0x586   :  { %21165 = vst [vmem:[#allocation25_spill] sm:$0xff] %v17855_v21  ;;  %v6034_v49 = vadd.f32 %v6033_v6, %v17855_v21  ;;  %v6104_v14 = vmul.f32 %v17855_v21, %v17855_v21  ;;  %v6166_v36 = vadd.f32 %v6165_v54, %v6103_v28  ;;  %v17860_v16 = vpop.f32.mrb[58].mxu0 }
 0x587   :  { %21166 = vst [vmem:[#allocation26_spill] sm:$0xff] %v17860_v16  ;;  %v17862_v34 = vpop.f32.mrb[59].mxu0  ;;  %v6107_v21 = vmul.f32 %v17860_v16, %v17860_v16 }
 0x588   :  { %21167 = vst [vmem:[#allocation27_spill] sm:$0xff] %v17862_v34  ;;  %v6167_v32 = vadd.f32 %v6166_v36, %v6104_v14  ;;  %v6035_v4 = vadd.f32 %v6034_v49, %v17862_v34  ;;  %v6105_v58 = vmul.f32 %v17862_v34, %v17862_v34 }
 0x58a   :  { %v6036_v11 = vadd.f32 %v17852_v43, %v6035_v4  ;;  %v6168_v6 = vadd.f32 %v6167_v32, %v6105_v58 }
 0x58c   :  { %v6169_v28 = vadd.f32 %v6168_v6, %v6106_v29  ;;  %v17872_v54 = vpop.f32.mrb[60].mxu0  ;;  %v6037_v30 = vadd.f32 %v17860_v16, %v6036_v11 }
 0x58d   :  { %21168 = vst [vmem:[#allocation28_spill] sm:$0xff] %v17872_v54  ;;  %v17875_v36 = vpop.f32.mrb[61].mxu0  ;;  %v6110_v29 = vmul.f32 %v17872_v54, %v17872_v54 }
 0x58e   :  { %21169 = vst [vmem:[#allocation29_spill] sm:$0xff] %v17875_v36  ;;  %v6038_v49 = vadd.f32 %v6037_v30, %v17875_v36  ;;  %v6108_v14 = vmul.f32 %v17875_v36, %v17875_v36  ;;  %v6170_v34 = vadd.f32 %v6169_v28, %v6107_v21  ;;  %v17880_v9 = vpop.f32.mrb[62].mxu0 }
 0x58f   :  { %v5711_v4 = vpop.f32.mrb[63].mxu0  ;;  %v6111_v16 = vmul.f32 %v17880_v9, %v17880_v9 }
 0x590   :  { %v6171_v32 = vadd.f32 %v6170_v34, %v6108_v14  ;;  %v6039_v58 = vadd.f32 %v6038_v49, %v5711_v4  ;;  %v6109_v43 = vmul.f32 %v5711_v4, %v5711_v4 }
 0x592   :  { %v6040_v6 = vadd.f32 %v17872_v54, %v6039_v58  ;;  %v6172_v11 = vadd.f32 %v6171_v32, %v6109_v43 }
 0x594   :  { %v6041_v30 = vadd.f32 %v17880_v9, %v6040_v6  ;;  %v6173_v8 = vadd.f32 %v6172_v11, %v6110_v29  ;;  %v6193_v29 = vlaneseq }
 0x596   :  { %v6042_v36 = vrot.slane %v6041_v30, 4  ;;  %v6174_v21 = vadd.f32 %v6173_v8, %v6111_v16  ;;  %v6194_v8 = vshrl.u32 %v6193_v29, 7 }
 0x598   :  { %v6043_v28 = vadd.f32 %v6042_v36, %v6041_v30  ;;  %v6175_v46 = vrot.slane %v6174_v21, 4 }
 0x59a   :  { %v6044_v61 = vrot.slane %v6043_v28, 2  ;;  %v6176_v34 = vadd.f32 %v6175_v46, %v6174_v21  ;;  %v6188_v46 = vld [vmem:[%s20941_s3] sm:$0x1] }
 0x59c   :  { %v6045_v49 = vadd.f32 %v6044_v61, %v6043_v28  ;;  %v6177_v14 = vrot.slane %v6176_v34, 2  ;;  %v17891_v61 = vsub.s32 0, %v6194_v8  ;;  %v21177_v8 = vld [vmem:[#allocation11_spill] sm:$0xff] }
 0x59e   :  { %v6046_v35 = vrot.slane %v6045_v49, 1  ;;  %v6178_v37 = vadd.f32 %v6177_v14, %v6176_v34  ;;  %21170 = vst [vmem:[#allocation30_spill] sm:$0xff] %v17891_v61  ;;  %v21172_v14 = vld [vmem:[#allocation5_spill] sm:$0xff] }
 0x5a0   :  { %v6047_v45 = vadd.f32 %v6046_v35, %v6045_v49  ;;  %v6179_v1 = vrot.slane %v6178_v37, 1  ;;  %v21171_v49 = vld [vmem:[#allocation4_spill] sm:$0xff] }
 0x5a2   :  { %v6180_v58 = vadd.f32 %v6179_v1, %v6178_v37  ;;  %v6181_v43 = vmul.f32 0.001953125, %v6047_v45  ;;  %v6190_v37 = vld [vmem:[%s20942_s4] sm:$0x1] }
 0x5a4   :  { %v6182_v32 = vmul.f32 0.001953125, %v6180_v58  ;;  %v6183_v54 = vmul.f32 %v6181_v43, %v6181_v43  ;;  %v21173_v58 = vld [vmem:[#allocation7_spill] sm:$0xff] }
 0x5a6   :  { %v6184_v52 = vsub.f32 %v6182_v32, %v6183_v54  ;;  %v21175_v32 = vld [vmem:[#allocation6_spill] sm:$0xff] }
 0x5a8   :  { %v6185_v53 = vmax.f32 %v6184_v52, 0.0 }
 0x5aa   :  { %v6186_v6 = vadd.f32 1e-05, %v6185_v53 }
 0x5ac   :  { %16513 = vrsqrt.f32 %v6186_v6  ;;  %v21176_v6 = vld [vmem:[#allocation8_spill] sm:$0xff] }
 0x5b6   :  { %v16514_v16 = vpop.eup %16513 }
 0x5b7   :  { %v6189_v36 = vmul.f32 %v16514_v16, %v6188_v46  ;;  %v21178_v16 = vld [vmem:[#allocation14_spill] sm:$0xff] }
 0x5b9   :  { %v6191_v1 = vmul.f32 %v6189_v36, %v6181_v43  ;;  %v17897_v35 = vrot.slane %v6189_v36, %v17891_v61  ;;  %v21174_v43 = vld [vmem:[#allocation9_spill] sm:$0xff] }
 0x5bb   :  { %v6192_v53 = vsub.f32 %v6190_v37, %v6191_v1  ;;  %v6258_v52 = vmul.f32 %v17897_v35, %v5711_v4  ;;  %v17902_v45 = vmul.f32 %v17897_v35, %v17542_v25  ;;  %v17906_v54 = vmul.f32 %v17897_v35, %v17546_v42  ;;  %v21179_v37 = vld [vmem:[#allocation10_spill] sm:$0xff] }
 0x5bc   :  { %v17910_v11 = vmul.f32 %v17540_v3, %v17897_v35  ;;  %v17914_v30 = vmul.f32 %v17544_v10, %v17897_v35  ;;  %v17918_v21 = vmul.f32 %v17897_v35, %v17562_v40  ;;  %v17922_v25 = vmul.f32 %v17897_v35, %v17569_v19 }
 0x5bd   :  { %v17925_v4 = vrot.slane %v6192_v53, %v17891_v61  ;;  %v17929_v42 = vmul.f32 %v17559_v31, %v17897_v35  ;;  %v17933_v3 = vmul.f32 %v17567_v7, %v17897_v35  ;;  %v17937_v10 = vmul.f32 %v17897_v35, %v17582_v33  ;;  %v21180_v53 = vld [vmem:[#allocation13_spill] sm:$0xff]  ;;  %v21193_v61 = vld [vmem:[#allocation22_spill] sm:$0xff] }
 0x5be   :  { %v17941_v40 = vmul.f32 %v17897_v35, %v17589_v0  ;;  %v17945_v19 = vmul.f32 %v17579_v48, %v17897_v35  ;;  %v17949_v31 = vmul.f32 %v17587_v15, %v17897_v35  ;;  %v17953_v7 = vmul.f32 %v17897_v35, %v17602_v2 }
 0x5bf   :  { %v6328_v28 = vadd.f32 %v17925_v4, %v6258_v52  ;;  %v17958_v33 = vmul.f32 %v17897_v35, %v17609_v24  ;;  %v17962_v0 = vmul.f32 %v17599_v59, %v17897_v35  ;;  %v17966_v48 = vmul.f32 %v17607_v23, %v17897_v35 }
 0x5c0   :  { %v17970_v15 = vmul.f32 %v17897_v35, %v17622_v63  ;;  %v17974_v2 = vmul.f32 %v17897_v35, %v17629_v13  ;;  %v17978_v24 = vmul.f32 %v17619_v62, %v17897_v35  ;;  %v17982_v59 = vmul.f32 %v17627_v39, %v17897_v35 }
 0x5c1   :  { %v6392_v34 = vmax.f32 %v6328_v28, 0.0  ;;  %v17986_v23 = vmul.f32 %v17897_v35, %v17642_v57  ;;  %v17990_v63 = vmul.f32 %v17897_v35, %v17649_v27  ;;  %v17994_v13 = vmul.f32 %v17639_v20, %v17897_v35  ;;  %v21181_v28 = vld [vmem:[#allocation17_spill] sm:$0xff] }
 0x5c2   :  { %v17998_v62 = vmul.f32 %v17647_v26, %v17897_v35  ;;  %v18002_v39 = vmul.f32 %v17897_v35, %v17662_v51  ;;  %v18006_v57 = vmul.f32 %v17897_v35, %v17669_v18  ;;  %v18010_v27 = vmul.f32 %v17659_v44, %v17897_v35 }
 0x5c3   :  { %v18014_v20 = vmul.f32 %v17667_v17, %v17897_v35  ;;  %v18018_v26 = vmul.f32 %v17897_v35, %v17682_v5  ;;  %v18022_v51 = vmul.f32 %v17897_v35, %v17689_v47  ;;  %v18026_v18 = vmul.f32 %v17679_v60, %v17897_v35  ;;  %6456 = vst [vmem:[#allocation2 + $0x321] sm:$0xff] %v6392_v34 }
 0x5c4   :  { %v18030_v44 = vmul.f32 %v17687_v22, %v17897_v35  ;;  %v18034_v17 = vmul.f32 %v17897_v35, %v17702_v41  ;;  %v18038_v5 = vmul.f32 %v17897_v35, %v17712_v50  ;;  %v18042_v47 = vmul.f32 %v17699_v12, %v17897_v35 }
 0x5c5   :  { %v18046_v60 = vmul.f32 %v17710_v38, %v17897_v35  ;;  %v18050_v22 = vmul.f32 %v17897_v35, %v17728_v56  ;;  %v18054_v41 = vmul.f32 %v17897_v35, %v17738_v55  ;;  %v18058_v50 = vmul.f32 %v21171_v49, %v17897_v35  ;;  %v21182_v49 = vld [vmem:[#allocation19_spill] sm:$0xff] }
 0x5c6   :  { %v18062_v12 = vmul.f32 %v21172_v14, %v17897_v35  ;;  %v18066_v38 = vmul.f32 %v17897_v35, %v21173_v58  ;;  %v18070_v56 = vmul.f32 %v17897_v35, %v21174_v43  ;;  %v18074_v55 = vmul.f32 %v21175_v32, %v17897_v35  ;;  %v21183_v58 = vld [vmem:[#allocation16_spill] sm:$0xff]  ;;  %v21185_v32 = vld [vmem:[#allocation18_spill] sm:$0xff] }
 0x5c7   :  { %v18078_v29 = vmul.f32 %v21176_v6, %v17897_v35  ;;  %v18082_v46 = vmul.f32 %v17897_v35, %v21177_v8  ;;  %v18086_v36 = vmul.f32 %v17897_v35, %v21178_v16  ;;  %v18090_v1 = vmul.f32 %v21179_v37, %v17897_v35  ;;  %v21187_v8 = vld [vmem:[#allocation21_spill] sm:$0xff]  ;;  %v21189_v37 = vld [vmem:[#allocation23_spill] sm:$0xff] }
 0x5c8   :  { %v18094_v52 = vmul.f32 %v21180_v53, %v17897_v35  ;;  %v18098_v34 = vmul.f32 %v17897_v35, %v21181_v28  ;;  %v18102_v14 = vmul.f32 %v17897_v35, %v21182_v49  ;;  %v18106_v43 = vmul.f32 %v21183_v58, %v17897_v35  ;;  %v21191_v28 = vld [vmem:[#allocation20_spill] sm:$0xff] }
 0x5c9   :  { %v18110_v6 = vmul.f32 %v21185_v32, %v17897_v35  ;;  %v18114_v16 = vmul.f32 %v17897_v35, %v21187_v8  ;;  %v18118_v53 = vmul.f32 %v17897_v35, %v21189_v37  ;;  %v18122_v49 = vmul.f32 %v21191_v28, %v17897_v35 }
 0x5ca   :  { %21184 = vst [vmem:[#allocation31_spill] sm:$0xff] %v18106_v43  ;;  %v18126_v58 = vmul.f32 %v21193_v61, %v17897_v35  ;;  %v21195_v43 = vld [vmem:[#allocation25_spill] sm:$0xff] }
 0x5cb   :  { %21186 = vst [vmem:[#allocation32_spill] sm:$0xff] %v18110_v6  ;;  %21188 = vst [vmem:[#allocation33_spill] sm:$0xff] %v18114_v16  ;;  %v18130_v32 = vmul.f32 %v17897_v35, %v21195_v43  ;;  %v21196_v6 = vld [vmem:[#allocation27_spill] sm:$0xff]  ;;  %v21197_v16 = vld [vmem:[#allocation24_spill] sm:$0xff] }
 0x5cc   :  { %21190 = vst [vmem:[#allocation34_spill] sm:$0xff] %v18118_v53  ;;  %21192 = vst [vmem:[#allocation35_spill] sm:$0xff] %v18122_v49  ;;  %v18134_v8 = vmul.f32 %v17897_v35, %v21196_v6  ;;  %v18138_v37 = vmul.f32 %v21197_v16, %v17897_v35  ;;  %v21198_v53 = vld [vmem:[#allocation26_spill] sm:$0xff]  ;;  %v21199_v49 = vld [vmem:[#allocation29_spill] sm:$0xff]  ;;  %v18154_v6 = vmul.f32 %v17880_v9, %v17897_v35 }
 0x5cd   :  { %21194 = vst [vmem:[#allocation36_spill] sm:$0xff] %v18126_v58  ;;  %v18142_v28 = vmul.f32 %v21198_v53, %v17897_v35  ;;  %v18146_v61 = vmul.f32 %v17897_v35, %v21199_v49  ;;  %v21200_v58 = vld [vmem:[#allocation28_spill] sm:$0xff]  ;;  %v18158_v16 = vadd.f32 %v17925_v4, %v17902_v45  ;;  %v18162_v53 = vadd.f32 %v17925_v4, %v17906_v54 }
 0x5ce   :  { %v18150_v43 = vmul.f32 %v21200_v58, %v17897_v35  ;;  %v18166_v49 = vadd.f32 %v17925_v4, %v17910_v11  ;;  %v18170_v58 = vadd.f32 %v17925_v4, %v17914_v30  ;;  %v18174_v9 = vadd.f32 %v17925_v4, %v17918_v21 }
 0x5cf   :  { %v18178_v35 = vadd.f32 %v17925_v4, %v17922_v25  ;;  %v18182_v45 = vadd.f32 %v17925_v4, %v17929_v42  ;;  %v18186_v54 = vadd.f32 %v17925_v4, %v17933_v3  ;;  %v18190_v11 = vadd.f32 %v17925_v4, %v17937_v10 }
 0x5d0   :  { %v18194_v30 = vadd.f32 %v17925_v4, %v17941_v40  ;;  %v18198_v21 = vadd.f32 %v17925_v4, %v17945_v19  ;;  %v18202_v25 = vadd.f32 %v17925_v4, %v17949_v31  ;;  %v18206_v42 = vadd.f32 %v17925_v4, %v17953_v7 }
 0x5d1   :  { %v18210_v3 = vadd.f32 %v17925_v4, %v17958_v33  ;;  %v18214_v10 = vadd.f32 %v17925_v4, %v17962_v0  ;;  %v18218_v40 = vadd.f32 %v17925_v4, %v17966_v48  ;;  %v18222_v19 = vadd.f32 %v17925_v4, %v17970_v15 }
 0x5d2   :  { %v18226_v31 = vadd.f32 %v17925_v4, %v17974_v2  ;;  %v18230_v7 = vadd.f32 %v17925_v4, %v17978_v24  ;;  %v18234_v33 = vadd.f32 %v17925_v4, %v17982_v59  ;;  %v18238_v0 = vadd.f32 %v17925_v4, %v17986_v23 }
 0x5d3   :  { %v18242_v48 = vadd.f32 %v17925_v4, %v17990_v63  ;;  %v18246_v15 = vadd.f32 %v17925_v4, %v17994_v13  ;;  %v18250_v2 = vadd.f32 %v17925_v4, %v17998_v62  ;;  %v18254_v24 = vadd.f32 %v17925_v4, %v18002_v39 }
 0x5d4   :  { %v18258_v59 = vadd.f32 %v17925_v4, %v18006_v57  ;;  %v18262_v23 = vadd.f32 %v17925_v4, %v18010_v27  ;;  %v18266_v63 = vadd.f32 %v17925_v4, %v18014_v20  ;;  %v18270_v13 = vadd.f32 %v17925_v4, %v18018_v26 }
 0x5d5   :  { %v18274_v62 = vadd.f32 %v17925_v4, %v18022_v51  ;;  %v18278_v39 = vadd.f32 %v17925_v4, %v18026_v18  ;;  %v18282_v57 = vadd.f32 %v17925_v4, %v18030_v44  ;;  %v18286_v27 = vadd.f32 %v17925_v4, %v18034_v17 }
 0x5d6   :  { %v18290_v20 = vadd.f32 %v17925_v4, %v18038_v5  ;;  %v18294_v26 = vadd.f32 %v17925_v4, %v18042_v47  ;;  %v18298_v51 = vadd.f32 %v17925_v4, %v18046_v60  ;;  %v18302_v18 = vadd.f32 %v17925_v4, %v18050_v22 }
 0x5d7   :  { %v18306_v44 = vadd.f32 %v17925_v4, %v18054_v41  ;;  %v18310_v17 = vadd.f32 %v17925_v4, %v18058_v50  ;;  %v18314_v5 = vadd.f32 %v17925_v4, %v18062_v12  ;;  %v18318_v47 = vadd.f32 %v17925_v4, %v18066_v38 }
 0x5d8   :  { %21201 = vst [vmem:[#allocation4_spill] sm:$0xff] %v18302_v18  ;;  %v18322_v60 = vadd.f32 %v17925_v4, %v18070_v56  ;;  %v18326_v22 = vadd.f32 %v17925_v4, %v18074_v55  ;;  %v18330_v41 = vadd.f32 %v17925_v4, %v18078_v29  ;;  %v18334_v50 = vadd.f32 %v17925_v4, %v18082_v46  ;;  %v21214_v46 = vld [vmem:[#allocation31_spill] sm:$0xff] }
 0x5d9   :  { %21202 = vst [vmem:[#allocation5_spill] sm:$0xff] %v18306_v44  ;;  %21203 = vst [vmem:[#allocation7_spill] sm:$0xff] %v18314_v5  ;;  %v18338_v12 = vadd.f32 %v17925_v4, %v18086_v36  ;;  %v18342_v38 = vadd.f32 %v17925_v4, %v18090_v1  ;;  %v18346_v56 = vadd.f32 %v17925_v4, %v18094_v52 }
 0x5da   :  { %21204 = vst [vmem:[#allocation9_spill] sm:$0xff] %v18318_v47  ;;  %21205 = vst [vmem:[#allocation6_spill] sm:$0xff] %v18322_v60  ;;  %v18350_v55 = vadd.f32 %v17925_v4, %v18098_v34  ;;  %v18354_v29 = vadd.f32 %v17925_v4, %v18102_v14  ;;  %v18358_v36 = vadd.f32 %v17925_v4, %v21214_v46 }
 0x5db   :  { %21206 = vst [vmem:[#allocation8_spill] sm:$0xff] %v18326_v22  ;;  %21207 = vst [vmem:[#allocation11_spill] sm:$0xff] %v18330_v41 }
 0x5dc   :  { %21208 = vst [vmem:[#allocation14_spill] sm:$0xff] %v18334_v50  ;;  %21209 = vst [vmem:[#allocation10_spill] sm:$0xff] %v18338_v12  ;;  %v21215_v12 = vld [vmem:[#allocation32_spill] sm:$0xff] }
 0x5dd   :  { %21210 = vst [vmem:[#allocation13_spill] sm:$0xff] %v18342_v38  ;;  %21211 = vst [vmem:[#allocation17_spill] sm:$0xff] %v18346_v56  ;;  %v18362_v1 = vadd.f32 %v17925_v4, %v21215_v12  ;;  %v21216_v38 = vld [vmem:[#allocation33_spill] sm:$0xff]  ;;  %v21218_v56 = vld [vmem:[#allocation34_spill] sm:$0xff]  ;;  %v18382_v12 = vadd.f32 %v17925_v4, %v18130_v32  ;;  %v18402_v32 = vadd.f32 %v17925_v4, %v18150_v43  ;;  %v21227_v43 = vmax.f32 %v18170_v58, 0.0 }
 0x5de   :  { %21212 = vst [vmem:[#allocation19_spill] sm:$0xff] %v18350_v55  ;;  %21213 = vst [vmem:[#allocation16_spill] sm:$0xff] %v18354_v29  ;;  %v18366_v52 = vadd.f32 %v17925_v4, %v21216_v38  ;;  %v18370_v34 = vadd.f32 %v17925_v4, %v21218_v56  ;;  %v21219_v55 = vld [vmem:[#allocation35_spill] sm:$0xff]  ;;  %v21220_v29 = vld [vmem:[#allocation36_spill] sm:$0xff]  ;;  %v18386_v38 = vadd.f32 %v17925_v4, %v18134_v8 }
 0x5df   :  { %v18374_v14 = vadd.f32 %v17925_v4, %v21219_v55  ;;  %v18378_v46 = vadd.f32 %v17925_v4, %v21220_v29  ;;  %v18390_v56 = vadd.f32 %v17925_v4, %v18138_v37  ;;  %v18394_v55 = vadd.f32 %v17925_v4, %v18142_v28  ;;  %21225 = vst [vmem:[#allocation25_spill] sm:$0xff] %v18402_v32 }
 0x5e0   :  { %21217 = vst [vmem:[#allocation18_spill] sm:$0xff] %v18366_v52  ;;  %21221 = vst [vmem:[#allocation21_spill] sm:$0xff] %v18386_v38  ;;  %v18398_v29 = vadd.f32 %v17925_v4, %v18146_v61  ;;  %v18406_v8 = vadd.f32 %v17925_v4, %v18154_v6  ;;  %v21016_v38 = vmax.f32 %v18158_v16, 0.0  ;;  %v21017_v37 = vmax.f32 %v18162_v53, 0.0 }
 0x5e1   :  { %21222 = vst [vmem:[#allocation23_spill] sm:$0xff] %v18390_v56  ;;  %21223 = vst [vmem:[#allocation20_spill] sm:$0xff] %v18394_v55  ;;  %v21018_v55 = vmax.f32 %v18174_v9, 0.0  ;;  %v21019_v61 = vmax.f32 %v18178_v35, 0.0  ;;  %v21020_v32 = vmax.f32 %v18190_v11, 0.0  ;;  %v21021_v4 = vmax.f32 %v18194_v30, 0.0 }
 0x5e2   :  { %21224 = vst [vmem:[#allocation22_spill] sm:$0xff] %v18398_v29  ;;  %6395 = vst [vmem:[#allocation2 + $0x19] sm:$0xff] %v21016_v38  ;;  %v21226_v29 = vmax.f32 %v18166_v49, 0.0  ;;  %v21022_v38 = vmax.f32 %v18210_v3, 0.0  ;;  %v21023_v6 = vmax.f32 %v18214_v10, 0.0  ;;  %v6362_v56 = vmax.f32 %v18282_v57, 0.0 }
 0x5e3   :  { %6396 = vst [vmem:[#allocation2 + $0x21] sm:$0xff] %v21017_v37  ;;  %6398 = vst [vmem:[#allocation2 + $0x39] sm:$0xff] %v21227_v43  ;;  %v21228_v37 = vmax.f32 %v18182_v45, 0.0  ;;  %v21024_v43 = vmax.f32 %v18226_v31, 0.0  ;;  %v21028_v28 = vmax.f32 %v18286_v27, 0.0 }
 0x5e4   :  { %6397 = vst [vmem:[#allocation2 + $0x31] sm:$0xff] %v21226_v29  ;;  %6399 = vst [vmem:[#allocation2 + $0x49] sm:$0xff] %v21018_v55  ;;  %v21229_v29 = vmax.f32 %v18186_v54, 0.0  ;;  %v21026_v55 = vmax.f32 %v18246_v15, 0.0  ;;  %v21248_v57 = vld [vmem:[#allocation17_spill] sm:$0xff] }
 0x5e5   :  { %6400 = vst [vmem:[#allocation2 + $0x51] sm:$0xff] %v21019_v61  ;;  %6401 = vst [vmem:[#allocation2 + $0x61] sm:$0xff] %v21228_v37  ;;  %v21230_v61 = vmax.f32 %v18198_v21, 0.0  ;;  %v21231_v37 = vmax.f32 %v18202_v25, 0.0 }
 0x5e6   :  { %6402 = vst [vmem:[#allocation2 + $0x69] sm:$0xff] %v21229_v29  ;;  %6403 = vst [vmem:[#allocation2 + $0x79] sm:$0xff] %v21020_v32  ;;  %v21232_v29 = vmax.f32 %v18206_v42, 0.0  ;;  %v21025_v32 = vmax.f32 %v18242_v48, 0.0 }
 0x5e7   :  { %6404 = vst [vmem:[#allocation2 + $0x81] sm:$0xff] %v21021_v4  ;;  %6405 = vst [vmem:[#allocation2 + $0x91] sm:$0xff] %v21230_v61  ;;  %v21233_v61 = vmax.f32 %v18218_v40, 0.0  ;;  %v6361_v4 = vmax.f32 %v18278_v39, 0.0  ;;  %v21249_v39 = vld [vmem:[#allocation19_spill] sm:$0xff] }
 0x5e8   :  { %6406 = vst [vmem:[#allocation2 + $0x99] sm:$0xff] %v21231_v37  ;;  %6407 = vst [vmem:[#allocation2 + $0xa9] sm:$0xff] %v21232_v29  ;;  %v21234_v37 = vmax.f32 %v18222_v19, 0.0  ;;  %v21027_v29 = vmax.f32 %v18258_v59, 0.0 }
 0x5e9   :  { %6408 = vst [vmem:[#allocation2 + $0xb1] sm:$0xff] %v21022_v38  ;;  %6409 = vst [vmem:[#allocation2 + $0xc1] sm:$0xff] %v21023_v6  ;;  %v21235_v38 = vmax.f32 %v18230_v7, 0.0  ;;  %v21236_v6 = vmax.f32 %v18234_v33, 0.0 }
 0x5ea   :  { %6410 = vst [vmem:[#allocation2 + $0xc9] sm:$0xff] %v21233_v61  ;;  %6411 = vst [vmem:[#allocation2 + $0xd9] sm:$0xff] %v21234_v37  ;;  %v21237_v61 = vmax.f32 %v18238_v0, 0.0  ;;  %v21029_v37 = vmax.f32 %v18274_v62, 0.0 }
 0x5eb   :  { %6412 = vst [vmem:[#allocation2 + $0xe1] sm:$0xff] %v21024_v43  ;;  %6413 = vst [vmem:[#allocation2 + $0xf1] sm:$0xff] %v21235_v38  ;;  %v21238_v38 = vmax.f32 %v18250_v2, 0.0  ;;  %v21243_v43 = vmax.f32 %v18294_v26, 0.0 }
 0x5ec   :  { %6414 = vst [vmem:[#allocation2 + $0xf9] sm:$0xff] %v21236_v6  ;;  %6415 = vst [vmem:[#allocation2 + $0x109] sm:$0xff] %v21237_v61  ;;  %v21239_v6 = vmax.f32 %v18254_v24, 0.0  ;;  %v21030_v61 = vmax.f32 %v18290_v20, 0.0 }
 0x5ed   :  { %6416 = vst [vmem:[#allocation2 + $0x111] sm:$0xff] %v21025_v32  ;;  %6417 = vst [vmem:[#allocation2 + $0x121] sm:$0xff] %v21026_v55  ;;  %v21240_v32 = vmax.f32 %v18262_v23, 0.0  ;;  %v21241_v55 = vmax.f32 %v18266_v63, 0.0 }
 0x5ee   :  { %6418 = vst [vmem:[#allocation2 + $0x129] sm:$0xff] %v21238_v38  ;;  %6419 = vst [vmem:[#allocation2 + $0x139] sm:$0xff] %v21239_v6  ;;  %v21242_v38 = vmax.f32 %v18270_v13, 0.0  ;;  %v21033_v6 = vmax.f32 %v18306_v44, 0.0  ;;  %v21271_v44 = vmax.f32 %v18370_v34, 0.0 }
 0x5ef   :  { %6420 = vst [vmem:[#allocation2 + $0x141] sm:$0xff] %v21027_v29  ;;  %6421 = vst [vmem:[#allocation2 + $0x151] sm:$0xff] %v21240_v32  ;;  %v6464_v32 = vld [vmem:[#allocation2 + $0x38] sm:$0xff]  ;;  %v6394_v29 = vmax.f32 %v18406_v8, 0.0  ;;  %v16450_v8 = vld [vmem:[%s20940_s2 + $0x48] sm:$0xff]  }
 0x5f0   :  { %6422 = vst [vmem:[#allocation2 + $0x159] sm:$0xff] %v21241_v55  ;;  %6423 = vst [vmem:[#allocation2 + $0x169] sm:$0xff] %v21242_v38  ;;  %v21247_v55 = vld [vmem:[#allocation13_spill] sm:$0xff] }
 0x5f1   :  { %6424 = vst [vmem:[#allocation2 + $0x171] sm:$0xff] %v21029_v37  ;;  %6425 = vst [vmem:[#allocation2 + $0x181] sm:$0xff] %v6361_v4  ;;  %v21244_v4 = vmax.f32 %v18298_v51, 0.0  ;;  %v6462_v37 = vld [vmem:[#allocation2 + $0x20] sm:$0xff] }
 0x5f2   :  { %6426 = vst [vmem:[#allocation2 + $0x189] sm:$0xff] %v6362_v56  ;;  %6427 = vst [vmem:[#allocation2 + $0x1c9] sm:$0xff] %v21028_v28  ;;  %v21245_v56 = vmax.f32 %v18302_v18, 0.0  ;;  %v21246_v28 = vld [vmem:[#allocation10_spill] sm:$0xff]  ;;  %v21253_v18 = vld [vmem:[#allocation16_spill] sm:$0xff] }
 0x5f3   :  { %6428 = vst [vmem:[#allocation2 + $0x1d1] sm:$0xff] %v21030_v61  ;;  %6429 = vst [vmem:[#allocation2 + $0x1e1] sm:$0xff] %v21243_v43  ;;  %v21250_v61 = vmax.f32 %v18310_v17, 0.0  ;;  %v21251_v43 = vmax.f32 %v18314_v5, 0.0  ;;  %v21265_v5 = vld [vmem:[#allocation22_spill] sm:$0xff] }
 0x5f4   :  { %6430 = vst [vmem:[#allocation2 + $0x1e9] sm:$0xff] %v21244_v4  ;;  %6431 = vst [vmem:[#allocation2 + $0x1f9] sm:$0xff] %v21245_v56  ;;  %v21252_v4 = vmax.f32 %v18318_v47, 0.0  ;;  %v6461_v56 = vld [vmem:[#allocation2 + $0x18] sm:$0xff]  ;;  %v6463_v47 = vld [vmem:[#allocation2 + $0x30] sm:$0xff] }
 0x5f5   :  { %6432 = vst [vmem:[#allocation2 + $0x201] sm:$0xff] %v21033_v6  ;;  %6433 = vst [vmem:[#allocation2 + $0x211] sm:$0xff] %v21250_v61  ;;  %v21254_v6 = vmax.f32 %v18322_v60, 0.0  ;;  %v21255_v61 = vmax.f32 %v18326_v22, 0.0  ;;  %v21264_v22 = vld [vmem:[#allocation20_spill] sm:$0xff]  ;;  %v21272_v60 = vmax.f32 %v18374_v14, 0.0 }
 0x5f6   :  { %6434 = vst [vmem:[#allocation2 + $0x219] sm:$0xff] %v21251_v43  ;;  %6435 = vst [vmem:[#allocation2 + $0x229] sm:$0xff] %v21252_v4  ;;  %v21256_v43 = vmax.f32 %v18330_v41, 0.0  ;;  %v21257_v4 = vmax.f32 %v18334_v50, 0.0  ;;  %v21262_v50 = vld [vmem:[#allocation21_spill] sm:$0xff]  ;;  %v21263_v41 = vld [vmem:[#allocation23_spill] sm:$0xff] }
 0x5f7   :  { %6436 = vst [vmem:[#allocation2 + $0x231] sm:$0xff] %v21254_v6  ;;  %6437 = vst [vmem:[#allocation2 + $0x241] sm:$0xff] %v21255_v61  ;;  %v21258_v6 = vmax.f32 %v21246_v28, 0.0  ;;  %v21259_v61 = vmax.f32 %v21247_v55, 0.0  ;;  %v21266_v28 = vmax.f32 %v21253_v18, 0.0 }
 0x5f8   :  { %6438 = vst [vmem:[#allocation2 + $0x249] sm:$0xff] %v21256_v43  ;;  %6439 = vst [vmem:[#allocation2 + $0x259] sm:$0xff] %v21257_v4  ;;  %v21260_v43 = vmax.f32 %v21248_v57, 0.0  ;;  %v21261_v4 = vmax.f32 %v21249_v39, 0.0 }
 0x5f9   :  { %6440 = vst [vmem:[#allocation2 + $0x261] sm:$0xff] %v21258_v6  ;;  %6441 = vst [vmem:[#allocation2 + $0x271] sm:$0xff] %v21259_v61  ;;  %v21267_v6 = vmax.f32 %v18358_v36, 0.0  ;;  %v21268_v61 = vmax.f32 %v18362_v1, 0.0 }
 0x5fa   :  { %6442 = vst [vmem:[#allocation2 + $0x279] sm:$0xff] %v21260_v43  ;;  %6443 = vst [vmem:[#allocation2 + $0x289] sm:$0xff] %v21261_v4  ;;  %v21269_v43 = vmax.f32 %v18366_v52, 0.0  ;;  %v21270_v4 = vld [vmem:[#allocation25_spill] sm:$0xff]  ;;  %v18583_v52 = vpack.c.bf16 %v6464_v32, %v6463_v47  ;;  %v21279_v47 = vmax.f32 %v18158_v16, 0.0  ;;  %v21284_v16 = vmax.f32 %v18174_v9, 0.0 }
 0x5fb   :  { %6444 = vst [vmem:[#allocation2 + $0x291] sm:$0xff] %v21266_v28  ;;  %6445 = vst [vmem:[#allocation2 + $0x2a1] sm:$0xff] %v21267_v6  ;;  %v6393_v38 = vmax.f32 %v21270_v4, 0.0  ;;  %v21273_v28 = vmax.f32 %v18378_v46, 0.0  ;;  %v21274_v6 = vmax.f32 %v18382_v12, 0.0  ;;  %v21278_v4 = vmax.f32 %v21265_v5, 0.0 }
 0x5fc   :  { %6446 = vst [vmem:[#allocation2 + $0x2a9] sm:$0xff] %v21268_v61  ;;  %6447 = vst [vmem:[#allocation2 + $0x2b9] sm:$0xff] %v21269_v43  ;;  %v18581_v61 = vpack.c.bf16 %v6462_v37, %v6461_v56  ;;  %v21275_v43 = vmax.f32 %v21262_v50, 0.0  ;;  %v21280_v37 = vmax.f32 %v18162_v53, 0.0  ;;  %v21281_v56 = vld [vmem:[#allocation15_spill] sm:$0xff]  ;;  %v21285_v53 = vmax.f32 %v18178_v35, 0.0 }
 0x5fd   :  { %6448 = vst [vmem:[#allocation2 + $0x2c1] sm:$0xff] %v21271_v44  ;;  %6449 = vst [vmem:[#allocation2 + $0x2d1] sm:$0xff] %v21272_v60  ;;  %v21276_v44 = vmax.f32 %v21263_v41, 0.0  ;;  %v21277_v60 = vmax.f32 %v21264_v22, 0.0  ;;  %v21290_v9 = vmax.f32 %v18198_v21, 0.0  ;;  %v21291_v35 = vmax.f32 %v18202_v25, 0.0 }
 0x5fe   :  { %6450 = vst [vmem:[#allocation2 + $0x2d9] sm:$0xff] %v21273_v28  ;;  %6451 = vst [vmem:[#allocation2 + $0x2e9] sm:$0xff] %v21274_v6  ;;  %14641 = vmatmul.mubr.bf16.vlgmr.msra.gmra.mrb[0].mxu1 %v18581_v61  ;;  %v18601_v32 = vpack.c.bf16 %v21280_v37, %v21279_v47  ;;  %v21282_v28 = vmax.f32 %v18166_v49, 0.0  ;;  %v21283_v6 = vmax.f32 %v18170_v58, 0.0  ;;  %v21288_v58 = vmax.f32 %v18190_v11, 0.0  ;;  %v6465_v37 = vld [vmem:[#allocation2 + $0x48] sm:$0xff] }
 0x5ff   :  { %6452 = vst [vmem:[#allocation2 + $0x2f1] sm:$0xff] %v21275_v43  ;;  %6453 = vst [vmem:[#allocation2 + $0x301] sm:$0xff] %v21276_v44  ;;  %14644 = vmatprep.mubr.bf16.mxu1 %v18583_v52  ;;  %14705 = vmatpush3.bf16.msra.mxu1 %v21281_v56  ;;  %v21286_v44 = vmax.f32 %v18182_v45, 0.0  ;;  %v6466_v56 = vld [vmem:[#allocation2 + $0x50] sm:$0xff]  ;;  %v21292_v45 = vmax.f32 %v18206_v42, 0.0  ;;  %v6468_v11 = vld [vmem:[#allocation2 + $0x68] sm:$0xff] }
 0x600   :  { %6454 = vst [vmem:[#allocation2 + $0x309] sm:$0xff] %v21277_v60  ;;  %6455 = vst [vmem:[#allocation2 + $0x319] sm:$0xff] %v21278_v4  ;;  %v18609_v43 = vpack.c.bf16 %v21283_v6, %v21282_v28  ;;  %14706 = vmatprep.subr.bf16.mxu1 %v16450_v8  ;;  %v21287_v60 = vmax.f32 %v18186_v54, 0.0  ;;  %v21289_v4 = vmax.f32 %v18194_v30, 0.0  ;;  %v18636_v28 = vpack.c.bf16 %v21291_v35, %v21290_v9 }
 0x601   :  { %6457 = vst [vmem:[#allocation2 + $0x331] sm:$0xff] %v6393_v38  ;;  %6458 = vst [vmem:[#allocation2 + $0x339] sm:$0xff] %v6394_v29  ;;  %v16451_v29 = vld [vmem:[%s20940_s2 + $0x50] sm:$0xff]   ;;  %v18618_v38 = vpack.c.bf16 %v21285_v53, %v21284_v16  ;;  %v21293_v54 = vmax.f32 %v18210_v3, 0.0  ;;  %v6467_v16 = vld [vmem:[#allocation2 + $0x60] sm:$0xff]  ;;  %v21294_v30 = vmax.f32 %v18214_v10, 0.0  ;;  %v18674_v35 = vpack.c.bf16 %v6466_v56, %v6465_v37 }
 0x602   :  { %v18624_v49 = vpack.c.bf16 %v21287_v60, %v21286_v44  ;;  %v18630_v47 = vpack.c.bf16 %v21289_v4, %v21288_v58  ;;  %v21295_v53 = vmax.f32 %v18218_v40, 0.0  ;;  %v21296_v21 = vmax.f32 %v18222_v19, 0.0 }
 0x603   :  { %v18642_v6 = vpack.c.bf16 %v21293_v54, %v21292_v45  ;;  %v21297_v25 = vmax.f32 %v18226_v31, 0.0  ;;  %v21298_v42 = vmax.f32 %v18230_v7, 0.0  ;;  %v21299_v3 = vmax.f32 %v18234_v33, 0.0  ;;  %14707 = vmatpush3.bf16.msra.mxu1 %v16450_v8  ;;  %v16452_v7 = vld [vmem:[%s20940_s2 + $0x58] sm:$0xff]  }
 0x604   :  { %v18648_v44 = vpack.c.bf16 %v21295_v53, %v21294_v30  ;;  %v21300_v4 = vmax.f32 %v18238_v0, 0.0  ;;  %v21301_v10 = vmax.f32 %v18242_v48, 0.0  ;;  %v21302_v9 = vmax.f32 %v18246_v15, 0.0  ;;  %14708 = vmatprep.subr.bf16.mxu1 %v16451_v29 }
 0x605   :  { %v18654_v60 = vpack.c.bf16 %v21297_v25, %v21296_v21  ;;  %v18660_v58 = vpack.c.bf16 %v21299_v3, %v21298_v42  ;;  %v21303_v19 = vmax.f32 %v18250_v2, 0.0  ;;  %v21304_v33 = vmax.f32 %v18254_v24, 0.0  ;;  %v21316_v21 = vld [vmem:[#allocation5_spill] sm:$0xff] }
 0x606   :  { %v18666_v40 = vpack.c.bf16 %v21301_v10, %v21300_v4  ;;  %v21305_v0 = vmax.f32 %v18258_v59, 0.0  ;;  %v21306_v8 = vmax.f32 %v18262_v23, 0.0  ;;  %v21307_v15 = vmax.f32 %v18266_v63, 0.0  ;;  %14645 = vmatmul.mubr.bf16.gmra.mrb[4].mxu1 %v18674_v35  ;;  %v21321_v3 = vld [vmem:[#allocation9_spill] sm:$0xff]  ;;  %v21323_v4 = vld [vmem:[#allocation6_spill] sm:$0xff] }
 0x607   :  { %v18672_v31 = vpack.c.bf16 %v21303_v19, %v21302_v9  ;;  %v21308_v37 = vmax.f32 %v18270_v13, 0.0  ;;  %v21309_v56 = vmax.f32 %v18274_v62, 0.0  ;;  %v18697_v54 = vpack.c.bf16 %v6468_v11, %v6467_v16  ;;  %v21314_v13 = vld [vmem:[#allocation4_spill] sm:$0xff]  ;;  %v21319_v11 = vld [vmem:[#allocation7_spill] sm:$0xff]  ;;  %14709 = vmatpush3.bf16.msra.mxu1 %v16451_v29 }
 0x608   :  { %v18683_v48 = vpack.c.bf16 %v21305_v0, %v21304_v33  ;;  %v18689_v2 = vpack.c.bf16 %v21307_v15, %v21306_v8  ;;  %v21310_v24 = vmax.f32 %v18286_v27, 0.0  ;;  %v21311_v59 = vmax.f32 %v18290_v20, 0.0  ;;  %v21325_v9 = vld [vmem:[#allocation8_spill] sm:$0xff]  ;;  %v21327_v33 = vld [vmem:[#allocation11_spill] sm:$0xff]  ;;  %14710 = vmatprep.subr.bf16.mxu1 %v16452_v7  ;;  %v21329_v15 = vld [vmem:[#allocation14_spill] sm:$0xff] }
 0x609   :  { %v18695_v45 = vpack.c.bf16 %v21309_v56, %v21308_v37  ;;  %v21312_v23 = vmax.f32 %v18294_v26, 0.0  ;;  %v21313_v63 = vmax.f32 %v18298_v51, 0.0  ;;  %v21315_v62 = vmax.f32 %v21314_v13, 0.0  ;;  %14648 = vmatprep.mubr.bf16.mxu1 %v18697_v54  ;;  %v21331_v56 = vld [vmem:[#allocation10_spill] sm:$0xff] }
 0x60a   :  { %v18703_v30 = vpack.c.bf16 %v21311_v59, %v21310_v24  ;;  %v21317_v25 = vmax.f32 %v21316_v21, 0.0  ;;  %v21318_v27 = vmax.f32 %v18310_v17, 0.0  ;;  %v21320_v20 = vmax.f32 %v21319_v11, 0.0  ;;  %v16453_v17 = vld [vmem:[%s20940_s2 + $0x60] sm:$0xff]  }
 0x60b   :  { %v18709_v53 = vpack.c.bf16 %v21313_v63, %v21312_v23  ;;  %v21322_v26 = vmax.f32 %v21321_v3, 0.0  ;;  %v21324_v51 = vmax.f32 %v21323_v4, 0.0  ;;  %v21326_v19 = vmax.f32 %v21325_v9, 0.0  ;;  %14711 = vmatpush3.bf16.msra.mxu1 %v16452_v7  ;;  %v6476_v7 = vld [vmem:[#allocation2 + $0xc8] sm:$0xff] }
 0x60c   :  { %v18716_v16 = vpack.c.bf16 %v21317_v25, %v21315_v62  ;;  %v18722_v42 = vpack.c.bf16 %v21320_v20, %v21318_v27  ;;  %v21328_v0 = vmax.f32 %v21327_v33, 0.0  ;;  %v21330_v37 = vmax.f32 %v21329_v15, 0.0  ;;  %v6469_v25 = vld [vmem:[#allocation2 + $0x78] sm:$0xff]  ;;  %v6470_v27 = vld [vmem:[#allocation2 + $0x80] sm:$0xff]  ;;  %14712 = vmatprep.subr.bf16.mxu1 %v16453_v17 }
 0x60d   :  { %v18728_v10 = vpack.c.bf16 %v21324_v51, %v21322_v26  ;;  %v21332_v24 = vmax.f32 %v21331_v56, 0.0  ;;  %v21333_v23 = vmax.f32 %v21247_v55, 0.0  ;;  %v21334_v29 = vmax.f32 %v21248_v57, 0.0  ;;  %v21339_v26 = vld [vmem:[#allocation18_spill] sm:$0xff] }
 0x60e   :  { %v18735_v8 = vpack.c.bf16 %v21328_v0, %v21326_v19  ;;  %v21335_v13 = vmax.f32 %v21249_v39, 0.0  ;;  %v21336_v62 = vmax.f32 %v21253_v18, 0.0  ;;  %v21337_v11 = vmax.f32 %v18358_v36, 0.0  ;;  %v6471_v51 = vld [vmem:[#allocation2 + $0x90] sm:$0xff]  ;;  %v6472_v39 = vld [vmem:[#allocation2 + $0x98] sm:$0xff] }
 0x60f   :  { %v18744_v59 = vpack.c.bf16 %v21332_v24, %v21330_v37  ;;  %v18750_v63 = vpack.c.bf16 %v21334_v29, %v21333_v23  ;;  %v21338_v20 = vmax.f32 %v18362_v1, 0.0  ;;  %v21340_v55 = vmax.f32 %v21339_v26, 0.0  ;;  %14713 = vmatpush3.bf16.msra.mxu1 %v16453_v17  ;;  %v16456_v24 = vld [vmem:[%s20940_s2 + $0x78] sm:$0xff]   ;;  %v18812_v17 = vld [vmem:[%s20940_s2 + $0x80] sm:$0xff]   ;;  %v6482_v26 = vld [vmem:[#allocation2 + $0x110] sm:$0xff] }
 0x610   :  { %v18756_v21 = vpack.c.bf16 %v21336_v62, %v21335_v13  ;;  %v21341_v57 = vmax.f32 %v18370_v34, 0.0  ;;  %v21342_v18 = vmax.f32 %v18374_v14, 0.0  ;;  %v21343_v9 = vmax.f32 %v18378_v46, 0.0  ;;  %v16454_v14 = vld [vmem:[%s20940_s2 + $0x68] sm:$0xff]   ;;  %v6477_v29 = vld [vmem:[#allocation2 + $0xd8] sm:$0xff]  ;;  %v6478_v13 = vld [vmem:[#allocation2 + $0xe0] sm:$0xff] }
 0x611   :  { %v18762_v3 = vpack.c.bf16 %v21338_v20, %v21337_v11  ;;  %v21344_v36 = vmax.f32 %v18382_v12, 0.0  ;;  %v21345_v1 = vmax.f32 %v21262_v50, 0.0  ;;  %v21346_v0 = vmax.f32 %v21263_v41, 0.0  ;;  %14714 = vmatprep.subr.bf16.mxu1 %v16454_v14  ;;  %v6473_v41 = vld [vmem:[#allocation2 + $0xa8] sm:$0xff]  ;;  %v6474_v50 = vld [vmem:[#allocation2 + $0xb0] sm:$0xff]  ;;  %v6475_v12 = vld [vmem:[#allocation2 + $0xc0] sm:$0xff] }
 0x612   :  { %v18768_v4 = vpack.c.bf16 %v21341_v57, %v21340_v55  ;;  %v18774_v19 = vpack.c.bf16 %v21343_v9, %v21342_v18  ;;  %v21347_v34 = vmax.f32 %v21264_v22, 0.0  ;;  %v18788_v37 = vpack.c.bf16 %v6470_v27, %v6469_v25  ;;  %v16455_v22 = vld [vmem:[%s20940_s2 + $0x70] sm:$0xff]   ;;  %v6480_v25 = vld [vmem:[#allocation2 + $0xf8] sm:$0xff]  ;;  %v6481_v20 = vld [vmem:[#allocation2 + $0x108] sm:$0xff] }
 0x613   :  { %v18780_v33 = vpack.c.bf16 %v21345_v1, %v21344_v36  ;;  %v18793_v46 = vpack.c.bf16 %v6472_v39, %v6471_v51  ;;  %14715 = vmatpush3.bf16.msra.mxu1 %v16454_v14  ;;  %v18800_v56 = vpack.c.bf16 %v6474_v50, %v6473_v41  ;;  %v18805_v23 = vpack.c.bf16 %v6476_v7, %v6475_v12  ;;  %v6479_v62 = vld [vmem:[#allocation2 + $0xf0] sm:$0xff]  ;;  %v6483_v55 = vld [vmem:[#allocation2 + $0x120] sm:$0xff]  ;;  %v6484_v57 = vld [vmem:[#allocation2 + $0x128] sm:$0xff] }
 0x614   :  { %v18786_v15 = vpack.c.bf16 %v21347_v34, %v21346_v0  ;;  %14649 = vmatmul.mubr.bf16.gmra.mrb[8].mxu1 %v18788_v37  ;;  %14716 = vmatprep.subr.bf16.mxu1 %v16455_v22  ;;  %v18814_v27 = vpack.c.bf16 %v6478_v13, %v6477_v29  ;;  %v18817_v11 = vpack.c.bf16 %v6480_v25, %v6479_v62  ;;  %v6485_v18 = vld [vmem:[#allocation2 + $0x138] sm:$0xff]  ;;  %v6486_v9 = vld [vmem:[#allocation2 + $0x140] sm:$0xff]  ;;  %v6487_v36 = vld [vmem:[#allocation2 + $0x150] sm:$0xff] }
 0x615   :  { %14652 = vmatprep.mubr.bf16.mxu1 %v18793_v46  ;;  %v18821_v51 = vpack.c.bf16 %v6482_v26, %v6481_v20  ;;  %v18823_v39 = vpack.c.bf16 %v6484_v57, %v6483_v55  ;;  %v6488_v1 = vld [vmem:[#allocation2 + $0x158] sm:$0xff]  ;;  %v18827_v0 = vpack.c.bf16 %v6486_v9, %v6485_v18  ;;  %v6489_v14 = vld [vmem:[#allocation2 + $0x168] sm:$0xff]  ;;  %v21348_v50 = vld [vmem:[#allocation12_spill] sm:$0xff] }
 0x616   :  { %v18829_v34 = vpack.c.bf16 %v6488_v1, %v6487_v36  ;;  %v6493_v12 = vld [vmem:[#allocation2 + $0x1c8] sm:$0xff]  ;;  %v6494_v7 = vld [vmem:[#allocation2 + $0x1d0] sm:$0xff]  ;;  %v6497_v25 = vld [vmem:[#allocation2 + $0x1f8] sm:$0xff] }
 0x617   :  { %14717 = vmatpush3.bf16.msra.mxu1 %v16455_v22  ;;  %v6490_v22 = vld [vmem:[#allocation2 + $0x170] sm:$0xff]  ;;  %v6496_v29 = vld [vmem:[#allocation2 + $0x1e8] sm:$0xff]  ;;  %v18837_v13 = vpack.c.bf16 %v6494_v7, %v6493_v12  ;;  %v6498_v20 = vld [vmem:[#allocation2 + $0x200] sm:$0xff] }
 0x618   :  { %14718 = vmatprep.subr.bf16.mxu1 %v16456_v24  ;;  %v18833_v41 = vpack.c.bf16 %v6490_v22, %v6489_v14  ;;  %v6499_v26 = vld [vmem:[#allocation2 + $0x210] sm:$0xff]  ;;  %v6500_v55 = vld [vmem:[#allocation2 + $0x218] sm:$0xff]  ;;  %v18843_v57 = vpack.c.bf16 %v6498_v20, %v6497_v25  ;;  %v6501_v9 = vld [vmem:[#allocation2 + $0x228] sm:$0xff] }
 0x619   :  { %v18845_v18 = vpack.c.bf16 %v6500_v55, %v6499_v26  ;;  %v6502_v36 = vld [vmem:[#allocation2 + $0x230] sm:$0xff]  ;;  %v6503_v1 = vld [vmem:[#allocation2 + $0x240] sm:$0xff]  ;;  %v6504_v14 = vld [vmem:[#allocation2 + $0x248] sm:$0xff] }
 0x61a   :  { %v18849_v22 = vpack.c.bf16 %v6502_v36, %v6501_v9  ;;  %v6505_v12 = vld [vmem:[#allocation2 + $0x258] sm:$0xff]  ;;  %v6506_v7 = vld [vmem:[#allocation2 + $0x260] sm:$0xff]  ;;  %v6509_v26 = vld [vmem:[#allocation2 + $0x288] sm:$0xff] }
 0x61b   :  { %14719 = vmatpush3.bf16.msra.mxu1 %v16456_v24  ;;  %v6495_v24 = vld [vmem:[#allocation2 + $0x1e0] sm:$0xff]  ;;  %v18855_v25 = vpack.c.bf16 %v6506_v7, %v6505_v12  ;;  %v6510_v55 = vld [vmem:[#allocation2 + $0x290] sm:$0xff]  ;;  %v6512_v36 = vld [vmem:[#allocation2 + $0x2a8] sm:$0xff] }
 0x61c   :  { %14653 = vmatmul.mubr.bf16.gmra.mrb[12].mxu1 %v18800_v56  ;;  %14784 = vmatprep.subr.bf16.mxu1 %v18812_v17  ;;  %v18839_v62 = vpack.c.bf16 %v6496_v29, %v6495_v24  ;;  %v6507_v24 = vld [vmem:[#allocation2 + $0x270] sm:$0xff]  ;;  %v6508_v29 = vld [vmem:[#allocation2 + $0x278] sm:$0xff]  ;;  %v6511_v9 = vld [vmem:[#allocation2 + $0x2a0] sm:$0xff] }
 0x61d   :  { %14656 = vmatprep.mubr.bf16.mxu1 %v18805_v23  ;;  %21350 = vst [vmem:[#allocation24_spill] sm:$0xff] %v18855_v25  ;;  %v18857_v20 = vpack.c.bf16 %v6508_v29, %v6507_v24  ;;  %v6513_v12 = vld [vmem:[#allocation2 + $0x2b8] sm:$0xff]  ;;  %v6514_v7 = vld [vmem:[#allocation2 + $0x2c0] sm:$0xff]  ;;  %v6515_v24 = vld [vmem:[#allocation2 + $0x2d0] sm:$0xff] }
 0x61e   :  { %v6516_v29 = vld [vmem:[#allocation2 + $0x2d8] sm:$0xff] }
 0x61f   :  { %21351 = vst [vmem:[#allocation26_spill] sm:$0xff] %v18857_v20 }
 0x624   :  { %14657 = vmatmul.mubr.bf16.gmra.mrb[16].mxu1 %v18814_v27 }
 0x625   :  { %14660 = vmatprep.mubr.bf16.mxu1 %v18817_v11 }
 0x62c   :  { %14661 = vmatmul.mubr.bf16.gmra.mrb[20].mxu1 %v18821_v51 }
 0x62d   :  { %14664 = vmatprep.mubr.bf16.mxu1 %v18823_v39 }
 0x634   :  { %14665 = vmatmul.mubr.bf16.gmra.mrb[24].mxu1 %v18827_v0 }
 0x635   :  { %14668 = vmatprep.mubr.bf16.mxu1 %v18829_v34 }
 0x63c   :  { %14669 = vmatmul.mubr.bf16.gmra.mrb[28].mxu1 %v18833_v41 }
 0x63d   :  { %14672 = vmatprep.mubr.bf16.mxu1 %v21348_v50  ;;  %v18851_v50 = vpack.c.bf16 %v6504_v14, %v6503_v1  ;;  %v18861_v1 = vpack.c.bf16 %v6510_v55, %v6509_v26  ;;  %v18863_v14 = vpack.c.bf16 %v6512_v36, %v6511_v9  ;;  %v6517_v26 = vld [vmem:[#allocation2 + $0x2e8] sm:$0xff]  ;;  %v6518_v55 = vld [vmem:[#allocation2 + $0x2f0] sm:$0xff]  ;;  %v6519_v9 = vld [vmem:[#allocation2 + $0x300] sm:$0xff] }
 0x63e   :  { %v6520_v36 = vld [vmem:[#allocation2 + $0x308] sm:$0xff] }
 0x63f   :  { %21349 = vst [vmem:[#allocation27_spill] sm:$0xff] %v18851_v50  ;;  %21352 = vst [vmem:[#allocation29_spill] sm:$0xff] %v18861_v1 }
 0x640   :  { %21353 = vst [vmem:[#allocation28_spill] sm:$0xff] %v18863_v14 }
 0x644   :  { %14673 = vmatmul.mubr.bf16.gmra.mrb[32].mxu1 %v18837_v13 }
 0x645   :  { %14676 = vmatprep.mubr.bf16.mxu1 %v18839_v62 }
 0x64c   :  { %14677 = vmatmul.mubr.bf16.gmra.mrb[36].mxu1 %v18843_v57 }
 0x64d   :  { %14680 = vmatprep.mubr.bf16.mxu1 %v18845_v18 }
 0x654   :  { %14681 = vmatmul.mubr.bf16.gmra.mrb[40].mxu1 %v18849_v22 }
 0x655   :  { %14684 = vmatprep.mubr.bf16.mxu1 %v18851_v50  ;;  %v18867_v50 = vpack.c.bf16 %v6514_v7, %v6513_v12  ;;  %v6972_v12 = vld [vmem:[#allocation2 + $0x1] sm:$0xff]  ;;  %v6973_v7 = vld [vmem:[#allocation2 + $0x9] sm:$0xff] }
 0x657   :  { %21354 = vst [vmem:[#allocation31_spill] sm:$0xff] %v18867_v50 }
 0x65c   :  { %14685 = vmatmul.mubr.bf16.gmra.mrb[44].mxu1 %v18855_v25  ;;  %v18869_v25 = vpack.c.bf16 %v6516_v29, %v6515_v24  ;;  %v6521_v24 = vld [vmem:[#allocation2 + $0x318] sm:$0xff]  ;;  %v6522_v29 = vld [vmem:[#allocation2 + $0x320] sm:$0xff] }
 0x65d   :  { %14688 = vmatprep.mubr.bf16.mxu1 %v18857_v20  ;;  %v18873_v20 = vpack.c.bf16 %v6518_v55, %v6517_v26  ;;  %v16458_v26 = vld [vmem:[%s20940_s2 + $0x88] sm:$0xff]   ;;  %v16459_v55 = vld [vmem:[%s20940_s2 + $0x90] sm:$0xff]  }
 0x664   :  { %14689 = vmatmul.mubr.bf16.gmra.mrb[48].mxu1 %v18861_v1  ;;  %v18875_v1 = vpack.c.bf16 %v6520_v36, %v6519_v9  ;;  %v7625_v9 = vld [vmem:[#allocation2 + $0x82] sm:$0xff]  ;;  %v7626_v36 = vld [vmem:[#allocation2 + $0x92] sm:$0xff] }
 0x665   :  { %14692 = vmatprep.mubr.bf16.mxu1 %v18863_v14  ;;  %v7036_v14 = vpack.c.bf16 %v6973_v7, %v6972_v12  ;;  %v7627_v12 = vld [vmem:[#allocation2 + $0x9a] sm:$0xff] }
 0x66c   :  { %14693 = vmatmul.mubr.bf16.gmra.mrb[52].mxu1 %v18867_v50  ;;  %v18879_v50 = vpack.c.bf16 %v6522_v29, %v6521_v24  ;;  %v16470_v24 = vld [vmem:[%s20940_s2 + $0xe8] sm:$0xff]   ;;  %v18970_v29 = vpack.c.bf16 %v7627_v12, %v7626_v36  ;;  %v7645_v36 = vld [vmem:[#allocation2 + $0x172] sm:$0xff] }
 0x66d   :  { %14696 = vmatprep.mubr.bf16.mxu1 %v18869_v25 }
 0x674   :  { %14697 = vmatmul.mubr.bf16.gmra.mrb[56].mxu1 %v18873_v20 }
 0x675   :  { %14700 = vmatprep.mubr.bf16.mxu1 %v18875_v1 }
 0x67c   :  { %14701 = vmatmul.mubr.bf16.gmra.mrb[60].mxu1 %v18879_v50 }
 0x67d   :  { %14720 = vmatprep.mubr.bf16.mxu1 %v7036_v14  ;;  %v16460_v14 = vld [vmem:[%s20940_s2 + $0x98] sm:$0xff]  }
 0x684   :  { %14721 = vmatmul.mubr.bf16.vlgmr.msra.gmra.mrb[0].mxu1 %v18601_v32  ;;  %v16461_v32 = vld [vmem:[%s20940_s2 + $0xa0] sm:$0xff]  }
 0x685   :  { %14724 = vmatprep.mubr.bf16.mxu1 %v18609_v43  ;;  %14785 = vmatpush3.bf16.msra.mxu1 %v18812_v17  ;;  %v16462_v43 = vld [vmem:[%s20940_s2 + $0xa8] sm:$0xff]   ;;  %v7624_v17 = vld [vmem:[#allocation2 + $0x7a] sm:$0xff] }
 0x686   :  { %14786 = vmatprep.subr.bf16.mxu1 %v16458_v26  ;;  %v18965_v7 = vpack.c.bf16 %v7625_v9, %v7624_v17  ;;  %v7647_v17 = vld [vmem:[#allocation2 + $0x1ba] sm:$0xff]  ;;  %v7644_v9 = vld [vmem:[#allocation2 + $0x16a] sm:$0xff] }
 0x689   :  { %14787 = vmatpush3.bf16.msra.mxu1 %v16458_v26  ;;  %v16471_v26 = vld [vmem:[%s20940_s2 + $0xf0] sm:$0xff]  }
 0x68a   :  { %14788 = vmatprep.subr.bf16.mxu1 %v16459_v55 }
 0x68c   :  { %14725 = vmatmul.mubr.bf16.gmra.mrb[4].mxu1 %v18618_v38  ;;  %v16463_v38 = vld [vmem:[%s20940_s2 + $0xb0] sm:$0xff]  }
 0x68d   :  { %14728 = vmatprep.mubr.bf16.mxu1 %v18624_v49  ;;  %14789 = vmatpush3.bf16.msra.mxu1 %v16459_v55  ;;  %v16464_v49 = vld [vmem:[%s20940_s2 + $0xb8] sm:$0xff]   ;;  %v7628_v55 = vld [vmem:[#allocation2 + $0xaa] sm:$0xff] }
 0x68e   :  { %14790 = vmatprep.subr.bf16.mxu1 %v16460_v14 }
 0x691   :  { %14791 = vmatpush3.bf16.msra.mxu1 %v16460_v14  ;;  %v7629_v14 = vld [vmem:[#allocation2 + $0xb2] sm:$0xff] }
 0x692   :  { %14792 = vmatprep.subr.bf16.mxu1 %v16461_v32 }
 0x694   :  { %14729 = vmatmul.mubr.bf16.gmra.mrb[8].mxu1 %v18630_v47  ;;  %v16465_v47 = vld [vmem:[%s20940_s2 + $0xc0] sm:$0xff]  }
 0x695   :  { %14732 = vmatprep.mubr.bf16.mxu1 %v18636_v28  ;;  %14793 = vmatpush3.bf16.msra.mxu1 %v16461_v32  ;;  %v7004_v28 = vld [vmem:[#allocation2 + $0x1b1] sm:$0xff]  ;;  %v7630_v32 = vld [vmem:[#allocation2 + $0xc2] sm:$0xff] }
 0x696   :  { %14794 = vmatprep.subr.bf16.mxu1 %v16462_v43 }
 0x699   :  { %14795 = vmatpush3.bf16.msra.mxu1 %v16462_v43  ;;  %v7631_v43 = vld [vmem:[#allocation2 + $0xca] sm:$0xff] }
 0x69a   :  { %14796 = vmatprep.subr.bf16.mxu1 %v16463_v38 }
 0x69c   :  { %14733 = vmatmul.mubr.bf16.gmra.mrb[12].mxu1 %v18642_v6  ;;  %v7005_v6 = vld [vmem:[#allocation2 + $0x1b9] sm:$0xff] }
 0x69d   :  { %14736 = vmatprep.mubr.bf16.mxu1 %v18648_v44  ;;  %14797 = vmatpush3.bf16.msra.mxu1 %v16463_v38  ;;  %v7052_v44 = vpack.c.bf16 %v7005_v6, %v7004_v28  ;;  %v18977_v38 = vpack.c.bf16 %v7629_v14, %v7628_v55  ;;  %v18989_v28 = vld [vmem:[%s20940_s2 + $0x100] sm:$0xff]   ;;  %v7649_v55 = vld [vmem:[#allocation2 + $0x1d2] sm:$0xff] }
 0x69e   :  { %14798 = vmatprep.subr.bf16.mxu1 %v16464_v49  ;;  %v7632_v6 = vld [vmem:[#allocation2 + $0xda] sm:$0xff]  ;;  %v7650_v14 = vld [vmem:[#allocation2 + $0x1e2] sm:$0xff] }
 0x6a1   :  { %14799 = vmatpush3.bf16.msra.mxu1 %v16464_v49  ;;  %v16472_v49 = vld [vmem:[%s20940_s2 + $0xf8] sm:$0xff]  }
 0x6a2   :  { %14864 = vmatprep.subr.bf16.mxu1 %v16465_v47 }
 0x6a4   :  { %14737 = vmatmul.mubr.bf16.gmra.mrb[16].mxu1 %v18654_v60  ;;  %v7614_v60 = vld [vmem:[#allocation2 + $0x2] sm:$0xff] }
 0x6a5   :  { %14740 = vmatprep.mubr.bf16.mxu1 %v18660_v58  ;;  %v7615_v58 = vld [vmem:[#allocation2 + $0xa] sm:$0xff] }
 0x6ac   :  { %14741 = vmatmul.mubr.bf16.gmra.mrb[20].mxu1 %v18666_v40  ;;  %v18936_v40 = vld [vmem:[#allocation2 + $0x321] sm:$0xff] }
 0x6ad   :  { %14744 = vmatprep.mubr.bf16.mxu1 %v18672_v31  ;;  %v7678_v31 = vpack.c.bf16 %v7615_v58, %v7614_v60  ;;  %v7634_v60 = vld [vmem:[#allocation2 + $0xf2] sm:$0xff]  ;;  %v7635_v58 = vld [vmem:[#allocation2 + $0xfa] sm:$0xff] }
 0x6b4   :  { %14745 = vmatmul.mubr.bf16.gmra.mrb[24].mxu1 %v18683_v48  ;;  %v21355_v48 = vmax.f32 %v21265_v5, 0.0  ;;  %v16467_v5 = vld [vmem:[%s20940_s2 + $0xd0] sm:$0xff]  }
 0x6b5   :  { %14748 = vmatprep.mubr.bf16.mxu1 %v18689_v2 }
 0x6b6   :  { %v7067_v2 = vpack.c.bf16 %v18936_v40, %v21355_v48  ;;  %v18994_v48 = vpack.c.bf16 %v7635_v58, %v7634_v60  ;;  %v7654_v60 = vld [vmem:[#allocation2 + $0x212] sm:$0xff]  ;;  %v7655_v58 = vld [vmem:[#allocation2 + $0x21a] sm:$0xff] }
 0x6bc   :  { %14749 = vmatmul.mubr.bf16.gmra.mrb[28].mxu1 %v18695_v45  ;;  %v7616_v45 = vld [vmem:[#allocation2 + $0x1a] sm:$0xff] }
 0x6bd   :  { %14752 = vmatprep.mubr.bf16.mxu1 %v7052_v44  ;;  %v7633_v44 = vld [vmem:[#allocation2 + $0xe2] sm:$0xff] }
 0x6c4   :  { %14753 = vmatmul.mubr.bf16.gmra.mrb[32].mxu1 %v18703_v30  ;;  %v7617_v30 = vld [vmem:[#allocation2 + $0x22] sm:$0xff] }
 0x6c5   :  { %14756 = vmatprep.mubr.bf16.mxu1 %v18709_v53  ;;  %v7618_v53 = vld [vmem:[#allocation2 + $0x32] sm:$0xff] }
 0x6cc   :  { %14757 = vmatmul.mubr.bf16.gmra.mrb[36].mxu1 %v18716_v16  ;;  %v7619_v16 = vld [vmem:[#allocation2 + $0x3a] sm:$0xff] }
 0x6cd   :  { %14760 = vmatprep.mubr.bf16.mxu1 %v18722_v42  ;;  %v18941_v42 = vpack.c.bf16 %v7617_v30, %v7616_v45  ;;  %v7637_v45 = vld [vmem:[#allocation2 + $0x112] sm:$0xff]  ;;  %v7638_v30 = vld [vmem:[#allocation2 + $0x122] sm:$0xff] }
 0x6d4   :  { %14761 = vmatmul.mubr.bf16.gmra.mrb[40].mxu1 %v18728_v10  ;;  %v16466_v10 = vld [vmem:[%s20940_s2 + $0xc8] sm:$0xff]  }
 0x6d5   :  { %14764 = vmatprep.mubr.bf16.mxu1 %v18735_v8  ;;  %v18946_v8 = vpack.c.bf16 %v7619_v16, %v7618_v53  ;;  %v7639_v53 = vld [vmem:[#allocation2 + $0x12a] sm:$0xff] }
 0x6dc   :  { %14765 = vmatmul.mubr.bf16.gmra.mrb[44].mxu1 %v18744_v59  ;;  %v7620_v59 = vld [vmem:[#allocation2 + $0x4a] sm:$0xff] }
 0x6dd   :  { %14768 = vmatprep.mubr.bf16.mxu1 %v18750_v63  ;;  %v7621_v63 = vld [vmem:[#allocation2 + $0x52] sm:$0xff] }
 0x6e4   :  { %14769 = vmatmul.mubr.bf16.gmra.mrb[48].mxu1 %v18756_v21  ;;  %v7622_v21 = vld [vmem:[#allocation2 + $0x62] sm:$0xff] }
 0x6e5   :  { %14772 = vmatprep.mubr.bf16.mxu1 %v18762_v3  ;;  %v7623_v3 = vld [vmem:[#allocation2 + $0x6a] sm:$0xff] }
 0x6ec   :  { %14773 = vmatmul.mubr.bf16.gmra.mrb[52].mxu1 %v18768_v4  ;;  %v18953_v4 = vpack.c.bf16 %v7621_v63, %v7620_v59  ;;  %v7641_v59 = vld [vmem:[#allocation2 + $0x142] sm:$0xff]  ;;  %v7642_v63 = vld [vmem:[#allocation2 + $0x152] sm:$0xff] }
 0x6ed   :  { %14776 = vmatprep.mubr.bf16.mxu1 %v18774_v19  ;;  %v16468_v19 = vld [vmem:[%s20940_s2 + $0xd8] sm:$0xff]  }
 0x6f4   :  { %14777 = vmatmul.mubr.bf16.gmra.mrb[56].mxu1 %v18780_v33  ;;  %v18958_v33 = vpack.c.bf16 %v7623_v3, %v7622_v21  ;;  %v7643_v21 = vld [vmem:[#allocation2 + $0x15a] sm:$0xff] }
 0x6f5   :  { %14780 = vmatprep.mubr.bf16.mxu1 %v18786_v15  ;;  %v16469_v15 = vld [vmem:[%s20940_s2 + $0xe0] sm:$0xff]  }
 0x6fc   :  { %14781 = vmatmul.mubr.bf16.gmra.mrb[60].mxu1 %v7067_v2  ;;  %v7636_v2 = vld [vmem:[#allocation2 + $0x10a] sm:$0xff] }
 0x6fd   :  { %14800 = vmatprep.mubr.bf16.mxu1 %v7678_v31  ;;  %v18991_v31 = vpack.c.bf16 %v7633_v44, %v7632_v6  ;;  %v18998_v16 = vpack.c.bf16 %v7637_v45, %v7636_v2  ;;  %v7652_v6 = vld [vmem:[#allocation2 + $0x1fa] sm:$0xff]  ;;  %v7653_v44 = vld [vmem:[#allocation2 + $0x202] sm:$0xff]  ;;  %v19021_v45 = vpack.c.bf16 %v7655_v58, %v7654_v60 }
 0x6fe   :  { %v19019_v2 = vpack.c.bf16 %v7653_v44, %v7652_v6  ;;  %v7667_v6 = vld [vmem:[#allocation2 + $0x2aa] sm:$0xff]  ;;  %v7668_v58 = vld [vmem:[#allocation2 + $0x2ba] sm:$0xff] }
 0x704   :  { %14801 = vmatmul.mubr.bf16.vlgmr.msra.gmra.mrb[0].mxu1 %v18941_v42 }
 0x705   :  { %14804 = vmatprep.mubr.bf16.mxu1 %v18946_v8  ;;  %14865 = vmatpush3.bf16.msra.mxu1 %v16465_v47  ;;  %v18982_v47 = vpack.c.bf16 %v7631_v43, %v7630_v32  ;;  %v7651_v32 = vld [vmem:[#allocation2 + $0x1ea] sm:$0xff] }
 0x706   :  { %14866 = vmatprep.subr.bf16.mxu1 %v16466_v10 }
 0x709   :  { %14867 = vmatpush3.bf16.msra.mxu1 %v16466_v10  ;;  %v19000_v10 = vpack.c.bf16 %v7639_v53, %v7638_v30  ;;  %v7656_v30 = vld [vmem:[#allocation2 + $0x22a] sm:$0xff]  ;;  %v7657_v53 = vld [vmem:[#allocation2 + $0x232] sm:$0xff] }
 0x70a   :  { %14868 = vmatprep.subr.bf16.mxu1 %v16467_v5 }
 0x70c   :  { %14805 = vmatmul.mubr.bf16.gmra.mrb[4].mxu1 %v18953_v4 }
 0x70d   :  { %14808 = vmatprep.mubr.bf16.mxu1 %v18958_v33  ;;  %14869 = vmatpush3.bf16.msra.mxu1 %v16467_v5  ;;  %v7640_v5 = vld [vmem:[#allocation2 + $0x13a] sm:$0xff] }
 0x70e   :  { %14870 = vmatprep.subr.bf16.mxu1 %v16468_v19  ;;  %v19004_v3 = vpack.c.bf16 %v7641_v59, %v7640_v5  ;;  %v7658_v5 = vld [vmem:[#allocation2 + $0x242] sm:$0xff]  ;;  %v7659_v59 = vld [vmem:[#allocation2 + $0x24a] sm:$0xff] }
 0x711   :  { %14871 = vmatpush3.bf16.msra.mxu1 %v16468_v19  ;;  %v19006_v19 = vpack.c.bf16 %v7643_v21, %v7642_v63  ;;  %v19025_v63 = vpack.c.bf16 %v7657_v53, %v7656_v30  ;;  %v19027_v21 = vpack.c.bf16 %v7659_v59, %v7658_v5  ;;  %v7669_v30 = vld [vmem:[#allocation2 + $0x2c2] sm:$0xff]  ;;  %v7670_v53 = vld [vmem:[#allocation2 + $0x2d2] sm:$0xff]  ;;  %v7671_v5 = vld [vmem:[#allocation2 + $0x2da] sm:$0xff] }
 0x712   :  { %14872 = vmatprep.subr.bf16.mxu1 %v16469_v15  ;;  %v19043_v59 = vpack.c.bf16 %v7669_v30, %v7668_v58  ;;  %v7677_v58 = vld [vmem:[#allocation2 + $0x322] sm:$0xff] }
 0x714   :  { %14809 = vmatmul.mubr.bf16.gmra.mrb[8].mxu1 %v18965_v7 }
 0x715   :  { %14812 = vmatprep.mubr.bf16.mxu1 %v18970_v29  ;;  %14873 = vmatpush3.bf16.msra.mxu1 %v16469_v15  ;;  %v7646_v15 = vld [vmem:[#allocation2 + $0x1b2] sm:$0xff] }
 0x716   :  { %14874 = vmatprep.subr.bf16.mxu1 %v16470_v24  ;;  %v7694_v12 = vpack.c.bf16 %v7647_v17, %v7646_v15  ;;  %v7660_v15 = vld [vmem:[#allocation2 + $0x25a] sm:$0xff]  ;;  %v7661_v17 = vld [vmem:[#allocation2 + $0x262] sm:$0xff] }
 0x719   :  { %14875 = vmatpush3.bf16.msra.mxu1 %v16470_v24  ;;  %v19010_v24 = vpack.c.bf16 %v7645_v36, %v7644_v9  ;;  %v7662_v9 = vld [vmem:[#allocation2 + $0x272] sm:$0xff]  ;;  %v7663_v36 = vld [vmem:[#allocation2 + $0x27a] sm:$0xff] }
 0x71a   :  { %14876 = vmatprep.subr.bf16.mxu1 %v16471_v26 }
 0x71c   :  { %14813 = vmatmul.mubr.bf16.gmra.mrb[12].mxu1 %v18977_v38 }
 0x71d   :  { %14816 = vmatprep.mubr.bf16.mxu1 %v18982_v47  ;;  %14877 = vmatpush3.bf16.msra.mxu1 %v16471_v26  ;;  %v7648_v26 = vld [vmem:[#allocation2 + $0x1ca] sm:$0xff] }
 0x71e   :  { %14878 = vmatprep.subr.bf16.mxu1 %v16472_v49  ;;  %v19013_v43 = vpack.c.bf16 %v7649_v55, %v7648_v26  ;;  %v19033_v26 = vpack.c.bf16 %v7663_v36, %v7662_v9  ;;  %v7664_v55 = vld [vmem:[#allocation2 + $0x28a] sm:$0xff]  ;;  %v7673_v9 = vld [vmem:[#allocation2 + $0x2f2] sm:$0xff]  ;;  %v7674_v36 = vld [vmem:[#allocation2 + $0x302] sm:$0xff] }
 0x721   :  { %14879 = vmatpush3.bf16.msra.mxu1 %v16472_v49  ;;  %v19015_v49 = vpack.c.bf16 %v7651_v32, %v7650_v14  ;;  %v7665_v14 = vld [vmem:[#allocation2 + $0x292] sm:$0xff]  ;;  %v7666_v32 = vld [vmem:[#allocation2 + $0x2a2] sm:$0xff] }
 0x722   :  { %14944 = vmatprep.subr.bf16.mxu1 %v18989_v28  ;;  %v19037_v44 = vpack.c.bf16 %v7665_v14, %v7664_v55  ;;  %v19039_v60 = vpack.c.bf16 %v7667_v6, %v7666_v32  ;;  %v7675_v55 = vld [vmem:[#allocation2 + $0x30a] sm:$0xff]  ;;  %v7676_v6 = vld [vmem:[#allocation2 + $0x31a] sm:$0xff] }
 0x723   :  { %v19051_v32 = vpack.c.bf16 %v7675_v55, %v7674_v36  ;;  %v19055_v30 = vpack.c.bf16 %v7677_v58, %v7676_v6  ;;  %v8902_v36 = vld [vmem:[#allocation2 + $0x49] sm:$0xff]  ;;  %v8904_v6 = vld [vmem:[#allocation2 + $0x61] sm:$0xff] }
 0x724   :  { %14817 = vmatmul.mubr.bf16.gmra.mrb[16].mxu1 %v18991_v31  ;;  %v8905_v58 = vld [vmem:[#allocation2 + $0x69] sm:$0xff] }
 0x725   :  { %14820 = vmatprep.mubr.bf16.mxu1 %v18994_v48 }
 0x72c   :  { %14821 = vmatmul.mubr.bf16.gmra.mrb[20].mxu1 %v18998_v16 }
 0x72d   :  { %14824 = vmatprep.mubr.bf16.mxu1 %v19000_v10 }
 0x734   :  { %14825 = vmatmul.mubr.bf16.gmra.mrb[24].mxu1 %v19004_v3 }
 0x735   :  { %14828 = vmatprep.mubr.bf16.mxu1 %v19006_v19 }
 0x73c   :  { %14829 = vmatmul.mubr.bf16.gmra.mrb[28].mxu1 %v19010_v24 }
 0x73d   :  { %14832 = vmatprep.mubr.bf16.mxu1 %v7694_v12  ;;  %v19031_v12 = vpack.c.bf16 %v7661_v17, %v7660_v15  ;;  %v19045_v15 = vpack.c.bf16 %v7671_v5, %v7670_v53  ;;  %v7672_v17 = vld [vmem:[#allocation2 + $0x2ea] sm:$0xff] }
 0x73e   :  { %v19049_v14 = vpack.c.bf16 %v7673_v9, %v7672_v17  ;;  %v16474_v53 = vld [vmem:[%s20940_s2 + $0x108] sm:$0xff]   ;;  %v16475_v5 = vld [vmem:[%s20940_s2 + $0x110] sm:$0xff]   ;;  %v8901_v9 = vld [vmem:[#allocation2 + $0x39] sm:$0xff] }
 0x73f   :  { %v8900_v17 = vld [vmem:[#allocation2 + $0x31] sm:$0xff] }
 0x740   :  { %v19119_v55 = vpack.c.bf16 %v8901_v9, %v8900_v17  ;;  %v19167_v17 = vld [vmem:[%s20940_s2 + $0x180] sm:$0xff]   ;;  %v8916_v9 = vld [vmem:[#allocation2 + $0xf1] sm:$0xff] }
 0x744   :  { %14833 = vmatmul.mubr.bf16.gmra.mrb[32].mxu1 %v19013_v43 }
 0x745   :  { %14836 = vmatprep.mubr.bf16.mxu1 %v19015_v49 }
 0x74c   :  { %14837 = vmatmul.mubr.bf16.gmra.mrb[36].mxu1 %v19019_v2 }
 0x74d   :  { %14840 = vmatprep.mubr.bf16.mxu1 %v19021_v45 }
 0x754   :  { %14841 = vmatmul.mubr.bf16.gmra.mrb[40].mxu1 %v19025_v63 }
 0x755   :  { %14844 = vmatprep.mubr.bf16.mxu1 %v19027_v21 }
 0x75c   :  { %14845 = vmatmul.mubr.bf16.gmra.mrb[44].mxu1 %v19031_v12 }
 0x75d   :  { %14848 = vmatprep.mubr.bf16.mxu1 %v19033_v26 }
 0x764   :  { %14849 = vmatmul.mubr.bf16.gmra.mrb[48].mxu1 %v19037_v44 }
 0x765   :  { %14852 = vmatprep.mubr.bf16.mxu1 %v19039_v60 }
 0x76c   :  { %14853 = vmatmul.mubr.bf16.gmra.mrb[52].mxu1 %v19043_v59 }
 0x76d   :  { %14856 = vmatprep.mubr.bf16.mxu1 %v19045_v15 }
 0x774   :  { %14857 = vmatmul.mubr.bf16.gmra.mrb[56].mxu1 %v19049_v14 }
 0x775   :  { %14860 = vmatprep.mubr.bf16.mxu1 %v19051_v32 }
 0x77c   :  { %14861 = vmatmul.mubr.bf16.gmra.mrb[60].mxu1 %v19055_v30 }
 0x77d   :  { %14880 = vmatprep.mubr.bf16.mxu1 %v18581_v61  ;;  %v16476_v61 = vld [vmem:[%s20940_s2 + $0x118] sm:$0xff]  }
 0x784   :  { %14881 = vmatmul.mubr.bf16.vlgmr.msra.gmra.mrb[0].mxu1 %v18583_v52  ;;  %v16477_v52 = vld [vmem:[%s20940_s2 + $0x120] sm:$0xff]  }
 0x785   :  { %14884 = vmatprep.mubr.bf16.mxu1 %v18674_v35  ;;  %14945 = vmatpush3.bf16.msra.mxu1 %v18989_v28  ;;  %v16478_v35 = vld [vmem:[%s20940_s2 + $0x128] sm:$0xff]  }
 0x786   :  { %14946 = vmatprep.subr.bf16.mxu1 %v16474_v53 }
 0x789   :  { %14947 = vmatpush3.bf16.msra.mxu1 %v16474_v53  ;;  %v8906_v53 = vld [vmem:[#allocation2 + $0x79] sm:$0xff] }
 0x78a   :  { %14948 = vmatprep.subr.bf16.mxu1 %v16475_v5 }
 0x78c   :  { %14885 = vmatmul.mubr.bf16.gmra.mrb[4].mxu1 %v18697_v54  ;;  %v16479_v54 = vld [vmem:[%s20940_s2 + $0x130] sm:$0xff]  }
 0x78d   :  { %14888 = vmatprep.mubr.bf16.mxu1 %v18788_v37  ;;  %14949 = vmatpush3.bf16.msra.mxu1 %v16475_v5  ;;  %v16480_v37 = vld [vmem:[%s20940_s2 + $0x138] sm:$0xff]   ;;  %v8907_v5 = vld [vmem:[#allocation2 + $0x81] sm:$0xff] }
 0x78e   :  { %14950 = vmatprep.subr.bf16.mxu1 %v16476_v61 }
 0x791   :  { %14951 = vmatpush3.bf16.msra.mxu1 %v16476_v61  ;;  %v19131_v61 = vpack.c.bf16 %v8905_v58, %v8904_v6  ;;  %v8920_v58 = vld [vmem:[#allocation2 + $0x121] sm:$0xff] }
 0x792   :  { %14952 = vmatprep.subr.bf16.mxu1 %v16477_v52 }
 0x794   :  { %14889 = vmatmul.mubr.bf16.gmra.mrb[8].mxu1 %v18793_v46  ;;  %v16481_v46 = vld [vmem:[%s20940_s2 + $0x140] sm:$0xff]  }
 0x795   :  { %14892 = vmatprep.mubr.bf16.mxu1 %v18800_v56  ;;  %14953 = vmatpush3.bf16.msra.mxu1 %v16477_v52  ;;  %v8286_v56 = vld [vmem:[#allocation2 + $0x180] sm:$0xff]  ;;  %v16484_v52 = vld [vmem:[%s20940_s2 + $0x158] sm:$0xff]  }
 0x796   :  { %14954 = vmatprep.subr.bf16.mxu1 %v16478_v35 }
 0x799   :  { %14955 = vmatpush3.bf16.msra.mxu1 %v16478_v35  ;;  %v19136_v35 = vpack.c.bf16 %v8907_v5, %v8906_v53  ;;  %v8921_v53 = vld [vmem:[#allocation2 + $0x129] sm:$0xff]  ;;  %v8922_v5 = vld [vmem:[#allocation2 + $0x139] sm:$0xff] }
 0x79a   :  { %14956 = vmatprep.subr.bf16.mxu1 %v16479_v54 }
 0x79c   :  { %14893 = vmatmul.mubr.bf16.gmra.mrb[12].mxu1 %v18805_v23  ;;  %v8287_v23 = vld [vmem:[#allocation2 + $0x188] sm:$0xff] }
 0x79d   :  { %14896 = vmatprep.mubr.bf16.mxu1 %v18814_v27  ;;  %14957 = vmatpush3.bf16.msra.mxu1 %v16479_v54  ;;  %v19098_v27 = vpack.c.bf16 %v8287_v23, %v8286_v56  ;;  %v16485_v54 = vld [vmem:[%s20940_s2 + $0x160] sm:$0xff]   ;;  %v8910_v56 = vld [vmem:[#allocation2 + $0xa9] sm:$0xff]  ;;  %v8911_v23 = vld [vmem:[#allocation2 + $0xb1] sm:$0xff] }
 0x79e   :  { %14958 = vmatprep.subr.bf16.mxu1 %v16480_v37 }
 0x7a1   :  { %14959 = vmatpush3.bf16.msra.mxu1 %v16480_v37  ;;  %v8908_v37 = vld [vmem:[#allocation2 + $0x91] sm:$0xff] }
 0x7a2   :  { %15024 = vmatprep.subr.bf16.mxu1 %v16481_v46 }
 0x7a4   :  { %14897 = vmatmul.mubr.bf16.gmra.mrb[16].mxu1 %v18817_v11  ;;  %v21356_v11 = vld [vmem:[#allocation27_spill] sm:$0xff] }
 0x7a5   :  { %14900 = vmatprep.mubr.bf16.mxu1 %v18821_v51  ;;  %v21357_v51 = vld [vmem:[#allocation24_spill] sm:$0xff] }
 0x7ac   :  { %14901 = vmatmul.mubr.bf16.gmra.mrb[20].mxu1 %v18823_v39  ;;  %v21358_v39 = vld [vmem:[#allocation26_spill] sm:$0xff] }
 0x7ad   :  { %14904 = vmatprep.mubr.bf16.mxu1 %v18827_v0  ;;  %v21359_v0 = vld [vmem:[#allocation29_spill] sm:$0xff] }
 0x7b4   :  { %14905 = vmatmul.mubr.bf16.gmra.mrb[24].mxu1 %v18829_v34  ;;  %v21360_v34 = vld [vmem:[#allocation28_spill] sm:$0xff] }
 0x7b5   :  { %14908 = vmatprep.mubr.bf16.mxu1 %v18833_v41  ;;  %v21361_v41 = vld [vmem:[#allocation31_spill] sm:$0xff] }
 0x7bc   :  { %14909 = vmatmul.mubr.bf16.gmra.mrb[28].mxu1 %v19098_v27 }
 0x7bd   :  { %14912 = vmatprep.mubr.bf16.mxu1 %v18837_v13  ;;  %v8318_v13 = vld [vmem:[#allocation2 + $0x330] sm:$0xff] }
 0x7c4   :  { %14913 = vmatmul.mubr.bf16.gmra.mrb[32].mxu1 %v18839_v62  ;;  %v8319_v62 = vld [vmem:[#allocation2 + $0x338] sm:$0xff] }
 0x7c5   :  { %14916 = vmatprep.mubr.bf16.mxu1 %v18843_v57  ;;  %v8898_v57 = vld [vmem:[#allocation2 + $0x19] sm:$0xff] }
 0x7cc   :  { %14917 = vmatmul.mubr.bf16.gmra.mrb[36].mxu1 %v18845_v18  ;;  %v8899_v18 = vld [vmem:[#allocation2 + $0x21] sm:$0xff] }
 0x7cd   :  { %14920 = vmatprep.mubr.bf16.mxu1 %v18849_v22  ;;  %v19116_v22 = vpack.c.bf16 %v8319_v62, %v8318_v13  ;;  %v8962_v28 = vpack.c.bf16 %v8899_v18, %v8898_v57  ;;  %v8914_v13 = vld [vmem:[#allocation2 + $0xd9] sm:$0xff]  ;;  %v8915_v62 = vld [vmem:[#allocation2 + $0xe1] sm:$0xff] }
 0x7ce   :  { %v16488_v18 = vld [vmem:[%s20940_s2 + $0x178] sm:$0xff]  }
 0x7d4   :  { %14921 = vmatmul.mubr.bf16.gmra.mrb[40].mxu1 %v21356_v11 }
 0x7d5   :  { %14924 = vmatprep.mubr.bf16.mxu1 %v21357_v51  ;;  %v16486_v51 = vld [vmem:[%s20940_s2 + $0x168] sm:$0xff]  }
 0x7dc   :  { %14925 = vmatmul.mubr.bf16.gmra.mrb[44].mxu1 %v21358_v39  ;;  %v19148_v39 = vpack.c.bf16 %v8911_v23, %v8910_v56  ;;  %v8925_v56 = vld [vmem:[#allocation2 + $0x159] sm:$0xff]  ;;  %v8926_v23 = vld [vmem:[#allocation2 + $0x169] sm:$0xff] }
 0x7dd   :  { %14928 = vmatprep.mubr.bf16.mxu1 %v21359_v0  ;;  %v16487_v0 = vld [vmem:[%s20940_s2 + $0x170] sm:$0xff]  }
 0x7e4   :  { %14929 = vmatmul.mubr.bf16.gmra.mrb[48].mxu1 %v21360_v34  ;;  %v8912_v34 = vld [vmem:[#allocation2 + $0xc1] sm:$0xff] }
 0x7e5   :  { %14932 = vmatprep.mubr.bf16.mxu1 %v21361_v41  ;;  %v8913_v41 = vld [vmem:[#allocation2 + $0xc9] sm:$0xff] }
 0x7e6   :  { %v19155_v57 = vpack.c.bf16 %v8913_v41, %v8912_v34  ;;  %v8928_v41 = vld [vmem:[#allocation2 + $0x181] sm:$0xff] }
 0x7ec   :  { %14933 = vmatmul.mubr.bf16.gmra.mrb[52].mxu1 %v18869_v25  ;;  %v8903_v25 = vld [vmem:[#allocation2 + $0x51] sm:$0xff] }
 0x7ed   :  { %14936 = vmatprep.mubr.bf16.mxu1 %v18873_v20  ;;  %v19124_v20 = vpack.c.bf16 %v8903_v25, %v8902_v36  ;;  %v8917_v36 = vld [vmem:[#allocation2 + $0xf9] sm:$0xff]  ;;  %v8918_v25 = vld [vmem:[#allocation2 + $0x109] sm:$0xff] }
 0x7f4   :  { %14937 = vmatmul.mubr.bf16.gmra.mrb[56].mxu1 %v18875_v1  ;;  %v16483_v1 = vld [vmem:[%s20940_s2 + $0x150] sm:$0xff]  }
 0x7f5   :  { %14940 = vmatprep.mubr.bf16.mxu1 %v18879_v50  ;;  %v16482_v50 = vld [vmem:[%s20940_s2 + $0x148] sm:$0xff]  }
 0x7fc   :  { %14941 = vmatmul.mubr.bf16.gmra.mrb[60].mxu1 %v19116_v22 }
 0x7fd   :  { %14960 = vmatprep.mubr.bf16.mxu1 %v8962_v28  ;;  %v19160_v28 = vpack.c.bf16 %v8915_v62, %v8914_v13  ;;  %v8929_v13 = vld [vmem:[#allocation2 + $0x189] sm:$0xff] }
 0x7fe   :  { %v8930_v62 = vld [vmem:[#allocation2 + $0x1c9] sm:$0xff] }
 0x804   :  { %14961 = vmatmul.mubr.bf16.vlgmr.msra.gmra.mrb[0].mxu1 %v19119_v55 }
 0x805   :  { %14964 = vmatprep.mubr.bf16.mxu1 %v19124_v20  ;;  %15025 = vmatpush3.bf16.msra.mxu1 %v16481_v46  ;;  %v8909_v46 = vld [vmem:[#allocation2 + $0x99] sm:$0xff] }
 0x806   :  { %15026 = vmatprep.subr.bf16.mxu1 %v16482_v50  ;;  %v19143_v11 = vpack.c.bf16 %v8909_v46, %v8908_v37  ;;  %v8924_v46 = vld [vmem:[#allocation2 + $0x151] sm:$0xff] }
 0x809   :  { %15027 = vmatpush3.bf16.msra.mxu1 %v16482_v50  ;;  %v8919_v50 = vld [vmem:[#allocation2 + $0x111] sm:$0xff] }
 0x80a   :  { %15028 = vmatprep.subr.bf16.mxu1 %v16483_v1  ;;  %v19172_v6 = vpack.c.bf16 %v8919_v50, %v8918_v25  ;;  %v8932_v25 = vld [vmem:[#allocation2 + $0x1e1] sm:$0xff]  ;;  %v8933_v50 = vld [vmem:[#allocation2 + $0x1e9] sm:$0xff] }
 0x80c   :  { %14965 = vmatmul.mubr.bf16.gmra.mrb[4].mxu1 %v19131_v61 }
 0x80d   :  { %14968 = vmatprep.mubr.bf16.mxu1 %v19136_v35  ;;  %15029 = vmatpush3.bf16.msra.mxu1 %v16483_v1  ;;  %v19169_v1 = vpack.c.bf16 %v8917_v36, %v8916_v9  ;;  %v19188_v9 = vpack.c.bf16 %v8929_v13, %v8928_v41 }
 0x80e   :  { %15030 = vmatprep.subr.bf16.mxu1 %v16484_v52 }
 0x811   :  { %15031 = vmatpush3.bf16.msra.mxu1 %v16484_v52  ;;  %v8923_v52 = vld [vmem:[#allocation2 + $0x141] sm:$0xff] }
 0x812   :  { %15032 = vmatprep.subr.bf16.mxu1 %v16485_v54  ;;  %v19178_v37 = vpack.c.bf16 %v8923_v52, %v8922_v5  ;;  %v19191_v5 = vpack.c.bf16 %v8933_v50, %v8932_v25  ;;  %v8943_v25 = vld [vmem:[#allocation2 + $0x261] sm:$0xff] }
 0x814   :  { %14969 = vmatmul.mubr.bf16.gmra.mrb[8].mxu1 %v19143_v11 }
 0x815   :  { %14972 = vmatprep.mubr.bf16.mxu1 %v19148_v39  ;;  %15033 = vmatpush3.bf16.msra.mxu1 %v16485_v54  ;;  %v19176_v54 = vpack.c.bf16 %v8921_v53, %v8920_v58  ;;  %v8934_v58 = vld [vmem:[#allocation2 + $0x1f9] sm:$0xff]  ;;  %v8935_v53 = vld [vmem:[#allocation2 + $0x201] sm:$0xff] }
 0x816   :  { %15034 = vmatprep.subr.bf16.mxu1 %v16486_v51  ;;  %v19193_v52 = vpack.c.bf16 %v8935_v53, %v8934_v58  ;;  %v8944_v53 = vld [vmem:[#allocation2 + $0x271] sm:$0xff] }
 0x819   :  { %15035 = vmatpush3.bf16.msra.mxu1 %v16486_v51  ;;  %v8927_v51 = vld [vmem:[#allocation2 + $0x171] sm:$0xff] }
 0x81a   :  { %15036 = vmatprep.subr.bf16.mxu1 %v16487_v0  ;;  %v19184_v34 = vpack.c.bf16 %v8927_v51, %v8926_v23  ;;  %v8938_v23 = vld [vmem:[#allocation2 + $0x229] sm:$0xff]  ;;  %v8939_v51 = vld [vmem:[#allocation2 + $0x231] sm:$0xff] }
 0x81b   :  { %v19199_v13 = vpack.c.bf16 %v8939_v51, %v8938_v23  ;;  %v8947_v23 = vld [vmem:[#allocation2 + $0x291] sm:$0xff] }
 0x81c   :  { %14973 = vmatmul.mubr.bf16.gmra.mrb[12].mxu1 %v19155_v57 }
 0x81d   :  { %14976 = vmatprep.mubr.bf16.mxu1 %v19160_v28  ;;  %15037 = vmatpush3.bf16.msra.mxu1 %v16487_v0  ;;  %v19182_v0 = vpack.c.bf16 %v8925_v56, %v8924_v46  ;;  %v8936_v46 = vld [vmem:[#allocation2 + $0x211] sm:$0xff]  ;;  %v8937_v56 = vld [vmem:[#allocation2 + $0x219] sm:$0xff]  ;;  %21363 = vst [vmem:[#allocation33_spill] sm:$0xff] %v19199_v13 }
 0x81e   :  { %15038 = vmatprep.subr.bf16.mxu1 %v16488_v18  ;;  %v19197_v41 = vpack.c.bf16 %v8937_v56, %v8936_v46  ;;  %v8945_v46 = vld [vmem:[#allocation2 + $0x279] sm:$0xff]  ;;  %v8946_v56 = vld [vmem:[#allocation2 + $0x289] sm:$0xff] }
 0x81f   :  { %v19209_v51 = vpack.c.bf16 %v8945_v46, %v8944_v53  ;;  %v8952_v53 = vld [vmem:[#allocation2 + $0x2d1] sm:$0xff]  ;;  %v8953_v46 = vld [vmem:[#allocation2 + $0x2d9] sm:$0xff] }
 0x820   :  { %21362 = vst [vmem:[#allocation32_spill] sm:$0xff] %v19197_v41 }
 0x821   :  { %15039 = vmatpush3.bf16.msra.mxu1 %v16488_v18  ;;  %v8931_v18 = vld [vmem:[#allocation2 + $0x1d1] sm:$0xff]  ;;  %21366 = vst [vmem:[#allocation36_spill] sm:$0xff] %v19209_v51 }
 0x822   :  { %15104 = vmatprep.subr.bf16.mxu1 %v19167_v17  ;;  %v8978_v36 = vpack.c.bf16 %v8931_v18, %v8930_v62  ;;  %v8940_v62 = vld [vmem:[#allocation2 + $0x241] sm:$0xff]  ;;  %v8941_v18 = vld [vmem:[#allocation2 + $0x249] sm:$0xff] }
 0x823   :  { %v19203_v50 = vpack.c.bf16 %v8941_v18, %v8940_v62  ;;  %v8948_v62 = vld [vmem:[#allocation2 + $0x2a1] sm:$0xff]  ;;  %v8949_v18 = vld [vmem:[#allocation2 + $0x2a9] sm:$0xff] }
 0x824   :  { %14977 = vmatmul.mubr.bf16.gmra.mrb[16].mxu1 %v19169_v1 }
 0x825   :  { %14980 = vmatprep.mubr.bf16.mxu1 %v19172_v6  ;;  %21364 = vst [vmem:[#allocation34_spill] sm:$0xff] %v19203_v50 }
 0x82c   :  { %14981 = vmatmul.mubr.bf16.gmra.mrb[20].mxu1 %v19176_v54 }
 0x82d   :  { %14984 = vmatprep.mubr.bf16.mxu1 %v19178_v37 }
 0x834   :  { %14985 = vmatmul.mubr.bf16.gmra.mrb[24].mxu1 %v19182_v0 }
 0x835   :  { %14988 = vmatprep.mubr.bf16.mxu1 %v19184_v34 }
 0x83c   :  { %14989 = vmatmul.mubr.bf16.gmra.mrb[28].mxu1 %v19188_v9 }
 0x83d   :  { %14992 = vmatprep.mubr.bf16.mxu1 %v8978_v36  ;;  %v8942_v36 = vld [vmem:[#allocation2 + $0x259] sm:$0xff] }
 0x83e   :  { %v19205_v58 = vpack.c.bf16 %v8943_v25, %v8942_v36  ;;  %v8950_v36 = vld [vmem:[#allocation2 + $0x2b9] sm:$0xff]  ;;  %v8951_v25 = vld [vmem:[#allocation2 + $0x2c1] sm:$0xff] }
 0x840   :  { %21365 = vst [vmem:[#allocation35_spill] sm:$0xff] %v19205_v58 }
 0x844   :  { %14993 = vmatmul.mubr.bf16.gmra.mrb[32].mxu1 %v19191_v5 }
 0x845   :  { %14996 = vmatprep.mubr.bf16.mxu1 %v19193_v52 }
 0x84c   :  { %14997 = vmatmul.mubr.bf16.gmra.mrb[36].mxu1 %v19197_v41  ;;  %v19211_v41 = vpack.c.bf16 %v8947_v23, %v8946_v56  ;;  %v8954_v56 = vld [vmem:[#allocation2 + $0x2e9] sm:$0xff]  ;;  %v8955_v23 = vld [vmem:[#allocation2 + $0x2f1] sm:$0xff] }
 0x84d   :  { %15000 = vmatprep.mubr.bf16.mxu1 %v19199_v13  ;;  %v19215_v13 = vpack.c.bf16 %v8949_v18, %v8948_v62  ;;  %v8956_v62 = vld [vmem:[#allocation2 + $0x301] sm:$0xff]  ;;  %v8957_v18 = vld [vmem:[#allocation2 + $0x309] sm:$0xff] }
 0x854   :  { %15001 = vmatmul.mubr.bf16.gmra.mrb[40].mxu1 %v19203_v50  ;;  %v19217_v50 = vpack.c.bf16 %v8951_v25, %v8950_v36  ;;  %v19227_v36 = vld [vmem:[#allocation2 + $0x319] sm:$0xff]  ;;  %v19229_v25 = vpack.c.bf16 %v8957_v18, %v8956_v62  ;;  %v10193_v62 = vld [vmem:[#allocation2 + $0xb0] sm:$0xff] }
 0x855   :  { %15004 = vmatprep.mubr.bf16.mxu1 %v19205_v58  ;;  %v19221_v58 = vpack.c.bf16 %v8953_v46, %v8952_v53  ;;  %v8960_v53 = vld [vmem:[#allocation2 + $0x331] sm:$0xff]  ;;  %v8961_v46 = vld [vmem:[#allocation2 + $0x339] sm:$0xff] }
 0x856   :  { %21367 = vst [vmem:[#allocation13_spill] sm:$0xff] %v19217_v50  ;;  %v10194_v18 = vld [vmem:[#allocation2 + $0xc0] sm:$0xff] }
 0x85c   :  { %15005 = vmatmul.mubr.bf16.gmra.mrb[44].mxu1 %v19209_v51  ;;  %v19223_v51 = vpack.c.bf16 %v8955_v23, %v8954_v56  ;;  %v19234_v56 = vpack.c.bf16 %v8961_v46, %v8960_v53  ;;  %v16490_v23 = vld [vmem:[%s20940_s2 + $0x188] sm:$0xff]  }
 0x85d   :  { %15008 = vmatprep.mubr.bf16.mxu1 %v19211_v41  ;;  %v10195_v53 = vld [vmem:[#allocation2 + $0xc8] sm:$0xff] }
 0x864   :  { %15009 = vmatmul.mubr.bf16.gmra.mrb[48].mxu1 %v19215_v13 }
 0x865   :  { %15012 = vmatprep.mubr.bf16.mxu1 %v19217_v50  ;;  %v8992_v50 = vpack.c.bf16 %v18936_v40, %v19227_v36  ;;  %v16491_v40 = vld [vmem:[%s20940_s2 + $0x190] sm:$0xff]  }
 0x86c   :  { %15013 = vmatmul.mubr.bf16.gmra.mrb[52].mxu1 %v19221_v58 }
 0x86d   :  { %15016 = vmatprep.mubr.bf16.mxu1 %v19223_v51 }
 0x874   :  { %15017 = vmatmul.mubr.bf16.gmra.mrb[56].mxu1 %v19229_v25 }
 0x875   :  { %15020 = vmatprep.mubr.bf16.mxu1 %v8992_v50  ;;  %v10192_v50 = vld [vmem:[#allocation2 + $0xa8] sm:$0xff] }
 0x876   :  { %v10251_v46 = vpack.c.bf16 %v10193_v62, %v10192_v50  ;;  %v10216_v50 = vld [vmem:[#allocation2 + $0x1f8] sm:$0xff]  ;;  %v10217_v62 = vld [vmem:[#allocation2 + $0x200] sm:$0xff] }
 0x87c   :  { %15021 = vmatmul.mubr.bf16.gmra.mrb[60].mxu1 %v19234_v56 }
 0x87d   :  { %15040 = vmatprep.mubr.bf16.mxu1 %v18941_v42  ;;  %v16492_v42 = vld [vmem:[%s20940_s2 + $0x198] sm:$0xff]  }
 0x884   :  { %15041 = vmatmul.mubr.bf16.vlgmr.msra.gmra.mrb[0].mxu1 %v18946_v8  ;;  %v16493_v8 = vld [vmem:[%s20940_s2 + $0x1a0] sm:$0xff]  }
 0x885   :  { %15044 = vmatprep.mubr.bf16.mxu1 %v18953_v4  ;;  %15105 = vmatpush3.bf16.msra.mxu1 %v19167_v17  ;;  %v16494_v4 = vld [vmem:[%s20940_s2 + $0x1a8] sm:$0xff]   ;;  %v16501_v17 = vld [vmem:[%s20940_s2 + $0x1e0] sm:$0xff]  }
 0x886   :  { %15106 = vmatprep.subr.bf16.mxu1 %v16490_v23 }
 0x889   :  { %15107 = vmatpush3.bf16.msra.mxu1 %v16490_v23  ;;  %v16502_v23 = vld [vmem:[%s20940_s2 + $0x1e8] sm:$0xff]  }
 0x88a   :  { %15108 = vmatprep.subr.bf16.mxu1 %v16491_v40 }
 0x88c   :  { %15045 = vmatmul.mubr.bf16.gmra.mrb[4].mxu1 %v18958_v33  ;;  %v16495_v33 = vld [vmem:[%s20940_s2 + $0x1b0] sm:$0xff]  }
 0x88d   :  { %15048 = vmatprep.mubr.bf16.mxu1 %v18965_v7  ;;  %15109 = vmatpush3.bf16.msra.mxu1 %v16491_v40  ;;  %v16496_v7 = vld [vmem:[%s20940_s2 + $0x1b8] sm:$0xff]   ;;  %v10252_v40 = vpack.c.bf16 %v10195_v53, %v10194_v18  ;;  %v10218_v18 = vld [vmem:[#allocation2 + $0x210] sm:$0xff] }
 0x88e   :  { %15110 = vmatprep.subr.bf16.mxu1 %v16492_v42  ;;  %v10219_v53 = vld [vmem:[#allocation2 + $0x218] sm:$0xff] }
 0x891   :  { %15111 = vmatpush3.bf16.msra.mxu1 %v16492_v42  ;;  %v16503_v42 = vld [vmem:[%s20940_s2 + $0x1f0] sm:$0xff]  }
 0x892   :  { %15112 = vmatprep.subr.bf16.mxu1 %v16493_v8 }
 0x894   :  { %15049 = vmatmul.mubr.bf16.gmra.mrb[8].mxu1 %v18970_v29  ;;  %v16497_v29 = vld [vmem:[%s20940_s2 + $0x1c0] sm:$0xff]  }
 0x895   :  { %15052 = vmatprep.mubr.bf16.mxu1 %v18977_v38  ;;  %15113 = vmatpush3.bf16.msra.mxu1 %v16493_v8  ;;  %v9570_v38 = vld [vmem:[#allocation2 + $0x182] sm:$0xff]  ;;  %v10196_v8 = vld [vmem:[#allocation2 + $0xd8] sm:$0xff] }
 0x896   :  { %15114 = vmatprep.subr.bf16.mxu1 %v16494_v4 }
 0x899   :  { %15115 = vmatpush3.bf16.msra.mxu1 %v16494_v4  ;;  %v10197_v4 = vld [vmem:[#allocation2 + $0xe0] sm:$0xff] }
 0x89a   :  { %15116 = vmatprep.subr.bf16.mxu1 %v16495_v33 }
 0x89c   :  { %15053 = vmatmul.mubr.bf16.gmra.mrb[12].mxu1 %v18982_v47  ;;  %v9571_v47 = vld [vmem:[#allocation2 + $0x18a] sm:$0xff] }
 0x89d   :  { %15056 = vmatprep.mubr.bf16.mxu1 %v18991_v31  ;;  %15117 = vmatpush3.bf16.msra.mxu1 %v16495_v33  ;;  %v19277_v31 = vpack.c.bf16 %v9571_v47, %v9570_v38  ;;  %v10198_v33 = vld [vmem:[#allocation2 + $0xf0] sm:$0xff]  ;;  %v16504_v38 = vld [vmem:[%s20940_s2 + $0x1f8] sm:$0xff]  }
 0x89e   :  { %15118 = vmatprep.subr.bf16.mxu1 %v16496_v7 }
 0x8a1   :  { %15119 = vmatpush3.bf16.msra.mxu1 %v16496_v7  ;;  %v10199_v7 = vld [vmem:[#allocation2 + $0xf8] sm:$0xff] }
 0x8a2   :  { %15184 = vmatprep.subr.bf16.mxu1 %v16497_v29  ;;  %v10254_v47 = vpack.c.bf16 %v10199_v7, %v10198_v33  ;;  %v10224_v7 = vld [vmem:[#allocation2 + $0x258] sm:$0xff] }
 0x8a4   :  { %15057 = vmatmul.mubr.bf16.gmra.mrb[16].mxu1 %v18994_v48  ;;  %v9602_v48 = vld [vmem:[#allocation2 + $0x332] sm:$0xff] }
 0x8a5   :  { %15060 = vmatprep.mubr.bf16.mxu1 %v18998_v16  ;;  %v9603_v16 = vld [vmem:[#allocation2 + $0x33a] sm:$0xff] }
 0x8ac   :  { %15061 = vmatmul.mubr.bf16.gmra.mrb[20].mxu1 %v19000_v10  ;;  %v10182_v10 = vld [vmem:[#allocation2 + $0x30] sm:$0xff] }
 0x8ad   :  { %15064 = vmatprep.mubr.bf16.mxu1 %v19004_v3  ;;  %v10183_v3 = vld [vmem:[#allocation2 + $0x38] sm:$0xff] }
 0x8b4   :  { %15065 = vmatmul.mubr.bf16.gmra.mrb[24].mxu1 %v19006_v19  ;;  %v19295_v19 = vpack.c.bf16 %v9603_v16, %v9602_v48  ;;  %v19322_v48 = vld [vmem:[%s20940_s2 + $0x200] sm:$0xff]   ;;  %v10200_v16 = vld [vmem:[#allocation2 + $0x108] sm:$0xff] }
 0x8b5   :  { %15068 = vmatprep.mubr.bf16.mxu1 %v19010_v24  ;;  %v10246_v24 = vpack.c.bf16 %v10183_v3, %v10182_v10  ;;  %v10201_v10 = vld [vmem:[#allocation2 + $0x110] sm:$0xff]  ;;  %v10202_v3 = vld [vmem:[#allocation2 + $0x120] sm:$0xff] }
 0x8bc   :  { %15069 = vmatmul.mubr.bf16.gmra.mrb[28].mxu1 %v19277_v31 }
 0x8bd   :  { %15072 = vmatprep.mubr.bf16.mxu1 %v19013_v43  ;;  %v10184_v43 = vld [vmem:[#allocation2 + $0x48] sm:$0xff] }
 0x8c4   :  { %15073 = vmatmul.mubr.bf16.gmra.mrb[32].mxu1 %v19015_v49  ;;  %v10185_v49 = vld [vmem:[#allocation2 + $0x50] sm:$0xff] }
 0x8c5   :  { %15076 = vmatprep.mubr.bf16.mxu1 %v19019_v2  ;;  %v10186_v2 = vld [vmem:[#allocation2 + $0x60] sm:$0xff] }
 0x8cc   :  { %15077 = vmatmul.mubr.bf16.gmra.mrb[36].mxu1 %v19021_v45  ;;  %v10187_v45 = vld [vmem:[#allocation2 + $0x68] sm:$0xff] }
 0x8cd   :  { %15080 = vmatprep.mubr.bf16.mxu1 %v19025_v63  ;;  %v10247_v63 = vpack.c.bf16 %v10185_v49, %v10184_v43  ;;  %v10255_v43 = vpack.c.bf16 %v10201_v10, %v10200_v16 }
 0x8d4   :  { %15081 = vmatmul.mubr.bf16.gmra.mrb[40].mxu1 %v19027_v21  ;;  %v16498_v21 = vld [vmem:[%s20940_s2 + $0x1c8] sm:$0xff]  }
 0x8d5   :  { %15084 = vmatprep.mubr.bf16.mxu1 %v19031_v12  ;;  %v10248_v12 = vpack.c.bf16 %v10187_v45, %v10186_v2  ;;  %v10204_v2 = vld [vmem:[#allocation2 + $0x138] sm:$0xff]  ;;  %v10205_v45 = vld [vmem:[#allocation2 + $0x140] sm:$0xff] }
 0x8dc   :  { %15085 = vmatmul.mubr.bf16.gmra.mrb[44].mxu1 %v19033_v26  ;;  %v16499_v26 = vld [vmem:[%s20940_s2 + $0x1d0] sm:$0xff]  }
 0x8dd   :  { %15088 = vmatprep.mubr.bf16.mxu1 %v19037_v44  ;;  %v10188_v44 = vld [vmem:[#allocation2 + $0x78] sm:$0xff] }
 0x8e4   :  { %15089 = vmatmul.mubr.bf16.gmra.mrb[48].mxu1 %v19039_v60  ;;  %v10189_v60 = vld [vmem:[#allocation2 + $0x80] sm:$0xff] }
 0x8e5   :  { %15092 = vmatprep.mubr.bf16.mxu1 %v19043_v59  ;;  %v10190_v59 = vld [vmem:[#allocation2 + $0x90] sm:$0xff] }
 0x8ec   :  { %15093 = vmatmul.mubr.bf16.gmra.mrb[52].mxu1 %v19045_v15  ;;  %v10191_v15 = vld [vmem:[#allocation2 + $0x98] sm:$0xff] }
 0x8ed   :  { %15096 = vmatprep.mubr.bf16.mxu1 %v19049_v14  ;;  %v10249_v14 = vpack.c.bf16 %v10189_v60, %v10188_v44  ;;  %v10208_v44 = vld [vmem:[#allocation2 + $0x168] sm:$0xff]  ;;  %v10209_v60 = vld [vmem:[#allocation2 + $0x170] sm:$0xff] }
 0x8f4   :  { %15097 = vmatmul.mubr.bf16.gmra.mrb[56].mxu1 %v19051_v32  ;;  %v16500_v32 = vld [vmem:[%s20940_s2 + $0x1d8] sm:$0xff]  }
 0x8f5   :  { %15100 = vmatprep.mubr.bf16.mxu1 %v19055_v30  ;;  %v10250_v30 = vpack.c.bf16 %v10191_v15, %v10190_v59  ;;  %v10259_v59 = vpack.c.bf16 %v10209_v60, %v10208_v44  ;;  %v16519_v15 = vld [vmem:[#allocation2] sm:$0xff] }
 0x8fc   :  { %15101 = vmatmul.mubr.bf16.gmra.mrb[60].mxu1 %v19295_v19 }
 0x8fd   :  { %15120 = vmatprep.mubr.bf16.mxu1 %v10246_v24  ;;  %v10203_v24 = vld [vmem:[#allocation2 + $0x128] sm:$0xff] }
 0x8fe   :  { %v10256_v49 = vpack.c.bf16 %v10203_v24, %v10202_v3  ;;  %v10228_v3 = vld [vmem:[#allocation2 + $0x288] sm:$0xff]  ;;  %v10229_v24 = vld [vmem:[#allocation2 + $0x290] sm:$0xff] }
 0x904   :  { %15121 = vmatmul.mubr.bf16.vlgmr.msra.gmra.mrb[0].mxu1 %v10247_v63  ;;  %v10206_v63 = vld [vmem:[#allocation2 + $0x150] sm:$0xff] }
 0x905   :  { %15124 = vmatprep.mubr.bf16.mxu1 %v10248_v12  ;;  %15185 = vmatpush3.bf16.msra.mxu1 %v16497_v29  ;;  %v10253_v29 = vpack.c.bf16 %v10197_v4, %v10196_v8  ;;  %v10257_v12 = vpack.c.bf16 %v10205_v45, %v10204_v2  ;;  %v10222_v8 = vld [vmem:[#allocation2 + $0x240] sm:$0xff]  ;;  %v10223_v4 = vld [vmem:[#allocation2 + $0x248] sm:$0xff]  ;;  %v10269_v2 = vpack.c.bf16 %v10229_v24, %v10228_v3 }
 0x906   :  { %15186 = vmatprep.subr.bf16.mxu1 %v16498_v21  ;;  %v10266_v33 = vpack.c.bf16 %v10223_v4, %v10222_v8  ;;  %v11473_v4 = vld [vmem:[#allocation2 + $0x82] sm:$0xff]  ;;  %v11480_v24 = vld [vmem:[#allocation2 + $0xda] sm:$0xff] }
 0x909   :  { %15187 = vmatpush3.bf16.msra.mxu1 %v16498_v21  ;;  %v10207_v21 = vld [vmem:[#allocation2 + $0x158] sm:$0xff] }
 0x90a   :  { %15188 = vmatprep.subr.bf16.mxu1 %v16499_v26 }
 0x90c   :  { %15125 = vmatmul.mubr.bf16.gmra.mrb[4].mxu1 %v10249_v14  ;;  %v10261_v14 = vpack.c.bf16 %v16519_v15, %v16519_v15  ;;  %v10237_v15 = vld [vmem:[#allocation2 + $0x2f0] sm:$0xff] }
 0x90d   :  { %15128 = vmatprep.mubr.bf16.mxu1 %v10250_v30  ;;  %15189 = vmatpush3.bf16.msra.mxu1 %v16499_v26  ;;  %v10258_v26 = vpack.c.bf16 %v10207_v21, %v10206_v63  ;;  %v10215_v30 = vld [vmem:[#allocation2 + $0x1e8] sm:$0xff]  ;;  %v10232_v63 = vld [vmem:[#allocation2 + $0x2b8] sm:$0xff]  ;;  %v10233_v21 = vld [vmem:[#allocation2 + $0x2c0] sm:$0xff] }
 0x90e   :  { %15190 = vmatprep.subr.bf16.mxu1 %v16500_v32  ;;  %v10271_v44 = vpack.c.bf16 %v10233_v21, %v10232_v63  ;;  %v11484_v21 = vld [vmem:[#allocation2 + $0x10a] sm:$0xff] }
 0x911   :  { %15191 = vmatpush3.bf16.msra.mxu1 %v16500_v32  ;;  %v10214_v32 = vld [vmem:[#allocation2 + $0x1e0] sm:$0xff] }
 0x912   :  { %15192 = vmatprep.subr.bf16.mxu1 %v16501_v17 }
 0x914   :  { %15129 = vmatmul.mubr.bf16.gmra.mrb[8].mxu1 %v10251_v46  ;;  %v10263_v46 = vpack.c.bf16 %v10217_v62, %v10216_v50  ;;  %v10240_v62 = vld [vmem:[#allocation2 + $0x318] sm:$0xff] }
 0x915   :  { %15132 = vmatprep.mubr.bf16.mxu1 %v10252_v40  ;;  %15193 = vmatpush3.bf16.msra.mxu1 %v16501_v17  ;;  %v10262_v17 = vpack.c.bf16 %v10215_v30, %v10214_v32  ;;  %v10220_v40 = vld [vmem:[#allocation2 + $0x228] sm:$0xff]  ;;  %v10238_v32 = vld [vmem:[#allocation2 + $0x300] sm:$0xff] }
 0x916   :  { %15194 = vmatprep.subr.bf16.mxu1 %v16502_v23  ;;  %v10239_v30 = vld [vmem:[#allocation2 + $0x308] sm:$0xff] }
 0x917   :  { %v10274_v50 = vpack.c.bf16 %v10239_v30, %v10238_v32  ;;  %v11489_v32 = vld [vmem:[#allocation2 + $0x142] sm:$0xff]  ;;  %v11490_v30 = vld [vmem:[#allocation2 + $0x152] sm:$0xff] }
 0x919   :  { %15195 = vmatpush3.bf16.msra.mxu1 %v16502_v23  ;;  %v10264_v23 = vpack.c.bf16 %v10219_v53, %v10218_v18  ;;  %v10241_v18 = vld [vmem:[#allocation2 + $0x320] sm:$0xff] }
 0x91a   :  { %15196 = vmatprep.subr.bf16.mxu1 %v16503_v42  ;;  %v10275_v53 = vpack.c.bf16 %v10241_v18, %v10240_v62  ;;  %v11492_v18 = vld [vmem:[#allocation2 + $0x16a] sm:$0xff] }
 0x91c   :  { %15133 = vmatmul.mubr.bf16.gmra.mrb[12].mxu1 %v10253_v29  ;;  %v10225_v29 = vld [vmem:[#allocation2 + $0x260] sm:$0xff] }
 0x91d   :  { %15136 = vmatprep.mubr.bf16.mxu1 %v10254_v47  ;;  %15197 = vmatpush3.bf16.msra.mxu1 %v16503_v42  ;;  %v10221_v42 = vld [vmem:[#allocation2 + $0x230] sm:$0xff]  ;;  %v10227_v47 = vld [vmem:[#allocation2 + $0x278] sm:$0xff]  ;;  %v10267_v16 = vpack.c.bf16 %v10225_v29, %v10224_v7 }
 0x91e   :  { %15198 = vmatprep.subr.bf16.mxu1 %v16504_v38  ;;  %v11476_v29 = vld [vmem:[#allocation2 + $0xaa] sm:$0xff] }
 0x921   :  { %15199 = vmatpush3.bf16.msra.mxu1 %v16504_v38  ;;  %v10226_v38 = vld [vmem:[#allocation2 + $0x270] sm:$0xff] }
 0x922   :  { %15264 = vmatprep.subr.bf16.mxu1 %v19322_v48  ;;  %v10268_v10 = vpack.c.bf16 %v10227_v47, %v10226_v38  ;;  %v11477_v38 = vld [vmem:[#allocation2 + $0xb2] sm:$0xff]  ;;  %v11478_v47 = vld [vmem:[#allocation2 + $0xc2] sm:$0xff] }
 0x924   :  { %15137 = vmatmul.mubr.bf16.gmra.mrb[16].mxu1 %v10255_v43  ;;  %v10230_v43 = vld [vmem:[#allocation2 + $0x2a0] sm:$0xff] }
 0x925   :  { %15140 = vmatprep.mubr.bf16.mxu1 %v10256_v49  ;;  %v10231_v49 = vld [vmem:[#allocation2 + $0x2a8] sm:$0xff] }
 0x926   :  { %v10270_v45 = vpack.c.bf16 %v10231_v49, %v10230_v43  ;;  %v11481_v43 = vld [vmem:[#allocation2 + $0xe2] sm:$0xff]  ;;  %v11482_v49 = vld [vmem:[#allocation2 + $0xf2] sm:$0xff] }
 0x92c   :  { %15141 = vmatmul.mubr.bf16.gmra.mrb[20].mxu1 %v10257_v12  ;;  %v10234_v12 = vld [vmem:[#allocation2 + $0x2d0] sm:$0xff] }
 0x92d   :  { %15144 = vmatprep.mubr.bf16.mxu1 %v10258_v26  ;;  %v10235_v26 = vld [vmem:[#allocation2 + $0x2d8] sm:$0xff] }
 0x92e   :  { %v10272_v60 = vpack.c.bf16 %v10235_v26, %v10234_v12  ;;  %v11485_v12 = vld [vmem:[#allocation2 + $0x112] sm:$0xff]  ;;  %v11486_v26 = vld [vmem:[#allocation2 + $0x122] sm:$0xff] }
 0x934   :  { %15145 = vmatmul.mubr.bf16.gmra.mrb[24].mxu1 %v10259_v59  ;;  %v10236_v59 = vld [vmem:[#allocation2 + $0x2e8] sm:$0xff] }
 0x935   :  { %15148 = vmatprep.mubr.bf16.mxu1 %v19098_v27  ;;  %v10265_v27 = vpack.c.bf16 %v10221_v42, %v10220_v40  ;;  %v11468_v40 = vld [vmem:[#allocation2 + $0x4a] sm:$0xff]  ;;  %v11470_v42 = vld [vmem:[#allocation2 + $0x62] sm:$0xff] }
 0x93c   :  { %15149 = vmatmul.mubr.bf16.gmra.mrb[28].mxu1 %v10261_v14 }
 0x93d   :  { %15152 = vmatprep.mubr.bf16.mxu1 %v10262_v17  ;;  %v10273_v17 = vpack.c.bf16 %v10237_v15, %v10236_v59  ;;  %v11488_v15 = vld [vmem:[#allocation2 + $0x13a] sm:$0xff] }
 0x944   :  { %15153 = vmatmul.mubr.bf16.gmra.mrb[32].mxu1 %v10263_v46  ;;  %v16506_v46 = vld [vmem:[%s20940_s2 + $0x208] sm:$0xff]  }
 0x945   :  { %15156 = vmatprep.mubr.bf16.mxu1 %v10264_v23  ;;  %v16507_v23 = vld [vmem:[%s20940_s2 + $0x210] sm:$0xff]  }
 0x94c   :  { %15157 = vmatmul.mubr.bf16.gmra.mrb[36].mxu1 %v10265_v27  ;;  %v11474_v27 = vld [vmem:[#allocation2 + $0x92] sm:$0xff] }
 0x94d   :  { %15160 = vmatprep.mubr.bf16.mxu1 %v10266_v33 }
 0x954   :  { %15161 = vmatmul.mubr.bf16.gmra.mrb[40].mxu1 %v10267_v16  ;;  %v11479_v16 = vld [vmem:[#allocation2 + $0xca] sm:$0xff] }
 0x955   :  { %15164 = vmatprep.mubr.bf16.mxu1 %v10268_v10  ;;  %v11535_v10 = vpack.c.bf16 %v11477_v38, %v11476_v29  ;;  %v11536_v3 = vpack.c.bf16 %v11479_v16, %v11478_v47  ;;  %v11520_v29 = vld [vmem:[#allocation2 + $0x2ea] sm:$0xff]  ;;  %v11521_v38 = vld [vmem:[#allocation2 + $0x2f2] sm:$0xff]  ;;  %v11522_v47 = vld [vmem:[#allocation2 + $0x302] sm:$0xff] }
 0x956   :  { %v11523_v16 = vld [vmem:[#allocation2 + $0x30a] sm:$0xff] }
 0x95c   :  { %15165 = vmatmul.mubr.bf16.gmra.mrb[44].mxu1 %v10269_v2  ;;  %v11483_v2 = vld [vmem:[#allocation2 + $0xfa] sm:$0xff] }
 0x95d   :  { %15168 = vmatprep.mubr.bf16.mxu1 %v10270_v45  ;;  %v11537_v45 = vpack.c.bf16 %v11481_v43, %v11480_v24  ;;  %v11538_v63 = vpack.c.bf16 %v11483_v2, %v11482_v49  ;;  %v11524_v24 = vld [vmem:[#allocation2 + $0x31a] sm:$0xff]  ;;  %v11525_v43 = vld [vmem:[#allocation2 + $0x322] sm:$0xff]  ;;  %v11528_v2 = vld [vmem:[#allocation2 + $0x34a] sm:$0xff] }
 0x95e   :  { %v11559_v49 = vpack.c.bf16 %v11525_v43, %v11524_v24 }
 0x964   :  { %15169 = vmatmul.mubr.bf16.gmra.mrb[48].mxu1 %v10271_v44  ;;  %v11487_v44 = vld [vmem:[#allocation2 + $0x12a] sm:$0xff] }
 0x965   :  { %15172 = vmatprep.mubr.bf16.mxu1 %v10272_v60  ;;  %v11539_v60 = vpack.c.bf16 %v11485_v12, %v11484_v21  ;;  %v11540_v59 = vpack.c.bf16 %v11487_v44, %v11486_v26 }
 0x96c   :  { %15173 = vmatmul.mubr.bf16.gmra.mrb[52].mxu1 %v10273_v17  ;;  %v11491_v17 = vld [vmem:[#allocation2 + $0x15a] sm:$0xff] }
 0x96d   :  { %15176 = vmatprep.mubr.bf16.mxu1 %v10274_v50  ;;  %v11541_v50 = vpack.c.bf16 %v11489_v32, %v11488_v15  ;;  %v11542_v62 = vpack.c.bf16 %v11491_v17, %v11490_v30 }
 0x974   :  { %15177 = vmatmul.mubr.bf16.gmra.mrb[56].mxu1 %v10275_v53  ;;  %v11493_v53 = vld [vmem:[#allocation2 + $0x172] sm:$0xff] }
 0x975   :  { %15180 = vmatprep.mubr.bf16.mxu1 %v19116_v22  ;;  %v16508_v22 = vld [vmem:[%s20940_s2 + $0x218] sm:$0xff]  }
 0x97c   :  { %15181 = vmatmul.mubr.bf16.gmra.mrb[60].mxu1 %v10261_v14  ;;  %v11467_v14 = vld [vmem:[#allocation2 + $0x3a] sm:$0xff] }
 0x97d   :  { %15200 = vmatprep.mubr.bf16.mxu1 %v19119_v55  ;;  %v16509_v55 = vld [vmem:[%s20940_s2 + $0x220] sm:$0xff]  }
 0x984   :  { %15201 = vmatmul.mubr.bf16.vlgmr.msra.gmra.mrb[0].mxu1 %v19124_v20  ;;  %v16510_v20 = vld [vmem:[%s20940_s2 + $0x228] sm:$0xff]  }
 0x985   :  { %15204 = vmatprep.mubr.bf16.mxu1 %v19131_v61  ;;  %15265 = vmatpush3.bf16.msra.mxu1 %v19322_v48  ;;  %v16511_v61 = vld [vmem:[%s20940_s2 + $0x230] sm:$0xff]  }
 0x986   :  { %15266 = vmatprep.subr.bf16.mxu1 %v16506_v46 }
 0x989   :  { %15267 = vmatpush3.bf16.msra.mxu1 %v16506_v46  ;;  %v11543_v46 = vpack.c.bf16 %v11493_v53, %v11492_v18 }
 0x98a   :  { %15268 = vmatprep.subr.bf16.mxu1 %v16507_v23 }
 0x98c   :  { %15205 = vmatmul.mubr.bf16.gmra.mrb[4].mxu1 %v19136_v35  ;;  %v16512_v35 = vld [vmem:[%s20940_s2 + $0x238] sm:$0xff]  }
 0x98d   :  { %15208 = vmatprep.mubr.bf16.mxu1 %v19143_v11  ;;  %15269 = vmatpush3.bf16.msra.mxu1 %v16507_v23  ;;  %v10854_v11 = vld [vmem:[#allocation2 + $0x199] sm:$0xff] }
 0x98e   :  { %15270 = vmatprep.subr.bf16.mxu1 %v16508_v22  ;;  %v11496_v23 = vld [vmem:[#allocation2 + $0x19a] sm:$0xff] }
 0x991   :  { %15271 = vmatpush3.bf16.msra.mxu1 %v16508_v22  ;;  %v11497_v22 = vld [vmem:[#allocation2 + $0x1a2] sm:$0xff] }
 0x992   :  { %15272 = vmatprep.subr.bf16.mxu1 %v16509_v55 }
 0x994   :  { %15209 = vmatmul.mubr.bf16.gmra.mrb[8].mxu1 %v19148_v39  ;;  %v10855_v39 = vld [vmem:[#allocation2 + $0x1a1] sm:$0xff] }
 0x995   :  { %15212 = vmatprep.mubr.bf16.mxu1 %v19155_v57  ;;  %15273 = vmatpush3.bf16.msra.mxu1 %v16509_v55  ;;  %v10903_v57 = vpack.c.bf16 %v10855_v39, %v10854_v11  ;;  %v11545_v55 = vpack.c.bf16 %v11497_v22, %v11496_v23  ;;  %v11500_v11 = vld [vmem:[#allocation2 + $0x1fa] sm:$0xff]  ;;  %v11501_v39 = vld [vmem:[#allocation2 + $0x202] sm:$0xff] }
 0x996   :  { %15274 = vmatprep.subr.bf16.mxu1 %v16510_v20 }
 0x999   :  { %15275 = vmatpush3.bf16.msra.mxu1 %v16510_v20  ;;  %v11498_v20 = vld [vmem:[#allocation2 + $0x1e2] sm:$0xff] }
 0x99a   :  { %15276 = vmatprep.subr.bf16.mxu1 %v16511_v61 }
 0x99c   :  { %15213 = vmatmul.mubr.bf16.gmra.mrb[12].mxu1 %v19160_v28  ;;  %v21368_v28 = vld [vmem:[#allocation32_spill] sm:$0xff] }
 0x99d   :  { %15216 = vmatprep.mubr.bf16.mxu1 %v19169_v1  ;;  %15277 = vmatpush3.bf16.msra.mxu1 %v16511_v61  ;;  %v21369_v1 = vld [vmem:[#allocation33_spill] sm:$0xff] }
 0x99e   :  { %15278 = vmatprep.subr.bf16.mxu1 %v16512_v35  ;;  %v11499_v61 = vld [vmem:[#allocation2 + $0x1ea] sm:$0xff] }
 0x9a1   :  { %15279 = vmatpush3.bf16.msra.mxu1 %v16512_v35  ;;  %v11546_v35 = vpack.c.bf16 %v11499_v61, %v11498_v20 }
 0x9a4   :  { %15217 = vmatmul.mubr.bf16.gmra.mrb[16].mxu1 %v19172_v6  ;;  %v21370_v6 = vld [vmem:[#allocation34_spill] sm:$0xff] }
 0x9a5   :  { %15220 = vmatprep.mubr.bf16.mxu1 %v19176_v54  ;;  %v21371_v54 = vld [vmem:[#allocation35_spill] sm:$0xff] }
 0x9ac   :  { %15221 = vmatmul.mubr.bf16.gmra.mrb[20].mxu1 %v19178_v37  ;;  %v21372_v37 = vld [vmem:[#allocation36_spill] sm:$0xff] }
 0x9ad   :  { %15224 = vmatprep.mubr.bf16.mxu1 %v19182_v0  ;;  %v21373_v0 = vld [vmem:[#allocation13_spill] sm:$0xff] }
 0x9b4   :  { %15225 = vmatmul.mubr.bf16.gmra.mrb[24].mxu1 %v19184_v34  ;;  %v10883_v34 = vld [vmem:[#allocation2 + $0x321] sm:$0xff] }
 0x9b5   :  { %15228 = vmatprep.mubr.bf16.mxu1 %v19188_v9  ;;  %v10917_v9 = vpack.c.bf16 %v10883_v34, %v19227_v36  ;;  %v11472_v36 = vld [vmem:[#allocation2 + $0x7a] sm:$0xff] }
 0x9b6   :  { %v11533_v33 = vpack.c.bf16 %v11473_v4, %v11472_v36  ;;  %v11516_v36 = vld [vmem:[#allocation2 + $0x2ba] sm:$0xff]  ;;  %v11517_v4 = vld [vmem:[#allocation2 + $0x2c2] sm:$0xff] }
 0x9bc   :  { %15229 = vmatmul.mubr.bf16.gmra.mrb[28].mxu1 %v10903_v57  ;;  %v11502_v57 = vld [vmem:[#allocation2 + $0x212] sm:$0xff] }
 0x9bd   :  { %15232 = vmatprep.mubr.bf16.mxu1 %v19191_v5  ;;  %v10886_v5 = vld [vmem:[#allocation2 + $0x349] sm:$0xff] }
 0x9c4   :  { %15233 = vmatmul.mubr.bf16.gmra.mrb[32].mxu1 %v19193_v52  ;;  %v10887_v52 = vld [vmem:[#allocation2 + $0x351] sm:$0xff] }
 0x9c5   :  { %15236 = vmatprep.mubr.bf16.mxu1 %v21368_v28  ;;  %v10919_v48 = vpack.c.bf16 %v10887_v52, %v10886_v5  ;;  %v11503_v28 = vld [vmem:[#allocation2 + $0x21a] sm:$0xff]  ;;  %v11509_v52 = vld [vmem:[#allocation2 + $0x262] sm:$0xff] }
 0x9c6   :  { %v11508_v5 = vld [vmem:[#allocation2 + $0x25a] sm:$0xff] }
 0x9cc   :  { %15237 = vmatmul.mubr.bf16.gmra.mrb[36].mxu1 %v21369_v1  ;;  %v11547_v1 = vpack.c.bf16 %v11501_v39, %v11500_v11 }
 0x9cd   :  { %15240 = vmatprep.mubr.bf16.mxu1 %v21370_v6  ;;  %v11548_v6 = vpack.c.bf16 %v11503_v28, %v11502_v57 }
 0x9d4   :  { %15241 = vmatmul.mubr.bf16.gmra.mrb[40].mxu1 %v21371_v54  ;;  %v11504_v54 = vld [vmem:[#allocation2 + $0x22a] sm:$0xff] }
 0x9d5   :  { %15244 = vmatprep.mubr.bf16.mxu1 %v21372_v37  ;;  %v11505_v37 = vld [vmem:[#allocation2 + $0x232] sm:$0xff] }
 0x9d6   :  { %v11549_v34 = vpack.c.bf16 %v11505_v37, %v11504_v54 }
 0x9dc   :  { %15245 = vmatmul.mubr.bf16.gmra.mrb[44].mxu1 %v19211_v41  ;;  %v11466_v41 = vld [vmem:[#allocation2 + $0x32] sm:$0xff] }
 0x9dd   :  { %15248 = vmatprep.mubr.bf16.mxu1 %v19215_v13  ;;  %v11530_v13 = vpack.c.bf16 %v11467_v14, %v11466_v41  ;;  %v11511_v41 = vld [vmem:[#allocation2 + $0x27a] sm:$0xff]  ;;  %v11551_v14 = vpack.c.bf16 %v11509_v52, %v11508_v5 }
 0x9e4   :  { %15249 = vmatmul.mubr.bf16.gmra.mrb[48].mxu1 %v21373_v0  ;;  %v11506_v0 = vld [vmem:[#allocation2 + $0x242] sm:$0xff] }
 0x9e5   :  { %15252 = vmatprep.mubr.bf16.mxu1 %v19221_v58  ;;  %v11469_v58 = vld [vmem:[#allocation2 + $0x52] sm:$0xff] }
 0x9e6   :  { %v11531_v8 = vpack.c.bf16 %v11469_v58, %v11468_v40  ;;  %v11512_v40 = vld [vmem:[#allocation2 + $0x28a] sm:$0xff]  ;;  %v11513_v58 = vld [vmem:[#allocation2 + $0x292] sm:$0xff] }
 0x9ec   :  { %15253 = vmatmul.mubr.bf16.gmra.mrb[52].mxu1 %v19223_v51  ;;  %v11471_v51 = vld [vmem:[#allocation2 + $0x6a] sm:$0xff] }
 0x9ed   :  { %15256 = vmatprep.mubr.bf16.mxu1 %v19229_v25  ;;  %v11532_v25 = vpack.c.bf16 %v11471_v51, %v11470_v42  ;;  %v11514_v42 = vld [vmem:[#allocation2 + $0x2a2] sm:$0xff]  ;;  %v11515_v51 = vld [vmem:[#allocation2 + $0x2aa] sm:$0xff] }
 0x9f4   :  { %15257 = vmatmul.mubr.bf16.gmra.mrb[56].mxu1 %v10917_v9 }
 0x9f5   :  { %15260 = vmatprep.mubr.bf16.mxu1 %v19234_v56  ;;  %v11475_v56 = vld [vmem:[#allocation2 + $0x9a] sm:$0xff] }
 0x9f6   :  { %v11534_v7 = vpack.c.bf16 %v11475_v56, %v11474_v27  ;;  %v11518_v27 = vld [vmem:[#allocation2 + $0x2d2] sm:$0xff]  ;;  %v11519_v56 = vld [vmem:[#allocation2 + $0x2da] sm:$0xff] }
 0x9fc   :  { %15261 = vmatmul.mubr.bf16.gmra.mrb[60].mxu1 %v10919_v48  ;;  %v11510_v48 = vld [vmem:[#allocation2 + $0x272] sm:$0xff] }
 0x9fd   :  { %15280 = vmatprep.mubr.bf16.mxu1 %v11530_v13  ;;  %v11552_v13 = vpack.c.bf16 %v11511_v41, %v11510_v48 }
 0xa04   :  { %15281 = vmatmul.mubr.bf16.vlgmr.msra.gmra.mrb[0].mxu1 %v11531_v8  ;;  %v11553_v8 = vpack.c.bf16 %v11513_v58, %v11512_v40 }
 0xa05   :  { %15284 = vmatprep.mubr.bf16.mxu1 %v11532_v25  ;;  %v11554_v25 = vpack.c.bf16 %v11515_v51, %v11514_v42 }
 0xa0c   :  { %15285 = vmatmul.mubr.bf16.gmra.mrb[4].mxu1 %v11533_v33  ;;  %v11555_v33 = vpack.c.bf16 %v11517_v4, %v11516_v36 }
 0xa0d   :  { %15288 = vmatprep.mubr.bf16.mxu1 %v11534_v7  ;;  %v11556_v7 = vpack.c.bf16 %v11519_v56, %v11518_v27 }
 0xa14   :  { %15289 = vmatmul.mubr.bf16.gmra.mrb[8].mxu1 %v11535_v10  ;;  %v11557_v10 = vpack.c.bf16 %v11521_v38, %v11520_v29 }
 0xa15   :  { %15292 = vmatprep.mubr.bf16.mxu1 %v11536_v3  ;;  %v11558_v3 = vpack.c.bf16 %v11523_v16, %v11522_v47 }
 0xa1c   :  { %15293 = vmatmul.mubr.bf16.gmra.mrb[12].mxu1 %v11537_v45  ;;  %v11529_v45 = vld [vmem:[#allocation2 + $0x352] sm:$0xff] }
 0xa1d   :  { %15296 = vmatprep.mubr.bf16.mxu1 %v11538_v63  ;;  %v11561_v63 = vpack.c.bf16 %v11529_v45, %v11528_v2 }
 0xa24   :  { %15297 = vmatmul.mubr.bf16.gmra.mrb[16].mxu1 %v11539_v60 }
 0xa25   :  { %15300 = vmatprep.mubr.bf16.mxu1 %v11540_v59 }
 0xa2c   :  { %15301 = vmatmul.mubr.bf16.gmra.mrb[20].mxu1 %v11541_v50 }
 0xa2d   :  { %15304 = vmatprep.mubr.bf16.mxu1 %v11542_v62 }
 0xa34   :  { %15305 = vmatmul.mubr.bf16.gmra.mrb[24].mxu1 %v11543_v46 }
 0xa35   :  { %15308 = vmatprep.mubr.bf16.mxu1 %v19277_v31  ;;  %v11507_v31 = vld [vmem:[#allocation2 + $0x24a] sm:$0xff] }
 0xa36   :  { %v11550_v9 = vpack.c.bf16 %v11507_v31, %v11506_v0 }
 0xa3c   :  { %15309 = vmatmul.mubr.bf16.gmra.mrb[28].mxu1 %v11545_v55 }
 0xa3d   :  { %15312 = vmatprep.mubr.bf16.mxu1 %v11546_v35 }
 0xa44   :  { %15313 = vmatmul.mubr.bf16.gmra.mrb[32].mxu1 %v11547_v1 }
 0xa45   :  { %15316 = vmatprep.mubr.bf16.mxu1 %v11548_v6 }
 0xa4c   :  { %15317 = vmatmul.mubr.bf16.gmra.mrb[36].mxu1 %v11549_v34 }
 0xa4d   :  { %15320 = vmatprep.mubr.bf16.mxu1 %v11550_v9 }
 0xa54   :  { %15321 = vmatmul.mubr.bf16.gmra.mrb[40].mxu1 %v11551_v14 }
 0xa55   :  { %15324 = vmatprep.mubr.bf16.mxu1 %v11552_v13 }
 0xa5c   :  { %15325 = vmatmul.mubr.bf16.gmra.mrb[44].mxu1 %v11553_v8 }
 0xa5d   :  { %15328 = vmatprep.mubr.bf16.mxu1 %v11554_v25 }
 0xa64   :  { %15329 = vmatmul.mubr.bf16.gmra.mrb[48].mxu1 %v11555_v33 }
 0xa65   :  { %15332 = vmatprep.mubr.bf16.mxu1 %v11556_v7 }
 0xa6c   :  { %15333 = vmatmul.mubr.bf16.gmra.mrb[52].mxu1 %v11557_v10 }
 0xa6d   :  { %15336 = vmatprep.mubr.bf16.mxu1 %v11558_v3 }
 0xa74   :  { %15337 = vmatmul.mubr.bf16.gmra.mrb[56].mxu1 %v11559_v49 }
 0xa75   :  { %15340 = vmatprep.mubr.bf16.mxu1 %v19295_v19 }
 0xa7c   :  { %15341 = vmatmul.mubr.bf16.gmra.mrb[60].mxu1 %v11561_v63 }
 0xad7   :  { %v19381_v21 = vpop.f32.mrb[0].mxu1 }
 0xad8   :  { %v19383_v12 = vpop.f32.mrb[1].mxu1  ;;  %v12243_v15 = vmul.f32 %v19381_v21, %v19381_v21 }
 0xad9   :  { %v19385_v26 = vpop.f32.mrb[2].mxu1  ;;  %v12241_v60 = vmul.f32 %v19383_v12, %v19383_v12 }
 0xada   :  { %v19387_v44 = vpop.f32.mrb[3].mxu1  ;;  %v12244_v17 = vmul.f32 %v19385_v26, %v19385_v26 }
 0xadb   :  { %v12172_v59 = vadd.f32 %v19387_v44, %v19383_v12  ;;  %v12242_v19 = vmul.f32 %v19387_v44, %v19387_v44 }
 0xadd   :  { %v12173_v32 = vadd.f32 %v19381_v21, %v12172_v59  ;;  %v12305_v30 = vadd.f32 %v12242_v19, %v12241_v60 }
 0xadf   :  { %v12306_v50 = vadd.f32 %v12305_v30, %v12243_v15  ;;  %v19400_v62 = vpop.f32.mrb[4].mxu1  ;;  %v12174_v18 = vadd.f32 %v19385_v26, %v12173_v32 }
 0xae0   :  { %v19403_v53 = vpop.f32.mrb[5].mxu1  ;;  %v12247_v39 = vmul.f32 %v19400_v62, %v19400_v62 }
 0xae1   :  { %v12175_v46 = vadd.f32 %v12174_v18, %v19403_v53  ;;  %v12245_v23 = vmul.f32 %v19403_v53, %v19403_v53  ;;  %v12307_v22 = vadd.f32 %v12306_v50, %v12244_v17  ;;  %v19408_v55 = vpop.f32.mrb[6].mxu1 }
 0xae2   :  { %v19410_v20 = vpop.f32.mrb[7].mxu1  ;;  %v12248_v1 = vmul.f32 %v19408_v55, %v19408_v55 }
 0xae3   :  { %v12308_v61 = vadd.f32 %v12307_v22, %v12245_v23  ;;  %v12176_v35 = vadd.f32 %v12175_v46, %v19410_v20  ;;  %v12246_v11 = vmul.f32 %v19410_v20, %v19410_v20 }
 0xae5   :  { %v12177_v57 = vadd.f32 %v19400_v62, %v12176_v35  ;;  %v12309_v28 = vadd.f32 %v12308_v61, %v12246_v11 }
 0xae7   :  { %v12310_v6 = vadd.f32 %v12309_v28, %v12247_v39  ;;  %v19420_v54 = vpop.f32.mrb[8].mxu1  ;;  %v12178_v37 = vadd.f32 %v19408_v55, %v12177_v57 }
 0xae8   :  { %v19423_v0 = vpop.f32.mrb[9].mxu1  ;;  %v12251_v13 = vmul.f32 %v19420_v54, %v19420_v54 }
 0xae9   :  { %v12179_v31 = vadd.f32 %v12178_v37, %v19423_v0  ;;  %v12249_v34 = vmul.f32 %v19423_v0, %v19423_v0  ;;  %v12311_v9 = vadd.f32 %v12310_v6, %v12248_v1  ;;  %v19428_v5 = vpop.f32.mrb[10].mxu1 }
 0xaea   :  { %v19430_v52 = vpop.f32.mrb[11].mxu1  ;;  %v12252_v42 = vmul.f32 %v19428_v5, %v19428_v5 }
 0xaeb   :  { %v12312_v48 = vadd.f32 %v12311_v9, %v12249_v34  ;;  %v12180_v41 = vadd.f32 %v12179_v31, %v19430_v52  ;;  %v12250_v14 = vmul.f32 %v19430_v52, %v19430_v52 }
 0xaed   :  { %v12181_v40 = vadd.f32 %v19420_v54, %v12180_v41  ;;  %v12313_v58 = vadd.f32 %v12312_v48, %v12250_v14 }
 0xaef   :  { %v12314_v51 = vadd.f32 %v12313_v58, %v12251_v13  ;;  %v19440_v8 = vpop.f32.mrb[12].mxu1  ;;  %v12182_v25 = vadd.f32 %v19428_v5, %v12181_v40 }
 0xaf0   :  { %v19443_v36 = vpop.f32.mrb[13].mxu1  ;;  %v12255_v16 = vmul.f32 %v19440_v8, %v19440_v8 }
 0xaf1   :  { %v12183_v4 = vadd.f32 %v12182_v25, %v19443_v36  ;;  %v12253_v27 = vmul.f32 %v19443_v36, %v19443_v36  ;;  %v12315_v56 = vadd.f32 %v12314_v51, %v12252_v42  ;;  %v19448_v33 = vpop.f32.mrb[14].mxu1 }
 0xaf2   :  { %v19450_v7 = vpop.f32.mrb[15].mxu1  ;;  %v12256_v24 = vmul.f32 %v19448_v33, %v19448_v33 }
 0xaf3   :  { %v12316_v29 = vadd.f32 %v12315_v56, %v12253_v27  ;;  %v12184_v38 = vadd.f32 %v12183_v4, %v19450_v7  ;;  %v12254_v47 = vmul.f32 %v19450_v7, %v19450_v7 }
 0xaf5   :  { %v12185_v10 = vadd.f32 %v19440_v8, %v12184_v38  ;;  %v12317_v3 = vadd.f32 %v12316_v29, %v12254_v47 }
 0xaf7   :  { %v12318_v43 = vadd.f32 %v12317_v3, %v12255_v16  ;;  %v19460_v49 = vpop.f32.mrb[16].mxu1  ;;  %v12186_v2 = vadd.f32 %v19448_v33, %v12185_v10 }
 0xaf8   :  { %v19463_v45 = vpop.f32.mrb[17].mxu1  ;;  %v12259_v50 = vmul.f32 %v19460_v49, %v19460_v49 }
 0xaf9   :  { %v12187_v63 = vadd.f32 %v12186_v2, %v19463_v45  ;;  %v12257_v60 = vmul.f32 %v19463_v45, %v19463_v45  ;;  %v12319_v59 = vadd.f32 %v12318_v43, %v12256_v24  ;;  %v19468_v19 = vpop.f32.mrb[18].mxu1 }
 0xafa   :  { %v19470_v15 = vpop.f32.mrb[19].mxu1  ;;  %v12260_v23 = vmul.f32 %v19468_v19, %v19468_v19 }
 0xafb   :  { %v12320_v32 = vadd.f32 %v12319_v59, %v12257_v60  ;;  %v12188_v30 = vadd.f32 %v12187_v63, %v19470_v15  ;;  %v12258_v17 = vmul.f32 %v19470_v15, %v19470_v15 }
 0xafd   :  { %v12189_v18 = vadd.f32 %v19460_v49, %v12188_v30  ;;  %v12321_v46 = vadd.f32 %v12320_v32, %v12258_v17 }
 0xaff   :  { %v12322_v22 = vadd.f32 %v12321_v46, %v12259_v50  ;;  %v19480_v61 = vpop.f32.mrb[20].mxu1  ;;  %v12190_v35 = vadd.f32 %v19468_v19, %v12189_v18 }
 0xb00   :  { %v19483_v11 = vpop.f32.mrb[21].mxu1  ;;  %v12263_v9 = vmul.f32 %v19480_v61, %v19480_v61 }
 0xb01   :  { %v12191_v39 = vadd.f32 %v12190_v35, %v19483_v11  ;;  %v12261_v57 = vmul.f32 %v19483_v11, %v19483_v11  ;;  %v12323_v28 = vadd.f32 %v12322_v22, %v12260_v23  ;;  %v19488_v1 = vpop.f32.mrb[22].mxu1 }
 0xb02   :  { %v19490_v6 = vpop.f32.mrb[23].mxu1  ;;  %v12264_v14 = vmul.f32 %v19488_v1, %v19488_v1 }
 0xb03   :  { %v12324_v37 = vadd.f32 %v12323_v28, %v12261_v57  ;;  %v12192_v31 = vadd.f32 %v12191_v39, %v19490_v6  ;;  %v12262_v34 = vmul.f32 %v19490_v6, %v19490_v6 }
 0xb05   :  { %v12193_v48 = vadd.f32 %v19480_v61, %v12192_v31  ;;  %v12325_v41 = vadd.f32 %v12324_v37, %v12262_v34 }
 0xb07   :  { %v12326_v13 = vadd.f32 %v12325_v41, %v12263_v9  ;;  %v19500_v40 = vpop.f32.mrb[24].mxu1  ;;  %v12194_v58 = vadd.f32 %v19488_v1, %v12193_v48 }
 0xb08   :  { %v19503_v42 = vpop.f32.mrb[25].mxu1  ;;  %v12267_v16 = vmul.f32 %v19500_v40, %v19500_v40 }
 0xb09   :  { %v12195_v51 = vadd.f32 %v12194_v58, %v19503_v42  ;;  %v12265_v25 = vmul.f32 %v19503_v42, %v19503_v42  ;;  %v12327_v4 = vadd.f32 %v12326_v13, %v12264_v14  ;;  %v19508_v27 = vpop.f32.mrb[26].mxu1 }
 0xb0a   :  { %v19510_v56 = vpop.f32.mrb[27].mxu1  ;;  %v12268_v24 = vmul.f32 %v19508_v27, %v19508_v27 }
 0xb0b   :  { %v12328_v29 = vadd.f32 %v12327_v4, %v12265_v25  ;;  %v12196_v38 = vadd.f32 %v12195_v51, %v19510_v56  ;;  %v12266_v47 = vmul.f32 %v19510_v56, %v19510_v56 }
 0xb0d   :  { %v12197_v10 = vadd.f32 %v19500_v40, %v12196_v38  ;;  %v12329_v3 = vadd.f32 %v12328_v29, %v12266_v47 }
 0xb0f   :  { %v12330_v43 = vadd.f32 %v12329_v3, %v12267_v16  ;;  %v19520_v2 = vpop.f32.mrb[28].mxu1  ;;  %v12198_v63 = vadd.f32 %v19508_v27, %v12197_v10 }
 0xb10   :  { %v19523_v60 = vpop.f32.mrb[29].mxu1  ;;  %v12271_v22 = vmul.f32 %v19520_v2, %v19520_v2 }
 0xb11   :  { %v12199_v59 = vadd.f32 %v12198_v63, %v19523_v60  ;;  %v12269_v32 = vmul.f32 %v19523_v60, %v19523_v60  ;;  %v12331_v30 = vadd.f32 %v12330_v43, %v12268_v24  ;;  %v19528_v17 = vpop.f32.mrb[30].mxu1 }
 0xb12   :  { %v19530_v50 = vpop.f32.mrb[31].mxu1  ;;  %v12272_v57 = vmul.f32 %v19528_v17, %v19528_v17 }
 0xb13   :  { %v12332_v18 = vadd.f32 %v12331_v30, %v12269_v32  ;;  %v12200_v46 = vadd.f32 %v12199_v59, %v19530_v50  ;;  %v12270_v23 = vmul.f32 %v19530_v50, %v19530_v50 }
 0xb15   :  { %v12201_v35 = vadd.f32 %v19520_v2, %v12200_v46  ;;  %v12333_v39 = vadd.f32 %v12332_v18, %v12270_v23 }
 0xb17   :  { %v12334_v28 = vadd.f32 %v12333_v39, %v12271_v22  ;;  %v19540_v37 = vpop.f32.mrb[32].mxu1  ;;  %v12202_v31 = vadd.f32 %v19528_v17, %v12201_v35 }
 0xb18   :  { %v19543_v34 = vpop.f32.mrb[33].mxu1  ;;  %v12275_v4 = vmul.f32 %v19540_v37, %v19540_v37 }
 0xb19   :  { %v12203_v9 = vadd.f32 %v12202_v31, %v19543_v34  ;;  %v12273_v48 = vmul.f32 %v19543_v34, %v19543_v34  ;;  %v12335_v41 = vadd.f32 %v12334_v28, %v12272_v57  ;;  %v19548_v14 = vpop.f32.mrb[34].mxu1 }
 0xb1a   :  { %v19550_v13 = vpop.f32.mrb[35].mxu1  ;;  %v12276_v47 = vmul.f32 %v19548_v14, %v19548_v14 }
 0xb1b   :  { %v12336_v58 = vadd.f32 %v12335_v41, %v12273_v48  ;;  %v12204_v51 = vadd.f32 %v12203_v9, %v19550_v13  ;;  %v12274_v25 = vmul.f32 %v19550_v13, %v19550_v13 }
 0xb1d   :  { %v12205_v29 = vadd.f32 %v19540_v37, %v12204_v51  ;;  %v12337_v38 = vadd.f32 %v12336_v58, %v12274_v25 }
 0xb1f   :  { %v12338_v16 = vadd.f32 %v12337_v38, %v12275_v4  ;;  %v19560_v10 = vpop.f32.mrb[36].mxu1  ;;  %v12206_v3 = vadd.f32 %v19548_v14, %v12205_v29 }
 0xb20   :  { %v19563_v24 = vpop.f32.mrb[37].mxu1  ;;  %v12279_v22 = vmul.f32 %v19560_v10, %v19560_v10 }
 0xb21   :  { %v12207_v43 = vadd.f32 %v12206_v3, %v19563_v24  ;;  %v12277_v63 = vmul.f32 %v19563_v24, %v19563_v24  ;;  %v12339_v59 = vadd.f32 %v12338_v16, %v12276_v47  ;;  %v19568_v32 = vpop.f32.mrb[38].mxu1 }
 0xb22   :  { %21374 = vst [vmem:[#allocation17_spill] sm:$0xff] %v19568_v32  ;;  %v19570_v30 = vpop.f32.mrb[39].mxu1  ;;  %v12280_v57 = vmul.f32 %v19568_v32, %v19568_v32 }
 0xb23   :  { %v12340_v18 = vadd.f32 %v12339_v59, %v12277_v63  ;;  %v12208_v46 = vadd.f32 %v12207_v43, %v19570_v30  ;;  %v12278_v23 = vmul.f32 %v19570_v30, %v19570_v30 }
 0xb25   :  { %v12209_v35 = vadd.f32 %v19560_v10, %v12208_v46  ;;  %v12341_v39 = vadd.f32 %v12340_v18, %v12278_v23 }
 0xb27   :  { %v12342_v28 = vadd.f32 %v12341_v39, %v12279_v22  ;;  %v19580_v31 = vpop.f32.mrb[40].mxu1  ;;  %v12210_v9 = vadd.f32 %v19568_v32, %v12209_v35 }
 0xb28   :  { %21375 = vst [vmem:[#allocation19_spill] sm:$0xff] %v19580_v31  ;;  %v19583_v48 = vpop.f32.mrb[41].mxu1  ;;  %v12283_v16 = vmul.f32 %v19580_v31, %v19580_v31 }
 0xb29   :  { %21376 = vst [vmem:[#allocation16_spill] sm:$0xff] %v19583_v48  ;;  %v12211_v41 = vadd.f32 %v12210_v9, %v19583_v48  ;;  %v12281_v58 = vmul.f32 %v19583_v48, %v19583_v48  ;;  %v12343_v51 = vadd.f32 %v12342_v28, %v12280_v57  ;;  %v19588_v25 = vpop.f32.mrb[42].mxu1 }
 0xb2a   :  { %21377 = vst [vmem:[#allocation21_spill] sm:$0xff] %v19588_v25  ;;  %v19590_v4 = vpop.f32.mrb[43].mxu1  ;;  %v12284_v63 = vmul.f32 %v19588_v25, %v19588_v25 }
 0xb2b   :  { %21378 = vst [vmem:[#allocation23_spill] sm:$0xff] %v19590_v4  ;;  %v12344_v29 = vadd.f32 %v12343_v51, %v12281_v58  ;;  %v12212_v38 = vadd.f32 %v12211_v41, %v19590_v4  ;;  %v12282_v47 = vmul.f32 %v19590_v4, %v19590_v4 }
 0xb2d   :  { %v12213_v3 = vadd.f32 %v19580_v31, %v12212_v38  ;;  %v12345_v43 = vadd.f32 %v12344_v29, %v12282_v47 }
 0xb2f   :  { %v12346_v59 = vadd.f32 %v12345_v43, %v12283_v16  ;;  %v19600_v18 = vpop.f32.mrb[44].mxu1  ;;  %v12214_v46 = vadd.f32 %v19588_v25, %v12213_v3 }
 0xb30   :  { %21379 = vst [vmem:[#allocation20_spill] sm:$0xff] %v19600_v18  ;;  %v19603_v23 = vpop.f32.mrb[45].mxu1  ;;  %v12287_v51 = vmul.f32 %v19600_v18, %v19600_v18 }
 0xb31   :  { %21380 = vst [vmem:[#allocation22_spill] sm:$0xff] %v19603_v23  ;;  %v12215_v22 = vadd.f32 %v12214_v46, %v19603_v23  ;;  %v12285_v35 = vmul.f32 %v19603_v23, %v19603_v23  ;;  %v12347_v39 = vadd.f32 %v12346_v59, %v12284_v63  ;;  %v19608_v57 = vpop.f32.mrb[46].mxu1 }
 0xb32   :  { %21381 = vst [vmem:[#allocation25_spill] sm:$0xff] %v19608_v57  ;;  %v19610_v28 = vpop.f32.mrb[47].mxu1  ;;  %v12288_v47 = vmul.f32 %v19608_v57, %v19608_v57 }
 0xb33   :  { %21382 = vst [vmem:[#allocation15_spill] sm:$0xff] %v19610_v28  ;;  %v12348_v9 = vadd.f32 %v12347_v39, %v12285_v35  ;;  %v12216_v41 = vadd.f32 %v12215_v22, %v19610_v28  ;;  %v12286_v58 = vmul.f32 %v19610_v28, %v19610_v28 }
 0xb35   :  { %v12217_v29 = vadd.f32 %v19600_v18, %v12216_v41  ;;  %v12349_v38 = vadd.f32 %v12348_v9, %v12286_v58 }
 0xb37   :  { %v12350_v16 = vadd.f32 %v12349_v38, %v12287_v51  ;;  %v19620_v3 = vpop.f32.mrb[48].mxu1  ;;  %v12218_v43 = vadd.f32 %v19608_v57, %v12217_v29 }
 0xb38   :  { %21383 = vst [vmem:[#allocation4_spill] sm:$0xff] %v19620_v3  ;;  %v19623_v63 = vpop.f32.mrb[49].mxu1  ;;  %v12291_v51 = vmul.f32 %v19620_v3, %v19620_v3 }
 0xb39   :  { %21384 = vst [vmem:[#allocation5_spill] sm:$0xff] %v19623_v63  ;;  %v12219_v59 = vadd.f32 %v12218_v43, %v19623_v63  ;;  %v12289_v46 = vmul.f32 %v19623_v63, %v19623_v63  ;;  %v12351_v22 = vadd.f32 %v12350_v16, %v12288_v47  ;;  %v19628_v35 = vpop.f32.mrb[50].mxu1 }
 0xb3a   :  { %21385 = vst [vmem:[#allocation7_spill] sm:$0xff] %v19628_v35  ;;  %v19630_v39 = vpop.f32.mrb[51].mxu1  ;;  %v12292_v43 = vmul.f32 %v19628_v35, %v19628_v35 }
 0xb3b   :  { %21386 = vst [vmem:[#allocation9_spill] sm:$0xff] %v19630_v39  ;;  %v12352_v9 = vadd.f32 %v12351_v22, %v12289_v46  ;;  %v12220_v41 = vadd.f32 %v12219_v59, %v19630_v39  ;;  %v12290_v58 = vmul.f32 %v19630_v39, %v19630_v39 }
 0xb3d   :  { %v12221_v29 = vadd.f32 %v19620_v3, %v12220_v41  ;;  %v12353_v38 = vadd.f32 %v12352_v9, %v12290_v58 }
 0xb3f   :  { %v12354_v47 = vadd.f32 %v12353_v38, %v12291_v51  ;;  %v19640_v16 = vpop.f32.mrb[52].mxu1  ;;  %v12222_v63 = vadd.f32 %v19628_v35, %v12221_v29 }
 0xb40   :  { %21387 = vst [vmem:[#allocation6_spill] sm:$0xff] %v19640_v16  ;;  %v19643_v46 = vpop.f32.mrb[53].mxu1  ;;  %v12295_v29 = vmul.f32 %v19640_v16, %v19640_v16 }
 0xb41   :  { %21388 = vst [vmem:[#allocation8_spill] sm:$0xff] %v19643_v46  ;;  %v12223_v59 = vadd.f32 %v12222_v63, %v19643_v46  ;;  %v12293_v22 = vmul.f32 %v19643_v46, %v19643_v46  ;;  %v12355_v39 = vadd.f32 %v12354_v47, %v12292_v43  ;;  %v19648_v57 = vpop.f32.mrb[54].mxu1 }
 0xb42   :  { %21389 = vst [vmem:[#allocation11_spill] sm:$0xff] %v19648_v57  ;;  %v19650_v41 = vpop.f32.mrb[55].mxu1  ;;  %v12296_v46 = vmul.f32 %v19648_v57, %v19648_v57 }
 0xb43   :  { %21390 = vst [vmem:[#allocation14_spill] sm:$0xff] %v19650_v41  ;;  %v12356_v9 = vadd.f32 %v12355_v39, %v12293_v22  ;;  %v12224_v58 = vadd.f32 %v12223_v59, %v19650_v41  ;;  %v12294_v51 = vmul.f32 %v19650_v41, %v19650_v41 }
 0xb45   :  { %v12225_v38 = vadd.f32 %v19640_v16, %v12224_v58  ;;  %v12357_v63 = vadd.f32 %v12356_v9, %v12294_v51 }
 0xb47   :  { %v12358_v43 = vadd.f32 %v12357_v63, %v12295_v29  ;;  %v19660_v47 = vpop.f32.mrb[56].mxu1  ;;  %v12226_v35 = vadd.f32 %v19648_v57, %v12225_v38 }
 0xb48   :  { %21391 = vst [vmem:[#allocation10_spill] sm:$0xff] %v19660_v47  ;;  %v19663_v39 = vpop.f32.mrb[57].mxu1  ;;  %v12299_v38 = vmul.f32 %v19660_v47, %v19660_v47 }
 0xb49   :  { %21392 = vst [vmem:[#allocation18_spill] sm:$0xff] %v19663_v39  ;;  %v12227_v59 = vadd.f32 %v12226_v35, %v19663_v39  ;;  %v12297_v22 = vmul.f32 %v19663_v39, %v19663_v39  ;;  %v12359_v41 = vadd.f32 %v12358_v43, %v12296_v46  ;;  %v19668_v3 = vpop.f32.mrb[58].mxu1 }
 0xb4a   :  { %21393 = vst [vmem:[#allocation12_spill] sm:$0xff] %v19668_v3  ;;  %v19670_v58 = vpop.f32.mrb[59].mxu1  ;;  %v12300_v39 = vmul.f32 %v19668_v3, %v19668_v3 }
 0xb4b   :  { %21394 = vst [vmem:[#allocation27_spill] sm:$0xff] %v19670_v58  ;;  %v12360_v9 = vadd.f32 %v12359_v41, %v12297_v22  ;;  %v12228_v51 = vadd.f32 %v12227_v59, %v19670_v58  ;;  %v12298_v29 = vmul.f32 %v19670_v58, %v19670_v58 }
 0xb4d   :  { %v12229_v63 = vadd.f32 %v19660_v47, %v12228_v51  ;;  %v12361_v35 = vadd.f32 %v12360_v9, %v12298_v29 }
 0xb4f   :  { %v12362_v46 = vadd.f32 %v12361_v35, %v12299_v38  ;;  %v19680_v43 = vpop.f32.mrb[60].mxu1  ;;  %v12230_v57 = vadd.f32 %v19668_v3, %v12229_v63 }
 0xb50   :  { %21395 = vst [vmem:[#allocation24_spill] sm:$0xff] %v19680_v43  ;;  %v19683_v41 = vpop.f32.mrb[61].mxu1  ;;  %v12303_v63 = vmul.f32 %v19680_v43, %v19680_v43 }
 0xb51   :  { %21396 = vst [vmem:[#allocation26_spill] sm:$0xff] %v19683_v41  ;;  %v12231_v59 = vadd.f32 %v12230_v57, %v19683_v41  ;;  %v12301_v22 = vmul.f32 %v19683_v41, %v19683_v41  ;;  %v12363_v58 = vadd.f32 %v12362_v46, %v12300_v39  ;;  %v19688_v16 = vpop.f32.mrb[62].mxu1 }
 0xb52   :  { %v19690_v51 = vpop.f32.mrb[63].mxu1  ;;  %v12304_v41 = vmul.f32 %v19688_v16, %v19688_v16 }
 0xb53   :  { %21397 = vst [vmem:[#allocation29_spill] sm:$0xff] %v19690_v51  ;;  %v12364_v9 = vadd.f32 %v12363_v58, %v12301_v22  ;;  %v12232_v29 = vadd.f32 %v12231_v59, %v19690_v51  ;;  %v12302_v38 = vmul.f32 %v19690_v51, %v19690_v51 }
 0xb55   :  { %v12233_v35 = vadd.f32 %v19680_v43, %v12232_v29  ;;  %v12365_v57 = vadd.f32 %v12364_v9, %v12302_v38 }
 0xb57   :  { %v12234_v39 = vadd.f32 %v19688_v16, %v12233_v35  ;;  %v12366_v46 = vadd.f32 %v12365_v57, %v12303_v63  ;;  %v21399_v63 = vld [vmem:[#allocation17_spill] sm:$0xff]  ;;  %v21400_v57 = vld [vmem:[#allocation16_spill] sm:$0xff] }
 0xb59   :  { %v12235_v3 = vrot.slane %v12234_v39, 4  ;;  %v12367_v47 = vadd.f32 %v12366_v46, %v12304_v41  ;;  %v21402_v46 = vld [vmem:[#allocation19_spill] sm:$0xff] }
 0xb5b   :  { %v12236_v58 = vadd.f32 %v12235_v3, %v12234_v39  ;;  %v12368_v22 = vrot.slane %v12367_v47, 4  ;;  %v12381_v3 = vld [vmem:[%s20943_s5] sm:$0x1]  ;;  %v21401_v39 = vld [vmem:[#allocation23_spill] sm:$0xff] }
 0xb5d   :  { %v12237_v59 = vrot.slane %v12236_v58, 2  ;;  %v12369_v18 = vadd.f32 %v12368_v22, %v12367_v47  ;;  %v21404_v22 = vld [vmem:[#allocation22_spill] sm:$0xff] }
 0xb5f   :  { %v12238_v28 = vadd.f32 %v12237_v59, %v12236_v58  ;;  %v12370_v51 = vrot.slane %v12369_v18, 2  ;;  %v21403_v58 = vld [vmem:[#allocation21_spill] sm:$0xff] }
 0xb61   :  { %v12239_v23 = vrot.slane %v12238_v28, 1  ;;  %v12371_v25 = vadd.f32 %v12370_v51, %v12369_v18  ;;  %v19707_v18 = vld [vmem:[%s20944_s6] sm:$0x1] }
 0xb63   :  { %v12240_v31 = vadd.f32 %v12239_v23, %v12238_v28  ;;  %v12372_v4 = vrot.slane %v12371_v25, 1 }
 0xb65   :  { %v12373_v29 = vadd.f32 %v12372_v4, %v12371_v25  ;;  %v12374_v9 = vmul.f32 0.001953125, %v12240_v31  ;;  %v21398_v31 = vld [vmem:[#allocation30_spill] sm:$0xff] }
 0xb67   :  { %v12375_v38 = vmul.f32 0.001953125, %v12373_v29  ;;  %v12376_v43 = vmul.f32 %v12374_v9, %v12374_v9  ;;  %v21405_v29 = vld [vmem:[#allocation15_spill] sm:$0xff] }
 0xb69   :  { %v12377_v48 = vsub.f32 %v12375_v38, %v12376_v43  ;;  %v21406_v38 = vld [vmem:[#allocation20_spill] sm:$0xff] }
 0xb6b   :  { %v12378_v32 = vmax.f32 %v12377_v48, 0.0 }
 0xb6d   :  { %v12379_v35 = vadd.f32 1e-05, %v12378_v32  ;;  %v21418_v32 = vld [vmem:[#allocation14_spill] sm:$0xff] }
 0xb6f   :  { %16515 = vrsqrt.f32 %v12379_v35 }
 0xb79   :  { %v16516_v41 = vpop.eup %16515 }
 0xb7a   :  { %v12382_v47 = vmul.f32 %v16516_v41, %v12381_v3  ;;  %v21407_v3 = vld [vmem:[#allocation25_spill] sm:$0xff] }
 0xb7c   :  { %v19709_v23 = vmul.f32 %v12382_v47, %v12374_v9  ;;  %v19712_v25 = vrot.slane %v12382_v47, %v21398_v31  ;;  %v21408_v47 = vld [vmem:[#allocation5_spill] sm:$0xff] }
 0xb7e   :  { %v19718_v48 = vmul.f32 %v19712_v25, %v19383_v12  ;;  %v19722_v4 = vmul.f32 %v19712_v25, %v19387_v44  ;;  %v19726_v28 = vmul.f32 %v19381_v21, %v19712_v25  ;;  %v19730_v43 = vmul.f32 %v19385_v26, %v19712_v25 }
 0xb7f   :  { %v19734_v51 = vmul.f32 %v19712_v25, %v19403_v53  ;;  %v19738_v12 = vmul.f32 %v19712_v25, %v19410_v20  ;;  %v19742_v44 = vmul.f32 %v19400_v62, %v19712_v25  ;;  %v19746_v21 = vmul.f32 %v19408_v55, %v19712_v25 }
 0xb80   :  { %v19750_v26 = vmul.f32 %v19712_v25, %v19423_v0  ;;  %v19754_v53 = vmul.f32 %v19712_v25, %v19430_v52  ;;  %v19758_v20 = vmul.f32 %v19420_v54, %v19712_v25  ;;  %v19762_v62 = vmul.f32 %v19428_v5, %v19712_v25 }
 0xb81   :  { %v19766_v55 = vmul.f32 %v19712_v25, %v19443_v36  ;;  %v19770_v0 = vmul.f32 %v19712_v25, %v19450_v7  ;;  %v19774_v52 = vmul.f32 %v19440_v8, %v19712_v25  ;;  %v19778_v54 = vmul.f32 %v19448_v33, %v19712_v25 }
 0xb82   :  { %v19782_v5 = vmul.f32 %v19712_v25, %v19463_v45  ;;  %v19786_v36 = vmul.f32 %v19712_v25, %v19470_v15  ;;  %v19790_v7 = vmul.f32 %v19460_v49, %v19712_v25  ;;  %v19794_v8 = vmul.f32 %v19468_v19, %v19712_v25 }
 0xb83   :  { %v19798_v33 = vmul.f32 %v19712_v25, %v19483_v11  ;;  %v19802_v45 = vmul.f32 %v19712_v25, %v19490_v6  ;;  %v19806_v15 = vmul.f32 %v19480_v61, %v19712_v25  ;;  %v19810_v49 = vmul.f32 %v19488_v1, %v19712_v25 }
 0xb84   :  { %v19814_v19 = vmul.f32 %v19712_v25, %v19503_v42  ;;  %v19818_v11 = vmul.f32 %v19712_v25, %v19510_v56  ;;  %v19822_v6 = vmul.f32 %v19500_v40, %v19712_v25  ;;  %v19826_v61 = vmul.f32 %v19508_v27, %v19712_v25 }
 0xb85   :  { %v19830_v1 = vmul.f32 %v19712_v25, %v19523_v60  ;;  %v19834_v42 = vmul.f32 %v19712_v25, %v19530_v50  ;;  %v19838_v56 = vmul.f32 %v19520_v2, %v19712_v25  ;;  %v19842_v40 = vmul.f32 %v19528_v17, %v19712_v25 }
 0xb86   :  { %v19846_v27 = vmul.f32 %v19712_v25, %v19543_v34  ;;  %v19850_v60 = vmul.f32 %v19712_v25, %v19550_v13  ;;  %v19854_v50 = vmul.f32 %v19540_v37, %v19712_v25  ;;  %v19858_v2 = vmul.f32 %v19548_v14, %v19712_v25 }
 0xb87   :  { %v19862_v17 = vmul.f32 %v19712_v25, %v19563_v24  ;;  %v19866_v34 = vmul.f32 %v19712_v25, %v19570_v30  ;;  %v19870_v13 = vmul.f32 %v19560_v10, %v19712_v25  ;;  %v19874_v37 = vmul.f32 %v21399_v63, %v19712_v25 }
 0xb88   :  { %v19878_v14 = vmul.f32 %v19712_v25, %v21400_v57  ;;  %v19882_v24 = vmul.f32 %v19712_v25, %v21401_v39  ;;  %v19886_v30 = vmul.f32 %v21402_v46, %v19712_v25  ;;  %v19890_v10 = vmul.f32 %v21403_v58, %v19712_v25  ;;  %v21410_v57 = vld [vmem:[#allocation9_spill] sm:$0xff]  ;;  %v21412_v46 = vld [vmem:[#allocation4_spill] sm:$0xff] }
 0xb89   :  { %v19894_v59 = vmul.f32 %v19712_v25, %v21404_v22  ;;  %v19898_v9 = vmul.f32 %v19712_v25, %v21405_v29  ;;  %v19902_v35 = vmul.f32 %v21406_v38, %v19712_v25  ;;  %v19906_v41 = vmul.f32 %v21407_v3, %v19712_v25  ;;  %v21414_v22 = vld [vmem:[#allocation7_spill] sm:$0xff]  ;;  %v21416_v38 = vld [vmem:[#allocation8_spill] sm:$0xff] }
 0xb8a   :  { %v19910_v63 = vmul.f32 %v19712_v25, %v21408_v47  ;;  %v19914_v39 = vmul.f32 %v19712_v25, %v21410_v57  ;;  %v19918_v58 = vmul.f32 %v21412_v46, %v19712_v25  ;;  %v19922_v29 = vmul.f32 %v21414_v22, %v19712_v25 }
 0xb8b   :  { %v19926_v3 = vmul.f32 %v19712_v25, %v21416_v38  ;;  %v19930_v47 = vmul.f32 %v19712_v25, %v21418_v32 }
 0xb8c   :  { %21409 = vst [vmem:[#allocation28_spill] sm:$0xff] %v19910_v63  ;;  %21411 = vst [vmem:[#allocation31_spill] sm:$0xff] %v19914_v39  ;;  %v21420_v63 = vld [vmem:[#allocation6_spill] sm:$0xff]  ;;  %v21422_v39 = vld [vmem:[#allocation11_spill] sm:$0xff] }
 0xb8d   :  { %21413 = vst [vmem:[#allocation32_spill] sm:$0xff] %v19918_v58  ;;  %21415 = vst [vmem:[#allocation33_spill] sm:$0xff] %v19922_v29  ;;  %v19934_v57 = vmul.f32 %v21420_v63, %v19712_v25  ;;  %v19938_v46 = vmul.f32 %v21422_v39, %v19712_v25  ;;  %v21424_v58 = vld [vmem:[#allocation18_spill] sm:$0xff]  ;;  %v21426_v29 = vld [vmem:[#allocation27_spill] sm:$0xff] }
 0xb8e   :  { %21417 = vst [vmem:[#allocation34_spill] sm:$0xff] %v19926_v3  ;;  %21419 = vst [vmem:[#allocation35_spill] sm:$0xff] %v19930_v47  ;;  %v19942_v22 = vmul.f32 %v19712_v25, %v21424_v58  ;;  %v19946_v38 = vmul.f32 %v19712_v25, %v21426_v29  ;;  %v21427_v3 = vld [vmem:[#allocation10_spill] sm:$0xff]  ;;  %v21428_v47 = vld [vmem:[#allocation12_spill] sm:$0xff] }
 0xb8f   :  { %21421 = vst [vmem:[#allocation36_spill] sm:$0xff] %v19934_v57  ;;  %21423 = vst [vmem:[#allocation13_spill] sm:$0xff] %v19938_v46  ;;  %v19950_v32 = vmul.f32 %v21427_v3, %v19712_v25  ;;  %v19954_v63 = vmul.f32 %v21428_v47, %v19712_v25  ;;  %v21430_v57 = vld [vmem:[#allocation26_spill] sm:$0xff]  ;;  %v21431_v46 = vld [vmem:[#allocation29_spill] sm:$0xff]  ;;  %v19970_v3 = vmul.f32 %v19688_v16, %v19712_v25 }
 0xb90   :  { %21425 = vst [vmem:[#allocation30_spill] sm:$0xff] %v19942_v22  ;;  %v19958_v39 = vmul.f32 %v19712_v25, %v21430_v57  ;;  %v19962_v58 = vmul.f32 %v19712_v25, %v21431_v46  ;;  %v21432_v22 = vld [vmem:[#allocation24_spill] sm:$0xff]  ;;  %v21433_v47 = vsub.f32 %v19707_v18, %v19709_v23 }
 0xb91   :  { %21429 = vst [vmem:[#allocation17_spill] sm:$0xff] %v19954_v63  ;;  %v19966_v29 = vmul.f32 %v21432_v22, %v19712_v25 }
 0xb92   :  { %v19976_v63 = vrot.slane %v21433_v47, %v21398_v31 }
 0xb94   :  { %v19980_v57 = vadd.f32 %v19976_v63, %v19718_v48  ;;  %v19984_v46 = vadd.f32 %v19976_v63, %v19722_v4  ;;  %v19988_v22 = vadd.f32 %v19976_v63, %v19726_v28  ;;  %v19992_v16 = vadd.f32 %v19976_v63, %v19730_v43  ;;  %v21452_v47 = vld [vmem:[#allocation32_spill] sm:$0xff] }
 0xb95   :  { %v19996_v18 = vadd.f32 %v19976_v63, %v19734_v51  ;;  %v20000_v23 = vadd.f32 %v19976_v63, %v19738_v12  ;;  %v20004_v31 = vadd.f32 %v19976_v63, %v19742_v44  ;;  %v20008_v25 = vadd.f32 %v19976_v63, %v19746_v21 }
 0xb96   :  { %v20012_v48 = vadd.f32 %v19976_v63, %v19750_v26  ;;  %v20016_v4 = vadd.f32 %v19976_v63, %v19754_v53  ;;  %v20020_v28 = vadd.f32 %v19976_v63, %v19758_v20  ;;  %v20024_v43 = vadd.f32 %v19976_v63, %v19762_v62 }
 0xb97   :  { %v20028_v51 = vadd.f32 %v19976_v63, %v19766_v55  ;;  %v20032_v12 = vadd.f32 %v19976_v63, %v19770_v0  ;;  %v20036_v44 = vadd.f32 %v19976_v63, %v19774_v52  ;;  %v20040_v21 = vadd.f32 %v19976_v63, %v19778_v54 }
 0xb98   :  { %v20044_v26 = vadd.f32 %v19976_v63, %v19782_v5  ;;  %v20048_v53 = vadd.f32 %v19976_v63, %v19786_v36  ;;  %v20052_v20 = vadd.f32 %v19976_v63, %v19790_v7  ;;  %v20056_v62 = vadd.f32 %v19976_v63, %v19794_v8 }
 0xb99   :  { %v20060_v55 = vadd.f32 %v19976_v63, %v19798_v33  ;;  %v20064_v0 = vadd.f32 %v19976_v63, %v19802_v45  ;;  %v20068_v52 = vadd.f32 %v19976_v63, %v19806_v15  ;;  %v20072_v54 = vadd.f32 %v19976_v63, %v19810_v49 }
 0xb9a   :  { %v20076_v5 = vadd.f32 %v19976_v63, %v19814_v19  ;;  %v20080_v36 = vadd.f32 %v19976_v63, %v19818_v11  ;;  %v20084_v7 = vadd.f32 %v19976_v63, %v19822_v6  ;;  %v20088_v8 = vadd.f32 %v19976_v63, %v19826_v61 }
 0xb9b   :  { %v20092_v33 = vadd.f32 %v19976_v63, %v19830_v1  ;;  %v20096_v45 = vadd.f32 %v19976_v63, %v19834_v42  ;;  %v20100_v15 = vadd.f32 %v19976_v63, %v19838_v56  ;;  %v20104_v49 = vadd.f32 %v19976_v63, %v19842_v40 }
 0xb9c   :  { %v20108_v19 = vadd.f32 %v19976_v63, %v19846_v27  ;;  %v20112_v11 = vadd.f32 %v19976_v63, %v19850_v60  ;;  %v20116_v6 = vadd.f32 %v19976_v63, %v19854_v50  ;;  %v20120_v61 = vadd.f32 %v19976_v63, %v19858_v2 }
 0xb9d   :  { %v20124_v1 = vadd.f32 %v19976_v63, %v19862_v17  ;;  %v20128_v42 = vadd.f32 %v19976_v63, %v19866_v34  ;;  %v20132_v56 = vadd.f32 %v19976_v63, %v19870_v13  ;;  %v20136_v40 = vadd.f32 %v19976_v63, %v19874_v37 }
 0xb9e   :  { %21434 = vst [vmem:[#allocation16_spill] sm:$0xff] %v20116_v6  ;;  %21435 = vst [vmem:[#allocation23_spill] sm:$0xff] %v20120_v61  ;;  %v20140_v27 = vadd.f32 %v19976_v63, %v19878_v14  ;;  %v20144_v60 = vadd.f32 %v19976_v63, %v19882_v24  ;;  %v20148_v50 = vadd.f32 %v19976_v63, %v19886_v30  ;;  %v12524_v14 = vld [vmem:[%s20939_s0] sm:$0xff]  ;;  %v12525_v24 = vld [vmem:[%s20939_s0 + $0x8] sm:$0xff] }
 0xb9f   :  { %21436 = vst [vmem:[#allocation19_spill] sm:$0xff] %v20124_v1  ;;  %21437 = vst [vmem:[#allocation21_spill] sm:$0xff] %v20128_v42  ;;  %v20152_v2 = vadd.f32 %v19976_v63, %v19890_v10  ;;  %v20156_v17 = vadd.f32 %v19976_v63, %v19894_v59  ;;  %v20160_v34 = vadd.f32 %v19976_v63, %v19898_v9  ;;  %v12526_v30 = vld [vmem:[%s20939_s0 + $0x10] sm:$0xff]  ;;  %v12527_v10 = vld [vmem:[%s20939_s0 + $0x18] sm:$0xff] }
 0xba0   :  { %21438 = vst [vmem:[#allocation22_spill] sm:$0xff] %v20132_v56  ;;  %21439 = vst [vmem:[#allocation15_spill] sm:$0xff] %v20136_v40  ;;  %v20164_v13 = vadd.f32 %v19976_v63, %v19902_v35  ;;  %v20168_v37 = vadd.f32 %v19976_v63, %v19906_v41  ;;  %v21448_v59 = vld [vmem:[#allocation28_spill] sm:$0xff]  ;;  %v21450_v35 = vld [vmem:[#allocation31_spill] sm:$0xff]  ;;  %v20313_v42 = vadd.f32 %v12526_v30, %v19988_v22 }
 0xba1   :  { %21440 = vst [vmem:[#allocation20_spill] sm:$0xff] %v20140_v27  ;;  %21441 = vst [vmem:[#allocation25_spill] sm:$0xff] %v20144_v60  ;;  %v20184_v9 = vadd.f32 %v19976_v63, %v21448_v59  ;;  %v20188_v41 = vadd.f32 %v19976_v63, %v21450_v35  ;;  %v12529_v59 = vld [vmem:[%s20939_s0 + $0x28] sm:$0xff]  ;;  %v12530_v35 = vld [vmem:[%s20939_s0 + $0x30] sm:$0xff]  ;;  %v20316_v1 = vadd.f32 %v12527_v10, %v19992_v16 }
 0xba2   :  { %21442 = vst [vmem:[#allocation5_spill] sm:$0xff] %v20148_v50  ;;  %21443 = vst [vmem:[#allocation9_spill] sm:$0xff] %v20152_v2  ;;  %v21462_v50 = vld [vmem:[#allocation13_spill] sm:$0xff]  ;;  %v12532_v27 = vld [vmem:[%s20939_s0 + $0x40] sm:$0xff]  ;;  %v20334_v16 = vadd.f32 %v12529_v59, %v20000_v23 }
 0xba3   :  { %21444 = vst [vmem:[#allocation4_spill] sm:$0xff] %v20156_v17  ;;  %21445 = vst [vmem:[#allocation7_spill] sm:$0xff] %v20160_v34  ;;  %v12528_v17 = vld [vmem:[%s20939_s0 + $0x20] sm:$0xff]  ;;  %v20224_v60 = vadd.f32 %v19976_v63, %v21462_v50  ;;  %v12549_v6 = vld [vmem:[%s20939_s0 + $0xc8] sm:$0xff] }
 0xba4   :  { %21446 = vst [vmem:[#allocation8_spill] sm:$0xff] %v20164_v13  ;;  %21447 = vst [vmem:[#allocation14_spill] sm:$0xff] %v20168_v37  ;;  %v20192_v37 = vadd.f32 %v19976_v63, %v21452_v47  ;;  %v21454_v13 = vld [vmem:[#allocation33_spill] sm:$0xff]  ;;  %v12531_v47 = vld [vmem:[%s20939_s0 + $0x38] sm:$0xff]  ;;  %v20331_v22 = vadd.f32 %v12528_v17, %v19996_v18 }
 0xba5   :  { %21449 = vst [vmem:[#allocation6_spill] sm:$0xff] %v20184_v9  ;;  %21451 = vst [vmem:[#allocation11_spill] sm:$0xff] %v20188_v41  ;;  %v20196_v34 = vadd.f32 %v19976_v63, %v21454_v13  ;;  %v21460_v9 = vld [vmem:[#allocation36_spill] sm:$0xff]  ;;  %v12553_v10 = vld [vmem:[%s20939_s0 + $0xe8] sm:$0xff] }
 0xba6   :  { %21453 = vst [vmem:[#allocation18_spill] sm:$0xff] %v20192_v37  ;;  %v21456_v37 = vld [vmem:[#allocation34_spill] sm:$0xff]  ;;  %v20220_v2 = vadd.f32 %v19976_v63, %v21460_v9  ;;  %21463 = vst [vmem:[#allocation29_spill] sm:$0xff] %v20224_v60  ;;  %v12535_v9 = vld [vmem:[%s20939_s0 + $0x58] sm:$0xff]  ;;  %v20244_v60 = vadd.f32 %v19976_v63, %v19946_v38 }
 0xba7   :  { %21455 = vst [vmem:[#allocation27_spill] sm:$0xff] %v20196_v34  ;;  %v20212_v13 = vadd.f32 %v19976_v63, %v21456_v37  ;;  %v21458_v34 = vld [vmem:[#allocation35_spill] sm:$0xff]  ;;  %v12533_v37 = vld [vmem:[%s20939_s0 + $0x48] sm:$0xff]  ;;  %v12536_v56 = vld [vmem:[%s20939_s0 + $0x60] sm:$0xff]  ;;  %v20364_v59 = vadd.f32 %v12535_v9, %v20024_v43 }
 0xba8   :  { %v20216_v41 = vadd.f32 %v19976_v63, %v21458_v34  ;;  %21461 = vst [vmem:[#allocation26_spill] sm:$0xff] %v20220_v2  ;;  %v12534_v34 = vld [vmem:[%s20939_s0 + $0x50] sm:$0xff]  ;;  %21466 = vst [vmem:[#allocation28_spill] sm:$0xff] %v20244_v60  ;;  %v20280_v60 = vadd.f32 %v19976_v63, %v19970_v3  ;;  %v12545_v3 = vld [vmem:[%s20939_s0 + $0xa8] sm:$0xff] }
 0xba9   :  { %21457 = vst [vmem:[#allocation10_spill] sm:$0xff] %v20212_v13  ;;  %v21464_v2 = vld [vmem:[#allocation30_spill] sm:$0xff]  ;;  %v21468_v13 = vld [vmem:[#allocation17_spill] sm:$0xff]  ;;  %v12548_v61 = vld [vmem:[%s20939_s0 + $0xc0] sm:$0xff]  ;;  %v20361_v17 = vadd.f32 %v12534_v34, %v20020_v28  ;;  %v20379_v28 = vadd.f32 %v12536_v56, %v20028_v51 }
 0xbaa   :  { %21459 = vst [vmem:[#allocation12_spill] sm:$0xff] %v20216_v41  ;;  %v20240_v50 = vadd.f32 %v19976_v63, %v21464_v2  ;;  %v20248_v41 = vadd.f32 %v19976_v63, %v19950_v32  ;;  %v20252_v40 = vadd.f32 %v19976_v63, %v21468_v13  ;;  %v12537_v2 = vld [vmem:[%s20939_s0 + $0x68] sm:$0xff]  ;;  %v12538_v38 = vld [vmem:[%s20939_s0 + $0x70] sm:$0xff]  ;;  %v12539_v32 = vld [vmem:[%s20939_s0 + $0x78] sm:$0xff]  ;;  %v20268_v13 = vadd.f32 %v19976_v63, %v19958_v39 }
 0xbab   :  { %21473 = vst [vmem:[#allocation36_spill] sm:$0xff] %v20280_v60  ;;  %v12541_v39 = vld [vmem:[%s20939_s0 + $0x88] sm:$0xff]  ;;  %v12546_v60 = vld [vmem:[%s20939_s0 + $0xb0] sm:$0xff]  ;;  %v12552_v30 = vld [vmem:[%s20939_s0 + $0xe0] sm:$0xff]  ;;  %v20382_v43 = vadd.f32 %v12537_v2, %v20032_v12 }
 0xbac   :  { %21465 = vst [vmem:[#allocation24_spill] sm:$0xff] %v20240_v50  ;;  %21467 = vst [vmem:[#allocation31_spill] sm:$0xff] %v20248_v41  ;;  %v20276_v41 = vadd.f32 %v19976_v63, %v19966_v29  ;;  %v12540_v50 = vld [vmem:[%s20939_s0 + $0x80] sm:$0xff]  ;;  %v12543_v29 = vld [vmem:[%s20939_s0 + $0x98] sm:$0xff] }
 0xbad   :  { %21469 = vst [vmem:[#allocation32_spill] sm:$0xff] %v20252_v40  ;;  %21470 = vst [vmem:[#allocation33_spill] sm:$0xff] %v20268_v13  ;;  %v20272_v40 = vadd.f32 %v19976_v63, %v19962_v58  ;;  %v12542_v58 = vld [vmem:[%s20939_s0 + $0x90] sm:$0xff]  ;;  %v12544_v63 = vld [vmem:[%s20939_s0 + $0xa0] sm:$0xff]  ;;  %v20310_v13 = vadd.f32 %v12525_v24, %v19984_v46  ;;  %v20340_v24 = vadd.f32 %v12531_v47, %v20008_v25 }
 0xbae   :  { %21472 = vst [vmem:[#allocation35_spill] sm:$0xff] %v20276_v41  ;;  %v12547_v41 = vld [vmem:[%s20939_s0 + $0xb8] sm:$0xff]  ;;  %v12554_v18 = vld [vmem:[%s20939_s0 + $0xf0] sm:$0xff]  ;;  %v20358_v25 = vadd.f32 %v12533_v37, %v20016_v4  ;;  %v12557_v47 = vld [vmem:[%s20939_s0 + $0x108] sm:$0xff]  ;;  %v20388_v37 = vadd.f32 %v12539_v32, %v20040_v21  ;;  %v20406_v21 = vadd.f32 %v12541_v39, %v20048_v53  ;;  %v20409_v56 = vadd.f32 %v12542_v58, %v20052_v20 }
 0xbaf   :  { %21471 = vst [vmem:[#allocation34_spill] sm:$0xff] %v20272_v40  ;;  %v20307_v40 = vadd.f32 %v12524_v14, %v19980_v57  ;;  %v12550_v57 = vld [vmem:[%s20939_s0 + $0xd0] sm:$0xff]  ;;  %v12551_v46 = vld [vmem:[%s20939_s0 + $0xd8] sm:$0xff]  ;;  %v20337_v14 = vadd.f32 %v12530_v35, %v20004_v31  ;;  %v20355_v31 = vadd.f32 %v12532_v27, %v20012_v48  ;;  %v12556_v35 = vld [vmem:[%s20939_s0 + $0x100] sm:$0xff]  ;;  %v20385_v27 = vadd.f32 %v12538_v38, %v20036_v44 }
 0xbb0   :  { %v12555_v23 = vld [vmem:[%s20939_s0 + $0xf8] sm:$0xff]  ;;  %v12558_v48 = vld [vmem:[%s20939_s0 + $0x110] sm:$0xff]  ;;  %v12560_v34 = vld [vmem:[%s20939_s0 + $0x120] sm:$0xff]  ;;  %v20403_v44 = vadd.f32 %v12540_v50, %v20044_v26  ;;  %v20412_v2 = vadd.f32 %v12543_v29, %v20056_v62  ;;  %v20424_v53 = vadd.f32 %v12544_v63, %v20060_v55  ;;  %v20427_v20 = vadd.f32 %v12545_v3, %v20064_v0 }
 0xbb1   :  { %v12559_v4 = vld [vmem:[%s20939_s0 + $0x118] sm:$0xff]  ;;  %v12561_v9 = vld [vmem:[%s20939_s0 + $0x128] sm:$0xff]  ;;  %v12562_v51 = vld [vmem:[%s20939_s0 + $0x130] sm:$0xff]  ;;  %v20430_v62 = vadd.f32 %v12546_v60, %v20068_v52  ;;  %v20433_v50 = vadd.f32 %v12547_v41, %v20072_v54  ;;  %v20445_v0 = vadd.f32 %v12548_v61, %v20076_v5  ;;  %v20448_v52 = vadd.f32 %v12549_v6, %v20080_v36 }
 0xbb2   :  { %v12563_v12 = vld [vmem:[%s20939_s0 + $0x138] sm:$0xff]  ;;  %v12564_v38 = vld [vmem:[%s20939_s0 + $0x140] sm:$0xff]  ;;  %v12565_v32 = vld [vmem:[%s20939_s0 + $0x148] sm:$0xff]  ;;  %v20451_v54 = vadd.f32 %v12550_v57, %v20084_v7  ;;  %v20454_v60 = vadd.f32 %v12551_v46, %v20088_v8  ;;  %v20466_v36 = vadd.f32 %v12552_v30, %v20092_v33  ;;  %v20469_v7 = vadd.f32 %v12553_v10, %v20096_v45 }
 0xbb3   :  { %v12566_v26 = vld [vmem:[%s20939_s0 + $0x150] sm:$0xff]  ;;  %v12567_v39 = vld [vmem:[%s20939_s0 + $0x158] sm:$0xff]  ;;  %v12568_v58 = vld [vmem:[%s20939_s0 + $0x160] sm:$0xff]  ;;  %v20472_v8 = vadd.f32 %v12554_v18, %v20100_v15  ;;  %v20475_v6 = vadd.f32 %v12555_v23, %v20104_v49  ;;  %v20487_v45 = vadd.f32 %v12556_v35, %v20108_v19  ;;  %v20490_v15 = vadd.f32 %v12557_v47, %v20112_v11 }
 0xbb4   :  { %v12569_v55 = vld [vmem:[%s20939_s0 + $0x168] sm:$0xff]  ;;  %v12570_v41 = vld [vmem:[%s20939_s0 + $0x170] sm:$0xff]  ;;  %v12571_v29 = vld [vmem:[%s20939_s0 + $0x178] sm:$0xff] }
 0xbb5   :  { %v12572_v5 = vld [vmem:[%s20939_s0 + $0x180] sm:$0xff]  ;;  %v12573_v61 = vld [vmem:[%s20939_s0 + $0x188] sm:$0xff]  ;;  %v12574_v63 = vld [vmem:[%s20939_s0 + $0x190] sm:$0xff] }
 0xbb6   :  { %v12575_v33 = vld [vmem:[%s20939_s0 + $0x198] sm:$0xff]  ;;  %v21474_v49 = vld [vmem:[#allocation16_spill] sm:$0xff]  ;;  %v12577_v10 = vld [vmem:[%s20939_s0 + $0x1a8] sm:$0xff] }
 0xbb7   :  { %v20493_v3 = vadd.f32 %v12558_v48, %v21474_v49  ;;  %v21476_v57 = vld [vmem:[#allocation23_spill] sm:$0xff]  ;;  %v12576_v30 = vld [vmem:[%s20939_s0 + $0x1a0] sm:$0xff]  ;;  %v12578_v19 = vld [vmem:[%s20939_s0 + $0x1b0] sm:$0xff] }
 0xbb8   :  { %v20496_v46 = vadd.f32 %v12559_v4, %v21476_v57  ;;  %v21478_v11 = vld [vmem:[#allocation19_spill] sm:$0xff]  ;;  %v21480_v23 = vld [vmem:[#allocation21_spill] sm:$0xff]  ;;  %v21482_v47 = vld [vmem:[#allocation22_spill] sm:$0xff] }
 0xbb9   :  { %21475 = vst [vmem:[#allocation13_spill] sm:$0xff] %v20493_v3  ;;  %v20508_v18 = vadd.f32 %v12560_v34, %v21478_v11  ;;  %v20511_v35 = vadd.f32 %v12561_v9, %v21480_v23  ;;  %v20514_v48 = vadd.f32 %v12562_v51, %v21482_v47  ;;  %v21484_v4 = vld [vmem:[#allocation15_spill] sm:$0xff]  ;;  %v12581_v34 = vld [vmem:[%s20939_s0 + $0x1c8] sm:$0xff]  ;;  %v21486_v9 = vld [vmem:[#allocation20_spill] sm:$0xff] }
 0xbba   :  { %21477 = vst [vmem:[#allocation30_spill] sm:$0xff] %v20496_v46  ;;  %v20517_v49 = vadd.f32 %v12563_v12, %v21484_v4  ;;  %v12579_v57 = vld [vmem:[%s20939_s0 + $0x1b8] sm:$0xff]  ;;  %v12580_v46 = vld [vmem:[%s20939_s0 + $0x1c0] sm:$0xff]  ;;  %v20529_v11 = vadd.f32 %v12564_v38, %v21486_v9  ;;  %v21488_v51 = vld [vmem:[#allocation25_spill] sm:$0xff] }
 0xbbb   :  { %21479 = vst [vmem:[#allocation17_spill] sm:$0xff] %v20508_v18  ;;  %21481 = vst [vmem:[#allocation16_spill] sm:$0xff] %v20511_v35  ;;  %v20532_v23 = vadd.f32 %v12565_v32, %v21488_v51  ;;  %v21490_v12 = vld [vmem:[#allocation5_spill] sm:$0xff]  ;;  %v12583_v35 = vld [vmem:[%s20939_s0 + $0x1d8] sm:$0xff] }
 0xbbc   :  { %21483 = vst [vmem:[#allocation23_spill] sm:$0xff] %v20514_v48  ;;  %21485 = vst [vmem:[#allocation19_spill] sm:$0xff] %v20517_v49  ;;  %v20535_v47 = vadd.f32 %v12566_v26, %v21490_v12  ;;  %v21492_v4 = vld [vmem:[#allocation9_spill] sm:$0xff]  ;;  %v12582_v48 = vld [vmem:[%s20939_s0 + $0x1d0] sm:$0xff] }
 0xbbd   :  { %21487 = vst [vmem:[#allocation21_spill] sm:$0xff] %v20529_v11  ;;  %21489 = vst [vmem:[#allocation22_spill] sm:$0xff] %v20532_v23  ;;  %v20538_v49 = vadd.f32 %v12567_v39, %v21492_v4  ;;  %v12584_v38 = vld [vmem:[%s20939_s0 + $0x1e0] sm:$0xff]  ;;  %v21496_v26 = vld [vmem:[#allocation7_spill] sm:$0xff] }
 0xbbe   :  { %21491 = vst [vmem:[#allocation15_spill] sm:$0xff] %v20535_v47  ;;  %v21494_v32 = vld [vmem:[#allocation4_spill] sm:$0xff]  ;;  %v20553_v51 = vadd.f32 %v12569_v55, %v21496_v26  ;;  %v21500_v4 = vld [vmem:[#allocation14_spill] sm:$0xff]  ;;  %v12585_v47 = vld [vmem:[%s20939_s0 + $0x1e8] sm:$0xff] }
 0xbbf   :  { %21493 = vst [vmem:[#allocation20_spill] sm:$0xff] %v20538_v49  ;;  %v20550_v9 = vadd.f32 %v12568_v58, %v21494_v32  ;;  %v21498_v39 = vld [vmem:[#allocation8_spill] sm:$0xff]  ;;  %v20559_v49 = vadd.f32 %v12571_v29, %v21500_v4  ;;  %v12586_v23 = vld [vmem:[%s20939_s0 + $0x1f0] sm:$0xff]  ;;  %v12587_v58 = vld [vmem:[%s20939_s0 + $0x1f8] sm:$0xff] }
 0xbc0   :  { %21497 = vst [vmem:[#allocation5_spill] sm:$0xff] %v20553_v51  ;;  %v20556_v12 = vadd.f32 %v12570_v41, %v21498_v39  ;;  %v21502_v55 = vld [vmem:[#allocation6_spill] sm:$0xff]  ;;  %v21503_v41 = vld [vmem:[#allocation11_spill] sm:$0xff] }
 0xbc1   :  { %21495 = vst [vmem:[#allocation25_spill] sm:$0xff] %v20550_v9  ;;  %21501 = vst [vmem:[#allocation4_spill] sm:$0xff] %v20559_v49  ;;  %v20571_v32 = vadd.f32 %v12572_v5, %v21502_v55  ;;  %v20574_v26 = vadd.f32 %v12573_v61, %v21503_v41  ;;  %v21504_v29 = vld [vmem:[#allocation18_spill] sm:$0xff]  ;;  %v21505_v4 = vld [vmem:[#allocation27_spill] sm:$0xff] }
 0xbc2   :  { %21499 = vst [vmem:[#allocation9_spill] sm:$0xff] %v20556_v12  ;;  %v20577_v39 = vadd.f32 %v12574_v63, %v21504_v29  ;;  %v20580_v49 = vadd.f32 %v12575_v33, %v21505_v4  ;;  %v21506_v12 = vld [vmem:[#allocation10_spill] sm:$0xff]  ;;  %v21507_v9 = vld [vmem:[#allocation12_spill] sm:$0xff]  ;;  %v21509_v5 = vld [vmem:[#allocation29_spill] sm:$0xff] }
 0xbc3   :  { %v20583_v51 = vadd.f32 %v12576_v30, %v21506_v12  ;;  %v20586_v11 = vadd.f32 %v12577_v10, %v21507_v9  ;;  %v21508_v18 = vld [vmem:[#allocation26_spill] sm:$0xff]  ;;  %v20592_v55 = vadd.f32 %v12579_v57, %v21509_v5  ;;  %v21510_v61 = vld [vmem:[#allocation24_spill] sm:$0xff]  ;;  %v21512_v33 = vld [vmem:[#allocation31_spill] sm:$0xff] }
 0xbc4   :  { %v20589_v3 = vadd.f32 %v12578_v19, %v21508_v18  ;;  %v20595_v41 = vadd.f32 %v12580_v46, %v21510_v61  ;;  %v21511_v63 = vld [vmem:[#allocation28_spill] sm:$0xff]  ;;  %v20601_v4 = vadd.f32 %v12582_v48, %v21512_v33  ;;  %v21514_v10 = vld [vmem:[#allocation33_spill] sm:$0xff]  ;;  %v21515_v19 = vld [vmem:[#allocation34_spill] sm:$0xff]  ;;  %v12653_v48 = vmax.f32 %v20310_v13, 0.0 }
 0xbc5   :  { %v20598_v29 = vadd.f32 %v12581_v34, %v21511_v63  ;;  %v21513_v30 = vld [vmem:[#allocation32_spill] sm:$0xff]  ;;  %v20607_v9 = vadd.f32 %v12584_v38, %v21514_v10  ;;  %v20610_v18 = vadd.f32 %v12585_v47, %v21515_v19  ;;  %v21516_v57 = vld [vmem:[#allocation35_spill] sm:$0xff]  ;;  %v12652_v34 = vmax.f32 %v20307_v40, 0.0 }
 0xbc6   :  { %v20604_v12 = vadd.f32 %v12583_v35, %v21513_v30  ;;  %v20613_v5 = vadd.f32 %v12586_v23, %v21516_v57  ;;  %v21517_v46 = vld [vmem:[#allocation36_spill] sm:$0xff]  ;;  %v12654_v63 = vmax.f32 %v20313_v42, 0.0  ;;  %v12655_v35 = vmax.f32 %v20316_v1, 0.0  ;;  %12717 = vst.msk [vmem:[%s20945_s7 + $0x8] sm:$0xff] %vm200_vm0, %v12653_v48  ;;  %v21523_v10 = vld [vmem:[#allocation19_spill] sm:$0xff]  ;;  %v21524_v57 = vld [vmem:[#allocation21_spill] sm:$0xff] }
 0xbc7   :  { %v20616_v61 = vadd.f32 %v12587_v58, %v21517_v46  ;;  %v12656_v38 = vmax.f32 %v20331_v22, 0.0  ;;  %v12657_v33 = vmax.f32 %v20334_v16, 0.0  ;;  %v12658_v47 = vmax.f32 %v20337_v14, 0.0  ;;  %12716 = vst.msk [vmem:[%s20945_s7] sm:$0xff] %vm200_vm0, %v12652_v34  ;;  %v21525_v34 = vld [vmem:[#allocation22_spill] sm:$0xff] }
 0xbc8   :  { %v12659_v23 = vmax.f32 %v20340_v24, 0.0  ;;  %v12660_v30 = vmax.f32 %v20355_v31, 0.0  ;;  %v12661_v58 = vmax.f32 %v20358_v25, 0.0  ;;  %v12662_v40 = vmax.f32 %v20361_v17, 0.0  ;;  %12718 = vst.msk [vmem:[%s20945_s7 + $0x10] sm:$0xff] %vm200_vm0, %v12654_v63  ;;  %12719 = vst.msk [vmem:[%s20945_s7 + $0x18] sm:$0xff] %vm200_vm0, %v12655_v35 }
 0xbc9   :  { %v12663_v13 = vmax.f32 %v20364_v59, 0.0  ;;  %v12664_v1 = vmax.f32 %v20379_v28, 0.0  ;;  %v12665_v42 = vmax.f32 %v20382_v43, 0.0  ;;  %v12666_v22 = vmax.f32 %v20385_v27, 0.0  ;;  %12720 = vst.msk [vmem:[%s20945_s7 + $0x20] sm:$0xff] %vm200_vm0, %v12656_v38  ;;  %12721 = vst.msk [vmem:[%s20945_s7 + $0x28] sm:$0xff] %vm200_vm0, %v12657_v33 }
 0xbca   :  { %v12667_v16 = vmax.f32 %v20388_v37, 0.0  ;;  %12722 = vst.msk [vmem:[%s20945_s7 + $0x30] sm:$0xff] %vm200_vm0, %v12658_v47  ;;  %12723 = vst.msk [vmem:[%s20945_s7 + $0x38] sm:$0xff] %vm200_vm0, %v12659_v23  ;;  %v12668_v14 = vmax.f32 %v20403_v44, 0.0  ;;  %v12669_v24 = vmax.f32 %v20406_v21, 0.0  ;;  %v12670_v31 = vmax.f32 %v20409_v56, 0.0 }
 0xbcb   :  { %v12671_v25 = vmax.f32 %v20412_v2, 0.0  ;;  %12724 = vst.msk [vmem:[%s20945_s7 + $0x40] sm:$0xff] %vm200_vm0, %v12660_v30  ;;  %12725 = vst.msk [vmem:[%s20945_s7 + $0x48] sm:$0xff] %vm200_vm0, %v12661_v58  ;;  %v12672_v17 = vmax.f32 %v20424_v53, 0.0  ;;  %v12673_v59 = vmax.f32 %v20427_v20, 0.0  ;;  %v12674_v28 = vmax.f32 %v20430_v62, 0.0 }
 0xbcc   :  { %12726 = vst.msk [vmem:[%s20945_s7 + $0x50] sm:$0xff] %vm200_vm0, %v12662_v40  ;;  %12727 = vst.msk [vmem:[%s20945_s7 + $0x58] sm:$0xff] %vm200_vm0, %v12663_v13  ;;  %v12675_v43 = vmax.f32 %v20433_v50, 0.0  ;;  %v12676_v27 = vmax.f32 %v20445_v0, 0.0  ;;  %v12677_v37 = vmax.f32 %v20448_v52, 0.0  ;;  %v12678_v44 = vmax.f32 %v20451_v54, 0.0 }
 0xbcd   :  { %12728 = vst.msk [vmem:[%s20945_s7 + $0x60] sm:$0xff] %vm200_vm0, %v12664_v1  ;;  %12729 = vst.msk [vmem:[%s20945_s7 + $0x68] sm:$0xff] %vm200_vm0, %v12665_v42  ;;  %v12679_v21 = vmax.f32 %v20454_v60, 0.0  ;;  %v12680_v56 = vmax.f32 %v20466_v36, 0.0  ;;  %v12681_v2 = vmax.f32 %v20469_v7, 0.0  ;;  %v12682_v53 = vmax.f32 %v20472_v8, 0.0 }
 0xbce   :  { %12730 = vst.msk [vmem:[%s20945_s7 + $0x70] sm:$0xff] %vm200_vm0, %v12666_v22  ;;  %12731 = vst.msk [vmem:[%s20945_s7 + $0x78] sm:$0xff] %vm200_vm0, %v12667_v16  ;;  %v12683_v20 = vmax.f32 %v20475_v6, 0.0  ;;  %v12684_v62 = vmax.f32 %v20487_v45, 0.0  ;;  %v12685_v50 = vmax.f32 %v20490_v15, 0.0  ;;  %v21518_v0 = vld [vmem:[#allocation13_spill] sm:$0xff] }
 0xbcf   :  { %12732 = vst.msk [vmem:[%s20945_s7 + $0x80] sm:$0xff] %vm200_vm0, %v12668_v14  ;;  %12733 = vst.msk [vmem:[%s20945_s7 + $0x88] sm:$0xff] %vm200_vm0, %v12669_v24  ;;  %v12686_v52 = vmax.f32 %v21518_v0, 0.0  ;;  %v21519_v54 = vld [vmem:[#allocation30_spill] sm:$0xff]  ;;  %v21520_v36 = vld [vmem:[#allocation17_spill] sm:$0xff]  ;;  %v12691_v19 = vmax.f32 %v21523_v10, 0.0 }
 0xbd0   :  { %12734 = vst.msk [vmem:[%s20945_s7 + $0x90] sm:$0xff] %vm200_vm0, %v12670_v31  ;;  %12735 = vst.msk [vmem:[%s20945_s7 + $0x98] sm:$0xff] %vm200_vm0, %v12671_v25  ;;  %v12687_v60 = vmax.f32 %v21519_v54, 0.0  ;;  %v12688_v7 = vmax.f32 %v21520_v36, 0.0  ;;  %v21521_v8 = vld [vmem:[#allocation16_spill] sm:$0xff]  ;;  %v21522_v45 = vld [vmem:[#allocation23_spill] sm:$0xff] }
 0xbd1   :  { %12736 = vst.msk [vmem:[%s20945_s7 + $0xa0] sm:$0xff] %vm200_vm0, %v12672_v17  ;;  %12737 = vst.msk [vmem:[%s20945_s7 + $0xa8] sm:$0xff] %vm200_vm0, %v12673_v59  ;;  %v12689_v6 = vmax.f32 %v21521_v8, 0.0  ;;  %v12690_v15 = vmax.f32 %v21522_v45, 0.0  ;;  %v12692_v46 = vmax.f32 %v21524_v57, 0.0  ;;  %v12693_v48 = vmax.f32 %v21525_v34, 0.0 }
 0xbd2   :  { %12738 = vst.msk [vmem:[%s20945_s7 + $0xb0] sm:$0xff] %vm200_vm0, %v12674_v28  ;;  %12739 = vst.msk [vmem:[%s20945_s7 + $0xb8] sm:$0xff] %vm200_vm0, %v12675_v43  ;;  %v21526_v63 = vld [vmem:[#allocation15_spill] sm:$0xff]  ;;  %v21527_v38 = vld [vmem:[#allocation20_spill] sm:$0xff]  ;;  %v12700_v22 = vmax.f32 %v20571_v32, 0.0  ;;  %v12701_v16 = vmax.f32 %v20574_v26, 0.0 }
 0xbd3   :  { %12740 = vst.msk [vmem:[%s20945_s7 + $0xc0] sm:$0xff] %vm200_vm0, %v12676_v27  ;;  %12741 = vst.msk [vmem:[%s20945_s7 + $0xc8] sm:$0xff] %vm200_vm0, %v12677_v37  ;;  %v12694_v35 = vmax.f32 %v21526_v63, 0.0  ;;  %v12695_v33 = vmax.f32 %v21527_v38, 0.0  ;;  %v21528_v47 = vld [vmem:[#allocation25_spill] sm:$0xff]  ;;  %v21531_v1 = vld [vmem:[#allocation4_spill] sm:$0xff] }
 0xbd4   :  { %12742 = vst.msk [vmem:[%s20945_s7 + $0xd0] sm:$0xff] %vm200_vm0, %v12678_v44  ;;  %12743 = vst.msk [vmem:[%s20945_s7 + $0xd8] sm:$0xff] %vm200_vm0, %v12679_v21  ;;  %v12696_v23 = vmax.f32 %v21528_v47, 0.0  ;;  %v21529_v30 = vld [vmem:[#allocation5_spill] sm:$0xff]  ;;  %v12699_v42 = vmax.f32 %v21531_v1, 0.0  ;;  %v12702_v14 = vmax.f32 %v20577_v39, 0.0 }
 0xbd5   :  { %12744 = vst.msk [vmem:[%s20945_s7 + $0xe0] sm:$0xff] %vm200_vm0, %v12680_v56  ;;  %12745 = vst.msk [vmem:[%s20945_s7 + $0xe8] sm:$0xff] %vm200_vm0, %v12681_v2  ;;  %v12697_v58 = vmax.f32 %v21529_v30, 0.0  ;;  %v21530_v40 = vld [vmem:[#allocation9_spill] sm:$0xff]  ;;  %v12703_v24 = vmax.f32 %v20580_v49, 0.0  ;;  %v12704_v49 = vmax.f32 %v20583_v51, 0.0 }
 0xbd6   :  { %12746 = vst.msk [vmem:[%s20945_s7 + $0xf0] sm:$0xff] %vm200_vm0, %v12682_v53  ;;  %12747 = vst.msk [vmem:[%s20945_s7 + $0xf8] sm:$0xff] %vm200_vm0, %v12683_v20  ;;  %v12698_v13 = vmax.f32 %v21530_v40, 0.0  ;;  %v12705_v32 = vmax.f32 %v20586_v11, 0.0  ;;  %v12706_v26 = vmax.f32 %v20589_v3, 0.0  ;;  %v12707_v39 = vmax.f32 %v20592_v55, 0.0 }
 0xbd7   :  { %12748 = vst.msk [vmem:[%s20945_s7 + $0x100] sm:$0xff] %vm200_vm0, %v12684_v62  ;;  %12749 = vst.msk [vmem:[%s20945_s7 + $0x108] sm:$0xff] %vm200_vm0, %v12685_v50  ;;  %v12708_v3 = vmax.f32 %v20595_v41, 0.0  ;;  %v12709_v11 = vmax.f32 %v20598_v29, 0.0  ;;  %v12710_v51 = vmax.f32 %v20601_v4, 0.0  ;;  %v12711_v55 = vmax.f32 %v20604_v12, 0.0 }
 0xbd8   :  { %12750 = vst.msk [vmem:[%s20945_s7 + $0x110] sm:$0xff] %vm200_vm0, %v12686_v52  ;;  %12751 = vst.msk [vmem:[%s20945_s7 + $0x118] sm:$0xff] %vm200_vm0, %v12687_v60  ;;  %v12712_v41 = vmax.f32 %v20607_v9, 0.0  ;;  %v12713_v29 = vmax.f32 %v20610_v18, 0.0  ;;  %v12714_v4 = vmax.f32 %v20613_v5, 0.0  ;;  %v12715_v12 = vmax.f32 %v20616_v61, 0.0 }
 0xbd9   :  { %12752 = vst.msk [vmem:[%s20945_s7 + $0x120] sm:$0xff] %vm200_vm0, %v12688_v7  ;;  %12753 = vst.msk [vmem:[%s20945_s7 + $0x128] sm:$0xff] %vm200_vm0, %v12689_v6 }
 0xbda   :  { %12754 = vst.msk [vmem:[%s20945_s7 + $0x130] sm:$0xff] %vm200_vm0, %v12690_v15  ;;  %12755 = vst.msk [vmem:[%s20945_s7 + $0x138] sm:$0xff] %vm200_vm0, %v12691_v19 }
 0xbdb   :  { %12756 = vst.msk [vmem:[%s20945_s7 + $0x140] sm:$0xff] %vm200_vm0, %v12692_v46  ;;  %12757 = vst.msk [vmem:[%s20945_s7 + $0x148] sm:$0xff] %vm200_vm0, %v12693_v48 }
 0xbdc   :  { %12758 = vst.msk [vmem:[%s20945_s7 + $0x150] sm:$0xff] %vm200_vm0, %v12694_v35  ;;  %12759 = vst.msk [vmem:[%s20945_s7 + $0x158] sm:$0xff] %vm200_vm0, %v12695_v33 }
 0xbdd   :  { %12760 = vst.msk [vmem:[%s20945_s7 + $0x160] sm:$0xff] %vm200_vm0, %v12696_v23  ;;  %12761 = vst.msk [vmem:[%s20945_s7 + $0x168] sm:$0xff] %vm200_vm0, %v12697_v58 }
 0xbde   :  { %12762 = vst.msk [vmem:[%s20945_s7 + $0x170] sm:$0xff] %vm200_vm0, %v12698_v13  ;;  %12763 = vst.msk [vmem:[%s20945_s7 + $0x178] sm:$0xff] %vm200_vm0, %v12699_v42 }
 0xbdf   :  { %12764 = vst.msk [vmem:[%s20945_s7 + $0x180] sm:$0xff] %vm200_vm0, %v12700_v22  ;;  %12765 = vst.msk [vmem:[%s20945_s7 + $0x188] sm:$0xff] %vm200_vm0, %v12701_v16 }
 0xbe0   :  { %12766 = vst.msk [vmem:[%s20945_s7 + $0x190] sm:$0xff] %vm200_vm0, %v12702_v14  ;;  %12767 = vst.msk [vmem:[%s20945_s7 + $0x198] sm:$0xff] %vm200_vm0, %v12703_v24 }
 0xbe1   :  { %12768 = vst.msk [vmem:[%s20945_s7 + $0x1a0] sm:$0xff] %vm200_vm0, %v12704_v49  ;;  %12769 = vst.msk [vmem:[%s20945_s7 + $0x1a8] sm:$0xff] %vm200_vm0, %v12705_v32 }
 0xbe2   :  { %12770 = vst.msk [vmem:[%s20945_s7 + $0x1b0] sm:$0xff] %vm200_vm0, %v12706_v26  ;;  %12771 = vst.msk [vmem:[%s20945_s7 + $0x1b8] sm:$0xff] %vm200_vm0, %v12707_v39 }
 0xbe3   :  { %12772 = vst.msk [vmem:[%s20945_s7 + $0x1c0] sm:$0xff] %vm200_vm0, %v12708_v3  ;;  %12773 = vst.msk [vmem:[%s20945_s7 + $0x1c8] sm:$0xff] %vm200_vm0, %v12709_v11 }
 0xbe4   :  { %12774 = vst.msk [vmem:[%s20945_s7 + $0x1d0] sm:$0xff] %vm200_vm0, %v12710_v51  ;;  %12775 = vst.msk [vmem:[%s20945_s7 + $0x1d8] sm:$0xff] %vm200_vm0, %v12711_v55 }
 0xbe5   :  { %12776 = vst.msk [vmem:[%s20945_s7 + $0x1e0] sm:$0xff] %vm200_vm0, %v12712_v41  ;;  %12777 = vst.msk [vmem:[%s20945_s7 + $0x1e8] sm:$0xff] %vm200_vm0, %v12713_v29 }
 0xbe6   :  { %12778 = vst.msk [vmem:[%s20945_s7 + $0x1f0] sm:$0xff] %vm200_vm0, %v12714_v4  ;;  %12779 = vst.msk [vmem:[%s20945_s7 + $0x1f8] sm:$0xff] %vm200_vm0, %v12715_v12 }

</bundles_post_ra>
